<compile_context>
chip_gen: v5e
topology: v5e:2x2
jax: 0.10.0
libtpu: 0.0.40
codegen_flags: <defaults>
</compile_context>

<pallas_src>
import functools

import jax
import jax.numpy as jnp
from jax.experimental import pallas as pl
from jax.experimental.pallas import tpu as pltpu

# ---------------- configuration (stand-ins for argparse `opt`) ----------------
LATENT_DIM = 100      # opt.latent_dim
N_CLASSES = 10        # opt.n_classes
CHANNELS = 1          # opt.channels
IMG_SIZE = 16         # opt.img_size
N_FEATURES = CHANNELS * IMG_SIZE * IMG_SIZE   # 256 (already a multiple of 128)
H1, H2, H3 = 200, 1000, 1200                  # hard-coded in the module
BN_EPS = 1e-5

# lane-aligned (multiple-of-128) padded dims
LAT_P = 128          # latent 100 -> 128
CLS_P = 128          # classes 10 -> 128
H1_P = 256           # 200  -> 256
H2_P = 1024          # 1000 -> 1024
H3_P = 1280          # 1200 -> 1280

# offsets into the packed per-feature parameter vector
_OFF_G1, _OFF_BE1 = 0, H1_P                                  # 0,    256
_OFF_G2, _OFF_BE2 = 2 * H1_P, 2 * H1_P + H2_P                # 512,  1536
_OFF_G3 = 2 * H1_P + 2 * H2_P                                # 2560
_OFF_BE3 = _OFF_G3 + H3_P                                    # 3840
_OFF_B4 = _OFF_BE3 + H3_P                                    # 5120
_PVEC_LEN = _OFF_B4 + N_FEATURES                             # 5376 = 42 * 128


def generator_kernel(
    z_ref, y_ref,                # padded inputs (f32)
    w1_ref, w2_ref,              # z_map / y_map weights (bf16, padded)
    w3a_ref, w3b_ref,            # zy_map weight split over the concat (bf16, padded)
    w4_ref,                      # model weight (bf16, padded)
    p_ref,                       # packed per-feature params (1, 5376) f32
    out_ref,
):
    f32 = jnp.float32
    bf16 = jnp.bfloat16

    # ---- unpack packed per-feature params (static, lane-aligned slices) ----
    g1 = p_ref[:, _OFF_G1:_OFF_G1 + H1_P]
    be1 = p_ref[:, _OFF_BE1:_OFF_BE1 + H1_P]
    g2 = p_ref[:, _OFF_G2:_OFF_G2 + H2_P]
    be2 = p_ref[:, _OFF_BE2:_OFF_BE2 + H2_P]
    g3 = p_ref[:, _OFF_G3:_OFF_G3 + H3_P]
    be3 = p_ref[:, _OFF_BE3:_OFF_BE3 + H3_P]
    b4 = p_ref[:, _OFF_B4:_OFF_B4 + N_FEATURES]

    def bn_relu(h, gamma, beta):
        # One-pass training-mode BatchNorm1d (biased batch var) + ReLU.
        # (Linear bias before BN is omitted upstream: exactly cancelled by mean.)
        mean = jnp.mean(h, axis=0, keepdims=True)
        var = jnp.maximum(jnp.mean(h * h, axis=0, keepdims=True) - mean * mean, 0.0)
        scale = gamma * jax.lax.rsqrt(var + BN_EPS)
        return jnp.maximum(h * scale + (beta - mean * scale), 0.0)

    # --- z_map: Linear (no bias) + BN + ReLU ---
    zh = jnp.dot(z_ref[...].astype(bf16), w1_ref[...], preferred_element_type=f32)
    zh = bn_relu(zh, g1, be1)

    # --- y_map: Linear (no bias) + BN + ReLU ---
    yh = jnp.dot(y_ref[...].astype(bf16), w2_ref[...], preferred_element_type=f32)
    yh = bn_relu(yh, g2, be2)

    # --- zy_map: (cat + Linear) as split matmul sum, then BN + ReLU ---
    zy = (jnp.dot(zh.astype(bf16), w3a_ref[...], preferred_element_type=f32)
          + jnp.dot(yh.astype(bf16), w3b_ref[...], preferred_element_type=f32))
    zy = bn_relu(zy, g3, be3)

    # --- model: Linear + bias + Tanh ---
    x = jnp.dot(zy.astype(bf16), w4_ref[...], preferred_element_type=f32) + b4
    out_ref[...] = jnp.tanh(x).astype(out_ref.dtype)


def _full_spec(shape):
    return pl.BlockSpec(shape, lambda i: tuple(0 for _ in shape))


@jax.jit
def generator_forward(z, y, params):
    """z: (B, LATENT_DIM) f32, y: (B, N_CLASSES) one-hot f32 -> (B, C, H, W)."""
    B = z.shape[0]
    # zero-pad inputs to lane-aligned widths (padded weight rows are zero anyway)
    z_p = jnp.pad(z.astype(jnp.float32), ((0, 0), (0, LAT_P - LATENT_DIM)))
    y_p = jnp.pad(y.astype(jnp.float32), ((0, 0), (0, CLS_P - N_CLASSES)))

    args = (
        z_p, y_p,
        params["w1"], params["w2"],
        params["w3a"], params["w3b"],
        params["w4"],
        params["pvec"],
    )
    flat = pl.pallas_call(
        generator_kernel,
        out_shape=jax.ShapeDtypeStruct((B, N_FEATURES), jnp.float32),
        grid=(1,),
        in_specs=[_full_spec(a.shape) for a in args],
        out_specs=_full_spec((B, N_FEATURES)),
        compiler_params=pltpu.CompilerParams(
            dimension_semantics=("arbitrary",),
            vmem_limit_bytes=32 * 1024 * 1024,   # safe on v7x (64 MiB physical VMEM)
        ),
    )(*args)
    # x.view(B, C, H, W)
    return flat.reshape(B, CHANNELS, IMG_SIZE, IMG_SIZE)


def init_params(key):
    """PyTorch-style uniform(-1/sqrt(fan_in), +1/sqrt(fan_in)) init, then
    zero-padded to lane-aligned shapes and cast to bf16 for the weights."""
    ks = jax.random.split(key, 4)

    def lin_w(k, fan_in, fan_out):
        bound = 1.0 / jnp.sqrt(fan_in)
        return jax.random.uniform(k, (fan_in, fan_out), jnp.float32, -bound, bound)

    def lin_b(k, fan_in, fan_out):
        bound = 1.0 / jnp.sqrt(fan_in)
        return jax.random.uniform(k, (1, fan_out), jnp.float32, -bound, bound)

    def pad_w(w, rows_p, cols_p):
        r, c = w.shape
        return jnp.pad(w, ((0, rows_p - r), (0, cols_p - c)))

    # NOTE: Linear biases of the layers feeding BatchNorm (b1, b2, b3) are
    # mathematically cancelled by the batch-mean subtraction -> not materialized.
    w1 = lin_w(ks[0], LATENT_DIM, H1)
    w2 = lin_w(ks[1], N_CLASSES, H2)
    w3 = lin_w(ks[2], H3, H3)                       # 1200 x 1200
    kw4, kb4 = jax.random.split(ks[3])
    w4 = lin_w(kw4, H3, N_FEATURES)
    b4 = lin_b(kb4, H3, N_FEATURES)

    # split 1200x1200 into rows multiplying zh (first 200) and yh (next 1000)
    w3a, w3b = w3[:H1, :], w3[H1:, :]

    w1_p = pad_w(w1, LAT_P, H1_P).astype(jnp.bfloat16)
    w2_p = pad_w(w2, CLS_P, H2_P).astype(jnp.bfloat16)
    w3a_p = pad_w(w3a, H1_P, H3_P).astype(jnp.bfloat16)
    w3b_p = pad_w(w3b, H2_P, H3_P).astype(jnp.bfloat16)
    w4_p = pad_w(w4, H3_P, N_FEATURES).astype(jnp.bfloat16)

    def bn(d, d_pad):
        # gamma padded with 1, beta padded with 0 -> padded features stay 0
        gamma = jnp.ones((1, d_pad), jnp.float32)
        beta = jnp.zeros((1, d_pad), jnp.float32)
        return gamma, beta

    g1, be1 = bn(H1, H1_P)
    g2, be2 = bn(H2, H2_P)
    g3, be3 = bn(H3, H3_P)

    # pack all per-feature params into a single lane-aligned vector (one DMA)
    pvec = jnp.concatenate([g1, be1, g2, be2, g3, be3, b4], axis=1)
    assert pvec.shape == (1, _PVEC_LEN)

    return {
        "w1": w1_p, "w2": w2_p,
        "w3a": w3a_p, "w3b": w3b_p,
        "w4": w4_p,
        "pvec": pvec,
    }


if __name__ == "__main__":
    key = jax.random.PRNGKey(0)
    kp, kz, ky = jax.random.split(key, 3)

    B = 8
    params = init_params(kp)
    z = jax.random.normal(kz, (B, LATENT_DIM), jnp.float32)
    labels = jax.random.randint(ky, (B,), 0, N_CLASSES)
    y = jax.nn.one_hot(labels, N_CLASSES, dtype=jnp.float32)

    out = generator_forward(z, y, params)
    jax.block_until_ready(out)

    assert out.shape == (B, CHANNELS, IMG_SIZE, IMG_SIZE), out.shape
    assert bool(jnp.all(jnp.isfinite(out)))
    assert bool(jnp.all(jnp.abs(out) <= 1.0 + 1e-6))   # tanh range
    print("KERNEL_OK")
</pallas_src>

<mosaic_0001>
module attributes {stable_mosaic.version = 11 : i64} {
  func.func @generator_kernel(%arg0: i32, %arg1: memref<8x128xf32, #tpu.memory_space<vmem>>, %arg2: memref<8x128xf32, #tpu.memory_space<vmem>>, %arg3: memref<128x256xbf16, #tpu.memory_space<vmem>>, %arg4: memref<128x1024xbf16, #tpu.memory_space<vmem>>, %arg5: memref<256x1280xbf16, #tpu.memory_space<vmem>>, %arg6: memref<1024x1280xbf16, #tpu.memory_space<vmem>>, %arg7: memref<1280x256xbf16, #tpu.memory_space<vmem>>, %arg8: memref<1x5376xf32, #tpu.memory_space<vmem>>, %arg9: memref<8x256xf32, #tpu.memory_space<vmem>>) attributes {dimension_semantics = [#tpu.dimension_semantics<arbitrary>], iteration_bounds = array<i64: 1>, scalar_prefetch = 0 : i64, scratch_operands = 0 : i64, tpu.core_type = #tpu.core_type<tc>, window_params = [{pipeline_mode = #tpu.pipeline_mode<synchronous>, transform_indices = @transform_0, window_bounds = array<i64: 8, 128>}, {pipeline_mode = #tpu.pipeline_mode<synchronous>, transform_indices = @transform_1, window_bounds = array<i64: 8, 128>}, {pipeline_mode = #tpu.pipeline_mode<synchronous>, transform_indices = @transform_2, window_bounds = array<i64: 128, 256>}, {pipeline_mode = #tpu.pipeline_mode<synchronous>, transform_indices = @transform_3, window_bounds = array<i64: 128, 1024>}, {pipeline_mode = #tpu.pipeline_mode<synchronous>, transform_indices = @transform_4, window_bounds = array<i64: 256, 1280>}, {pipeline_mode = #tpu.pipeline_mode<synchronous>, transform_indices = @transform_5, window_bounds = array<i64: 1024, 1280>}, {pipeline_mode = #tpu.pipeline_mode<synchronous>, transform_indices = @transform_6, window_bounds = array<i64: 1280, 256>}, {pipeline_mode = #tpu.pipeline_mode<synchronous>, transform_indices = @transform_7, window_bounds = array<i64: 1, 5376>}, {pipeline_mode = #tpu.pipeline_mode<synchronous>, transform_indices = @transform_8, window_bounds = array<i64: 8, 256>}]} {
    %c0 = arith.constant 0 : index
    %c0_0 = arith.constant 0 : index
    %0 = vector.load %arg8[%c0, %c0_0] : memref<1x5376xf32, #tpu.memory_space<vmem>>, vector<1x256xf32>
    %c0_1 = arith.constant 0 : index
    %c256 = arith.constant 256 : index
    %1 = vector.load %arg8[%c0_1, %c256] : memref<1x5376xf32, #tpu.memory_space<vmem>>, vector<1x256xf32>
    %c0_2 = arith.constant 0 : index
    %c512 = arith.constant 512 : index
    %2 = vector.load %arg8[%c0_2, %c512] : memref<1x5376xf32, #tpu.memory_space<vmem>>, vector<1x1024xf32>
    %c0_3 = arith.constant 0 : index
    %c1536 = arith.constant 1536 : index
    %3 = vector.load %arg8[%c0_3, %c1536] : memref<1x5376xf32, #tpu.memory_space<vmem>>, vector<1x1024xf32>
    %c0_4 = arith.constant 0 : index
    %c2560 = arith.constant 2560 : index
    %4 = vector.load %arg8[%c0_4, %c2560] : memref<1x5376xf32, #tpu.memory_space<vmem>>, vector<1x1280xf32>
    %c0_5 = arith.constant 0 : index
    %c3840 = arith.constant 3840 : index
    %5 = vector.load %arg8[%c0_5, %c3840] : memref<1x5376xf32, #tpu.memory_space<vmem>>, vector<1x1280xf32>
    %c0_6 = arith.constant 0 : index
    %c5120 = arith.constant 5120 : index
    %6 = vector.load %arg8[%c0_6, %c5120] : memref<1x5376xf32, #tpu.memory_space<vmem>>, vector<1x256xf32>
    %c0_7 = arith.constant 0 : index
    %c0_8 = arith.constant 0 : index
    %7 = vector.load %arg1[%c0_7, %c0_8] : memref<8x128xf32, #tpu.memory_space<vmem>>, vector<8x128xf32>
    %8 = arith.truncf %7 : vector<8x128xf32> to vector<8x128xbf16>
    %c0_9 = arith.constant 0 : index
    %c0_10 = arith.constant 0 : index
    %9 = vector.load %arg3[%c0_9, %c0_10] : memref<128x256xbf16, #tpu.memory_space<vmem>>, vector<128x256xbf16>
    %cst = arith.constant dense<0.000000e+00> : vector<8x256xf32>
    %10 = tpu.matmul %8, %9, %cst {dimension_numbers = #tpu.dot_dimension_numbers<[1], [0], [0], [1], [0, 0, 1, 1], [], []>} : vector<8x128xbf16>, vector<128x256xbf16>, vector<8x256xf32> -> vector<8x256xf32>
    %cst_11 = arith.constant dense<0.000000e+00> : vector<256xf32>
    %11 = vector.multi_reduction <add>, %10, %cst_11 [0] : vector<8x256xf32> to vector<256xf32>
    %12 = vector.shape_cast %11 : vector<256xf32> to vector<1x256xf32>
    %cst_12 = arith.constant 8.000000e+00 : f32
    %13 = vector.broadcast %cst_12 : f32 to vector<1x256xf32>
    %14 = arith.divf %12, %13 : vector<1x256xf32>
    %15 = arith.mulf %10, %10 : vector<8x256xf32>
    %cst_13 = arith.constant dense<0.000000e+00> : vector<256xf32>
    %16 = vector.multi_reduction <add>, %15, %cst_13 [0] : vector<8x256xf32> to vector<256xf32>
    %17 = vector.shape_cast %16 : vector<256xf32> to vector<1x256xf32>
    %cst_14 = arith.constant 8.000000e+00 : f32
    %18 = vector.broadcast %cst_14 : f32 to vector<1x256xf32>
    %19 = arith.divf %17, %18 : vector<1x256xf32>
    %20 = arith.mulf %14, %14 : vector<1x256xf32>
    %21 = arith.subf %19, %20 : vector<1x256xf32>
    %cst_15 = arith.constant 0.000000e+00 : f32
    %22 = vector.broadcast %cst_15 : f32 to vector<1x256xf32>
    %23 = arith.maximumf %21, %22 : vector<1x256xf32>
    %cst_16 = arith.constant 9.99999974E-6 : f32
    %24 = vector.broadcast %cst_16 : f32 to vector<1x256xf32>
    %25 = arith.addf %23, %24 : vector<1x256xf32>
    %26 = math.rsqrt %25 : vector<1x256xf32>
    %27 = arith.mulf %0, %26 : vector<1x256xf32>
    %28 = vector.broadcast %27 : vector<1x256xf32> to vector<8x256xf32>
    %29 = arith.mulf %10, %28 : vector<8x256xf32>
    %30 = arith.mulf %14, %27 : vector<1x256xf32>
    %31 = arith.subf %1, %30 : vector<1x256xf32>
    %32 = vector.broadcast %31 : vector<1x256xf32> to vector<8x256xf32>
    %33 = arith.addf %29, %32 : vector<8x256xf32>
    %cst_17 = arith.constant 0.000000e+00 : f32
    %34 = vector.broadcast %cst_17 : f32 to vector<8x256xf32>
    %35 = arith.maximumf %33, %34 : vector<8x256xf32>
    %c0_18 = arith.constant 0 : index
    %c0_19 = arith.constant 0 : index
    %36 = vector.load %arg2[%c0_18, %c0_19] : memref<8x128xf32, #tpu.memory_space<vmem>>, vector<8x128xf32>
    %37 = arith.truncf %36 : vector<8x128xf32> to vector<8x128xbf16>
    %c0_20 = arith.constant 0 : index
    %c0_21 = arith.constant 0 : index
    %38 = vector.load %arg4[%c0_20, %c0_21] : memref<128x1024xbf16, #tpu.memory_space<vmem>>, vector<128x1024xbf16>
    %cst_22 = arith.constant dense<0.000000e+00> : vector<8x1024xf32>
    %39 = tpu.matmul %37, %38, %cst_22 {dimension_numbers = #tpu.dot_dimension_numbers<[1], [0], [0], [1], [0, 0, 1, 1], [], []>} : vector<8x128xbf16>, vector<128x1024xbf16>, vector<8x1024xf32> -> vector<8x1024xf32>
    %cst_23 = arith.constant dense<0.000000e+00> : vector<1024xf32>
    %40 = vector.multi_reduction <add>, %39, %cst_23 [0] : vector<8x1024xf32> to vector<1024xf32>
    %41 = vector.shape_cast %40 : vector<1024xf32> to vector<1x1024xf32>
    %cst_24 = arith.constant 8.000000e+00 : f32
    %42 = vector.broadcast %cst_24 : f32 to vector<1x1024xf32>
    %43 = arith.divf %41, %42 : vector<1x1024xf32>
    %44 = arith.mulf %39, %39 : vector<8x1024xf32>
    %cst_25 = arith.constant dense<0.000000e+00> : vector<1024xf32>
    %45 = vector.multi_reduction <add>, %44, %cst_25 [0] : vector<8x1024xf32> to vector<1024xf32>
    %46 = vector.shape_cast %45 : vector<1024xf32> to vector<1x1024xf32>
    %cst_26 = arith.constant 8.000000e+00 : f32
    %47 = vector.broadcast %cst_26 : f32 to vector<1x1024xf32>
    %48 = arith.divf %46, %47 : vector<1x1024xf32>
    %49 = arith.mulf %43, %43 : vector<1x1024xf32>
    %50 = arith.subf %48, %49 : vector<1x1024xf32>
    %cst_27 = arith.constant 0.000000e+00 : f32
    %51 = vector.broadcast %cst_27 : f32 to vector<1x1024xf32>
    %52 = arith.maximumf %50, %51 : vector<1x1024xf32>
    %cst_28 = arith.constant 9.99999974E-6 : f32
    %53 = vector.broadcast %cst_28 : f32 to vector<1x1024xf32>
    %54 = arith.addf %52, %53 : vector<1x1024xf32>
    %55 = math.rsqrt %54 : vector<1x1024xf32>
    %56 = arith.mulf %2, %55 : vector<1x1024xf32>
    %57 = vector.broadcast %56 : vector<1x1024xf32> to vector<8x1024xf32>
    %58 = arith.mulf %39, %57 : vector<8x1024xf32>
    %59 = arith.mulf %43, %56 : vector<1x1024xf32>
    %60 = arith.subf %3, %59 : vector<1x1024xf32>
    %61 = vector.broadcast %60 : vector<1x1024xf32> to vector<8x1024xf32>
    %62 = arith.addf %58, %61 : vector<8x1024xf32>
    %cst_29 = arith.constant 0.000000e+00 : f32
    %63 = vector.broadcast %cst_29 : f32 to vector<8x1024xf32>
    %64 = arith.maximumf %62, %63 : vector<8x1024xf32>
    %65 = arith.truncf %35 : vector<8x256xf32> to vector<8x256xbf16>
    %c0_30 = arith.constant 0 : index
    %c0_31 = arith.constant 0 : index
    %66 = vector.load %arg5[%c0_30, %c0_31] : memref<256x1280xbf16, #tpu.memory_space<vmem>>, vector<256x1280xbf16>
    %cst_32 = arith.constant dense<0.000000e+00> : vector<8x1280xf32>
    %67 = tpu.matmul %65, %66, %cst_32 {dimension_numbers = #tpu.dot_dimension_numbers<[1], [0], [0], [1], [0, 0, 1, 1], [], []>} : vector<8x256xbf16>, vector<256x1280xbf16>, vector<8x1280xf32> -> vector<8x1280xf32>
    %68 = arith.truncf %64 : vector<8x1024xf32> to vector<8x1024xbf16>
    %c0_33 = arith.constant 0 : index
    %c0_34 = arith.constant 0 : index
    %69 = vector.load %arg6[%c0_33, %c0_34] : memref<1024x1280xbf16, #tpu.memory_space<vmem>>, vector<1024x1280xbf16>
    %cst_35 = arith.constant dense<0.000000e+00> : vector<8x1280xf32>
    %70 = tpu.matmul %68, %69, %cst_35 {dimension_numbers = #tpu.dot_dimension_numbers<[1], [0], [0], [1], [0, 0, 1, 1], [], []>} : vector<8x1024xbf16>, vector<1024x1280xbf16>, vector<8x1280xf32> -> vector<8x1280xf32>
    %71 = arith.addf %67, %70 : vector<8x1280xf32>
    %cst_36 = arith.constant dense<0.000000e+00> : vector<1280xf32>
    %72 = vector.multi_reduction <add>, %71, %cst_36 [0] : vector<8x1280xf32> to vector<1280xf32>
    %73 = vector.shape_cast %72 : vector<1280xf32> to vector<1x1280xf32>
    %cst_37 = arith.constant 8.000000e+00 : f32
    %74 = vector.broadcast %cst_37 : f32 to vector<1x1280xf32>
    %75 = arith.divf %73, %74 : vector<1x1280xf32>
    %76 = arith.mulf %71, %71 : vector<8x1280xf32>
    %cst_38 = arith.constant dense<0.000000e+00> : vector<1280xf32>
    %77 = vector.multi_reduction <add>, %76, %cst_38 [0] : vector<8x1280xf32> to vector<1280xf32>
    %78 = vector.shape_cast %77 : vector<1280xf32> to vector<1x1280xf32>
    %cst_39 = arith.constant 8.000000e+00 : f32
    %79 = vector.broadcast %cst_39 : f32 to vector<1x1280xf32>
    %80 = arith.divf %78, %79 : vector<1x1280xf32>
    %81 = arith.mulf %75, %75 : vector<1x1280xf32>
    %82 = arith.subf %80, %81 : vector<1x1280xf32>
    %cst_40 = arith.constant 0.000000e+00 : f32
    %83 = vector.broadcast %cst_40 : f32 to vector<1x1280xf32>
    %84 = arith.maximumf %82, %83 : vector<1x1280xf32>
    %cst_41 = arith.constant 9.99999974E-6 : f32
    %85 = vector.broadcast %cst_41 : f32 to vector<1x1280xf32>
    %86 = arith.addf %84, %85 : vector<1x1280xf32>
    %87 = math.rsqrt %86 : vector<1x1280xf32>
    %88 = arith.mulf %4, %87 : vector<1x1280xf32>
    %89 = vector.broadcast %88 : vector<1x1280xf32> to vector<8x1280xf32>
    %90 = arith.mulf %71, %89 : vector<8x1280xf32>
    %91 = arith.mulf %75, %88 : vector<1x1280xf32>
    %92 = arith.subf %5, %91 : vector<1x1280xf32>
    %93 = vector.broadcast %92 : vector<1x1280xf32> to vector<8x1280xf32>
    %94 = arith.addf %90, %93 : vector<8x1280xf32>
    %cst_42 = arith.constant 0.000000e+00 : f32
    %95 = vector.broadcast %cst_42 : f32 to vector<8x1280xf32>
    %96 = arith.maximumf %94, %95 : vector<8x1280xf32>
    %97 = arith.truncf %96 : vector<8x1280xf32> to vector<8x1280xbf16>
    %c0_43 = arith.constant 0 : index
    %c0_44 = arith.constant 0 : index
    %98 = vector.load %arg7[%c0_43, %c0_44] : memref<1280x256xbf16, #tpu.memory_space<vmem>>, vector<1280x256xbf16>
    %cst_45 = arith.constant dense<0.000000e+00> : vector<8x256xf32>
    %99 = tpu.matmul %97, %98, %cst_45 {dimension_numbers = #tpu.dot_dimension_numbers<[1], [0], [0], [1], [0, 0, 1, 1], [], []>} : vector<8x1280xbf16>, vector<1280x256xbf16>, vector<8x256xf32> -> vector<8x256xf32>
    %100 = vector.broadcast %6 : vector<1x256xf32> to vector<8x256xf32>
    %101 = arith.addf %99, %100 : vector<8x256xf32>
    %102 = math.tanh %101 : vector<8x256xf32>
    %c0_46 = arith.constant 0 : index
    %c0_47 = arith.constant 0 : index
    %103 = vector.load %arg9[%c0_46, %c0_47] : memref<8x256xf32, #tpu.memory_space<vmem>>, vector<8x256xf32>
    tpu.vector_store %arg9[%c0_46, %c0_47], %102 {strides = array<i32>} : memref<8x256xf32, #tpu.memory_space<vmem>>, vector<8x256xf32>,
    return
  }
  func.func @transform_0(%arg0: i32) -> (i32, i32) {
    %c0_i32 = arith.constant 0 : i32
    %c0_i32_0 = arith.constant 0 : i32
    %c0_i32_1 = arith.constant 0 : i32
    return %c0_i32, %c0_i32_0 : i32, i32
  }
  func.func @transform_1(%arg0: i32) -> (i32, i32) {
    %c0_i32 = arith.constant 0 : i32
    %c0_i32_0 = arith.constant 0 : i32
    %c0_i32_1 = arith.constant 0 : i32
    return %c0_i32, %c0_i32_0 : i32, i32
  }
  func.func @transform_2(%arg0: i32) -> (i32, i32) {
    %c0_i32 = arith.constant 0 : i32
    %c0_i32_0 = arith.constant 0 : i32
    %c0_i32_1 = arith.constant 0 : i32
    return %c0_i32, %c0_i32_0 : i32, i32
  }
  func.func @transform_3(%arg0: i32) -> (i32, i32) {
    %c0_i32 = arith.constant 0 : i32
    %c0_i32_0 = arith.constant 0 : i32
    %c0_i32_1 = arith.constant 0 : i32
    return %c0_i32, %c0_i32_0 : i32, i32
  }
  func.func @transform_4(%arg0: i32) -> (i32, i32) {
    %c0_i32 = arith.constant 0 : i32
    %c0_i32_0 = arith.constant 0 : i32
    %c0_i32_1 = arith.constant 0 : i32
    return %c0_i32, %c0_i32_0 : i32, i32
  }
  func.func @transform_5(%arg0: i32) -> (i32, i32) {
    %c0_i32 = arith.constant 0 : i32
    %c0_i32_0 = arith.constant 0 : i32
    %c0_i32_1 = arith.constant 0 : i32
    return %c0_i32, %c0_i32_0 : i32, i32
  }
  func.func @transform_6(%arg0: i32) -> (i32, i32) {
    %c0_i32 = arith.constant 0 : i32
    %c0_i32_0 = arith.constant 0 : i32
    %c0_i32_1 = arith.constant 0 : i32
    return %c0_i32, %c0_i32_0 : i32, i32
  }
  func.func @transform_7(%arg0: i32) -> (i32, i32) {
    %c0_i32 = arith.constant 0 : i32
    %c0_i32_0 = arith.constant 0 : i32
    %c0_i32_1 = arith.constant 0 : i32
    return %c0_i32, %c0_i32_0 : i32, i32
  }
  func.func @transform_8(%arg0: i32) -> (i32, i32) {
    %c0_i32 = arith.constant 0 : i32
    %c0_i32_0 = arith.constant 0 : i32
    %c0_i32_1 = arith.constant 0 : i32
    return %c0_i32, %c0_i32_0 : i32, i32
  }
}

</mosaic_0001>

<bundles_post_ra>
// kernel: generator_forward.1
= control target key start
LH: loop header
LB: loop body
LE: loop exit
PB: predicated region body
PF: predicated region fallthrough
CT: control target
= control target key end

     0   :  { %13 = vsyncpa [#allocation3], 0  ;;  %s15555_s0 = inlined_call_operand.vmem [shape: f32[8,128], index: 0, kind: input, shape index: {}]   ;;  %s15556_s1 = inlined_call_operand.vmem [shape: f32[8,128], index: 1, kind: input, shape index: {}]   ;;  %s15557_s2 = inlined_call_operand.hbm [shape: bf16[128,256], index: 2, kind: input, shape index: {}]   ;;  %s15558_s3 = inlined_call_operand.hbm [shape: bf16[128,1024], index: 3, kind: input, shape index: {}]   ;;  %s15559_s4 = inlined_call_operand.hbm [shape: bf16[256,1280], index: 4, kind: input, shape index: {}]   ;;  %s15560_s5 = inlined_call_operand.hbm [shape: bf16[1024,1280], index: 5, kind: input, shape index: {}]   ;;  %s15561_s6 = inlined_call_operand.hbm [shape: bf16[1280,256], index: 6, kind: input, shape index: {}]   ;;  %s15562_s7 = inlined_call_operand.hbm [shape: f32[1,5376], index: 7, kind: input, shape index: {}]   ;;  %s15563_s8 = inlined_call_operand.vmem [shape: f32[8,256], index: 8, kind: output, shape index: {}]  }
   0x1   :  { %14 = vsyncpa [#allocation5], 0 }
   0x2   :  { %15 = vsyncpa [#allocation8], 0  ;;  %s38_s29 = sshll.u32 %s15558_s3, 4  ;;  %s39_s29 = int_to_ptr.hbm [resolvable:$true] %s38_s29 }
   0x3   :  { %16 = vsyncpa [#allocation11], 0  ;;  %s14394_s30 = smov [#allocation4]   ;;  %s14395_s10 = smov 512  }
   0x4   :  { %s40_s9 = sshll.u32 %s14394_s30, 4  ;;  %s14396_s11 = smov 32   ;;  %s41_s9 = int_to_ptr.vmem [resolvable:$true] %s40_s9 }
   0x5   :  { %46 = dma.hbm_to_vmem [thread:$0]  %s39_s29, 8192, %s41_s9, [#allocation5], %s14395_s10, %s14395_s10, %s14396_s11  }
   0x6   :  { %s64_s14 = sshll.u32 %s15560_s5, 4  ;;  %s14397_s15 = smov [#allocation7]   ;;  %s65_s14 = int_to_ptr.hbm [resolvable:$true] %s64_s14 }
   0x7   :  { %s66_s16 = sshll.u32 %s14397_s15, 4  ;;  %s25_s19 = sshll.u32 %s15557_s2, 4  ;;  %s67_s16 = int_to_ptr.vmem [resolvable:$true] %s66_s16  ;;  %s26_s19 = int_to_ptr.hbm [resolvable:$true] %s25_s19 }
   0x8   :  { %s14398_s3 = smov 640   ;;  %s14399_s20 = smov 40  }
   0x9   :  { %72 = dma.hbm_to_vmem [thread:$0]  %s65_s14, 81920, %s67_s16, [#allocation8], %s14398_s3, %s14398_s3, %s14399_s20  }
   0xa   :  { %s14400_s21 = smov [#allocation2]   ;;  %s51_s25 = sshll.u32 %s15559_s4, 4  ;;  %s52_s25 = int_to_ptr.hbm [resolvable:$true] %s51_s25 }
   0xb   :  { %s27_s22 = sshll.u32 %s14400_s21, 4  ;;  %s14401_s5 = smov 128   ;;  %s28_s22 = int_to_ptr.vmem [resolvable:$true] %s27_s22 }
   0xc   :  { %s14402_s26 = smov 8   ;;  %s14403_s27 = smov [#allocation6]  }
   0xd   :  { %33 = dma.hbm_to_vmem [thread:$0]  %s26_s19, 2048, %s28_s22, [#allocation3], %s14401_s5, %s14401_s5, %s14402_s26  }
   0xe   :  { %s53_s28 = sshll.u32 %s14403_s27, 4  ;;  %s77_s30 = sshll.u32 %s15561_s6, 4  ;;  %s54_s28 = int_to_ptr.vmem [resolvable:$true] %s53_s28  ;;  %s78_s30 = int_to_ptr.hbm [resolvable:$true] %s77_s30 }
   0xf   :  { %59 = dma.hbm_to_vmem [thread:$0]  %s52_s25, 20480, %s54_s28, [#allocation5], %s14398_s3, %s14398_s3, %s14399_s20  }
  0x10   :  { %s91_s11 = sshll.u32 %s15562_s7, 4  ;;  %s14404_s12 = smov [#allocation9]   ;;  %s92_s11 = int_to_ptr.hbm [resolvable:$true] %s91_s11 }
  0x11   :  { %s79_s13 = sshll.u32 %s14404_s12, 4  ;;  %s14405_s4 = smov [#allocation10]   ;;  %s80_s13 = int_to_ptr.vmem [resolvable:$true] %s79_s13 }
  0x12   :  { %85 = dma.hbm_to_vmem [thread:$0]  %s78_s30, 20480, %s80_s13, [#allocation8], %s14401_s5, %s14401_s5, %s14402_s26  }
  0x13   :  { %s93_s14 = sshll.u32 %s14405_s4, 4  ;;  %s94_s14 = int_to_ptr.vmem [resolvable:$true] %s93_s14 }
  0x14   :  { %96 = dma.hbm_to_vmem [thread:$0]  %s92_s11, 672, %s94_s14, [#allocation11]  }
  0x15   :  { %14386 = dma.done.wait [#allocation3], 2048  }
  0x16   :  { %14387 = vsyncadd [#allocation3], 4294965248 }
  0x17   :  { %14388 = dma.done.wait [#allocation5], 28672  }
  0x18   :  { %14389 = vsyncadd [#allocation5], 4294938624 }
  0x19   :  { %14390 = dma.done.wait [#allocation8], 102400  }
  0x1a   :  { %14391 = vsyncadd [#allocation8], 4294864896 }
  0x1b   :  { %14392 = dma.done.wait [#allocation11], 672  }
  0x1c   :  { %14393 = vsyncadd [#allocation11], 4294966624  ;;  %v9041_v0 = vld [vmem:[#allocation2 + $0x70] sm:$0xf]  ;;  %v13158_v1 = vld [vmem:[#allocation2 + $0x74] sm:$0xf0] }
  0x1d   :  { %v13157_v2 = vld [vmem:[#allocation2 + $0x74] sm:$0xf]  ;;  %v9042_v3 = vor.u32 %v13158_v1, %v9041_v0  ;;  %v9043_v4 = vld [vmem:[#allocation2 + $0x78] sm:$0xf0]  ;;  %v9273_v5 = vld [vmem:[#allocation4 + $0x1c0] sm:$0xf] }
  0x1e   :  { %v13219_v6 = vld [vmem:[#allocation4 + $0x1dc] sm:$0xf0]  ;;  %v9046_v7 = vor.u32 %v13157_v2, %v9043_v4  ;;  %v13215_v9 = vld [vmem:[#allocation4 + $0x1c4] sm:$0xf]  ;;  %v13156_v13 = vld [vmem:[#allocation2 + $0x64] sm:$0xf0] }
  0x1f   :  { %v9274_v8 = vor.u32 %v13219_v6, %v9273_v5  ;;  %v9275_v10 = vld [vmem:[#allocation4 + $0x1e0] sm:$0xf0]  ;;  %v9033_v11 = vld [vmem:[#allocation2 + $0x60] sm:$0xf]  ;;  %228 = vmatpush.bf16.msra.mxu0 %v9042_v3  ;;  %v9035_v15 = vld [vmem:[#allocation2 + $0x68] sm:$0xf0] }
  0x20   :  { %v9278_v12 = vor.u32 %v13215_v9, %v9275_v10  ;;  %v13155_v14 = vld [vmem:[#allocation2 + $0x64] sm:$0xf]  ;;  %241 = vmatpush.bf16.msra.mxu1 %v9046_v7  ;;  %v9034_v16 = vor.u32 %v13156_v13, %v9033_v11  ;;  %v9241_v18 = vld [vmem:[#allocation4 + $0x180] sm:$0xf]  ;;  %v9025_v23 = vld [vmem:[#allocation2 + $0x50] sm:$0xf] }
  0x21   :  { %736 = vmatpush.bf16.msra.mxu2 %v9274_v8  ;;  %v9038_v17 = vor.u32 %v13155_v14, %v9035_v15  ;;  %v13211_v19 = vld [vmem:[#allocation4 + $0x19c] sm:$0xf0]  ;;  %v13207_v20 = vld [vmem:[#allocation4 + $0x184] sm:$0xf]  ;;  %v13154_v24 = vld [vmem:[#allocation2 + $0x54] sm:$0xf0] }
  0x22   :  { %749 = vmatpush.bf16.msra.mxu3 %v9278_v12  ;;  %v9242_v21 = vor.u32 %v13211_v19, %v9241_v18  ;;  %v9243_v22 = vld [vmem:[#allocation4 + $0x1a0] sm:$0xf0]  ;;  %v13153_v26 = vld [vmem:[#allocation2 + $0x54] sm:$0xf]  ;;  %v9027_v27 = vld [vmem:[#allocation2 + $0x58] sm:$0xf0]  ;;  %v9026_v29 = vor.u32 %v13154_v24, %v9025_v23 }
  0x23   :  { %v9246_v25 = vor.u32 %v13207_v20, %v9243_v22  ;;  %v9209_v28 = vld [vmem:[#allocation4 + $0x140] sm:$0xf]  ;;  %229 = vmatpush.bf16.msra.mxu0 %v9034_v16  ;;  %v13199_v31 = vld [vmem:[#allocation4 + $0x144] sm:$0xf]  ;;  %v9030_v33 = vor.u32 %v13153_v26, %v9027_v27  ;;  %v13152_v36 = vld [vmem:[#allocation2 + $0x44] sm:$0xf0] }
  0x24   :  { %v13203_v30 = vld [vmem:[#allocation4 + $0x15c] sm:$0xf0]  ;;  %v9211_v32 = vld [vmem:[#allocation4 + $0x160] sm:$0xf0]  ;;  %242 = vmatpush.bf16.msra.mxu1 %v9038_v17  ;;  %v9019_v39 = vld [vmem:[#allocation2 + $0x48] sm:$0xf0] }
  0x25   :  { %737 = vmatpush.bf16.msra.mxu2 %v9242_v21  ;;  %v9210_v34 = vor.u32 %v13203_v30, %v9209_v28  ;;  %v9017_v35 = vld [vmem:[#allocation2 + $0x40] sm:$0xf]  ;;  %v13151_v37 = vld [vmem:[#allocation2 + $0x44] sm:$0xf]  ;;  %v9214_v38 = vor.u32 %v13199_v31, %v9211_v32  ;;  %v9009_v47 = vld [vmem:[#allocation2 + $0x30] sm:$0xf] }
  0x26   :  { %750 = vmatpush.bf16.msra.mxu3 %v9246_v25  ;;  %v9177_v40 = vld [vmem:[#allocation4 + $0x100] sm:$0xf]  ;;  %v13191_v42 = vld [vmem:[#allocation4 + $0x104] sm:$0xf]  ;;  %v9018_v44 = vor.u32 %v13152_v36, %v9017_v35  ;;  %v9022_v45 = vor.u32 %v13151_v37, %v9019_v39  ;;  %v13150_v48 = vld [vmem:[#allocation2 + $0x34] sm:$0xf0] }
  0x27   :  { %v13195_v41 = vld [vmem:[#allocation4 + $0x11c] sm:$0xf0]  ;;  %v9179_v43 = vld [vmem:[#allocation4 + $0x120] sm:$0xf0]  ;;  %230 = vmatpush.bf16.msra.mxu0 %v9026_v29  ;;  %v13149_v49 = vld [vmem:[#allocation2 + $0x34] sm:$0xf]  ;;  %v9010_v56 = vor.u32 %v13150_v48, %v9009_v47 }
  0x28   :  { %243 = vmatpush.bf16.msra.mxu1 %v9030_v33  ;;  %v9178_v46 = vor.u32 %v13195_v41, %v9177_v40  ;;  %v9182_v50 = vor.u32 %v13191_v42, %v9179_v43  ;;  %v9011_v51 = vld [vmem:[#allocation2 + $0x38] sm:$0xf0]  ;;  %v9145_v52 = vld [vmem:[#allocation4 + $0xc0] sm:$0xf]  ;;  %v13183_v54 = vld [vmem:[#allocation4 + $0xc4] sm:$0xf] }
  0x29   :  { %738 = vmatpush.bf16.msra.mxu2 %v9210_v34  ;;  %v13187_v53 = vld [vmem:[#allocation4 + $0xdc] sm:$0xf0]  ;;  %v9147_v55 = vld [vmem:[#allocation4 + $0xe0] sm:$0xf0]  ;;  %v9014_v57 = vor.u32 %v13149_v49, %v9011_v51  ;;  %v13148_v60 = vld [vmem:[#allocation2 + $0x24] sm:$0xf0] }
  0x2a   :  { %751 = vmatpush.bf16.msra.mxu3 %v9214_v38  ;;  %v9146_v58 = vor.u32 %v13187_v53, %v9145_v52  ;;  %v9001_v59 = vld [vmem:[#allocation2 + $0x20] sm:$0xf]  ;;  %v13147_v61 = vld [vmem:[#allocation2 + $0x24] sm:$0xf]  ;;  %v9150_v62 = vor.u32 %v13183_v54, %v9147_v55  ;;  %v9003_v63 = vld [vmem:[#allocation2 + $0x28] sm:$0xf0] }
  0x2b   :  { %231 = vmatpush.bf16.msra.mxu0 %v9018_v44  ;;  %v9113_v0 = vld [vmem:[#allocation4 + $0x80] sm:$0xf]  ;;  %v13175_v2 = vld [vmem:[#allocation4 + $0x84] sm:$0xf]  ;;  %v9002_v4 = vor.u32 %v13148_v60, %v9001_v59  ;;  %v9006_v5 = vor.u32 %v13147_v61, %v9003_v63  ;;  %v8993_v7 = vld [vmem:[#allocation2 + $0x10] sm:$0xf] }
  0x2c   :  { %244 = vmatpush.bf16.msra.mxu1 %v9022_v45  ;;  %v13179_v1 = vld [vmem:[#allocation4 + $0x9c] sm:$0xf0]  ;;  %v9115_v3 = vld [vmem:[#allocation4 + $0xa0] sm:$0xf0]  ;;  %v13146_v8 = vld [vmem:[#allocation2 + $0x14] sm:$0xf0] }
  0x2d   :  { %739 = vmatpush.bf16.msra.mxu2 %v9178_v46  ;;  %v9114_v6 = vor.u32 %v13179_v1, %v9113_v0  ;;  %v13145_v9 = vld [vmem:[#allocation2 + $0x14] sm:$0xf]  ;;  %v9118_v10 = vor.u32 %v13175_v2, %v9115_v3  ;;  %v8995_v11 = vld [vmem:[#allocation2 + $0x18] sm:$0xf0]  ;;  %v9081_v12 = vld [vmem:[#allocation4 + $0x40] sm:$0xf]  ;;  %v8994_v16 = vor.u32 %v13146_v8, %v8993_v7 }
  0x2e   :  { %752 = vmatpush.bf16.msra.mxu3 %v9182_v50  ;;  %v13171_v13 = vld [vmem:[#allocation4 + $0x5c] sm:$0xf0]  ;;  %v13167_v14 = vld [vmem:[#allocation4 + $0x44] sm:$0xf]  ;;  %v13144_v18 = vld [vmem:[#allocation2 + $0x4] sm:$0xf0]  ;;  %v8998_v19 = vor.u32 %v13145_v9, %v8995_v11 }
  0x2f   :  { %232 = vmatpush.bf16.msra.mxu0 %v9010_v56  ;;  %v9083_v15 = vld [vmem:[#allocation4 + $0x60] sm:$0xf0]  ;;  %v8985_v17 = vld [vmem:[#allocation2] sm:$0xf]  ;;  %v9082_v20 = vor.u32 %v13171_v13, %v9081_v12  ;;  %v8987_v22 = vld [vmem:[#allocation2 + $0x8] sm:$0xf0] }
  0x30   :  { %245 = vmatpush.bf16.msra.mxu1 %v9014_v57  ;;  %v13143_v21 = vld [vmem:[#allocation2 + $0x4] sm:$0xf]  ;;  %v9281_v23 = vld [vmem:[#allocation4 + $0x1c8] sm:$0xf]  ;;  %v9086_v24 = vor.u32 %v13167_v14, %v9083_v15  ;;  %v13216_v26 = vld [vmem:[#allocation4 + $0x1cc] sm:$0xf]  ;;  %v8986_v31 = vor.u32 %v13144_v18, %v8985_v17 }
  0x31   :  { %740 = vmatpush.bf16.msra.mxu2 %v9146_v58  ;;  %v13220_v25 = vld [vmem:[#allocation4 + $0x1e4] sm:$0xf0]  ;;  %v9283_v27 = vld [vmem:[#allocation4 + $0x1e8] sm:$0xf0]  ;;  %v9049_v28 = vld [vmem:[#allocation4] sm:$0xf]  ;;  %v8990_v35 = vor.u32 %v13143_v21, %v8987_v22 }
  0x32   :  { %753 = vmatpush.bf16.msra.mxu3 %v9150_v62  ;;  %v13163_v29 = vld [vmem:[#allocation4 + $0x1c] sm:$0xf0]  ;;  %v13159_v30 = vld [vmem:[#allocation4 + $0x4] sm:$0xf]  ;;  %v9289_v33 = vld [vmem:[#allocation4 + $0x1d0] sm:$0xf]  ;;  %v9282_v36 = vor.u32 %v13220_v25, %v9281_v23  ;;  %v9286_v40 = vor.u32 %v13216_v26, %v9283_v27 }
  0x33   :  { %233 = vmatpush.bf16.msra.mxu0 %v9002_v4  ;;  %v9051_v32 = vld [vmem:[#allocation4 + $0x20] sm:$0xf0]  ;;  %v13221_v34 = vld [vmem:[#allocation4 + $0x1ec] sm:$0xf0]  ;;  %v13217_v38 = vld [vmem:[#allocation4 + $0x1d4] sm:$0xf]  ;;  %v9050_v41 = vor.u32 %v13163_v29, %v9049_v28 }
  0x34   :  { %246 = vmatpush.bf16.msra.mxu1 %v9006_v5  ;;  %v130_v37 = vld [vmem:[%s15555_s0] sm:$0xff]  ;;  %v9291_v39 = vld [vmem:[#allocation4 + $0x1f0] sm:$0xf0]  ;;  %v9249_v42 = vld [vmem:[#allocation4 + $0x188] sm:$0xf]  ;;  %v9054_v43 = vor.u32 %v13159_v30, %v9051_v32  ;;  %v9290_v44 = vor.u32 %v13221_v34, %v9289_v33  ;;  %vm322_vm7 = vcmask 1040384  }
  0x35   :  { %741 = vmatpush.bf16.msra.mxu2 %v9114_v6  ;;  %v13212_v45 = vld [vmem:[#allocation4 + $0x1a4] sm:$0xf0]  ;;  %v13208_v46 = vld [vmem:[#allocation4 + $0x18c] sm:$0xf]  ;;  %v131_v48 = vpack.c.bf16 %v130_v37, %v130_v37  ;;  %v9294_v49 = vor.u32 %v13217_v38, %v9291_v39  ;;  %v9257_v50 = vld [vmem:[#allocation4 + $0x190] sm:$0xf] }
  0x36   :  { %754 = vmatpush.bf16.msra.mxu3 %v9118_v10  ;;  %v9251_v47 = vld [vmem:[#allocation4 + $0x1a8] sm:$0xf0]  ;;  %v13213_v51 = vld [vmem:[#allocation4 + $0x1ac] sm:$0xf0]  ;;  %v13209_v52 = vld [vmem:[#allocation4 + $0x194] sm:$0xf]  ;;  %v9250_v55 = vor.u32 %v13212_v45, %v9249_v42 }
  0x37   :  { %234 = vmatpush.bf16.msra.mxu0 %v8994_v16  ;;  %v9259_v53 = vld [vmem:[#allocation4 + $0x1b0] sm:$0xf0]  ;;  %v350_v54 = vld [vmem:[%s15556_s1] sm:$0xff]  ;;  %v9254_v56 = vor.u32 %v13208_v46, %v9251_v47  ;;  %v9217_v57 = vld [vmem:[#allocation4 + $0x148] sm:$0xf]  ;;  %v9258_v58 = vor.u32 %v13213_v51, %v9257_v50 }
  0x38   :  { %247 = vmatpush.bf16.msra.mxu1 %v8998_v19  ;;  %v13204_v59 = vld [vmem:[#allocation4 + $0x164] sm:$0xf0]  ;;  %v13200_v60 = vld [vmem:[#allocation4 + $0x14c] sm:$0xf]  ;;  %v14476_v62 = vpack.c.bf16 %v350_v54, %v350_v54  ;;  %v9262_v63 = vor.u32 %v13209_v52, %v9259_v53  ;;  %v9225_v0 = vld [vmem:[#allocation4 + $0x150] sm:$0xf] }
  0x39   :  { %742 = vmatpush.bf16.msra.mxu2 %v9082_v20  ;;  %v9219_v61 = vld [vmem:[#allocation4 + $0x168] sm:$0xf0]  ;;  %v13205_v1 = vld [vmem:[#allocation4 + $0x16c] sm:$0xf0]  ;;  %v13201_v2 = vld [vmem:[#allocation4 + $0x154] sm:$0xf]  ;;  %v9218_v4 = vor.u32 %v13204_v59, %v9217_v57 }
  0x3a   :  { %755 = vmatpush.bf16.msra.mxu3 %v9086_v24  ;;  %v9227_v3 = vld [vmem:[#allocation4 + $0x170] sm:$0xf0]  ;;  %v9222_v5 = vor.u32 %v13200_v60, %v9219_v61  ;;  %v9185_v6 = vld [vmem:[#allocation4 + $0x108] sm:$0xf]  ;;  %v9226_v7 = vor.u32 %v13205_v1, %v9225_v0  ;;  %v13192_v9 = vld [vmem:[#allocation4 + $0x10c] sm:$0xf] }
  0x3b   :  { %235 = vmatpush.bf16.msra.mxu0 %v8986_v31  ;;  %v13196_v8 = vld [vmem:[#allocation4 + $0x124] sm:$0xf0]  ;;  %v9187_v10 = vld [vmem:[#allocation4 + $0x128] sm:$0xf0]  ;;  %v9230_v11 = vor.u32 %v13201_v2, %v9227_v3  ;;  %v9193_v12 = vld [vmem:[#allocation4 + $0x110] sm:$0xf] }
  0x3c   :  { %248 = vmatpush.bf16.msra.mxu1 %v8990_v35  ;;  %v13197_v13 = vld [vmem:[#allocation4 + $0x12c] sm:$0xf0]  ;;  %v13193_v14 = vld [vmem:[#allocation4 + $0x114] sm:$0xf]  ;;  %v9186_v16 = vor.u32 %v13196_v8, %v9185_v6  ;;  %v9190_v17 = vor.u32 %v13192_v9, %v9187_v10  ;;  %v9153_v18 = vld [vmem:[#allocation4 + $0xc8] sm:$0xf] }
  0x3d   :  { %743 = vmatpush.bf16.msra.mxu2 %v9050_v41  ;;  %v9195_v15 = vld [vmem:[#allocation4 + $0x130] sm:$0xf0]  ;;  %v9194_v19 = vor.u32 %v13197_v13, %v9193_v12  ;;  %v13188_v20 = vld [vmem:[#allocation4 + $0xe4] sm:$0xf0]  ;;  %v13184_v21 = vld [vmem:[#allocation4 + $0xcc] sm:$0xf] }
  0x3e   :  { %756 = vmatpush.bf16.msra.mxu3 %v9054_v43  ;;  %236 = vmatmul.bf16.vlgmr.msra.gmra.mxu0 %v131_v48  ;;  %v9155_v22 = vld [vmem:[#allocation4 + $0xe8] sm:$0xf0]  ;;  %v9198_v23 = vor.u32 %v13193_v14, %v9195_v15  ;;  %v9161_v24 = vld [vmem:[#allocation4 + $0xd0] sm:$0xf]  ;;  %v13185_v26 = vld [vmem:[#allocation4 + $0xd4] sm:$0xf]  ;;  %v9154_v28 = vor.u32 %v13188_v20, %v9153_v18 }
  0x3f   :  { %762 = vmatpush.bf16.msrb.mxu0 %v9282_v36  ;;  %249 = vmatmul.bf16.vlgmr.msra.gmra.mxu1 %v131_v48  ;;  %v13189_v25 = vld [vmem:[#allocation4 + $0xec] sm:$0xf0]  ;;  %v9163_v27 = vld [vmem:[#allocation4 + $0xf0] sm:$0xf0]  ;;  %v9158_v29 = vor.u32 %v13184_v21, %v9155_v22  ;;  %v9121_v30 = vld [vmem:[#allocation4 + $0x88] sm:$0xf] }
  0x40   :  { %775 = vmatpush.bf16.msrb.mxu1 %v9286_v40  ;;  %744 = vmatmul.bf16.vlgmr.msra.gmra.mxu2 %v14476_v62  ;;  %v9162_v31 = vor.u32 %v13189_v25, %v9161_v24  ;;  %v13180_v32 = vld [vmem:[#allocation4 + $0xa4] sm:$0xf0]  ;;  %v13176_v33 = vld [vmem:[#allocation4 + $0x8c] sm:$0xf]  ;;  %v9166_v35 = vor.u32 %v13185_v26, %v9163_v27  ;;  %v9129_v36 = vld [vmem:[#allocation4 + $0x90] sm:$0xf] }
  0x41   :  { %788 = vmatpush.bf16.msrb.mxu2 %v9290_v44  ;;  %757 = vmatmul.bf16.vlgmr.msra.gmra.mxu3 %v14476_v62  ;;  %v9123_v34 = vld [vmem:[#allocation4 + $0xa8] sm:$0xf0]  ;;  %v13181_v37 = vld [vmem:[#allocation4 + $0xac] sm:$0xf0]  ;;  %v13177_v38 = vld [vmem:[#allocation4 + $0x94] sm:$0xf]  ;;  %v9122_v40 = vor.u32 %v13180_v32, %v9121_v30 }
  0x42   :  { %801 = vmatpush.bf16.msrb.mxu3 %v9294_v49  ;;  %v9131_v39 = vld [vmem:[#allocation4 + $0xb0] sm:$0xf0]  ;;  %v9126_v41 = vor.u32 %v13176_v33, %v9123_v34  ;;  %v9089_v42 = vld [vmem:[#allocation4 + $0x48] sm:$0xf]  ;;  %v9130_v43 = vor.u32 %v13181_v37, %v9129_v36  ;;  %v13168_v45 = vld [vmem:[#allocation4 + $0x4c] sm:$0xf] }
  0x43   :  { %763 = vmatpush.bf16.msrb.mxu0 %v9250_v55  ;;  %v13172_v44 = vld [vmem:[#allocation4 + $0x64] sm:$0xf0]  ;;  %v9091_v46 = vld [vmem:[#allocation4 + $0x68] sm:$0xf0]  ;;  %v9134_v47 = vor.u32 %v13177_v38, %v9131_v39  ;;  %v9097_v48 = vld [vmem:[#allocation4 + $0x50] sm:$0xf] }
  0x44   :  { %776 = vmatpush.bf16.msrb.mxu1 %v9254_v56  ;;  %v13173_v49 = vld [vmem:[#allocation4 + $0x6c] sm:$0xf0]  ;;  %v13169_v50 = vld [vmem:[#allocation4 + $0x54] sm:$0xf]  ;;  %v9090_v52 = vor.u32 %v13172_v44, %v9089_v42  ;;  %v9094_v53 = vor.u32 %v13168_v45, %v9091_v46  ;;  %v9057_v54 = vld [vmem:[#allocation4 + $0x8] sm:$0xf] }
  0x45   :  { %789 = vmatpush.bf16.msrb.mxu2 %v9258_v58  ;;  %v9099_v51 = vld [vmem:[#allocation4 + $0x70] sm:$0xf0]  ;;  %v13164_v55 = vld [vmem:[#allocation4 + $0x24] sm:$0xf0]  ;;  %v13160_v56 = vld [vmem:[#allocation4 + $0xc] sm:$0xf]  ;;  %v9098_v57 = vor.u32 %v13173_v49, %v9097_v48 }
  0x46   :  { %802 = vmatpush.bf16.msrb.mxu3 %v9262_v63  ;;  %v9059_v58 = vld [vmem:[#allocation4 + $0x28] sm:$0xf0]  ;;  %v9297_v59 = vld [vmem:[#allocation4 + $0x1d8] sm:$0xf]  ;;  %v9102_v61 = vor.u32 %v13169_v50, %v9099_v51  ;;  %v13218_v63 = vld [vmem:[#allocation4 + $0x1dc] sm:$0xf] }
  0x47   :  { %764 = vmatpush.bf16.msrb.mxu0 %v9218_v4  ;;  %v13222_v60 = vld [vmem:[#allocation4 + $0x1f4] sm:$0xf0]  ;;  %v9299_v0 = vld [vmem:[#allocation4 + $0x1f8] sm:$0xf0]  ;;  %v9065_v1 = vld [vmem:[#allocation4 + $0x10] sm:$0xf]  ;;  %v9062_v6 = vor.u32 %v13160_v56, %v9059_v58 }
  0x48   :  { %777 = vmatpush.bf16.msrb.mxu1 %v9222_v5  ;;  %v13165_v2 = vld [vmem:[#allocation4 + $0x2c] sm:$0xf0]  ;;  %v13161_v3 = vld [vmem:[#allocation4 + $0x14] sm:$0xf]  ;;  %v9058_v5 = vor.u32 %v13164_v55, %v9057_v54  ;;  %v9302_v8 = vor.u32 %v13218_v63, %v9299_v0  ;;  %v13214_v12 = vld [vmem:[#allocation4 + $0x1b4] sm:$0xf0] }
  0x49   :  { %790 = vmatpush.bf16.msrb.mxu2 %v9226_v7  ;;  %v9067_v4 = vld [vmem:[#allocation4 + $0x30] sm:$0xf0]  ;;  %v9298_v7 = vor.u32 %v13222_v60, %v9297_v59  ;;  %v9066_v9 = vor.u32 %v13165_v2, %v9065_v1  ;;  %v13210_v13 = vld [vmem:[#allocation4 + $0x19c] sm:$0xf]  ;;  %v13206_v18 = vld [vmem:[#allocation4 + $0x174] sm:$0xf0] }
  0x4a   :  { %803 = vmatpush.bf16.msrb.mxu3 %v9230_v11  ;;  %v9070_v10 = vor.u32 %v13161_v3, %v9067_v4  ;;  %v9265_v11 = vld [vmem:[#allocation4 + $0x198] sm:$0xf]  ;;  %v9267_v14 = vld [vmem:[#allocation4 + $0x1b8] sm:$0xf0] }
  0x4b   :  { %765 = vmatpush.bf16.msrb.mxu0 %v9186_v16  ;;  %v9266_v15 = vor.u32 %v13214_v12, %v9265_v11  ;;  %v9270_v16 = vor.u32 %v13210_v13, %v9267_v14  ;;  %v9235_v20 = vld [vmem:[#allocation4 + $0x178] sm:$0xf0]  ;;  %v13198_v24 = vld [vmem:[#allocation4 + $0x134] sm:$0xf0] }
  0x4c   :  { %778 = vmatpush.bf16.msrb.mxu1 %v9190_v17  ;;  %v9233_v17 = vld [vmem:[#allocation4 + $0x158] sm:$0xf]  ;;  %v13194_v25 = vld [vmem:[#allocation4 + $0x11c] sm:$0xf] }
  0x4d   :  { %791 = vmatpush.bf16.msrb.mxu2 %v9194_v19  ;;  %v13202_v19 = vld [vmem:[#allocation4 + $0x15c] sm:$0xf]  ;;  %v9234_v21 = vor.u32 %v13206_v18, %v9233_v17  ;;  %v13190_v30 = vld [vmem:[#allocation4 + $0xf4] sm:$0xf0] }
  0x4e   :  { %804 = vmatpush.bf16.msrb.mxu3 %v9198_v23  ;;  %v9238_v22 = vor.u32 %v13202_v19, %v9235_v20  ;;  %v9201_v23 = vld [vmem:[#allocation4 + $0x118] sm:$0xf]  ;;  %v9203_v26 = vld [vmem:[#allocation4 + $0x138] sm:$0xf0] }
  0x4f   :  { %766 = vmatpush.bf16.msrb.mxu0 %v9154_v28  ;;  %v9202_v27 = vor.u32 %v13198_v24, %v9201_v23  ;;  %v9206_v28 = vor.u32 %v13194_v25, %v9203_v26  ;;  %v9171_v32 = vld [vmem:[#allocation4 + $0xf8] sm:$0xf0]  ;;  %v13182_v36 = vld [vmem:[#allocation4 + $0xb4] sm:$0xf0] }
  0x50   :  { %779 = vmatpush.bf16.msrb.mxu1 %v9158_v29  ;;  %v9169_v29 = vld [vmem:[#allocation4 + $0xd8] sm:$0xf]  ;;  %v13178_v37 = vld [vmem:[#allocation4 + $0x9c] sm:$0xf] }
  0x51   :  { %792 = vmatpush.bf16.msrb.mxu2 %v9162_v31  ;;  %v13186_v31 = vld [vmem:[#allocation4 + $0xdc] sm:$0xf]  ;;  %v9170_v33 = vor.u32 %v13190_v30, %v9169_v29  ;;  %v13174_v42 = vld [vmem:[#allocation4 + $0x74] sm:$0xf0] }
  0x52   :  { %805 = vmatpush.bf16.msrb.mxu3 %v9166_v35  ;;  %v9174_v34 = vor.u32 %v13186_v31, %v9171_v32  ;;  %v9137_v35 = vld [vmem:[#allocation4 + $0x98] sm:$0xf]  ;;  %v9139_v38 = vld [vmem:[#allocation4 + $0xb8] sm:$0xf0] }
  0x53   :  { %767 = vmatpush.bf16.msrb.mxu0 %v9122_v40  ;;  %v9138_v39 = vor.u32 %v13182_v36, %v9137_v35  ;;  %v9142_v40 = vor.u32 %v13178_v37, %v9139_v38  ;;  %v9107_v44 = vld [vmem:[#allocation4 + $0x78] sm:$0xf0]  ;;  %v13166_v48 = vld [vmem:[#allocation4 + $0x34] sm:$0xf0] }
  0x54   :  { %780 = vmatpush.bf16.msrb.mxu1 %v9126_v41  ;;  %v9105_v41 = vld [vmem:[#allocation4 + $0x58] sm:$0xf]  ;;  %v13162_v49 = vld [vmem:[#allocation4 + $0x1c] sm:$0xf] }
  0x55   :  { %793 = vmatpush.bf16.msrb.mxu2 %v9130_v43  ;;  %v13170_v43 = vld [vmem:[#allocation4 + $0x5c] sm:$0xf]  ;;  %v9106_v45 = vor.u32 %v13174_v42, %v9105_v41 }
  0x56   :  { %806 = vmatpush.bf16.msrb.mxu3 %v9134_v47  ;;  %v9110_v46 = vor.u32 %v13170_v43, %v9107_v44  ;;  %v9073_v47 = vld [vmem:[#allocation4 + $0x18] sm:$0xf]  ;;  %v9075_v50 = vld [vmem:[#allocation4 + $0x38] sm:$0xf0] }
  0x57   :  { %768 = vmatpush.bf16.msrb.mxu0 %v9090_v52  ;;  %v9074_v51 = vor.u32 %v13166_v48, %v9073_v47  ;;  %v9078_v52 = vor.u32 %v13162_v49, %v9075_v50 }
  0x58   :  { %781 = vmatpush.bf16.msrb.mxu1 %v9094_v53  ;;  %v14406_v53 = vmov 8.0  }
  0x59   :  { %794 = vmatpush.bf16.msrb.mxu2 %v9098_v57  ;;  %14196 = vrcp.f32 %v14406_v53 }
  0x5a   :  { %807 = vmatpush.bf16.msrb.mxu3 %v9102_v61 }
  0x5b   :  { %769 = vmatpush.bf16.msrb.mxu0 %v9058_v5 }
  0x5c   :  { %782 = vmatpush.bf16.msrb.mxu1 %v9062_v6 }
  0x5d   :  { %795 = vmatpush.bf16.msrb.mxu2 %v9066_v9 }
  0x5e   :  { %808 = vmatpush.bf16.msrb.mxu3 %v9070_v10  ;;  %770 = vmatmul.bf16.vlgmr.msrb.gmra.mxu0 %v14476_v62 }
  0x5f   :  { %814 = vmatpush.bf16.msra.mxu0 %v9298_v7  ;;  %783 = vmatmul.bf16.vlgmr.msrb.gmra.mxu1 %v14476_v62  ;;  %v14197_v54 = vpop.eup %14196 }
  0x60   :  { %827 = vmatpush.bf16.msra.mxu1 %v9302_v8  ;;  %796 = vmatmul.bf16.vlgmr.msrb.gmra.mxu2 %v14476_v62  ;;  %v267_v55 = vmul.f32 8.0, %v14197_v54  ;;  %vm271_vm0 = vweird.f32 %v14197_v54 }
  0x61   :  { %809 = vmatmul.bf16.vlgmr.msrb.gmra.mxu3 %v14476_v62 }
  0x62   :  { %v268_v56 = vsub.f32 1.0, %v267_v55 }
  0x63   :  { %815 = vmatpush.bf16.msra.mxu0 %v9266_v15 }
  0x64   :  { %828 = vmatpush.bf16.msra.mxu1 %v9270_v16  ;;  %v269_v59 = vmul.f32 %v14197_v54, %v268_v56 }
  0x66   :  { %v270_v5 = vadd.f32 %v14197_v54, %v269_v59 }
  0x67   :  { %816 = vmatpush.bf16.msra.mxu0 %v9234_v21 }
  0x68   :  { %829 = vmatpush.bf16.msra.mxu1 %v9238_v22  ;;  %v14500_v16 = vsel %vm271_vm0, %v14197_v54, %v270_v5 }
  0x69   :  { %15566 = vst [vmem:[#allocation16_spill] sm:$0xff] %v14500_v16 }
  0x6b   :  { %817 = vmatpush.bf16.msra.mxu0 %v9202_v27 }
  0x6c   :  { %830 = vmatpush.bf16.msra.mxu1 %v9206_v28 }
  0x6f   :  { %818 = vmatpush.bf16.msra.mxu0 %v9170_v33 }
  0x70   :  { %831 = vmatpush.bf16.msra.mxu1 %v9174_v34 }
  0x73   :  { %819 = vmatpush.bf16.msra.mxu0 %v9138_v39 }
  0x74   :  { %832 = vmatpush.bf16.msra.mxu1 %v9142_v40 }
  0x77   :  { %820 = vmatpush.bf16.msra.mxu0 %v9106_v45 }
  0x78   :  { %833 = vmatpush.bf16.msra.mxu1 %v9110_v46 }
  0x7b   :  { %821 = vmatpush.bf16.msra.mxu0 %v9074_v51 }
  0x7c   :  { %834 = vmatpush.bf16.msra.mxu1 %v9078_v52 }
  0x7e   :  { %822 = vmatmul.bf16.vlgmr.msra.gmra.mxu0 %v14476_v62 }
  0x7f   :  { %835 = vmatmul.bf16.vlgmr.msra.gmra.mxu1 %v14476_v62 }
  0xbb   :  { %v14491_v61 = vpop.f32.mrf.mxu0 }
  0xbc   :  { %v14486_v57 = vpop.f32.mrf.mxu1  ;;  %v254_v63 = vrot.slane %v14491_v61, 4  ;;  %v275_v62 = vmul.f32 %v14491_v61, %v14491_v61 }
  0xbd   :  { %v260_v58 = vrot.slane %v14486_v57, 4  ;;  %v276_v60 = vmul.f32 %v14486_v57, %v14486_v57 }
  0xbe   :  { %v255_v2 = vadd.f32 %v254_v63, %v14491_v61  ;;  %v277_v3 = vrot.slane %v275_v62, 4 }
  0xbf   :  { %v261_v0 = vadd.f32 %v260_v58, %v14486_v57  ;;  %v283_v1 = vrot.slane %v276_v60, 4 }
  0xc0   :  { %v256_v7 = vrot.slane %v255_v2, 2  ;;  %v278_v8 = vadd.f32 %v277_v3, %v275_v62 }
  0xc1   :  { %v262_v4 = vrot.slane %v261_v0, 2  ;;  %v284_v6 = vadd.f32 %v283_v1, %v276_v60 }
  0xc2   :  { %v257_v12 = vadd.f32 %v256_v7, %v255_v2  ;;  %v279_v13 = vrot.slane %v278_v8, 2 }
  0xc3   :  { %v263_v9 = vadd.f32 %v262_v4, %v261_v0  ;;  %v285_v10 = vrot.slane %v284_v6, 2  ;;  %v14498_v11 = vpop.f32.mrf.mxu2  ;;  %v239_v19 = vpop.f32.mrf.mxu0 }
  0xc4   :  { %v252_v14 = vpop.f32.mrf.mxu1  ;;  %v14502_v18 = vpop.f32.mrf.mxu3  ;;  %v258_v20 = vrot.slane %v257_v12, 1  ;;  %v280_v21 = vadd.f32 %v279_v13, %v278_v8  ;;  %v840_v34 = vrot.slane %v14498_v11, 4  ;;  %v896_v35 = vmul.f32 %v14498_v11, %v14498_v11 }
  0xc5   :  { %v264_v15 = vrot.slane %v263_v9, 1  ;;  %v286_v17 = vadd.f32 %v285_v10, %v284_v6  ;;  %v846_v22 = vrot.slane %v14502_v18, 4  ;;  %v897_v23 = vmul.f32 %v14502_v18, %v14502_v18 }
  0xc6   :  { %v259_v26 = vadd.f32 %v258_v20, %v257_v12  ;;  %v281_v27 = vrot.slane %v280_v21, 1  ;;  %v841_v46 = vadd.f32 %v840_v34, %v14498_v11  ;;  %v904_v50 = vrot.slane %v896_v35, 4 }
  0xc7   :  { %v265_v24 = vadd.f32 %v264_v15, %v263_v9  ;;  %v287_v25 = vrot.slane %v286_v17, 1  ;;  %v847_v28 = vadd.f32 %v846_v22, %v14502_v18  ;;  %v910_v29 = vrot.slane %v897_v23, 4 }
  0xc8   :  { %v14512_v32 = vmul.f32 %v14500_v16, %v259_v26  ;;  %v282_v33 = vadd.f32 %v281_v27, %v280_v21  ;;  %v842_v54 = vrot.slane %v841_v46, 2  ;;  %v905_v58 = vadd.f32 %v904_v50, %v896_v35 }
  0xc9   :  { %v14509_v30 = vmul.f32 %v14500_v16, %v265_v24  ;;  %v288_v31 = vadd.f32 %v287_v25, %v286_v17  ;;  %v848_v38 = vrot.slane %v847_v28, 2  ;;  %v911_v39 = vadd.f32 %v910_v29, %v897_v23 }
  0xca   :  { %v289_v41 = vmul.f32 %v282_v33, %v14500_v16  ;;  %v291_v42 = vmul.f32 %v14512_v32, %v14512_v32  ;;  %v843_v59 = vadd.f32 %v842_v54, %v841_v46  ;;  %v906_v62 = vrot.slane %v905_v58, 2 }
  0xcb   :  { %v290_v36 = vmul.f32 %v288_v31, %v14500_v16  ;;  %v292_v37 = vmul.f32 %v14509_v30, %v14509_v30  ;;  %v747_v40 = vpop.f32.mrf.mxu2  ;;  %v849_v48 = vadd.f32 %v848_v38, %v847_v28  ;;  %v912_v49 = vrot.slane %v911_v39, 2 }
  0xcc   :  { %v760_v44 = vpop.f32.mrf.mxu3  ;;  %v293_v45 = vsub.f32 %v289_v41, %v291_v42  ;;  %v844_v4 = vrot.slane %v843_v59, 1  ;;  %v907_v10 = vadd.f32 %v906_v62, %v905_v58 }
  0xcd   :  { %v294_v43 = vsub.f32 %v290_v36, %v292_v37  ;;  %v850_v55 = vrot.slane %v849_v48, 1  ;;  %v913_v56 = vadd.f32 %v912_v49, %v911_v39 }
  0xce   :  { %v295_v51 = vmax.f32 %v293_v45, 0.0  ;;  %v908_v40 = vrot.slane %v907_v10, 1  ;;  %v845_v46 = vadd.f32 %v844_v4, %v843_v59 }
  0xcf   :  { %v296_v47 = vmax.f32 %v294_v43, 0.0  ;;  %v851_v60 = vadd.f32 %v850_v55, %v849_v48  ;;  %v914_v63 = vrot.slane %v913_v56, 1 }
  0xd0   :  { %v297_v53 = vadd.f32 1e-05, %v295_v51  ;;  %v14566_v62 = vmul.f32 %v845_v46, %v14500_v16 }
  0xd1   :  { %v298_v52 = vadd.f32 1e-05, %v296_v47  ;;  %v14530_v8 = vmul.f32 %v851_v60, %v14500_v16  ;;  %v915_v9 = vadd.f32 %v914_v63, %v913_v56  ;;  %v909_v56 = vadd.f32 %v908_v40, %v907_v10 }
  0xd2   :  { %vm305_vm1 = vweird.f32 %v297_v53 }
  0xd3   :  { %14198 = vrsqrt.f32 %v298_v52  ;;  %vm315_vm2 = vweird.f32 %v298_v52  ;;  %v953_v27 = vmul.f32 %v915_v9, %v14500_v16  ;;  %v961_v28 = vmul.f32 %v14530_v8, %v14530_v8 }
  0xd4   :  { %14200 = vrsqrt.f32 %v297_v53 }
  0xd5   :  { %v969_v49 = vsub.f32 %v953_v27, %v961_v28 }
  0xd9   :  { %v14199_v0 = vpop.eup %14198 }
  0xda   :  { %v14201_v2 = vpop.eup %14200  ;;  %v310_v3 = vmul.f32 %v14199_v0, %v298_v52  ;;  %vm316_vm4 = vweird.f32 %v14199_v0  ;;  %v121_v52 = vld [vmem:[#allocation10] sm:$0x3] }
  0xdb   :  { %v14524_v1 = vpop.f32.mrf.mxu0  ;;  %v300_v7 = vmul.f32 %v14201_v2, %v297_v53  ;;  %vm306_vm3 = vweird.f32 %v14201_v2  ;;  %vm14543_vm5 = vmor %vm315_vm2, %vm316_vm4 }
  0xdc   :  { %v852_v5 = vrot.slane %v14524_v1, 4  ;;  %v14527_v6 = vpop.f32.mrf.mxu1  ;;  %v311_v12 = vmul.f32 %v14199_v0, %v310_v3  ;;  %v898_v15 = vmul.f32 %v14524_v1, %v14524_v1  ;;  %vm14553_vm6 = vmor %vm305_vm1, %vm306_vm3 }
  0xdd   :  { %v301_v14 = vmul.f32 %v14201_v2, %v300_v7  ;;  %v858_v17 = vrot.slane %v14527_v6, 4  ;;  %v899_v19 = vmul.f32 %v14527_v6, %v14527_v6 }
  0xde   :  { %v853_v13 = vadd.f32 %v852_v5, %v14524_v1  ;;  %v312_v20 = vmul.f32 0.5, %v311_v12  ;;  %v916_v23 = vrot.slane %v898_v15, 4  ;;  %v977_v5 = vmax.f32 %v969_v49, 0.0 }
  0xdf   :  { %v302_v22 = vmul.f32 0.5, %v301_v14  ;;  %v859_v24 = vadd.f32 %v858_v17, %v14527_v6  ;;  %v922_v25 = vrot.slane %v899_v19, 4 }
  0xe0   :  { %v854_v21 = vrot.slane %v853_v13, 2  ;;  %v313_v26 = vsub.f32 1.5, %v312_v20  ;;  %v917_v34 = vadd.f32 %v916_v23, %v898_v15 }
  0xe1   :  { %v303_v31 = vsub.f32 1.5, %v302_v22  ;;  %v860_v35 = vrot.slane %v859_v24, 2  ;;  %v923_v42 = vadd.f32 %v922_v25, %v899_v19  ;;  %v952_v19 = vmul.f32 %v909_v56, %v14500_v16  ;;  %v9585_v56 = vld [vmem:[#allocation7 + $0x230] sm:$0xf] }
  0xe2   :  { %v855_v29 = vadd.f32 %v854_v21, %v853_v13  ;;  %v314_v39 = vmul.f32 %v14199_v0, %v313_v26  ;;  %v918_v47 = vrot.slane %v917_v34, 2  ;;  %v960_v21 = vmul.f32 %v14566_v62, %v14566_v62 }
  0xe3   :  { %v14547_v36 = vpop.f32.mrf.mxu2  ;;  %v773_v43 = vpop.f32.mrf.mxu0  ;;  %v304_v45 = vmul.f32 %v14201_v2, %v303_v31  ;;  %v861_v51 = vadd.f32 %v860_v35, %v859_v24  ;;  %v924_v63 = vrot.slane %v923_v42, 2 }
  0xe4   :  { %v14549_v37 = vpop.f32.mrf.mxu3  ;;  %v856_v41 = vrot.slane %v855_v29, 1  ;;  %v786_v44 = vpop.f32.mrf.mxu1  ;;  %v318_v48 = vsel %vm14543_vm5, %v14199_v0, %v314_v39  ;;  %v919_v55 = vadd.f32 %v918_v47, %v917_v34  ;;  %v864_v3 = vrot.slane %v14547_v36, 4  ;;  %v122_v34 = vld [vmem:[#allocation10 + $0x2] sm:$0x3] }
  0xe5   :  { %v308_v53 = vsel %vm14553_vm6, %v14201_v2, %v304_v45  ;;  %v321_v54 = vrot.slane %v318_v48, 7  ;;  %v862_v60 = vrot.slane %v861_v51, 1  ;;  %v925_v10 = vadd.f32 %v924_v63, %v923_v42 }
  0xe6   :  { %v857_v50 = vadd.f32 %v856_v41, %v855_v29  ;;  %v920_v0 = vrot.slane %v919_v55, 1  ;;  %v865_v12 = vadd.f32 %v864_v3, %v14547_v36  ;;  %v14583_v29 = vadd.f32 1e-05, %v977_v5 }
  0xe7   :  { %v323_v59 = vsel %vm322_vm7, %v308_v53, %v321_v54  ;;  %v863_v7 = vadd.f32 %v862_v60, %v861_v51  ;;  %v926_v23 = vrot.slane %v925_v10, 1  ;;  %v901_v43 = vmul.f32 %v14549_v37, %v14549_v37  ;;  %v13458_v60 = vld [vmem:[#allocation7 + $0x254] sm:$0xf0] }
  0xe8   :  { %v14562_v58 = vmul.f32 %v857_v50, %v14500_v16  ;;  %v325_v4 = vmul.f32 %v323_v59, %v121_v52  ;;  %v921_v2 = vadd.f32 %v920_v0, %v919_v55  ;;  %v866_v24 = vrot.slane %v865_v12, 2 }
  0xe9   :  { %v14574_v20 = vmul.f32 %v863_v7, %v14500_v16  ;;  %v927_v33 = vadd.f32 %v926_v23, %v925_v10  ;;  %14202 = vrsqrt.f32 %v14583_v29  ;;  %v934_v50 = vrot.slane %v901_v43, 4 }
  0xea   :  { %v962_v9 = vmul.f32 %v14562_v58, %v14562_v58  ;;  %v327_v15 = vperm.slane %v325_v4, 0  ;;  %v328_v17 = vperm.slane %v325_v4, 1  ;;  %v954_v22 = vmul.f32 %v921_v2, %v14500_v16 }
  0xeb   :  { %v799_v13 = vpop.f32.mrf.mxu2  ;;  %v963_v38 = vmul.f32 %v14574_v20, %v14574_v20  ;;  %v867_v39 = vadd.f32 %v866_v24, %v865_v12  ;;  %v955_v41 = vmul.f32 %v927_v33, %v14500_v16  ;;  %v935_v3 = vadd.f32 %v934_v50, %v901_v43 }
  0xec   :  { %v812_v14 = vpop.f32.mrf.mxu3  ;;  %v331_v25 = vmul.f32 %v327_v15, %v14491_v61  ;;  %v332_v26 = vmul.f32 %v328_v17, %v14486_v57  ;;  %v333_v27 = vmul.f32 %v327_v15, %v14512_v32  ;;  %v334_v28 = vmul.f32 %v328_v17, %v14509_v30 }
  0xed   :  { %v970_v31 = vsub.f32 %v954_v22, %v962_v9  ;;  %v900_v57 = vmul.f32 %v14547_v36, %v14547_v36  ;;  %v870_v61 = vrot.slane %v14549_v37, 4  ;;  %v968_v32 = vsub.f32 %v952_v19, %v960_v21 }
  0xee   :  { %v337_v35 = vrot.slane %v334_v28, 7  ;;  %v868_v42 = vrot.slane %v867_v39, 1  ;;  %v971_v45 = vsub.f32 %v955_v41, %v963_v38  ;;  %v936_v9 = vrot.slane %v935_v3, 2 }
  0xef   :  { %v978_v40 = vmax.f32 %v970_v31, 0.0  ;;  %v928_v46 = vrot.slane %v900_v57, 4  ;;  %v871_v49 = vadd.f32 %v870_v61, %v14549_v37  ;;  %v976_v0 = vmax.f32 %v968_v32, 0.0  ;;  %v14606_v2 = vpop.eup %14202 }
  0xf0   :  { %v338_v30 = vsel %vm322_vm7, %v333_v27, %v337_v35  ;;  %v869_v48 = vadd.f32 %v868_v42, %v867_v39  ;;  %v979_v53 = vmax.f32 %v971_v45, 0.0  ;;  %v9586_v13 = vor.u32 %v13458_v60, %v9585_v56 }
  0xf1   :  { %v340_v44 = vsub.f32 %v122_v34, %v338_v30  ;;  %v14595_v47 = vadd.f32 1e-05, %v978_v40  ;;  %v929_v54 = vadd.f32 %v928_v46, %v900_v57  ;;  %v872_v55 = vrot.slane %v871_v49, 2 }
  0xf2   :  { %v14604_v4 = vmul.f32 %v869_v48, %v14500_v16  ;;  %v14612_v14 = vadd.f32 1e-05, %v979_v53  ;;  %v14614_v19 = vadd.f32 1e-05, %v976_v0  ;;  %v937_v21 = vadd.f32 %v936_v9, %v935_v3  ;;  %5202 = vmatpush.bf16.msra.mxu2 %v9586_v13 }
  0xf3   :  { %v342_v51 = vperm.slane %v340_v44, 0  ;;  %v343_v52 = vperm.slane %v340_v44, 1  ;;  %14204 = vrsqrt.f32 %v14595_v47  ;;  %v930_v5 = vrot.slane %v929_v54, 2 }
  0xf4   :  { %v873_v7 = vadd.f32 %v872_v55, %v871_v49  ;;  %v1003_v23 = vmul.f32 %v14606_v2, %v14583_v29  ;;  %v938_v27 = vrot.slane %v937_v21, 1  ;;  %14206 = vrsqrt.f32 %v14612_v14 }
  0xf5   :  { %v14598_v63 = vadd.f32 %v342_v51, %v331_v25  ;;  %v14600_v59 = vadd.f32 %v343_v52, %v332_v26  ;;  %v931_v15 = vadd.f32 %v930_v5, %v929_v54  ;;  %v964_v25 = vmul.f32 %v14604_v4, %v14604_v4 }
  0xf6   :  { %v874_v17 = vrot.slane %v873_v7, 1  ;;  %v939_v40 = vadd.f32 %v938_v27, %v937_v21  ;;  %v1004_v43 = vmul.f32 %v14606_v2, %v1003_v23  ;;  %14208 = vrsqrt.f32 %v14614_v19  ;;  %v13538_v27 = vld [vmem:[#allocation7 + $0x4d4] sm:$0xf0] }
  0xf7   :  { %v932_v24 = vrot.slane %v931_v15, 1  ;;  %vm1008_vm8 = vweird.f32 %v14583_v29  ;;  %vm1009_vm9 = vweird.f32 %v14606_v2  ;;  %vm1018_vm10 = vweird.f32 %v14595_v47 }
  0xf8   :  { %v875_v26 = vadd.f32 %v874_v17, %v873_v7  ;;  %v957_v45 = vmul.f32 %v939_v40, %v14500_v16  ;;  %v1005_v5 = vmul.f32 0.5, %v1004_v43  ;;  %vm14698_vm12 = vmor %vm1008_vm8, %vm1009_vm9  ;;  %vm1028_vm14 = vweird.f32 %v14612_v14 }
  0xf9   :  { %v14625_v34 = vpop.eup %14204  ;;  %v933_v35 = vadd.f32 %v932_v24, %v931_v15  ;;  %vm998_vm0 = vweird.f32 %v14614_v19  ;;  %vm1088_vm9 = vcmask 1042434  }
  0xfa   :  { %v14629_v38 = vmul.f32 %v875_v26, %v14500_v16  ;;  %v1013_v44 = vmul.f32 %v14625_v34, %v14595_v47  ;;  %v14642_v56 = vpop.eup %14206  ;;  %v9905_v26 = vld [vmem:[#allocation7 + $0x4b0] sm:$0xf]  ;;  %v1006_v40 = vsub.f32 1.5, %v1005_v5  ;;  %vm1019_vm11 = vweird.f32 %v14625_v34 }
  0xfb   :  { %v14608_v10 = vpop.f32.mrf.mxu0  ;;  %v956_v30 = vmul.f32 %v933_v35, %v14500_v16  ;;  %v1023_v23 = vmul.f32 %v14642_v56, %v14612_v14  ;;  %v10225_v35 = vld [vmem:[#allocation7 + $0x730] sm:$0xf]  ;;  %vm14716_vm13 = vmor %vm1018_vm10, %vm1019_vm11  ;;  %vm1029_vm15 = vweird.f32 %v14642_v56 }
  0xfc   :  { %v14610_v12 = vpop.f32.mrf.mxu1  ;;  %v876_v22 = vrot.slane %v14608_v10, 4  ;;  %v902_v31 = vmul.f32 %v14608_v10, %v14608_v10  ;;  %v965_v32 = vmul.f32 %v14629_v38, %v14629_v38  ;;  %v1014_v7 = vmul.f32 %v14625_v34, %v1013_v44  ;;  %v9545_v44 = vld [vmem:[#allocation7 + $0x1e0] sm:$0xf]  ;;  %v9505_v5 = vld [vmem:[#allocation7 + $0x190] sm:$0xf]  ;;  %vm14748_vm2 = vmor %vm1028_vm14, %vm1029_vm15 }
  0xfd   :  { %v882_v33 = vrot.slane %v14610_v12, 4  ;;  %v903_v39 = vmul.f32 %v14610_v12, %v14610_v12  ;;  %v972_v50 = vsub.f32 %v956_v30, %v964_v25  ;;  %vm1094_vm14 = vcmask 1046534  }
  0xfe   :  { %v877_v28 = vadd.f32 %v876_v22, %v14608_v10  ;;  %v940_v57 = vrot.slane %v902_v31, 4  ;;  %v973_v53 = vsub.f32 %v957_v45, %v965_v32  ;;  %v13448_v45 = vld [vmem:[#allocation7 + $0x204] sm:$0xf0] }
  0xff   :  { %v883_v61 = vadd.f32 %v882_v33, %v14610_v12  ;;  %v946_v42 = vrot.slane %v903_v39, 4  ;;  %v980_v60 = vmax.f32 %v972_v50, 0.0  ;;  %v9906_v50 = vor.u32 %v13538_v27, %v9905_v26 }
 0x100   :  { %v878_v41 = vrot.slane %v877_v28, 2  ;;  %v941_v51 = vadd.f32 %v940_v57, %v902_v31  ;;  %v981_v9 = vmax.f32 %v973_v53, 0.0  ;;  %v10545_v57 = vld [vmem:[#allocation7 + $0x9b0] sm:$0xf]  ;;  %v10185_v53 = vld [vmem:[#allocation7 + $0x6e0] sm:$0xf] }
 0x101   :  { %v884_v52 = vrot.slane %v883_v61, 2  ;;  %v947_v55 = vadd.f32 %v946_v42, %v903_v39  ;;  %v14645_v15 = vadd.f32 1e-05, %v980_v60  ;;  %v13618_v39 = vld [vmem:[#allocation7 + $0x754] sm:$0xf0]  ;;  %5215 = vmatpush.bf16.msra.mxu3 %v9906_v50 }
 0x102   :  { %v879_v46 = vadd.f32 %v878_v41, %v877_v28  ;;  %v942_v0 = vrot.slane %v941_v51, 2  ;;  %v14649_v24 = vadd.f32 1e-05, %v981_v9  ;;  %v14654_v28 = vpop.eup %14208  ;;  %v14657_v41 = vmul.f32 0.5, %v1014_v7 }
 0x103   :  { %v825_v48 = vpop.f32.mrf.mxu0  ;;  %v885_v3 = vadd.f32 %v884_v52, %v883_v61  ;;  %v948_v22 = vrot.slane %v947_v55, 2  ;;  %14210 = vrsqrt.f32 %v14645_v15  ;;  %v13698_v61 = vld [vmem:[#allocation7 + $0x9d4] sm:$0xf0]  ;;  %v13528_v52 = vld [vmem:[#allocation7 + $0x484] sm:$0xf0]  ;;  %vm999_vm1 = vweird.f32 %v14654_v28 }
 0x104   :  { %v838_v49 = vpop.f32.mrf.mxu1  ;;  %v880_v54 = vrot.slane %v879_v46, 1  ;;  %v943_v17 = vadd.f32 %v942_v0, %v941_v51  ;;  %14212 = vrsqrt.f32 %v14649_v24  ;;  %v993_v48 = vmul.f32 %v14654_v28, %v14614_v19  ;;  %vm14789_vm8 = vmor %vm998_vm0, %vm999_vm1 }
 0x105   :  { %v886_v21 = vrot.slane %v885_v3, 1  ;;  %v949_v43 = vadd.f32 %v948_v22, %v947_v55  ;;  %v1024_v49 = vmul.f32 %v14642_v56, %v1023_v23  ;;  %v10226_v51 = vor.u32 %v13618_v39, %v10225_v35  ;;  %v13688_v55 = vld [vmem:[#allocation7 + $0x984] sm:$0xf0]  ;;  %v10145_v35 = vld [vmem:[#allocation7 + $0x690] sm:$0xf] }
 0x106   :  { %v881_v13 = vadd.f32 %v880_v54, %v879_v46  ;;  %v944_v31 = vrot.slane %v943_v17, 1  ;;  %v9865_v46 = vld [vmem:[#allocation7 + $0x460] sm:$0xf]  ;;  %v13608_v54 = vld [vmem:[#allocation7 + $0x704] sm:$0xf0]  ;;  %v1016_v7 = vsub.f32 1.5, %v14657_v41  ;;  %v10546_v9 = vor.u32 %v13698_v61, %v10545_v57 }
 0x107   :  { %v887_v33 = vadd.f32 %v886_v21, %v885_v3  ;;  %v950_v0 = vrot.slane %v949_v43, 1  ;;  %v10505_v3 = vld [vmem:[#allocation7 + $0x960] sm:$0xf]  ;;  %5228 = vmatpush.bf16.msrb.mxu0 %v10226_v51  ;;  %v9825_v21 = vld [vmem:[#allocation7 + $0x410] sm:$0xf]  ;;  %v14679_v41 = vmul.f32 %v14606_v2, %v1006_v40  ;;  %v994_v57 = vmul.f32 %v14654_v28, %v993_v48 }
 0x108   :  { %v14652_v25 = vmul.f32 %v881_v13, %v14500_v16  ;;  %v945_v30 = vadd.f32 %v944_v31, %v943_v17  ;;  %v9546_v13 = vor.u32 %v13448_v45, %v9545_v44  ;;  %v13438_v17 = vld [vmem:[#allocation7 + $0x1b4] sm:$0xf0]  ;;  %v9866_v31 = vor.u32 %v13528_v52, %v9865_v46  ;;  %5241 = vmatpush.bf16.msrb.mxu1 %v10546_v9  ;;  %v9465_v40 = vld [vmem:[#allocation7 + $0x140] sm:$0xf]  ;;  %v13428_v52 = vld [vmem:[#allocation7 + $0x164] sm:$0xf0] }
 0x109   :  { %v14663_v42 = vmul.f32 %v887_v33, %v14500_v16  ;;  %v14672_v22 = vpop.eup %14210  ;;  %v951_v26 = vadd.f32 %v950_v0, %v949_v43  ;;  %v13518_v33 = vld [vmem:[#allocation7 + $0x434] sm:$0xf0]  ;;  %v14682_v61 = vmul.f32 0.5, %v1024_v49  ;;  %v10465_v43 = vld [vmem:[#allocation7 + $0x910] sm:$0xf]  ;;  %v10506_v48 = vor.u32 %v13688_v55, %v10505_v3 }
 0x10a   :  { %v966_v32 = vmul.f32 %v14652_v25, %v14652_v25  ;;  %v958_v60 = vmul.f32 %v945_v30, %v14500_v16  ;;  %v13598_v39 = vld [vmem:[#allocation7 + $0x6b4] sm:$0xf0]  ;;  %v14676_v30 = vpop.eup %14212  ;;  %5203 = vmatpush.bf16.msra.mxu2 %v9546_v13  ;;  %v1033_v45 = vmul.f32 %v14672_v22, %v14645_v15  ;;  %5216 = vmatpush.bf16.msra.mxu3 %v9866_v31  ;;  %vm1038_vm3 = vweird.f32 %v14645_v15 }
 0x10b   :  { %v967_v27 = vmul.f32 %v14663_v42, %v14663_v42  ;;  %v13678_v44 = vld [vmem:[#allocation7 + $0x934] sm:$0xf0]  ;;  %v1043_v46 = vmul.f32 %v14676_v30, %v14649_v24  ;;  %v959_v51 = vmul.f32 %v951_v26, %v14500_v16  ;;  %v9506_v49 = vor.u32 %v13438_v17, %v9505_v5  ;;  %v13588_v26 = vld [vmem:[#allocation7 + $0x664] sm:$0xf0]  ;;  %v10425_v17 = vld [vmem:[#allocation7 + $0x8c0] sm:$0xf] }
 0x10c   :  { %v974_v23 = vsub.f32 %v958_v60, %v966_v32  ;;  %v10186_v32 = vor.u32 %v13608_v54, %v10185_v53  ;;  %v9785_v53 = vld [vmem:[#allocation7 + $0x3c0] sm:$0xf]  ;;  %v13508_v54 = vld [vmem:[#allocation7 + $0x3e4] sm:$0xf0]  ;;  %v1017_v60 = vmul.f32 %v14625_v34, %v1016_v7  ;;  %v9826_v13 = vor.u32 %v13518_v33, %v9825_v21  ;;  %5242 = vmatpush.bf16.msrb.mxu1 %v10506_v48  ;;  %v9425_v33 = vld [vmem:[#allocation7 + $0xf0] sm:$0xf] }
 0x10d   :  { %v975_v9 = vsub.f32 %v959_v51, %v967_v27  ;;  %v1026_v3 = vsub.f32 1.5, %v14682_v61  ;;  %v10146_v55 = vor.u32 %v13598_v39, %v10145_v35  ;;  %v10466_v5 = vor.u32 %v13678_v44, %v10465_v43  ;;  %v13668_v27 = vld [vmem:[#allocation7 + $0x8e4] sm:$0xf0]  ;;  %v9745_v35 = vld [vmem:[#allocation7 + $0x370] sm:$0xf] }
 0x10e   :  { %v982_v50 = vmax.f32 %v974_v23, 0.0  ;;  %5229 = vmatpush.bf16.msrb.mxu0 %v10186_v32  ;;  %v10105_v23 = vld [vmem:[#allocation7 + $0x640] sm:$0xf]  ;;  %5204 = vmatpush.bf16.msra.mxu2 %v9506_v49  ;;  %v9466_v7 = vor.u32 %v13428_v52, %v9465_v40  ;;  %v1034_v21 = vmul.f32 %v14672_v22, %v1033_v45  ;;  %v1044_v31 = vmul.f32 %v14676_v30, %v1043_v46  ;;  %v13418_v32 = vld [vmem:[#allocation7 + $0x114] sm:$0xf0] }
 0x10f   :  { %v983_v29 = vmax.f32 %v975_v9, 0.0  ;;  %5217 = vmatpush.bf16.msra.mxu3 %v9826_v13  ;;  %v9786_v61 = vor.u32 %v13508_v54, %v9785_v53  ;;  %v10106_v51 = vor.u32 %v13588_v26, %v10105_v23  ;;  %v13498_v39 = vld [vmem:[#allocation7 + $0x394] sm:$0xf0]  ;;  %v1011_v43 = vsel %vm14698_vm12, %v14606_v2, %v14679_v41  ;;  %v10065_v45 = vld [vmem:[#allocation7 + $0x5f0] sm:$0xf] }
 0x110   :  { %v14692_v0 = vadd.f32 1e-05, %v982_v50  ;;  %v14706_v50 = vmul.f32 0.5, %v994_v57  ;;  %v13578_v46 = vld [vmem:[#allocation7 + $0x614] sm:$0xf0]  ;;  %v1021_v40 = vsel %vm14716_vm13, %v14625_v34, %v1017_v60  ;;  %5243 = vmatpush.bf16.msrb.mxu1 %v10466_v5  ;;  %v10426_v16 = vor.u32 %v13668_v27, %v10425_v17 }
 0x111   :  { %v14721_v57 = vadd.f32 1e-05, %v983_v29  ;;  %v9426_v47 = vor.u32 %v13418_v32, %v9425_v33  ;;  %v10385_v2 = vld [vmem:[#allocation7 + $0x870] sm:$0xf]  ;;  %v13658_v41 = vld [vmem:[#allocation7 + $0x894] sm:$0xf0]  ;;  %v1027_v52 = vmul.f32 %v14642_v56, %v1026_v3  ;;  %v9746_v60 = vor.u32 %v13498_v39, %v9745_v35 }
 0x112   :  { %14214 = vrsqrt.f32 %v14692_v0  ;;  %5230 = vmatpush.bf16.msrb.mxu0 %v10146_v55  ;;  %5205 = vmatpush.bf16.msra.mxu2 %v9466_v7  ;;  %v14728_v48 = vmul.f32 0.5, %v1034_v21  ;;  %v14730_v49 = vmul.f32 0.5, %v1044_v31  ;;  %v9385_v53 = vld [vmem:[#allocation7 + $0xa0] sm:$0xf]  ;;  %v13408_v54 = vld [vmem:[#allocation7 + $0xc4] sm:$0xf0]  ;;  %v10066_v13 = vor.u32 %v13578_v46, %v10065_v45 }
 0x113   :  { %14216 = vrsqrt.f32 %v14721_v57  ;;  %v14733_v9 = vrot.slane %v1011_v43, 7  ;;  %v996_v34 = vsub.f32 1.5, %v14706_v50  ;;  %5218 = vmatpush.bf16.msra.mxu3 %v9786_v61  ;;  %v9705_v23 = vld [vmem:[#allocation7 + $0x320] sm:$0xf]  ;;  %v13488_v26 = vld [vmem:[#allocation7 + $0x344] sm:$0xf0]  ;;  %v10386_v31 = vor.u32 %v13658_v41, %v10385_v2 }
 0x114   :  { %v10025_v3 = vld [vmem:[#allocation7 + $0x5a0] sm:$0xf]  ;;  %v13568_v5 = vld [vmem:[#allocation7 + $0x5c4] sm:$0xf0]  ;;  %v14742_v17 = vrot.slane %v1021_v40, 6  ;;  %5244 = vmatpush.bf16.msrb.mxu1 %v10426_v16  ;;  %v9386_v29 = vor.u32 %v13408_v54, %v9385_v53  ;;  %v1031_v50 = vsel %vm14748_vm2, %v14642_v56, %v1027_v52  ;;  %v1036_v61 = vsub.f32 1.5, %v14728_v48 }
 0x115   :  { %v14740_v7 = vld [vmem:[#allocation7 + $0x820] sm:$0xf]  ;;  %v13648_v33 = vld [vmem:[#allocation7 + $0x844] sm:$0xf0]  ;;  %v9345_v32 = vld [vmem:[#allocation7 + $0x50] sm:$0xf]  ;;  %vm1039_vm4 = vweird.f32 %v14672_v22  ;;  %v9706_v43 = vor.u32 %v13488_v26, %v9705_v23  ;;  %v10026_v44 = vor.u32 %v13568_v5, %v10025_v3  ;;  %v14773_v16 = vmul.f32 %v14654_v28, %v996_v34 }
 0x116   :  { %5231 = vmatpush.bf16.msrb.mxu0 %v10106_v51  ;;  %5206 = vmatpush.bf16.msra.mxu2 %v9426_v47  ;;  %v1046_v14 = vsub.f32 1.5, %v14730_v49  ;;  %v13398_v51 = vld [vmem:[#allocation7 + $0x74] sm:$0xf0]  ;;  %v14760_v35 = vld [vmem:[#allocation7 + $0x2d0] sm:$0xf]  ;;  %vm1048_vm5 = vweird.f32 %v14649_v24  ;;  %vm1049_vm6 = vweird.f32 %v14676_v30  ;;  %v10346_v54 = vor.u32 %v13648_v33, %v14740_v7  ;;  %vm14807_vm10 = vmor %vm1038_vm3, %vm1039_vm4 }
 0x117   :  { %5219 = vmatpush.bf16.msra.mxu3 %v9746_v60  ;;  %v14764_v45 = vld [vmem:[#allocation7 + $0x2f4] sm:$0xf0]  ;;  %v14766_v56 = vld [vmem:[#allocation7 + $0x550] sm:$0xf]  ;;  %v14781_v41 = vld [vmem:[#allocation7] sm:$0xf]  ;;  %v9346_v34 = vor.u32 %v13398_v51, %v9345_v32  ;;  %v1037_v19 = vmul.f32 %v14672_v22, %v1036_v61  ;;  %v1001_v24 = vsel %vm14789_vm8, %v14654_v28, %v14773_v16  ;;  %vm1058_vm15 = vweird.f32 %v14692_v0 }
 0x118   :  { %v14736_v55 = vpop.eup %14214  ;;  %v14768_v46 = vld [vmem:[#allocation7 + $0x574] sm:$0xf0]  ;;  %v14777_v47 = vld [vmem:[#allocation7 + $0x7d0] sm:$0xf]  ;;  %v14783_v52 = vld [vmem:[#allocation7 + $0x24] sm:$0xf0]  ;;  %5245 = vmatpush.bf16.msrb.mxu1 %v10386_v31  ;;  %v1047_v3 = vmul.f32 %v14676_v30, %v1046_v14  ;;  %v9666_v31 = vor.u32 %v14764_v45, %v14760_v35  ;;  %vm1068_vm3 = vweird.f32 %v14721_v57 }
 0x119   :  { %v1053_v21 = vmul.f32 %v14736_v55, %v14692_v0  ;;  %v14770_v40 = vpop.eup %14216  ;;  %v14779_v2 = vld [vmem:[#allocation7 + $0x7f4] sm:$0xf0]  ;;  %v14796_v60 = vld [vmem:[#allocation7 + $0x280] sm:$0xf]  ;;  %v14800_v23 = vrot.slane %v1031_v50, 5  ;;  %vm1059_vm11 = vweird.f32 %v14736_v55  ;;  %vm1092_vm12 = vcmask 1044484   ;;  %vm14821_vm13 = vmor %vm1048_vm5, %vm1049_vm6 }
 0x11a   :  { %5232 = vmatpush.bf16.msrb.mxu0 %v10066_v13  ;;  %v1063_v53 = vmul.f32 %v14770_v40, %v14721_v57  ;;  %5207 = vmatpush.bf16.msra.mxu2 %v9386_v29  ;;  %v14798_v13 = vld [vmem:[#allocation7 + $0x2a4] sm:$0xf0]  ;;  %v14813_v5 = vld [vmem:[#allocation7 + $0x500] sm:$0xf]  ;;  %v9986_v29 = vor.u32 %v14768_v46, %v14766_v56  ;;  %v10865_v33 = vld [vmem:[#allocation7 + $0xc30] sm:$0xf]  ;;  %v1041_v46 = vsel %vm14807_vm10, %v14672_v22, %v1037_v19  ;;  %vm1069_vm2 = vweird.f32 %v14770_v40 }
 0x11b   :  { %v1054_v39 = vmul.f32 %v14736_v55, %v1053_v21  ;;  %v14815_v7 = vld [vmem:[#allocation7 + $0x524] sm:$0xf0]  ;;  %5220 = vmatpush.bf16.msra.mxu3 %v9706_v43  ;;  %v13778_v32 = vld [vmem:[#allocation7 + $0xc54] sm:$0xf0]  ;;  %vm1090_vm0 = vcmask 1041408   ;;  %v10306_v43 = vor.u32 %v14779_v2, %v14777_v47  ;;  %vm14854_vm1 = vmor %vm1058_vm15, %vm1059_vm11  ;;  %v9626_v47 = vor.u32 %v14798_v13, %v14796_v60 }
 0x11c   :  { %v1064_v21 = vmul.f32 %v14770_v40, %v1063_v53  ;;  %v14835_v50 = vld [vmem:[#allocation7 + $0x780] sm:$0xf]  ;;  %v14837_v61 = vld [vmem:[#allocation7 + $0x7a4] sm:$0xf0]  ;;  %v11185_v14 = vld [vmem:[#allocation7 + $0xeb0] sm:$0xf]  ;;  %5246 = vmatpush.bf16.msrb.mxu1 %v10346_v54  ;;  %v10866_v2 = vor.u32 %v13778_v32, %v10865_v33 }
 0x11d   :  { %v1055_v49 = vmul.f32 0.5, %v1054_v39  ;;  %v13858_v51 = vld [vmem:[#allocation7 + $0xed4] sm:$0xf0]  ;;  %v11505_v45 = vld [vmem:[#allocation7 + $0x1130] sm:$0xf]  ;;  %vm1096_vm4 = vcmask 1045508   ;;  %vm1070_vm5 = vmor %vm1068_vm3, %vm1069_vm2 }
 0x11e   :  { %5233 = vmatpush.bf16.msrb.mxu0 %v10026_v44  ;;  %v1065_v39 = vmul.f32 0.5, %v1064_v21  ;;  %5208 = vmatpush.bf16.msra.mxu2 %v9346_v34  ;;  %v9306_v44 = vor.u32 %v14783_v52, %v14781_v41  ;;  %v13938_v56 = vld [vmem:[#allocation7 + $0x1154] sm:$0xf0]  ;;  %v11825_v41 = vld [vmem:[#allocation7 + $0x13b0] sm:$0xf]  ;;  %v11186_v60 = vor.u32 %v13858_v51, %v11185_v14  ;;  %vm1098_vm6 = vcmask 1043456  }
 0x11f   :  { %v1056_v15 = vsub.f32 1.5, %v1055_v49  ;;  %v1051_v49 = vsel %vm14821_vm13, %v14676_v30, %v1047_v3  ;;  %v14018_v52 = vld [vmem:[#allocation7 + $0x13d4] sm:$0xf0]  ;;  %5221 = vmatpush.bf16.msra.mxu3 %v9666_v31  ;;  %v9946_v30 = vor.u32 %v14815_v7, %v14813_v5  ;;  %v10825_v0 = vld [vmem:[#allocation7 + $0xbe0] sm:$0xf]  ;;  %v11506_v13 = vor.u32 %v13938_v56, %v11505_v45 }
 0x120   :  { %v1066_v54 = vsub.f32 1.5, %v1065_v39  ;;  %v13768_v34 = vld [vmem:[#allocation7 + $0xc04] sm:$0xf0]  ;;  %v11145_v19 = vld [vmem:[#allocation7 + $0xe60] sm:$0xf]  ;;  %v1083_v3 = vrot.slane %v1041_v46, 4  ;;  %5247 = vmatpush.bf16.msrb.mxu1 %v10306_v43  ;;  %v11826_v31 = vor.u32 %v14018_v52, %v11825_v41 }
 0x121   :  { %v1057_v35 = vmul.f32 %v14736_v55, %v1056_v15  ;;  %v13848_v26 = vld [vmem:[#allocation7 + $0xe84] sm:$0xf0]  ;;  %v1084_v27 = vrot.slane %v1051_v49, 3  ;;  %v10266_v15 = vor.u32 %v14837_v61, %v14835_v50  ;;  %v11465_v21 = vld [vmem:[#allocation7 + $0x10e0] sm:$0xf] }
 0x122   :  { %5234 = vmatpush.bf16.msrb.mxu0 %v9986_v29  ;;  %5209 = vmatpush.bf16.msra.mxu2 %v9306_v44  ;;  %v13928_v5 = vld [vmem:[#allocation7 + $0x1104] sm:$0xf0]  ;;  %v10826_v29 = vor.u32 %v13768_v34, %v10825_v0  ;;  %v11785_v33 = vld [vmem:[#allocation7 + $0x1360] sm:$0xf]  ;;  %v10785_v51 = vld [vmem:[#allocation7 + $0xb90] sm:$0xf]  ;;  %v11146_v57 = vor.u32 %v13848_v26, %v11145_v19 }
 0x123   :  { %v1061_v22 = vsel %vm14854_vm1, %v14736_v55, %v1057_v35  ;;  %v1067_v55 = vmul.f32 %v14770_v40, %v1066_v54  ;;  %5222 = vmatpush.bf16.msra.mxu3 %v9626_v47  ;;  %v14008_v14 = vld [vmem:[#allocation7 + $0x1384] sm:$0xf0]  ;;  %v13758_v50 = vld [vmem:[#allocation7 + $0xbb4] sm:$0xf0]  ;;  %v1089_v35 = vsel %vm1088_vm9, %v14742_v17, %v14800_v23  ;;  %v11466_v39 = vor.u32 %v13928_v5, %v11465_v21  ;;  %v11105_v43 = vld [vmem:[#allocation7 + $0xe10] sm:$0xf] }
 0x124   :  { %v1085_v7 = vrot.slane %v1061_v22, 2  ;;  %v1093_v44 = vsel %vm1092_vm12, %v1083_v3, %v1084_v27  ;;  %5248 = vmatpush.bf16.msrb.mxu1 %v10266_v15  ;;  %v13838_v45 = vld [vmem:[#allocation7 + $0xe34] sm:$0xf0]  ;;  %v11425_v56 = vld [vmem:[#allocation7 + $0x1090] sm:$0xf]  ;;  %v123_v17 = vld [vmem:[#allocation10 + $0x4] sm:$0xff]  ;;  %v11786_v49 = vor.u32 %v14008_v14, %v11785_v33  ;;  %v10786_v53 = vor.u32 %v13758_v50, %v10785_v51 }
 0x125   :  { %v1071_v32 = vsel %vm1070_vm5, %v14770_v40, %v1067_v55  ;;  %v1087_v40 = vsel %vm322_vm7, %v1001_v24, %v14733_v9  ;;  %v13918_v46 = vld [vmem:[#allocation7 + $0x10b4] sm:$0xf0]  ;;  %v11745_v47 = vld [vmem:[#allocation7 + $0x1310] sm:$0xf]  ;;  %v10745_v9 = vld [vmem:[#allocation7 + $0xb40] sm:$0xf]  ;;  %v11106_v52 = vor.u32 %v13838_v45, %v11105_v43 }
 0x126   :  { %5254 = vmatpush.bf16.msrb.mxu2 %v10866_v2  ;;  %5235 = vmatpush.bf16.msrb.mxu0 %v9946_v30  ;;  %v1086_v61 = vrot.slane %v1071_v32, 1  ;;  %v13998_v48 = vld [vmem:[#allocation7 + $0x1334] sm:$0xf0]  ;;  %v1091_v2 = vsel %vm1090_vm0, %v1087_v40, %v1089_v35  ;;  %v13748_v16 = vld [vmem:[#allocation7 + $0xb64] sm:$0xf0]  ;;  %v11426_v22 = vor.u32 %v13918_v46, %v11425_v56 }
 0x127   :  { %5267 = vmatpush.bf16.msrb.mxu3 %v11186_v60  ;;  %v11065_v24 = vld [vmem:[#allocation7 + $0xdc0] sm:$0xf]  ;;  %v13828_v54 = vld [vmem:[#allocation7 + $0xde4] sm:$0xf0]  ;;  %v10705_v19 = vld [vmem:[#allocation7 + $0xaf0] sm:$0xf]  ;;  %v11746_v27 = vor.u32 %v13998_v48, %v11745_v47  ;;  %v10746_v55 = vor.u32 %v13748_v16, %v10745_v9 }
 0x128   :  { %v1095_v23 = vsel %vm1094_vm14, %v1085_v7, %v1086_v61  ;;  %5293 = vmatpush.bf16.msra.mxu1 %v11826_v31  ;;  %v11385_v30 = vld [vmem:[#allocation7 + $0x1040] sm:$0xf]  ;;  %v13908_v0 = vld [vmem:[#allocation7 + $0x1064] sm:$0xf0]  ;;  %v13738_v26 = vld [vmem:[#allocation7 + $0xb14] sm:$0xf0]  ;;  %v11066_v33 = vor.u32 %v13828_v54, %v11065_v24 }
 0x129   :  { %v1097_v28 = vsel %vm1096_vm4, %v1093_v44, %v1095_v23  ;;  %v11705_v60 = vld [vmem:[#allocation7 + $0x12c0] sm:$0xf]  ;;  %v14892_v3 = vld [vmem:[#allocation7 + $0xd70] sm:$0xf]  ;;  %v13818_v15 = vld [vmem:[#allocation7 + $0xd94] sm:$0xf0]  ;;  %v10706_v40 = vor.u32 %v13738_v26, %v10705_v19 }
 0x12a   :  { %5280 = vmatpush.bf16.msra.mxu0 %v11506_v13  ;;  %5255 = vmatpush.bf16.msrb.mxu2 %v10826_v29  ;;  %v1099_v41 = vsel %vm1098_vm6, %v1091_v2, %v1097_v28  ;;  %v13988_v13 = vld [vmem:[#allocation7 + $0x12e4] sm:$0xf0]  ;;  %v14894_v21 = vld [vmem:[#allocation7 + $0xff0] sm:$0xf]  ;;  %v14896_v5 = vld [vmem:[#allocation7 + $0x1014] sm:$0xf0]  ;;  %v11026_v44 = vor.u32 %v13818_v15, %v14892_v3 }
 0x12b   :  { %5268 = vmatpush.bf16.msrb.mxu3 %v11146_v57  ;;  %v14890_v34 = vmul.f32 %v1099_v41, %v123_v17  ;;  %v14901_v32 = vld [vmem:[#allocation7 + $0x1270] sm:$0xf]  ;;  %v13978_v35 = vld [vmem:[#allocation7 + $0x1294] sm:$0xf0]  ;;  %v11706_v43 = vor.u32 %v13988_v13, %v11705_v60  ;;  %v11346_v45 = vor.u32 %v14896_v5, %v14894_v21  ;;  %v10985_v47 = vld [vmem:[#allocation7 + $0xd20] sm:$0xf] }
 0x12c   :  { %5294 = vmatpush.bf16.msra.mxu1 %v11786_v49  ;;  %v11666_v23 = vor.u32 %v13978_v35, %v14901_v32  ;;  %v10665_v49 = vld [vmem:[#allocation7 + $0xaa0] sm:$0xf]  ;;  %v13808_v2 = vld [vmem:[#allocation7 + $0xd44] sm:$0xf0]  ;;  %v10625_v19 = vld [vmem:[#allocation7 + $0xa50] sm:$0xf] }
 0x12d   :  { %v1104_v7 = vperm.slane %v14890_v34, 1  ;;  %v1105_v31 = vperm.slane %v14890_v34, 2  ;;  %v1106_v29 = vperm.slane %v14890_v34, 3  ;;  %v1107_v14 = vperm.slane %v14890_v34, 4  ;;  %v11305_v28 = vld [vmem:[#allocation7 + $0xfa0] sm:$0xf] }
 0x12e   :  { %5281 = vmatpush.bf16.msra.mxu0 %v11466_v39  ;;  %5256 = vmatpush.bf16.msrb.mxu2 %v10786_v53  ;;  %v1108_v51 = vperm.slane %v14890_v34, 5  ;;  %v1109_v50 = vperm.slane %v14890_v34, 6  ;;  %v1110_v61 = vperm.slane %v14890_v34, 7  ;;  %v1103_v57 = vperm.slane %v14890_v34, 0  ;;  %v13728_v53 = vld [vmem:[#allocation7 + $0xac4] sm:$0xf0] }
 0x12f   :  { %5269 = vmatpush.bf16.msrb.mxu3 %v11106_v52  ;;  %v11386_v39 = vor.u32 %v13908_v0, %v11385_v30  ;;  %v1128_v56 = vmul.f32 %v1104_v7, %v14530_v8  ;;  %v1129_v46 = vmul.f32 %v1105_v31, %v14562_v58  ;;  %v1130_v17 = vmul.f32 %v1106_v29, %v14574_v20  ;;  %v13888_v9 = vld [vmem:[#allocation7 + $0xfc4] sm:$0xf0]  ;;  %v124_v52 = vld [vmem:[#allocation10 + $0xc] sm:$0xff]  ;;  %v13798_v21 = vld [vmem:[#allocation7 + $0xcf4] sm:$0xf0] }
 0x130   :  { %5295 = vmatpush.bf16.msra.mxu1 %v11746_v27  ;;  %v1131_v48 = vmul.f32 %v1107_v14, %v14604_v4  ;;  %v1132_v8 = vmul.f32 %v1108_v51, %v14629_v38  ;;  %v1133_v58 = vmul.f32 %v1109_v50, %v14652_v25  ;;  %v1134_v20 = vmul.f32 %v1110_v61, %v14663_v42  ;;  %v11625_v38 = vld [vmem:[#allocation7 + $0x1220] sm:$0xf]  ;;  %v13968_v42 = vld [vmem:[#allocation7 + $0x1244] sm:$0xf0]  ;;  %v10945_v26 = vld [vmem:[#allocation7 + $0xcd0] sm:$0xf] }
 0x131   :  { %v1127_v4 = vmul.f32 %v1103_v57, %v14566_v62  ;;  %v1143_v16 = vrot.slane %v1128_v56, 7  ;;  %v1144_v24 = vrot.slane %v1129_v46, 6  ;;  %v1145_v41 = vrot.slane %v1130_v17, 5  ;;  %v13718_v62 = vld [vmem:[#allocation7 + $0xa74] sm:$0xf0] }
 0x132   :  { %5282 = vmatpush.bf16.msra.mxu0 %v11426_v22  ;;  %5257 = vmatpush.bf16.msrb.mxu2 %v10746_v55  ;;  %v1146_v22 = vrot.slane %v1131_v48, 4  ;;  %v1147_v25 = vrot.slane %v1132_v8, 3  ;;  %v1148_v54 = vrot.slane %v1133_v58, 2  ;;  %v1149_v30 = vrot.slane %v1134_v20, 1  ;;  %v11265_v5 = vld [vmem:[#allocation7 + $0xf50] sm:$0xf] }
 0x133   :  { %5270 = vmatpush.bf16.msrb.mxu3 %v11066_v33  ;;  %v1150_v0 = vsel %vm322_vm7, %v1127_v4, %v1143_v16  ;;  %v1151_v60 = vsel %vm1088_vm9, %v1144_v24, %v1145_v41  ;;  %v10666_v13 = vor.u32 %v13728_v53, %v10665_v49  ;;  %v10986_v15 = vor.u32 %v13808_v2, %v10985_v47  ;;  %v13878_v33 = vld [vmem:[#allocation7 + $0xf74] sm:$0xf0]  ;;  %v10585_v53 = vld [vmem:[#allocation7 + $0xa00] sm:$0xf]  ;;  %v13708_v47 = vld [vmem:[#allocation7 + $0xa24] sm:$0xf0] }
 0x134   :  { %5296 = vmatpush.bf16.msra.mxu1 %v11706_v43  ;;  %v1152_v3 = vsel %vm1090_vm0, %v1150_v0, %v1151_v60  ;;  %v1153_v27 = vsel %vm1092_vm12, %v1146_v22, %v1147_v25  ;;  %v1154_v55 = vsel %vm1094_vm14, %v1148_v54, %v1149_v30  ;;  %v11306_v35 = vor.u32 %v13888_v9, %v11305_v28  ;;  %v10905_v58 = vld [vmem:[#allocation7 + $0xc80] sm:$0xf]  ;;  %v13788_v20 = vld [vmem:[#allocation7 + $0xca4] sm:$0xf0]  ;;  %v13453_v41 = vld [vmem:[#allocation7 + $0x234] sm:$0xf] }
 0x135   :  { %v1155_v32 = vsel %vm1096_vm4, %v1153_v27, %v1154_v55  ;;  %v11626_v43 = vor.u32 %v13968_v42, %v11625_v38  ;;  %v10626_v46 = vor.u32 %v13718_v62, %v10625_v19  ;;  %v10946_v17 = vor.u32 %v13798_v21, %v10945_v26  ;;  %v11225_v2 = vld [vmem:[#allocation7 + $0xf00] sm:$0xf]  ;;  %v13948_v24 = vld [vmem:[#allocation7 + $0x11a4] sm:$0xf0]  ;;  %v9587_v22 = vld [vmem:[#allocation7 + $0x258] sm:$0xf0] }
 0x136   :  { %5283 = vmatpush.bf16.msra.mxu0 %v11386_v39  ;;  %5258 = vmatpush.bf16.msrb.mxu2 %v10706_v40  ;;  %v1156_v39 = vsel %vm1098_vm6, %v1152_v3, %v1155_v32  ;;  %v11585_v40 = vld [vmem:[#allocation7 + $0x11d0] sm:$0xf]  ;;  %v11266_v49 = vor.u32 %v13878_v33, %v11265_v5  ;;  %v1119_v48 = vmul.f32 %v1103_v57, %v14498_v11  ;;  %v11545_v16 = vld [vmem:[#allocation7 + $0x1180] sm:$0xf]  ;;  %v13533_v25 = vld [vmem:[#allocation7 + $0x4b4] sm:$0xf] }
 0x137   :  { %5271 = vmatpush.bf16.msrb.mxu3 %v11026_v44  ;;  %v14943_v56 = vsub.f32 %v124_v52, %v1156_v39  ;;  %v13958_v44 = vld [vmem:[#allocation7 + $0x11f4] sm:$0xf0]  ;;  %v1122_v8 = vmul.f32 %v1106_v29, %v14527_v6  ;;  %v10906_v38 = vor.u32 %v13788_v20, %v10905_v58  ;;  %v9907_v54 = vld [vmem:[#allocation7 + $0x4d8] sm:$0xf0]  ;;  %v11546_v19 = vor.u32 %v13948_v24, %v11545_v16  ;;  %v13693_v26 = vld [vmem:[#allocation7 + $0x9b4] sm:$0xf] }
 0x138   :  { %5297 = vmatpush.bf16.msra.mxu1 %v11666_v23  ;;  %v1121_v23 = vmul.f32 %v1105_v31, %v14524_v1  ;;  %v11586_v1 = vor.u32 %v13958_v44, %v11585_v40  ;;  %v10586_v31 = vor.u32 %v13708_v47, %v10585_v53  ;;  %v10227_v62 = vld [vmem:[#allocation7 + $0x758] sm:$0xf0]  ;;  %v9590_v5 = vor.u32 %v13453_v41, %v9587_v22  ;;  %v13443_v32 = vld [vmem:[#allocation7 + $0x1e4] sm:$0xf]  ;;  %v10507_v53 = vld [vmem:[#allocation7 + $0x988] sm:$0xf0] }
 0x139   :  { %v1160_v28 = vperm.slane %v14943_v56, 0  ;;  %v1161_v11 = vperm.slane %v14943_v56, 1  ;;  %v1162_v57 = vperm.slane %v14943_v56, 2  ;;  %v10547_v3 = vld [vmem:[#allocation7 + $0x9d8] sm:$0xf0]  ;;  %v9910_v33 = vor.u32 %v13533_v25, %v9907_v54 }
 0x13a   :  { %5284 = vmatpush.bf16.msra.mxu0 %v11346_v45  ;;  %5259 = vmatpush.bf16.msrb.mxu2 %v10666_v13  ;;  %v1120_v45 = vmul.f32 %v1104_v7, %v14502_v18  ;;  %v1163_v18 = vperm.slane %v14943_v56, 3  ;;  %v13868_v7 = vld [vmem:[#allocation7 + $0xf24] sm:$0xf0]  ;;  %v13613_v13 = vld [vmem:[#allocation7 + $0x734] sm:$0xf] }
 0x13b   :  { %5272 = vmatpush.bf16.msrb.mxu3 %v10986_v15  ;;  %v1176_v9 = vadd.f32 %v1160_v28, %v1119_v48  ;;  %v1178_v6 = vadd.f32 %v1162_v57, %v1121_v23  ;;  %v11226_v52 = vor.u32 %v13868_v7, %v11225_v2  ;;  %v10230_v39 = vor.u32 %v13613_v13, %v10227_v62  ;;  %v13523_v40 = vld [vmem:[#allocation7 + $0x464] sm:$0xf]  ;;  %v13433_v47 = vld [vmem:[#allocation7 + $0x194] sm:$0xf]  ;;  %v9507_v48 = vld [vmem:[#allocation7 + $0x1b8] sm:$0xf0] }
 0x13c   :  { %5298 = vmatpush.bf16.msra.mxu1 %v11626_v43  ;;  %v1177_v4 = vadd.f32 %v1161_v11, %v1120_v45  ;;  %v1179_v29 = vadd.f32 %v1163_v18, %v1122_v8  ;;  %v10550_v43 = vor.u32 %v13693_v26, %v10547_v3  ;;  %v13683_v44 = vld [vmem:[#allocation7 + $0x964] sm:$0xf]  ;;  %v1164_v45 = vperm.slane %v14943_v56, 4  ;;  %v13513_v20 = vld [vmem:[#allocation7 + $0x414] sm:$0xf] }
 0x13d   :  { %v1184_v30 = vmax.f32 %v1176_v9, 0.0  ;;  %v1186_v0 = vmax.f32 %v1178_v6, 0.0  ;;  %v1165_v23 = vperm.slane %v14943_v56, 5  ;;  %v9827_v2 = vld [vmem:[#allocation7 + $0x438] sm:$0xf0]  ;;  %v1166_v28 = vperm.slane %v14943_v56, 6 }
 0x13e   :  { %5285 = vmatpush.bf16.msra.mxu0 %v11306_v35  ;;  %5260 = vmatpush.bf16.msrb.mxu2 %v10626_v46  ;;  %v1185_v42 = vmax.f32 %v1177_v4, 0.0  ;;  %v1187_v60 = vmax.f32 %v1179_v29, 0.0  ;;  %v9547_v35 = vld [vmem:[#allocation7 + $0x208] sm:$0xf0]  ;;  %v1167_v11 = vperm.slane %v14943_v56, 7  ;;  %v10510_v18 = vor.u32 %v13683_v44, %v10507_v53 }
 0x13f   :  { %5273 = vmatpush.bf16.msrb.mxu3 %v10946_v17  ;;  %v14961_v27 = vpack.c.bf16 %v1184_v30, %v1184_v30  ;;  %v14965_v15 = vpack.c.bf16 %v1186_v0, %v1186_v0  ;;  %v9867_v46 = vld [vmem:[#allocation7 + $0x488] sm:$0xf0]  ;;  %v13603_v17 = vld [vmem:[#allocation7 + $0x6e4] sm:$0xf]  ;;  %v9550_v8 = vor.u32 %v13443_v32, %v9547_v35  ;;  %v13593_v7 = vld [vmem:[#allocation7 + $0x694] sm:$0xf]  ;;  %v1124_v9 = vmul.f32 %v1108_v51, %v14549_v37 }
 0x140   :  { %5299 = vmatpush.bf16.msra.mxu1 %v11586_v1  ;;  %v14963_v55 = vpack.c.bf16 %v1185_v42, %v1185_v42  ;;  %v14967_v21 = vpack.c.bf16 %v1187_v60, %v1187_v60  ;;  %v9870_v58 = vor.u32 %v13523_v40, %v9867_v46  ;;  %v10147_v1 = vld [vmem:[#allocation7 + $0x6b8] sm:$0xf0]  ;;  %v13673_v4 = vld [vmem:[#allocation7 + $0x914] sm:$0xf]  ;;  %v1125_v56 = vmul.f32 %v1109_v50, %v14608_v10  ;;  %v13503_v25 = vld [vmem:[#allocation7 + $0x3c4] sm:$0xf] }
 0x141   :  { %5210 = vmatmul.bf16.vlgmr.msra.gmra.mxu2 %v14961_v27  ;;  %5236 = vmatmul.bf16.vlgmr.msrb.gmra.mxu0 %v14965_v15  ;;  %v10467_v6 = vld [vmem:[#allocation7 + $0x938] sm:$0xf0]  ;;  %v1126_v29 = vmul.f32 %v1110_v61, %v14610_v12  ;;  %v9510_v16 = vor.u32 %v13433_v47, %v9507_v48  ;;  %v9830_v24 = vor.u32 %v13513_v20, %v9827_v2  ;;  %v9787_v10 = vld [vmem:[#allocation7 + $0x3e8] sm:$0xf0]  ;;  %v13583_v50 = vld [vmem:[#allocation7 + $0x644] sm:$0xf] }
 0x142   :  { %5286 = vmatpush.bf16.msra.mxu0 %v11266_v49  ;;  %5261 = vmatpush.bf16.msrb.mxu2 %v10586_v31  ;;  %v10187_v49 = vld [vmem:[#allocation7 + $0x708] sm:$0xf0]  ;;  %v1123_v31 = vmul.f32 %v1107_v14, %v14547_v36  ;;  %v10150_v36 = vor.u32 %v13593_v7, %v10147_v1  ;;  %v13423_v14 = vld [vmem:[#allocation7 + $0x144] sm:$0xf]  ;;  %v1182_v37 = vadd.f32 %v1166_v28, %v1125_v56  ;;  %v13413_v61 = vld [vmem:[#allocation7 + $0xf4] sm:$0xf] }
 0x143   :  { %5274 = vmatpush.bf16.msrb.mxu3 %v10906_v38  ;;  %5249 = vmatmul.bf16.vlgmr.msrb.gmra.mxu1 %v14967_v21  ;;  %v10190_v57 = vor.u32 %v13603_v17, %v10187_v49  ;;  %v1181_v38 = vadd.f32 %v1165_v23, %v1124_v9  ;;  %v1183_v51 = vadd.f32 %v1167_v11, %v1126_v29  ;;  %v10107_v54 = vld [vmem:[#allocation7 + $0x668] sm:$0xf0]  ;;  %v13663_v34 = vld [vmem:[#allocation7 + $0x8c4] sm:$0xf]  ;;  %v9427_v30 = vld [vmem:[#allocation7 + $0x118] sm:$0xf0] }
 0x144   :  { %5300 = vmatpush.bf16.msra.mxu1 %v11546_v19  ;;  %5223 = vmatmul.bf16.vlgmr.msra.gmra.mxu3 %v14963_v55  ;;  %v1180_v41 = vadd.f32 %v1164_v45, %v1123_v31  ;;  %v10470_v22 = vor.u32 %v13673_v4, %v10467_v6  ;;  %v10427_v12 = vld [vmem:[#allocation7 + $0x8e8] sm:$0xf0]  ;;  %v9790_v13 = vor.u32 %v13503_v25, %v9787_v10  ;;  %v13493_v19 = vld [vmem:[#allocation7 + $0x374] sm:$0xf]  ;;  %v9747_v62 = vld [vmem:[#allocation7 + $0x398] sm:$0xf0] }
 0x145   :  { %v1189_v0 = vmax.f32 %v1181_v38, 0.0  ;;  %v1190_v26 = vmax.f32 %v1182_v37, 0.0  ;;  %v1191_v3 = vmax.f32 %v1183_v51, 0.0  ;;  %v13573_v32 = vld [vmem:[#allocation7 + $0x5f4] sm:$0xf]  ;;  %v9430_v40 = vor.u32 %v13413_v61, %v9427_v30 }
 0x146   :  { %5287 = vmatpush.bf16.msra.mxu0 %v11226_v52  ;;  %5306 = vmatpush.bf16.msra.mxu2 %v9590_v5  ;;  %v9467_v52 = vld [vmem:[#allocation7 + $0x168] sm:$0xf0]  ;;  %v1188_v42 = vmax.f32 %v1180_v41, 0.0  ;;  %v10110_v5 = vor.u32 %v13583_v50, %v10107_v54  ;;  %v10067_v35 = vld [vmem:[#allocation7 + $0x618] sm:$0xf0]  ;;  %v9750_v46 = vor.u32 %v13493_v19, %v9747_v62 }
 0x147   :  { %5319 = vmatpush.bf16.msra.mxu3 %v9910_v33  ;;  %v9470_v60 = vor.u32 %v13423_v14, %v9467_v52  ;;  %v10430_v33 = vor.u32 %v13663_v34, %v10427_v12  ;;  %v14991_v49 = vpack.c.bf16 %v1189_v0, %v1189_v0  ;;  %v10070_v44 = vor.u32 %v13573_v32, %v10067_v35  ;;  %v13403_v53 = vld [vmem:[#allocation7 + $0xa4] sm:$0xf]  ;;  %v9387_v47 = vld [vmem:[#allocation7 + $0xc8] sm:$0xf0]  ;;  %v13393_v7 = vld [vmem:[#allocation7 + $0x54] sm:$0xf] }
 0x148   :  { %5345 = vmatpush.bf16.msrb.mxu1 %v10550_v43  ;;  %v10387_v43 = vld [vmem:[#allocation7 + $0x898] sm:$0xf0]  ;;  %v14989_v17 = vpack.c.bf16 %v1188_v42, %v1188_v42  ;;  %v14993_v48 = vpack.c.bf16 %v1190_v26, %v1190_v26  ;;  %v14995_v45 = vpack.c.bf16 %v1191_v3, %v1191_v3  ;;  %v13563_v20 = vld [vmem:[#allocation7 + $0x5a4] sm:$0xf]  ;;  %v10027_v2 = vld [vmem:[#allocation7 + $0x5c8] sm:$0xf0] }
 0x149   :  { %v13643_v28 = vld [vmem:[#allocation7 + $0x824] sm:$0xf]  ;;  %v10347_v11 = vld [vmem:[#allocation7 + $0x848] sm:$0xf0]  ;;  %v9347_v1 = vld [vmem:[#allocation7 + $0x78] sm:$0xf0]  ;;  %v10030_v31 = vor.u32 %v13563_v20, %v10027_v2 }
 0x14a   :  { %5332 = vmatpush.bf16.msrb.mxu0 %v10230_v39  ;;  %5307 = vmatpush.bf16.msra.mxu2 %v9550_v8  ;;  %v13653_v39 = vld [vmem:[#allocation7 + $0x874] sm:$0xf]  ;;  %v13483_v8 = vld [vmem:[#allocation7 + $0x324] sm:$0xf]  ;;  %v10350_v9 = vor.u32 %v13643_v28, %v10347_v11  ;;  %v9667_v6 = vld [vmem:[#allocation7 + $0x2f8] sm:$0xf0]  ;;  %v9350_v38 = vor.u32 %v13393_v7, %v9347_v1 }
 0x14b   :  { %5320 = vmatpush.bf16.msra.mxu3 %v9870_v58  ;;  %v10390_v23 = vor.u32 %v13653_v39, %v10387_v43  ;;  %v9707_v58 = vld [vmem:[#allocation7 + $0x348] sm:$0xf0]  ;;  %v13473_v4 = vld [vmem:[#allocation7 + $0x2d4] sm:$0xf]  ;;  %v9987_v29 = vld [vmem:[#allocation7 + $0x578] sm:$0xf0] }
 0x14c   :  { %5346 = vmatpush.bf16.msrb.mxu1 %v10510_v18  ;;  %v9710_v18 = vor.u32 %v13483_v8, %v9707_v58  ;;  %v13553_v56 = vld [vmem:[#allocation7 + $0x554] sm:$0xf]  ;;  %v13383_v41 = vld [vmem:[#allocation7 + $0x4] sm:$0xf]  ;;  %v9307_v14 = vld [vmem:[#allocation7 + $0x28] sm:$0xf0] }
 0x14d   :  { %v13463_v52 = vld [vmem:[#allocation7 + $0x284] sm:$0xf]  ;;  %v9627_v37 = vld [vmem:[#allocation7 + $0x2a8] sm:$0xf0]  ;;  %v9990_v51 = vor.u32 %v13553_v56, %v9987_v29  ;;  %v13773_v34 = vld [vmem:[#allocation7 + $0xc34] sm:$0xf]  ;;  %v9310_v0 = vor.u32 %v13383_v41, %v9307_v14 }
 0x14e   :  { %5333 = vmatpush.bf16.msrb.mxu0 %v10190_v57  ;;  %5308 = vmatpush.bf16.msra.mxu2 %v9510_v16  ;;  %v9390_v57 = vor.u32 %v13403_v53, %v9387_v47  ;;  %v13633_v16 = vld [vmem:[#allocation7 + $0x7d4] sm:$0xf]  ;;  %v13543_v25 = vld [vmem:[#allocation7 + $0x504] sm:$0xf]  ;;  %v9947_v10 = vld [vmem:[#allocation7 + $0x528] sm:$0xf0] }
 0x14f   :  { %5321 = vmatpush.bf16.msra.mxu3 %v9830_v24  ;;  %v10307_v24 = vld [vmem:[#allocation7 + $0x7f8] sm:$0xf0]  ;;  %v13623_v50 = vld [vmem:[#allocation7 + $0x784] sm:$0xf]  ;;  %v10267_v54 = vld [vmem:[#allocation7 + $0x7a8] sm:$0xf0]  ;;  %v9950_v26 = vor.u32 %v13543_v25, %v9947_v10 }
 0x150   :  { %5347 = vmatpush.bf16.msrb.mxu1 %v10470_v22  ;;  %v10310_v22 = vor.u32 %v13633_v16, %v10307_v24  ;;  %v10867_v12 = vld [vmem:[#allocation7 + $0xc58] sm:$0xf0]  ;;  %v13853_v61 = vld [vmem:[#allocation7 + $0xeb4] sm:$0xf]  ;;  %v10270_v3 = vor.u32 %v13623_v50, %v10267_v54  ;;  %v13763_v32 = vld [vmem:[#allocation7 + $0xbe4] sm:$0xf] }
 0x151   :  { %5262 = vmatmul.bf16.vlgmr.msrb.gmra.mxu2 %v14989_v17  ;;  %5288 = vmatmul.bf16.vlgmr.msra.gmra.mxu0 %v14993_v48  ;;  %v11187_v30 = vld [vmem:[#allocation7 + $0xed8] sm:$0xf0]  ;;  %v13933_v42 = vld [vmem:[#allocation7 + $0x1134] sm:$0xf]  ;;  %v10827_v35 = vld [vmem:[#allocation7 + $0xc08] sm:$0xf0] }
 0x152   :  { %5334 = vmatpush.bf16.msrb.mxu0 %v10150_v36  ;;  %5309 = vmatpush.bf16.msra.mxu2 %v9470_v60  ;;  %v9670_v36 = vor.u32 %v13473_v4, %v9667_v6  ;;  %v9630_v60 = vor.u32 %v13463_v52, %v9627_v37  ;;  %v14013_v19 = vld [vmem:[#allocation7 + $0x13b4] sm:$0xf]  ;;  %v11827_v62 = vld [vmem:[#allocation7 + $0x13d8] sm:$0xf0]  ;;  %v11467_v53 = vld [vmem:[#allocation7 + $0x1108] sm:$0xf0]  ;;  %v10830_v8 = vor.u32 %v13763_v32, %v10827_v35 }
 0x153   :  { %5322 = vmatpush.bf16.msra.mxu3 %v9790_v13  ;;  %5301 = vmatmul.bf16.vlgmr.msra.gmra.mxu1 %v14995_v45  ;;  %v11507_v13 = vld [vmem:[#allocation7 + $0x1158] sm:$0xf0]  ;;  %v11830_v43 = vor.u32 %v14013_v19, %v11827_v62  ;;  %v14003_v47 = vld [vmem:[#allocation7 + $0x1364] sm:$0xf]  ;;  %v13753_v20 = vld [vmem:[#allocation7 + $0xb94] sm:$0xf] }
 0x154   :  { %5348 = vmatpush.bf16.msrb.mxu1 %v10430_v33  ;;  %5275 = vmatmul.bf16.vlgmr.msrb.gmra.mxu3 %v14991_v49  ;;  %v11190_v33 = vor.u32 %v13853_v61, %v11187_v30  ;;  %v11510_v39 = vor.u32 %v13933_v42, %v11507_v13  ;;  %v10787_v2 = vld [vmem:[#allocation7 + $0xbb8] sm:$0xf0]  ;;  %v13913_v7 = vld [vmem:[#allocation7 + $0x1094] sm:$0xf]  ;;  %v13743_v56 = vld [vmem:[#allocation7 + $0xb44] sm:$0xf] }
 0x155   :  { %v11427_v1 = vld [vmem:[#allocation7 + $0x10b8] sm:$0xf0]  ;;  %v10790_v4 = vor.u32 %v13753_v20, %v10787_v2  ;;  %v10747_v29 = vld [vmem:[#allocation7 + $0xb68] sm:$0xf0]  ;;  %v13823_v41 = vld [vmem:[#allocation7 + $0xdc4] sm:$0xf] }
 0x156   :  { %5335 = vmatpush.bf16.msrb.mxu0 %v10110_v5  ;;  %5310 = vmatpush.bf16.msra.mxu2 %v9430_v40  ;;  %v10870_v5 = vor.u32 %v13773_v34, %v10867_v12  ;;  %v13843_v40 = vld [vmem:[#allocation7 + $0xe64] sm:$0xf]  ;;  %v11430_v16 = vor.u32 %v13913_v7, %v11427_v1  ;;  %v11387_v14 = vld [vmem:[#allocation7 + $0x1068] sm:$0xf0]  ;;  %v13733_v25 = vld [vmem:[#allocation7 + $0xaf4] sm:$0xf] }
 0x157   :  { %5323 = vmatpush.bf16.msra.mxu3 %v9750_v46  ;;  %v11147_v46 = vld [vmem:[#allocation7 + $0xe88] sm:$0xf0]  ;;  %v13983_v52 = vld [vmem:[#allocation7 + $0x12c4] sm:$0xf]  ;;  %v10707_v10 = vld [vmem:[#allocation7 + $0xb18] sm:$0xf0] }
 0x158   :  { %5349 = vmatpush.bf16.msrb.mxu1 %v10390_v23  ;;  %v11787_v23 = vld [vmem:[#allocation7 + $0x1388] sm:$0xf0]  ;;  %v11150_v58 = vor.u32 %v13843_v40, %v11147_v46  ;;  %v13813_v34 = vld [vmem:[#allocation7 + $0xd74] sm:$0xf]  ;;  %v11027_v12 = vld [vmem:[#allocation7 + $0xd98] sm:$0xf0] }
 0x159   :  { %v11790_v11 = vor.u32 %v14003_v47, %v11787_v23  ;;  %v11707_v37 = vld [vmem:[#allocation7 + $0x12e8] sm:$0xf0]  ;;  %v13893_v61 = vld [vmem:[#allocation7 + $0xff4] sm:$0xf]  ;;  %v11347_v30 = vld [vmem:[#allocation7 + $0x1018] sm:$0xf0]  ;;  %v11030_v13 = vor.u32 %v13813_v34, %v11027_v12 }
 0x15a   :  { %5336 = vmatpush.bf16.msrb.mxu0 %v10070_v44  ;;  %5311 = vmatpush.bf16.msra.mxu2 %v9390_v57  ;;  %v13923_v44 = vld [vmem:[#allocation7 + $0x10e4] sm:$0xf]  ;;  %v13833_v57 = vld [vmem:[#allocation7 + $0xe14] sm:$0xf]  ;;  %v11710_v54 = vor.u32 %v13983_v52, %v11707_v37  ;;  %v10667_v62 = vld [vmem:[#allocation7 + $0xac8] sm:$0xf0] }
 0x15b   :  { %5324 = vmatpush.bf16.msra.mxu3 %v9710_v18  ;;  %v11470_v28 = vor.u32 %v13923_v44, %v11467_v53  ;;  %v11107_v18 = vld [vmem:[#allocation7 + $0xe38] sm:$0xf0]  ;;  %v13973_v42 = vld [vmem:[#allocation7 + $0x1274] sm:$0xf]  ;;  %v13723_v19 = vld [vmem:[#allocation7 + $0xaa4] sm:$0xf] }
 0x15c   :  { %5350 = vmatpush.bf16.msrb.mxu1 %v10350_v9  ;;  %v11747_v9 = vld [vmem:[#allocation7 + $0x1338] sm:$0xf0]  ;;  %v11110_v6 = vor.u32 %v13833_v57, %v11107_v18  ;;  %v13883_v32 = vld [vmem:[#allocation7 + $0xfa4] sm:$0xf]  ;;  %v11307_v35 = vld [vmem:[#allocation7 + $0xfc8] sm:$0xf0]  ;;  %v10670_v40 = vor.u32 %v13723_v19, %v10667_v62 }
 0x15d   :  { %v13713_v44 = vld [vmem:[#allocation7 + $0xa54] sm:$0xf]  ;;  %v10627_v53 = vld [vmem:[#allocation7 + $0xa78] sm:$0xf0]  ;;  %v11310_v47 = vor.u32 %v13883_v32, %v11307_v35  ;;  %v13703_v57 = vld [vmem:[#allocation7 + $0xa04] sm:$0xf] }
 0x15e   :  { %5337 = vmatpush.bf16.msrb.mxu0 %v10030_v31  ;;  %5312 = vmatpush.bf16.msra.mxu2 %v9350_v38  ;;  %v13993_v31 = vld [vmem:[#allocation7 + $0x1314] sm:$0xf]  ;;  %v11067_v38 = vld [vmem:[#allocation7 + $0xde8] sm:$0xf0]  ;;  %v11267_v2 = vld [vmem:[#allocation7 + $0xf78] sm:$0xf0]  ;;  %v10630_v18 = vor.u32 %v13713_v44, %v10627_v53 }
 0x15f   :  { %5325 = vmatpush.bf16.msra.mxu3 %v9670_v36  ;;  %v11750_v24 = vor.u32 %v13993_v31, %v11747_v9  ;;  %v13903_v36 = vld [vmem:[#allocation7 + $0x1044] sm:$0xf]  ;;  %v13873_v20 = vld [vmem:[#allocation7 + $0xf54] sm:$0xf]  ;;  %v10587_v1 = vld [vmem:[#allocation7 + $0xa28] sm:$0xf0] }
 0x160   :  { %5351 = vmatpush.bf16.msrb.mxu1 %v10310_v22  ;;  %v11070_v22 = vor.u32 %v13823_v41, %v11067_v38  ;;  %v11390_v50 = vor.u32 %v13903_v36, %v11387_v14  ;;  %v13783_v31 = vld [vmem:[#allocation7 + $0xc84] sm:$0xf]  ;;  %v10907_v9 = vld [vmem:[#allocation7 + $0xca8] sm:$0xf0]  ;;  %v9593_v41 = vld [vmem:[#allocation7 + $0x238] sm:$0xf]  ;;  %v10590_v37 = vor.u32 %v13703_v57, %v10587_v1 }
 0x161   :  { %v13459_v38 = vld [vmem:[#allocation7 + $0x25c] sm:$0xf0]  ;;  %v9913_v36 = vld [vmem:[#allocation7 + $0x4b8] sm:$0xf]  ;;  %v10193_v19 = vld [vmem:[#allocation7 + $0x6e8] sm:$0xf] }
 0x162   :  { %5338 = vmatpush.bf16.msrb.mxu0 %v9990_v51  ;;  %5313 = vmatpush.bf16.msra.mxu2 %v9310_v0  ;;  %v10750_v51 = vor.u32 %v13743_v56, %v10747_v29  ;;  %v11667_v0 = vld [vmem:[#allocation7 + $0x1298] sm:$0xf0]  ;;  %v13863_v56 = vld [vmem:[#allocation7 + $0xf04] sm:$0xf]  ;;  %v11227_v29 = vld [vmem:[#allocation7 + $0xf28] sm:$0xf0]  ;;  %v9594_v34 = vor.u32 %v13459_v38, %v9593_v41 }
 0x163   :  { %5326 = vmatpush.bf16.msra.mxu3 %v9630_v60  ;;  %v10710_v60 = vor.u32 %v13733_v25, %v10707_v10  ;;  %v13539_v14 = vld [vmem:[#allocation7 + $0x4dc] sm:$0xf0]  ;;  %v10233_v52 = vld [vmem:[#allocation7 + $0x738] sm:$0xf]  ;;  %v13609_v62 = vld [vmem:[#allocation7 + $0x70c] sm:$0xf0] }
 0x164   :  { %5352 = vmatpush.bf16.msrb.mxu1 %v10270_v3  ;;  %v11670_v3 = vor.u32 %v13973_v42, %v11667_v0  ;;  %v10553_v25 = vld [vmem:[#allocation7 + $0x9b8] sm:$0xf]  ;;  %v13699_v10 = vld [vmem:[#allocation7 + $0x9dc] sm:$0xf0]  ;;  %v9914_v12 = vor.u32 %v13539_v14, %v9913_v36  ;;  %v9793_v57 = vld [vmem:[#allocation7 + $0x3c8] sm:$0xf] }
 0x165   :  { %5314 = vmatmul.bf16.vlgmr.msra.gmra.mxu2 %v14961_v27  ;;  %v10554_v0 = vor.u32 %v13699_v10, %v10553_v25  ;;  %v9513_v32 = vld [vmem:[#allocation7 + $0x198] sm:$0xf]  ;;  %v13439_v35 = vld [vmem:[#allocation7 + $0x1bc] sm:$0xf0]  ;;  %v13589_v1 = vld [vmem:[#allocation7 + $0x66c] sm:$0xf0] }
 0x166   :  { %5339 = vmatpush.bf16.msrb.mxu0 %v9950_v26  ;;  %5358 = vmatpush.bf16.msrb.mxu2 %v10870_v5  ;;  %v11350_v26 = vor.u32 %v13893_v61, %v11347_v30  ;;  %v13803_v5 = vld [vmem:[#allocation7 + $0xd24] sm:$0xf]  ;;  %v9553_v61 = vld [vmem:[#allocation7 + $0x1e8] sm:$0xf]  ;;  %v13449_v30 = vld [vmem:[#allocation7 + $0x20c] sm:$0xf0] }
 0x167   :  { %5371 = vmatpush.bf16.msrb.mxu3 %v11190_v33  ;;  %5353 = vmatmul.bf16.vlgmr.msrb.gmra.mxu1 %v14967_v21  ;;  %v10987_v33 = vld [vmem:[#allocation7 + $0xd48] sm:$0xf0]  ;;  %v10153_v44 = vld [vmem:[#allocation7 + $0x698] sm:$0xf]  ;;  %v13599_v53 = vld [vmem:[#allocation7 + $0x6bc] sm:$0xf0] }
 0x168   :  { %5397 = vmatpush.bf16.msra.mxu1 %v11830_v43  ;;  %5327 = vmatmul.bf16.vlgmr.msra.gmra.mxu3 %v14963_v55  ;;  %v11627_v43 = vld [vmem:[#allocation7 + $0x1248] sm:$0xf0]  ;;  %v10990_v46 = vor.u32 %v13803_v5, %v10987_v33  ;;  %v9554_v5 = vor.u32 %v13449_v30, %v9553_v61  ;;  %v9753_v41 = vld [vmem:[#allocation7 + $0x378] sm:$0xf]  ;;  %v13499_v38 = vld [vmem:[#allocation7 + $0x39c] sm:$0xf0] }
 0x169   :  { %5340 = vmatmul.bf16.vlgmr.msrb.gmra.mxu0 %v14965_v15  ;;  %v10073_v36 = vld [vmem:[#allocation7 + $0x5f8] sm:$0xf]  ;;  %v13579_v14 = vld [vmem:[#allocation7 + $0x61c] sm:$0xf0]  ;;  %v9393_v25 = vld [vmem:[#allocation7 + $0xa8] sm:$0xf] }
 0x16a   :  { %5384 = vmatpush.bf16.msra.mxu0 %v11510_v39  ;;  %5359 = vmatpush.bf16.msrb.mxu2 %v10830_v8  ;;  %v13963_v39 = vld [vmem:[#allocation7 + $0x1224] sm:$0xf]  ;;  %v13793_v8 = vld [vmem:[#allocation7 + $0xcd4] sm:$0xf]  ;;  %v13409_v10 = vld [vmem:[#allocation7 + $0xcc] sm:$0xf0] }
 0x16b   :  { %5372 = vmatpush.bf16.msrb.mxu3 %v11150_v58  ;;  %v11630_v23 = vor.u32 %v13963_v39, %v11627_v43  ;;  %v10947_v58 = vld [vmem:[#allocation7 + $0xcf8] sm:$0xf0]  ;;  %v10194_v39 = vor.u32 %v13609_v62, %v10193_v19  ;;  %v10033_v61 = vld [vmem:[#allocation7 + $0x5a8] sm:$0xf]  ;;  %v13569_v30 = vld [vmem:[#allocation7 + $0x5cc] sm:$0xf0] }
 0x16c   :  { %5398 = vmatpush.bf16.msra.mxu1 %v11790_v11  ;;  %v11587_v11 = vld [vmem:[#allocation7 + $0x11f8] sm:$0xf0]  ;;  %v10950_v7 = vor.u32 %v13793_v8, %v10947_v58  ;;  %v9514_v8 = vor.u32 %v13439_v35, %v9513_v32  ;;  %v9353_v19 = vld [vmem:[#allocation7 + $0x58] sm:$0xf]  ;;  %v13399_v62 = vld [vmem:[#allocation7 + $0x7c] sm:$0xf0] }
 0x16d   :  { %v9993_v32 = vld [vmem:[#allocation7 + $0x558] sm:$0xf]  ;;  %v13559_v35 = vld [vmem:[#allocation7 + $0x57c] sm:$0xf0] }
 0x16e   :  { %5385 = vmatpush.bf16.msra.mxu0 %v11470_v28  ;;  %5360 = vmatpush.bf16.msrb.mxu2 %v10790_v4  ;;  %v13953_v28 = vld [vmem:[#allocation7 + $0x11d4] sm:$0xf]  ;;  %v11270_v4 = vor.u32 %v13873_v20, %v11267_v2  ;;  %v9473_v20 = vld [vmem:[#allocation7 + $0x148] sm:$0xf]  ;;  %v13429_v2 = vld [vmem:[#allocation7 + $0x16c] sm:$0xf0] }
 0x16f   :  { %5373 = vmatpush.bf16.msrb.mxu3 %v11110_v6  ;;  %v11590_v6 = vor.u32 %v13953_v28, %v11587_v11  ;;  %v10154_v28 = vor.u32 %v13599_v53, %v10153_v44  ;;  %v13389_v53 = vld [vmem:[#allocation7 + $0x2c] sm:$0xf0] }
 0x170   :  { %5399 = vmatpush.bf16.msra.mxu1 %v11750_v24  ;;  %v11547_v24 = vld [vmem:[#allocation7 + $0x11a8] sm:$0xf0] }
 0x172   :  { %5386 = vmatpush.bf16.msra.mxu0 %v11430_v16  ;;  %5361 = vmatpush.bf16.msrb.mxu2 %v10750_v51  ;;  %v13943_v16 = vld [vmem:[#allocation7 + $0x1184] sm:$0xf]  ;;  %v10910_v51 = vor.u32 %v13783_v31, %v10907_v9  ;;  %v10433_v31 = vld [vmem:[#allocation7 + $0x8c8] sm:$0xf]  ;;  %v13669_v9 = vld [vmem:[#allocation7 + $0x8ec] sm:$0xf0] }
 0x173   :  { %5374 = vmatpush.bf16.msrb.mxu3 %v11070_v22  ;;  %v13619_v22 = vld [vmem:[#allocation7 + $0x75c] sm:$0xf0] }
 0x174   :  { %5400 = vmatpush.bf16.msra.mxu1 %v11710_v54  ;;  %v11550_v54 = vor.u32 %v13943_v16, %v11547_v24  ;;  %v10234_v42 = vor.u32 %v13619_v22, %v10233_v52  ;;  %v10434_v24 = vor.u32 %v13669_v9, %v10433_v31  ;;  %v10393_v52 = vld [vmem:[#allocation7 + $0x878] sm:$0xf]  ;;  %v9754_v22 = vor.u32 %v13499_v38, %v9753_v41 }
 0x175   :  { %v11513_v31 = vld [vmem:[#allocation7 + $0x1138] sm:$0xf] }
 0x176   :  { %5387 = vmatpush.bf16.msra.mxu0 %v11390_v50  ;;  %5362 = vmatpush.bf16.msrb.mxu2 %v10710_v60  ;;  %v11230_v50 = vor.u32 %v13863_v56, %v11227_v29  ;;  %v9873_v60 = vld [vmem:[#allocation7 + $0x468] sm:$0xf]  ;;  %v9433_v56 = vld [vmem:[#allocation7 + $0xf8] sm:$0xf]  ;;  %v13419_v29 = vld [vmem:[#allocation7 + $0x11c] sm:$0xf0] }
 0x177   :  { %5375 = vmatpush.bf16.msrb.mxu3 %v11030_v13  ;;  %v13529_v13 = vld [vmem:[#allocation7 + $0x48c] sm:$0xf0] }
 0x178   :  { %5401 = vmatpush.bf16.msra.mxu1 %v11670_v3  ;;  %v13689_v3 = vld [vmem:[#allocation7 + $0x98c] sm:$0xf0]  ;;  %v9874_v33 = vor.u32 %v13529_v13, %v9873_v60  ;;  %v9394_v60 = vor.u32 %v13409_v10, %v9393_v25  ;;  %v11473_v25 = vld [vmem:[#allocation7 + $0x10e8] sm:$0xf] }
 0x179   :  { %v13929_v10 = vld [vmem:[#allocation7 + $0x110c] sm:$0xf0] }
 0x17a   :  { %5388 = vmatpush.bf16.msra.mxu0 %v11350_v26  ;;  %5363 = vmatpush.bf16.msrb.mxu2 %v10670_v40  ;;  %v10513_v26 = vld [vmem:[#allocation7 + $0x968] sm:$0xf]  ;;  %v9833_v40 = vld [vmem:[#allocation7 + $0x418] sm:$0xf] }
 0x17b   :  { %5376 = vmatpush.bf16.msrb.mxu3 %v10990_v46  ;;  %v10514_v43 = vor.u32 %v13689_v3, %v10513_v26  ;;  %v13519_v46 = vld [vmem:[#allocation7 + $0x43c] sm:$0xf0]  ;;  %v10034_v26 = vor.u32 %v13569_v30, %v10033_v61  ;;  %v10793_v61 = vld [vmem:[#allocation7 + $0xb98] sm:$0xf] }
 0x17c   :  { %5402 = vmatpush.bf16.msra.mxu1 %v11630_v23  ;;  %v13679_v23 = vld [vmem:[#allocation7 + $0x93c] sm:$0xf0]  ;;  %v9834_v58 = vor.u32 %v13519_v46, %v9833_v40  ;;  %v9313_v40 = vld [vmem:[#allocation7 + $0x8] sm:$0xf]  ;;  %v9354_v46 = vor.u32 %v13399_v62, %v9353_v19  ;;  %v11433_v19 = vld [vmem:[#allocation7 + $0x1098] sm:$0xf] }
 0x17d   :  { %v9314_v9 = vor.u32 %v13389_v53, %v9313_v40  ;;  %v13759_v30 = vld [vmem:[#allocation7 + $0xbbc] sm:$0xf0]  ;;  %v11073_v40 = vld [vmem:[#allocation7 + $0xdc8] sm:$0xf]  ;;  %v13909_v53 = vld [vmem:[#allocation7 + $0x106c] sm:$0xf0] }
 0x17e   :  { %5389 = vmatpush.bf16.msra.mxu0 %v11310_v47  ;;  %5364 = vmatpush.bf16.msrb.mxu2 %v10630_v18  ;;  %v10473_v47 = vld [vmem:[#allocation7 + $0x918] sm:$0xf]  ;;  %v13509_v18 = vld [vmem:[#allocation7 + $0x3ec] sm:$0xf0]  ;;  %v13919_v62 = vld [vmem:[#allocation7 + $0x10bc] sm:$0xf0] }
 0x17f   :  { %5377 = vmatpush.bf16.msrb.mxu3 %v10950_v7  ;;  %v10474_v11 = vor.u32 %v13679_v23, %v10473_v47  ;;  %v10113_v7 = vld [vmem:[#allocation7 + $0x648] sm:$0xf]  ;;  %v13469_v23 = vld [vmem:[#allocation7 + $0x2ac] sm:$0xf0] }
 0x180   :  { %5403 = vmatpush.bf16.msra.mxu1 %v11590_v6  ;;  %v9794_v6 = vor.u32 %v13509_v18, %v9793_v57  ;;  %v10114_v16 = vor.u32 %v13589_v1, %v10113_v7  ;;  %v9633_v47 = vld [vmem:[#allocation7 + $0x288] sm:$0xf]  ;;  %v10873_v57 = vld [vmem:[#allocation7 + $0xc38] sm:$0xf]  ;;  %v13779_v18 = vld [vmem:[#allocation7 + $0xc5c] sm:$0xf0] }
 0x181   :  { %v11193_v7 = vld [vmem:[#allocation7 + $0xeb8] sm:$0xf]  ;;  %v13859_v1 = vld [vmem:[#allocation7 + $0xedc] sm:$0xf0]  ;;  %v10874_v41 = vor.u32 %v13779_v18, %v10873_v57 }
 0x182   :  { %5390 = vmatpush.bf16.msra.mxu0 %v11270_v4  ;;  %5365 = vmatpush.bf16.msrb.mxu2 %v10590_v37  ;;  %v9474_v4 = vor.u32 %v13429_v2, %v9473_v20  ;;  %v13659_v37 = vld [vmem:[#allocation7 + $0x89c] sm:$0xf0]  ;;  %v9953_v20 = vld [vmem:[#allocation7 + $0x508] sm:$0xf]  ;;  %v13549_v2 = vld [vmem:[#allocation7 + $0x52c] sm:$0xf0]  ;;  %v11194_v38 = vor.u32 %v13859_v1, %v11193_v7 }
 0x183   :  { %5378 = vmatpush.bf16.msrb.mxu3 %v10910_v51  ;;  %v9434_v51 = vor.u32 %v13419_v29, %v9433_v56  ;;  %v11833_v56 = vld [vmem:[#allocation7 + $0x13b8] sm:$0xf]  ;;  %v14019_v29 = vld [vmem:[#allocation7 + $0x13dc] sm:$0xf0] }
 0x184   :  { %5404 = vmatpush.bf16.msra.mxu1 %v11550_v54  ;;  %v10394_v54 = vor.u32 %v13659_v37, %v10393_v52  ;;  %v11834_v37 = vor.u32 %v14019_v29, %v11833_v56  ;;  %v11033_v57 = vld [vmem:[#allocation7 + $0xd78] sm:$0xf]  ;;  %v13819_v18 = vld [vmem:[#allocation7 + $0xd9c] sm:$0xf0]  ;;  %v10673_v56 = vld [vmem:[#allocation7 + $0xaa8] sm:$0xf] }
 0x185   :  { %5366 = vmatmul.bf16.vlgmr.msrb.gmra.mxu2 %v14989_v17  ;;  %v11353_v7 = vld [vmem:[#allocation7 + $0xff8] sm:$0xf]  ;;  %v13899_v1 = vld [vmem:[#allocation7 + $0x101c] sm:$0xf0]  ;;  %v13729_v29 = vld [vmem:[#allocation7 + $0xacc] sm:$0xf0] }
 0x186   :  { %5391 = vmatpush.bf16.msra.mxu0 %v11230_v50  ;;  %5410 = vmatpush.bf16.msra.mxu2 %v9594_v34  ;;  %v10074_v50 = vor.u32 %v13579_v14, %v10073_v36  ;;  %v9713_v34 = vld [vmem:[#allocation7 + $0x328] sm:$0xf]  ;;  %v13769_v14 = vld [vmem:[#allocation7 + $0xc0c] sm:$0xf0] }
 0x187   :  { %5423 = vmatpush.bf16.msra.mxu3 %v9914_v12  ;;  %5405 = vmatmul.bf16.vlgmr.msra.gmra.mxu1 %v14995_v45  ;;  %v13489_v12 = vld [vmem:[#allocation7 + $0x34c] sm:$0xf0]  ;;  %v10833_v36 = vld [vmem:[#allocation7 + $0xbe8] sm:$0xf] }
 0x188   :  { %5449 = vmatpush.bf16.msrb.mxu1 %v10554_v0  ;;  %5379 = vmatmul.bf16.vlgmr.msrb.gmra.mxu3 %v14991_v49  ;;  %v13649_v0 = vld [vmem:[#allocation7 + $0x84c] sm:$0xf0]  ;;  %v9714_v13 = vor.u32 %v13489_v12, %v9713_v34  ;;  %v10834_v34 = vor.u32 %v13769_v14, %v10833_v36  ;;  %v11313_v36 = vld [vmem:[#allocation7 + $0xfa8] sm:$0xf] }
 0x189   :  { %5392 = vmatmul.bf16.vlgmr.msra.gmra.mxu0 %v14993_v48  ;;  %v13889_v14 = vld [vmem:[#allocation7 + $0xfcc] sm:$0xf0] }
 0x18a   :  { %5436 = vmatpush.bf16.msrb.mxu0 %v10234_v42  ;;  %5411 = vmatpush.bf16.msra.mxu2 %v9554_v5  ;;  %v10353_v42 = vld [vmem:[#allocation7 + $0x828] sm:$0xf]  ;;  %v9673_v5 = vld [vmem:[#allocation7 + $0x2d8] sm:$0xf] }
 0x18b   :  { %5424 = vmatpush.bf16.msra.mxu3 %v9874_v33  ;;  %v10354_v3 = vor.u32 %v13649_v0, %v10353_v42  ;;  %v13479_v33 = vld [vmem:[#allocation7 + $0x2fc] sm:$0xf0]  ;;  %v11474_v42 = vor.u32 %v13929_v10, %v11473_v25  ;;  %v10633_v25 = vld [vmem:[#allocation7 + $0xa58] sm:$0xf] }
 0x18c   :  { %5450 = vmatpush.bf16.msrb.mxu1 %v10514_v43  ;;  %v13639_v43 = vld [vmem:[#allocation7 + $0x7fc] sm:$0xf0]  ;;  %v9674_v44 = vor.u32 %v13479_v33, %v9673_v5  ;;  %v10794_v5 = vor.u32 %v13759_v30, %v10793_v61  ;;  %v11273_v61 = vld [vmem:[#allocation7 + $0xf58] sm:$0xf] }
 0x18d   :  { %v13719_v10 = vld [vmem:[#allocation7 + $0xa7c] sm:$0xf0] }
 0x18e   :  { %5437 = vmatpush.bf16.msrb.mxu0 %v10194_v39  ;;  %5412 = vmatpush.bf16.msra.mxu2 %v9514_v8  ;;  %v10313_v39 = vld [vmem:[#allocation7 + $0x7d8] sm:$0xf]  ;;  %v9994_v8 = vor.u32 %v13559_v35, %v9993_v32  ;;  %v10753_v32 = vld [vmem:[#allocation7 + $0xb48] sm:$0xf]  ;;  %v13749_v35 = vld [vmem:[#allocation7 + $0xb6c] sm:$0xf0] }
 0x18f   :  { %5425 = vmatpush.bf16.msra.mxu3 %v9834_v58  ;;  %v10314_v58 = vor.u32 %v13639_v43, %v10313_v39  ;;  %v11434_v39 = vor.u32 %v13919_v62, %v11433_v19  ;;  %v13879_v30 = vld [vmem:[#allocation7 + $0xf7c] sm:$0xf0]  ;;  %v13709_v62 = vld [vmem:[#allocation7 + $0xa2c] sm:$0xf0] }
 0x190   :  { %5451 = vmatpush.bf16.msrb.mxu1 %v10474_v11  ;;  %v13629_v11 = vld [vmem:[#allocation7 + $0x7ac] sm:$0xf0] }
 0x192   :  { %5438 = vmatpush.bf16.msrb.mxu0 %v10154_v28  ;;  %5413 = vmatpush.bf16.msra.mxu2 %v9474_v4  ;;  %v10273_v28 = vld [vmem:[#allocation7 + $0x788] sm:$0xf]  ;;  %v9634_v4 = vor.u32 %v13469_v23, %v9633_v47  ;;  %v13989_v23 = vld [vmem:[#allocation7 + $0x12ec] sm:$0xf0] }
 0x193   :  { %5426 = vmatpush.bf16.msra.mxu3 %v9794_v6  ;;  %v13939_v6 = vld [vmem:[#allocation7 + $0x115c] sm:$0xf0]  ;;  %v11713_v47 = vld [vmem:[#allocation7 + $0x12c8] sm:$0xf] }
 0x194   :  { %5452 = vmatpush.bf16.msrb.mxu1 %v10434_v24  ;;  %v10274_v24 = vor.u32 %v13629_v11, %v10273_v28  ;;  %v11514_v52 = vor.u32 %v13939_v6, %v11513_v31  ;;  %v11714_v11 = vor.u32 %v13989_v23, %v11713_v47  ;;  %v11673_v31 = vld [vmem:[#allocation7 + $0x1278] sm:$0xf]  ;;  %v11034_v6 = vor.u32 %v13819_v18, %v11033_v57  ;;  %v13614_v47 = vld [vmem:[#allocation7 + $0x73c] sm:$0xf] }
 0x196   :  { %5439 = vmatpush.bf16.msrb.mxu0 %v10114_v16  ;;  %5414 = vmatpush.bf16.msra.mxu2 %v9434_v51  ;;  %v9954_v16 = vor.u32 %v13549_v2, %v9953_v20  ;;  %v11153_v51 = vld [vmem:[#allocation7 + $0xe68] sm:$0xf]  ;;  %v10713_v20 = vld [vmem:[#allocation7 + $0xaf8] sm:$0xf]  ;;  %v13739_v2 = vld [vmem:[#allocation7 + $0xb1c] sm:$0xf0] }
 0x197   :  { %5427 = vmatpush.bf16.msra.mxu3 %v9754_v22  ;;  %v13849_v22 = vld [vmem:[#allocation7 + $0xe8c] sm:$0xf0] }
 0x198   :  { %5453 = vmatpush.bf16.msrb.mxu1 %v10394_v54  ;;  %v14009_v54 = vld [vmem:[#allocation7 + $0x138c] sm:$0xf0]  ;;  %v11154_v12 = vor.u32 %v13849_v22, %v11153_v51  ;;  %v10674_v51 = vor.u32 %v13729_v29, %v10673_v56  ;;  %v13604_v56 = vld [vmem:[#allocation7 + $0x6ec] sm:$0xf]  ;;  %v10195_v29 = vld [vmem:[#allocation7 + $0x710] sm:$0xf0] }
 0x19a   :  { %5440 = vmatpush.bf16.msrb.mxu0 %v10074_v50  ;;  %5415 = vmatpush.bf16.msra.mxu2 %v9394_v60  ;;  %v11793_v50 = vld [vmem:[#allocation7 + $0x1368] sm:$0xf]  ;;  %v11113_v60 = vld [vmem:[#allocation7 + $0xe18] sm:$0xf] }
 0x19b   :  { %5428 = vmatpush.bf16.msra.mxu3 %v9714_v13  ;;  %v11794_v0 = vor.u32 %v14009_v54, %v11793_v50  ;;  %v13839_v13 = vld [vmem:[#allocation7 + $0xe3c] sm:$0xf0]  ;;  %v11314_v50 = vor.u32 %v13889_v14, %v11313_v36  ;;  %v13434_v36 = vld [vmem:[#allocation7 + $0x19c] sm:$0xf]  ;;  %v9515_v14 = vld [vmem:[#allocation7 + $0x1c0] sm:$0xf0] }
 0x19c   :  { %5454 = vmatpush.bf16.msrb.mxu1 %v10354_v3  ;;  %v13999_v3 = vld [vmem:[#allocation7 + $0x133c] sm:$0xf0]  ;;  %v11114_v33 = vor.u32 %v13839_v13, %v11113_v60  ;;  %v10593_v60 = vld [vmem:[#allocation7 + $0xa08] sm:$0xf]  ;;  %v10634_v13 = vor.u32 %v13719_v10, %v10633_v25  ;;  %v13594_v25 = vld [vmem:[#allocation7 + $0x69c] sm:$0xf] }
 0x19d   :  { %v10594_v23 = vor.u32 %v13709_v62, %v10593_v60  ;;  %v10155_v10 = vld [vmem:[#allocation7 + $0x6c0] sm:$0xf0]  ;;  %v9795_v62 = vld [vmem:[#allocation7 + $0x3f0] sm:$0xf0] }
 0x19e   :  { %5441 = vmatpush.bf16.msrb.mxu0 %v10034_v26  ;;  %5416 = vmatpush.bf16.msra.mxu2 %v9354_v46  ;;  %v11753_v26 = vld [vmem:[#allocation7 + $0x1318] sm:$0xf]  ;;  %v13829_v46 = vld [vmem:[#allocation7 + $0xdec] sm:$0xf0]  ;;  %v10158_v60 = vor.u32 %v13594_v25, %v10155_v10 }
 0x19f   :  { %5429 = vmatpush.bf16.msra.mxu3 %v9674_v44  ;;  %v11754_v43 = vor.u32 %v13999_v3, %v11753_v26  ;;  %v11393_v44 = vld [vmem:[#allocation7 + $0x1048] sm:$0xf]  ;;  %v13789_v3 = vld [vmem:[#allocation7 + $0xcac] sm:$0xf0] }
 0x1a0   :  { %5455 = vmatpush.bf16.msrb.mxu1 %v10314_v58  ;;  %v11074_v58 = vor.u32 %v13829_v46, %v11073_v40  ;;  %v11394_v28 = vor.u32 %v13909_v53, %v11393_v44  ;;  %v10913_v26 = vld [vmem:[#allocation7 + $0xc88] sm:$0xf]  ;;  %v13454_v40 = vld [vmem:[#allocation7 + $0x23c] sm:$0xf]  ;;  %v9595_v46 = vld [vmem:[#allocation7 + $0x260] sm:$0xf0] }
 0x1a1   :  { %v13534_v44 = vld [vmem:[#allocation7 + $0x4bc] sm:$0xf]  ;;  %v9915_v53 = vld [vmem:[#allocation7 + $0x4e0] sm:$0xf0]  ;;  %v9598_v57 = vor.u32 %v13454_v40, %v9595_v46 }
 0x1a2   :  { %5442 = vmatpush.bf16.msrb.mxu0 %v9994_v8  ;;  %5417 = vmatpush.bf16.msra.mxu2 %v9314_v9  ;;  %v10754_v8 = vor.u32 %v13749_v35, %v10753_v32  ;;  %v13979_v9 = vld [vmem:[#allocation7 + $0x129c] sm:$0xf0]  ;;  %v11233_v32 = vld [vmem:[#allocation7 + $0xf08] sm:$0xf]  ;;  %v13869_v35 = vld [vmem:[#allocation7 + $0xf2c] sm:$0xf0]  ;;  %v9918_v18 = vor.u32 %v13534_v44, %v9915_v53 }
 0x1a3   :  { %5430 = vmatpush.bf16.msra.mxu3 %v9634_v4  ;;  %v10714_v4 = vor.u32 %v13739_v2, %v10713_v20  ;;  %v13694_v20 = vld [vmem:[#allocation7 + $0x9bc] sm:$0xf]  ;;  %v10555_v2 = vld [vmem:[#allocation7 + $0x9e0] sm:$0xf0] }
 0x1a4   :  { %5456 = vmatpush.bf16.msrb.mxu1 %v10274_v24  ;;  %v11674_v24 = vor.u32 %v13979_v9, %v11673_v31  ;;  %v10558_v9 = vor.u32 %v13694_v20, %v10555_v2  ;;  %v9435_v40 = vld [vmem:[#allocation7 + $0x120] sm:$0xf0]  ;;  %v13654_v2 = vld [vmem:[#allocation7 + $0x87c] sm:$0xf] }
 0x1a5   :  { %5418 = vmatmul.bf16.vlgmr.msra.gmra.mxu2 %v14961_v27  ;;  %v10075_v20 = vld [vmem:[#allocation7 + $0x620] sm:$0xf0] }
 0x1a6   :  { %5443 = vmatpush.bf16.msrb.mxu0 %v9954_v16  ;;  %5462 = vmatpush.bf16.msrb.mxu2 %v10874_v41  ;;  %v11354_v16 = vor.u32 %v13899_v1, %v11353_v7  ;;  %v10993_v41 = vld [vmem:[#allocation7 + $0xd28] sm:$0xf]  ;;  %v13444_v7 = vld [vmem:[#allocation7 + $0x1ec] sm:$0xf]  ;;  %v9555_v1 = vld [vmem:[#allocation7 + $0x210] sm:$0xf0] }
 0x1a7   :  { %5475 = vmatpush.bf16.msrb.mxu3 %v11194_v38  ;;  %5457 = vmatmul.bf16.vlgmr.msrb.gmra.mxu1 %v14967_v21  ;;  %v13809_v38 = vld [vmem:[#allocation7 + $0xd4c] sm:$0xf0] }
 0x1a8   :  { %5501 = vmatpush.bf16.msra.mxu1 %v11834_v37  ;;  %5431 = vmatmul.bf16.vlgmr.msra.gmra.mxu3 %v14963_v55  ;;  %v13969_v37 = vld [vmem:[#allocation7 + $0x124c] sm:$0xf0]  ;;  %v10994_v22 = vor.u32 %v13809_v38, %v10993_v41  ;;  %v9558_v41 = vor.u32 %v13444_v7, %v9555_v1 }
 0x1a9   :  { %5444 = vmatmul.bf16.vlgmr.msrb.gmra.mxu0 %v14965_v15 }
 0x1aa   :  { %5488 = vmatpush.bf16.msra.mxu0 %v11514_v52  ;;  %5463 = vmatpush.bf16.msrb.mxu2 %v10834_v34  ;;  %v11633_v52 = vld [vmem:[#allocation7 + $0x1228] sm:$0xf]  ;;  %v10953_v34 = vld [vmem:[#allocation7 + $0xcd8] sm:$0xf] }
 0x1ab   :  { %5476 = vmatpush.bf16.msrb.mxu3 %v11154_v12  ;;  %v11634_v54 = vor.u32 %v13969_v37, %v11633_v52  ;;  %v13799_v12 = vld [vmem:[#allocation7 + $0xcfc] sm:$0xf0]  ;;  %v10198_v52 = vor.u32 %v13604_v56, %v10195_v29  ;;  %v13484_v56 = vld [vmem:[#allocation7 + $0x32c] sm:$0xf]  ;;  %v9715_v29 = vld [vmem:[#allocation7 + $0x350] sm:$0xf0] }
 0x1ac   :  { %5502 = vmatpush.bf16.msra.mxu1 %v11794_v0  ;;  %v13959_v0 = vld [vmem:[#allocation7 + $0x11fc] sm:$0xf0]  ;;  %v10954_v19 = vor.u32 %v13799_v12, %v10953_v34  ;;  %v9518_v34 = vor.u32 %v13434_v36, %v9515_v14 }
 0x1ae   :  { %5489 = vmatpush.bf16.msra.mxu0 %v11474_v42  ;;  %5464 = vmatpush.bf16.msrb.mxu2 %v10794_v5  ;;  %v11593_v42 = vld [vmem:[#allocation7 + $0x11d8] sm:$0xf]  ;;  %v11274_v5 = vor.u32 %v13879_v30, %v11273_v61 }
 0x1af   :  { %5477 = vmatpush.bf16.msrb.mxu3 %v11114_v33  ;;  %v11594_v33 = vor.u32 %v13959_v0, %v11593_v42  ;;  %v13424_v42 = vld [vmem:[#allocation7 + $0x14c] sm:$0xf]  ;;  %v9475_v0 = vld [vmem:[#allocation7 + $0x170] sm:$0xf0] }
 0x1b0   :  { %5503 = vmatpush.bf16.msra.mxu1 %v11754_v43  ;;  %v13949_v43 = vld [vmem:[#allocation7 + $0x11ac] sm:$0xf0] }
 0x1b2   :  { %5490 = vmatpush.bf16.msra.mxu0 %v11434_v39  ;;  %5465 = vmatpush.bf16.msrb.mxu2 %v10754_v8  ;;  %v11553_v39 = vld [vmem:[#allocation7 + $0x1188] sm:$0xf]  ;;  %v10914_v8 = vor.u32 %v13789_v3, %v10913_v26  ;;  %v13584_v26 = vld [vmem:[#allocation7 + $0x64c] sm:$0xf]  ;;  %v10115_v3 = vld [vmem:[#allocation7 + $0x670] sm:$0xf0] }
 0x1b3   :  { %5478 = vmatpush.bf16.msrb.mxu3 %v11074_v58  ;;  %v10235_v58 = vld [vmem:[#allocation7 + $0x760] sm:$0xf0]  ;;  %v10118_v46 = vor.u32 %v13584_v26, %v10115_v3  ;;  %v9315_v26 = vld [vmem:[#allocation7 + $0x30] sm:$0xf0]  ;;  %v13464_v3 = vld [vmem:[#allocation7 + $0x28c] sm:$0xf] }
 0x1b4   :  { %5504 = vmatpush.bf16.msra.mxu1 %v11714_v11  ;;  %v11554_v11 = vor.u32 %v13949_v43, %v11553_v39  ;;  %v10238_v31 = vor.u32 %v13614_v47, %v10235_v58  ;;  %v13414_v43 = vld [vmem:[#allocation7 + $0xfc] sm:$0xf] }
 0x1b5   :  { %v13494_v47 = vld [vmem:[#allocation7 + $0x37c] sm:$0xf] }
 0x1b6   :  { %5491 = vmatpush.bf16.msra.mxu0 %v11394_v28  ;;  %5466 = vmatpush.bf16.msrb.mxu2 %v10714_v4  ;;  %v11234_v28 = vor.u32 %v13869_v35, %v11233_v32  ;;  %v13524_v4 = vld [vmem:[#allocation7 + $0x46c] sm:$0xf]  ;;  %v9478_v32 = vor.u32 %v13424_v42, %v9475_v0  ;;  %v13634_v42 = vld [vmem:[#allocation7 + $0x7dc] sm:$0xf]  ;;  %v10315_v0 = vld [vmem:[#allocation7 + $0x800] sm:$0xf0] }
 0x1b7   :  { %5479 = vmatpush.bf16.msrb.mxu3 %v11034_v6  ;;  %v9875_v6 = vld [vmem:[#allocation7 + $0x490] sm:$0xf0] }
 0x1b8   :  { %5505 = vmatpush.bf16.msra.mxu1 %v11674_v24  ;;  %v10515_v24 = vld [vmem:[#allocation7 + $0x990] sm:$0xf0]  ;;  %v9878_v38 = vor.u32 %v13524_v4, %v9875_v6 }
 0x1ba   :  { %5492 = vmatpush.bf16.msra.mxu0 %v11354_v16  ;;  %5467 = vmatpush.bf16.msrb.mxu2 %v10674_v51  ;;  %v13684_v16 = vld [vmem:[#allocation7 + $0x96c] sm:$0xf]  ;;  %v13514_v51 = vld [vmem:[#allocation7 + $0x41c] sm:$0xf] }
 0x1bb   :  { %5480 = vmatpush.bf16.msrb.mxu3 %v10994_v22  ;;  %v10518_v37 = vor.u32 %v13684_v16, %v10515_v24  ;;  %v9835_v22 = vld [vmem:[#allocation7 + $0x440] sm:$0xf0]  ;;  %v13564_v16 = vld [vmem:[#allocation7 + $0x5ac] sm:$0xf]  ;;  %v10035_v24 = vld [vmem:[#allocation7 + $0x5d0] sm:$0xf0] }
 0x1bc   :  { %5506 = vmatpush.bf16.msra.mxu1 %v11634_v54  ;;  %v10475_v54 = vld [vmem:[#allocation7 + $0x940] sm:$0xf0]  ;;  %v9838_v12 = vor.u32 %v13514_v51, %v9835_v22  ;;  %v13394_v51 = vld [vmem:[#allocation7 + $0x5c] sm:$0xf]  ;;  %v10038_v25 = vor.u32 %v13564_v16, %v10035_v24  ;;  %v13844_v16 = vld [vmem:[#allocation7 + $0xe6c] sm:$0xf] }
 0x1bd   :  { %v9355_v22 = vld [vmem:[#allocation7 + $0x80] sm:$0xf0]  ;;  %v11155_v24 = vld [vmem:[#allocation7 + $0xe90] sm:$0xf0] }
 0x1be   :  { %5493 = vmatpush.bf16.msra.mxu0 %v11314_v50  ;;  %5468 = vmatpush.bf16.msrb.mxu2 %v10634_v13  ;;  %v13674_v50 = vld [vmem:[#allocation7 + $0x91c] sm:$0xf]  ;;  %v5237_v61 = vpop.f32.mrf.mxu0 }
 0x1bf   :  { %5481 = vmatpush.bf16.msrb.mxu3 %v10954_v19  ;;  %v10478_v13 = vor.u32 %v13674_v50, %v10475_v54  ;;  %v13504_v19 = vld [vmem:[#allocation7 + $0x3cc] sm:$0xf]  ;;  %v13474_v54 = vld [vmem:[#allocation7 + $0x2dc] sm:$0xf] }
 0x1c0   :  { %5507 = vmatpush.bf16.msra.mxu1 %v11594_v33  ;;  %v5250_v30 = vpop.f32.mrf.mxu1  ;;  %v10435_v33 = vld [vmem:[#allocation7 + $0x8f0] sm:$0xf0]  ;;  %v9798_v35 = vor.u32 %v13504_v19, %v9795_v62 }
 0x1c2   :  { %5494 = vmatpush.bf16.msra.mxu0 %v11274_v5  ;;  %5469 = vmatpush.bf16.msrb.mxu2 %v10594_v23  ;;  %v13664_v5 = vld [vmem:[#allocation7 + $0x8cc] sm:$0xf]  ;;  %v9755_v23 = vld [vmem:[#allocation7 + $0x3a0] sm:$0xf0] }
 0x1c3   :  { %5482 = vmatpush.bf16.msrb.mxu3 %v10914_v8  ;;  %v10438_v44 = vor.u32 %v13664_v5, %v10435_v33  ;;  %v13574_v8 = vld [vmem:[#allocation7 + $0x5fc] sm:$0xf]  ;;  %v9635_v5 = vld [vmem:[#allocation7 + $0x2b0] sm:$0xf0] }
 0x1c4   :  { %5508 = vmatpush.bf16.msra.mxu1 %v11554_v11  ;;  %v5211_v39 = vpop.f32.mrf.mxu2  ;;  %v10078_v4 = vor.u32 %v13574_v8, %v10075_v20  ;;  %v11515_v20 = vld [vmem:[#allocation7 + $0x1160] sm:$0xf0] }
 0x1c5   :  { %5470 = vmatmul.bf16.vlgmr.msrb.gmra.mxu2 %v14989_v17 }
 0x1c6   :  { %5495 = vmatpush.bf16.msra.mxu0 %v11234_v28  ;;  %5514 = vmatpush.bf16.msra.mxu2 %v9598_v57  ;;  %v10395_v28 = vld [vmem:[#allocation7 + $0x8a0] sm:$0xf0]  ;;  %v9438_v57 = vor.u32 %v13414_v43, %v9435_v40  ;;  %v5239_v7 = vpop.f32.mrf.mxu0  ;;  %v13624_v43 = vld [vmem:[#allocation7 + $0x78c] sm:$0xf]  ;;  %v10275_v40 = vld [vmem:[#allocation7 + $0x7b0] sm:$0xf0] }
 0x1c7   :  { %5527 = vmatpush.bf16.msra.mxu3 %v9918_v18  ;;  %5509 = vmatmul.bf16.vlgmr.msra.gmra.mxu1 %v14995_v45  ;;  %v5224_v53 = vpop.f32.mrf.mxu3  ;;  %v9758_v18 = vor.u32 %v13494_v47, %v9755_v23  ;;  %v10398_v6 = vor.u32 %v13654_v2, %v10395_v28  ;;  %v11195_v47 = vld [vmem:[#allocation7 + $0xee0] sm:$0xf0]  ;;  %v13934_v23 = vld [vmem:[#allocation7 + $0x113c] sm:$0xf] }
 0x1c8   :  { %5553 = vmatpush.bf16.msrb.mxu1 %v10558_v9  ;;  %5483 = vmatmul.bf16.vlgmr.msrb.gmra.mxu3 %v14991_v49  ;;  %v5225_v58 = vadd.f32 %v5224_v53, %v5211_v39  ;;  %v5252_v1 = vpop.f32.mrf.mxu1  ;;  %v9395_v9 = vld [vmem:[#allocation7 + $0xd0] sm:$0xf0]  ;;  %v13854_v53 = vld [vmem:[#allocation7 + $0xebc] sm:$0xf]  ;;  %v11835_v28 = vld [vmem:[#allocation7 + $0x13e0] sm:$0xf0] }
 0x1c9   :  { %5496 = vmatmul.bf16.vlgmr.msra.gmra.mxu0 %v14993_v48  ;;  %v9955_v39 = vld [vmem:[#allocation7 + $0x530] sm:$0xf0]  ;;  %v14014_v2 = vld [vmem:[#allocation7 + $0x13bc] sm:$0xf] }
 0x1ca   :  { %5540 = vmatpush.bf16.msrb.mxu0 %v10238_v31  ;;  %5515 = vmatpush.bf16.msra.mxu2 %v9558_v41  ;;  %v5238_v11 = vadd.f32 %v5237_v61, %v5225_v58  ;;  %v13404_v31 = vld [vmem:[#allocation7 + $0xac] sm:$0xf]  ;;  %v9995_v61 = vld [vmem:[#allocation7 + $0x580] sm:$0xf0]  ;;  %v9638_v58 = vor.u32 %v13464_v3, %v9635_v5 }
 0x1cb   :  { %5528 = vmatpush.bf16.msra.mxu3 %v9878_v38  ;;  %v13644_v41 = vld [vmem:[#allocation7 + $0x82c] sm:$0xf]  ;;  %v10355_v38 = vld [vmem:[#allocation7 + $0x850] sm:$0xf0]  ;;  %v9398_v14 = vor.u32 %v13404_v31, %v9395_v9  ;;  %v11198_v31 = vor.u32 %v13854_v53, %v11195_v47 }
 0x1cc   :  { %5554 = vmatpush.bf16.msrb.mxu1 %v10518_v37  ;;  %v5251_v36 = vadd.f32 %v5250_v30, %v5238_v11  ;;  %v5213_v37 = vpop.f32.mrf.mxu2  ;;  %v10358_v10 = vor.u32 %v13644_v41, %v10355_v38  ;;  %v9358_v30 = vor.u32 %v13394_v51, %v9355_v22  ;;  %v13924_v41 = vld [vmem:[#allocation7 + $0x10ec] sm:$0xf]  ;;  %v11795_v22 = vld [vmem:[#allocation7 + $0x1390] sm:$0xf0] }
 0x1cd   :  { %v11475_v37 = vld [vmem:[#allocation7 + $0x1110] sm:$0xf0]  ;;  %v14004_v51 = vld [vmem:[#allocation7 + $0x136c] sm:$0xf] }
 0x1ce   :  { %5541 = vmatpush.bf16.msrb.mxu0 %v10198_v52  ;;  %5516 = vmatpush.bf16.msra.mxu2 %v9518_v34  ;;  %v9718_v52 = vor.u32 %v13484_v56, %v9715_v29  ;;  %v9675_v34 = vld [vmem:[#allocation7 + $0x300] sm:$0xf0]  ;;  %v5289_v19 = vpop.f32.mrf.mxu0  ;;  %v11518_v56 = vor.u32 %v13934_v23, %v11515_v20  ;;  %v11838_v29 = vor.u32 %v14014_v2, %v11835_v28  ;;  %v13984_v53 = vld [vmem:[#allocation7 + $0x12cc] sm:$0xf]  ;;  %v11715_v47 = vld [vmem:[#allocation7 + $0x12f0] sm:$0xf0] }
 0x1cf   :  { %5529 = vmatpush.bf16.msra.mxu3 %v9838_v12  ;;  %v5226_v50 = vpop.f32.mrf.mxu3  ;;  %v13554_v12 = vld [vmem:[#allocation7 + $0x55c] sm:$0xf]  ;;  %v10715_v28 = vld [vmem:[#allocation7 + $0xb20] sm:$0xf0] }
 0x1d0   :  { %5555 = vmatpush.bf16.msrb.mxu1 %v10478_v13  ;;  %v9678_v13 = vor.u32 %v13474_v54, %v9675_v34  ;;  %v15017_v62 = vpop.f32.mrf.mxu1  ;;  %v9998_v33 = vor.u32 %v13554_v12, %v9995_v61  ;;  %v13754_v50 = vld [vmem:[#allocation7 + $0xb9c] sm:$0xf]  ;;  %v10795_v54 = vld [vmem:[#allocation7 + $0xbc0] sm:$0xf0]  ;;  %v11478_v34 = vor.u32 %v13924_v41, %v11475_v37  ;;  %v11798_v12 = vor.u32 %v14004_v51, %v11795_v22  ;;  %v10995_v37 = vld [vmem:[#allocation7 + $0xd50] sm:$0xf0] }
 0x1d1   :  { %v13834_v61 = vld [vmem:[#allocation7 + $0xe1c] sm:$0xf]  ;;  %v10798_v5 = vor.u32 %v13754_v50, %v10795_v54  ;;  %v13884_v51 = vld [vmem:[#allocation7 + $0xfac] sm:$0xf] }
 0x1d2   :  { %5542 = vmatpush.bf16.msrb.mxu0 %v10158_v60  ;;  %5517 = vmatpush.bf16.msra.mxu2 %v9478_v32  ;;  %v13384_v60 = vld [vmem:[#allocation7 + $0xc] sm:$0xf]  ;;  %v10318_v32 = vor.u32 %v13634_v42, %v10315_v0  ;;  %v11115_v42 = vld [vmem:[#allocation7 + $0xe40] sm:$0xf0]  ;;  %v13914_v0 = vld [vmem:[#allocation7 + $0x109c] sm:$0xf] }
 0x1d3   :  { %5530 = vmatpush.bf16.msra.mxu3 %v9798_v35  ;;  %v13544_v35 = vld [vmem:[#allocation7 + $0x50c] sm:$0xf]  ;;  %v9318_v8 = vor.u32 %v13384_v60, %v9315_v26  ;;  %v11435_v60 = vld [vmem:[#allocation7 + $0x10c0] sm:$0xf0]  ;;  %v13734_v2 = vld [vmem:[#allocation7 + $0xafc] sm:$0xf] }
 0x1d4   :  { %5556 = vmatpush.bf16.msrb.mxu1 %v10438_v44  ;;  %v10875_v44 = vld [vmem:[#allocation7 + $0xc60] sm:$0xf0]  ;;  %v9958_v11 = vor.u32 %v13544_v35, %v9955_v39  ;;  %v10755_v35 = vld [vmem:[#allocation7 + $0xb70] sm:$0xf0]  ;;  %v11438_v39 = vor.u32 %v13914_v0, %v11435_v60 }
 0x1d5   :  { %v10635_v0 = vld [vmem:[#allocation7 + $0xa80] sm:$0xf0] }
 0x1d6   :  { %5543 = vmatpush.bf16.msrb.mxu0 %v10118_v46  ;;  %5518 = vmatpush.bf16.msra.mxu2 %v9438_v57  ;;  %v13774_v46 = vld [vmem:[#allocation7 + $0xc3c] sm:$0xf]  ;;  %v10278_v57 = vor.u32 %v13624_v43, %v10275_v40  ;;  %v13824_v40 = vld [vmem:[#allocation7 + $0xdcc] sm:$0xf] }
 0x1d7   :  { %5531 = vmatpush.bf16.msra.mxu3 %v9758_v18  ;;  %v5263_v18 = vpop.f32.mrf.mxu2  ;;  %v5276_v7 = vpop.f32.mrf.mxu3  ;;  %v10878_v1 = vor.u32 %v13774_v46, %v10875_v44  ;;  %v11075_v46 = vld [vmem:[#allocation7 + $0xdf0] sm:$0xf0] }
 0x1d8   :  { %5557 = vmatpush.bf16.msrb.mxu1 %v10398_v6  ;;  %v5264_v9 = vadd.f32 %v5263_v18, %v5251_v36  ;;  %v10835_v6 = vld [vmem:[#allocation7 + $0xc10] sm:$0xf0]  ;;  %v11078_v20 = vor.u32 %v13824_v40, %v11075_v46  ;;  %v13814_v18 = vld [vmem:[#allocation7 + $0xd7c] sm:$0xf] }
 0x1d9   :  { %v11395_v44 = vld [vmem:[#allocation7 + $0x1070] sm:$0xf0] }
 0x1da   :  { %5544 = vmatpush.bf16.msrb.mxu0 %v10078_v4  ;;  %5519 = vmatpush.bf16.msra.mxu2 %v9398_v14  ;;  %v13764_v4 = vld [vmem:[#allocation7 + $0xbec] sm:$0xf]  ;;  %v5277_v38 = vadd.f32 %v5276_v7, %v5264_v9  ;;  %v5291_v14 = vpop.f32.mrf.mxu0  ;;  %v11035_v7 = vld [vmem:[#allocation7 + $0xda0] sm:$0xf0]  ;;  %v13974_v9 = vld [vmem:[#allocation7 + $0x127c] sm:$0xf] }
 0x1db   :  { %5532 = vmatpush.bf16.msra.mxu3 %v9718_v52  ;;  %v5304_v52 = vpop.f32.mrf.mxu1  ;;  %v10595_v46 = vld [vmem:[#allocation7 + $0xa30] sm:$0xf0] }
 0x1dc   :  { %5558 = vmatpush.bf16.msrb.mxu1 %v10358_v10  ;;  %v5290_v36 = vadd.f32 %v5289_v19, %v5277_v38  ;;  %v11158_v10 = vor.u32 %v13844_v16, %v11155_v24  ;;  %v10675_v16 = vld [vmem:[#allocation7 + $0xad0] sm:$0xf0]  ;;  %v13804_v52 = vld [vmem:[#allocation7 + $0xd2c] sm:$0xf] }
 0x1de   :  { %5545 = vmatpush.bf16.msrb.mxu0 %v10038_v25  ;;  %5520 = vmatpush.bf16.msra.mxu2 %v9358_v30  ;;  %v10838_v25 = vor.u32 %v13764_v4, %v10835_v6  ;;  %v13994_v30 = vld [vmem:[#allocation7 + $0x131c] sm:$0xf]  ;;  %v15022_v19 = vadd.f32 %v15017_v62, %v5290_v36  ;;  %v13904_v62 = vld [vmem:[#allocation7 + $0x104c] sm:$0xf]  ;;  %v11675_v4 = vld [vmem:[#allocation7 + $0x12a0] sm:$0xf0]  ;;  %v10718_v6 = vor.u32 %v13734_v2, %v10715_v28 }
 0x1df   :  { %5533 = vmatpush.bf16.msra.mxu3 %v9678_v13  ;;  %v11755_v13 = vld [vmem:[#allocation7 + $0x1340] sm:$0xf0]  ;;  %v5265_v26 = vpop.f32.mrf.mxu2  ;;  %v5278_v3 = vpop.f32.mrf.mxu3  ;;  %v11678_v41 = vor.u32 %v13974_v9, %v11675_v4  ;;  %v11315_v36 = vld [vmem:[#allocation7 + $0xfd0] sm:$0xf0]  ;;  %v13944_v28 = vld [vmem:[#allocation7 + $0x118c] sm:$0xf] }
 0x1e0   :  { %5559 = vmatpush.bf16.msrb.mxu1 %v10318_v32  ;;  %v13744_v32 = vld [vmem:[#allocation7 + $0xb4c] sm:$0xf]  ;;  %v11758_v43 = vor.u32 %v13994_v30, %v11755_v13  ;;  %v11318_v60 = vor.u32 %v13884_v51, %v11315_v36  ;;  %v13794_v13 = vld [vmem:[#allocation7 + $0xcdc] sm:$0xf]  ;;  %v10955_v26 = vld [vmem:[#allocation7 + $0xd00] sm:$0xf0] }
 0x1e1   :  { %v13874_v3 = vld [vmem:[#allocation7 + $0xf5c] sm:$0xf]  ;;  %v10958_v40 = vor.u32 %v13794_v13, %v10955_v26  ;;  %v11235_v2 = vld [vmem:[#allocation7 + $0xf30] sm:$0xf0]  ;;  %v13620_v4 = vld [vmem:[#allocation7 + $0x764] sm:$0xf0] }
 0x1e2   :  { %5546 = vmatpush.bf16.msrb.mxu0 %v9998_v33  ;;  %5521 = vmatpush.bf16.msra.mxu2 %v9318_v8  ;;  %v11118_v33 = vor.u32 %v13834_v61, %v11115_v42  ;;  %v10998_v61 = vor.u32 %v13804_v52, %v10995_v37  ;;  %v13714_v42 = vld [vmem:[#allocation7 + $0xa5c] sm:$0xf]  ;;  %v9881_v51 = vld [vmem:[#allocation7 + $0x470] sm:$0xf]  ;;  %v10161_v13 = vld [vmem:[#allocation7 + $0x6a0] sm:$0xf] }
 0x1e3   :  { %5534 = vmatpush.bf16.msra.mxu3 %v9638_v58  ;;  %v10758_v58 = vor.u32 %v13744_v32, %v10755_v35  ;;  %v11595_v32 = vld [vmem:[#allocation7 + $0x1200] sm:$0xf0]  ;;  %v10201_v36 = vld [vmem:[#allocation7 + $0x6f0] sm:$0xf]  ;;  %v13600_v26 = vld [vmem:[#allocation7 + $0x6c4] sm:$0xf0] }
 0x1e4   :  { %5560 = vmatpush.bf16.msrb.mxu1 %v10278_v57  ;;  %v5354_v8 = vpop.f32.mrf.mxu1  ;;  %v11718_v57 = vor.u32 %v13984_v53, %v11715_v47 }
 0x1e5   :  { %5522 = vmatmul.bf16.vlgmr.msra.gmra.mxu2 %v14961_v27 }
 0x1e6   :  { %5547 = vmatpush.bf16.msrb.mxu0 %v9958_v11  ;;  %5566 = vmatpush.bf16.msrb.mxu2 %v10878_v1  ;;  %v5341_v23 = vpop.f32.mrf.mxu0  ;;  %v11398_v11 = vor.u32 %v13904_v62, %v11395_v44  ;;  %v13894_v1 = vld [vmem:[#allocation7 + $0xffc] sm:$0xf]  ;;  %v13784_v62 = vld [vmem:[#allocation7 + $0xc8c] sm:$0xf]  ;;  %v10915_v44 = vld [vmem:[#allocation7 + $0xcb0] sm:$0xf0] }
 0x1e7   :  { %5579 = vmatpush.bf16.msrb.mxu3 %v11198_v31  ;;  %5561 = vmatmul.bf16.vlgmr.msrb.gmra.mxu1 %v14967_v21  ;;  %v11355_v31 = vld [vmem:[#allocation7 + $0x1020] sm:$0xf0]  ;;  %v10918_v9 = vor.u32 %v13784_v62, %v10915_v44  ;;  %v9801_v62 = vld [vmem:[#allocation7 + $0x3d0] sm:$0xf]  ;;  %v13510_v44 = vld [vmem:[#allocation7 + $0x3f4] sm:$0xf0] }
 0x1e8   :  { %5605 = vmatpush.bf16.msra.mxu1 %v11838_v29  ;;  %5535 = vmatmul.bf16.vlgmr.msra.gmra.mxu3 %v14963_v55  ;;  %v13724_v29 = vld [vmem:[#allocation7 + $0xaac] sm:$0xf]  ;;  %v11358_v24 = vor.u32 %v13894_v1, %v11355_v31  ;;  %v5315_v38 = vpop.f32.mrf.mxu2  ;;  %v10241_v1 = vld [vmem:[#allocation7 + $0x740] sm:$0xf] }
 0x1e9   :  { %5548 = vmatmul.bf16.vlgmr.msrb.gmra.mxu0 %v14965_v15  ;;  %v10242_v52 = vor.u32 %v13620_v4, %v10241_v1  ;;  %v9761_v1 = vld [vmem:[#allocation7 + $0x380] sm:$0xf]  ;;  %v13580_v4 = vld [vmem:[#allocation7 + $0x624] sm:$0xf0] }
 0x1ea   :  { %5592 = vmatpush.bf16.msra.mxu0 %v11518_v56  ;;  %5567 = vmatpush.bf16.msrb.mxu2 %v10838_v25  ;;  %v11038_v56 = vor.u32 %v13814_v18, %v11035_v7  ;;  %v13964_v25 = vld [vmem:[#allocation7 + $0x122c] sm:$0xf]  ;;  %v9921_v18 = vld [vmem:[#allocation7 + $0x4c0] sm:$0xf]  ;;  %v13540_v7 = vld [vmem:[#allocation7 + $0x4e4] sm:$0xf0] }
 0x1eb   :  { %5580 = vmatpush.bf16.msrb.mxu3 %v11158_v10  ;;  %v5328_v14 = vpop.f32.mrf.mxu3  ;;  %v11635_v10 = vld [vmem:[#allocation7 + $0x1250] sm:$0xf0] }
 0x1ec   :  { %5606 = vmatpush.bf16.msra.mxu1 %v11798_v12  ;;  %v5329_v22 = vadd.f32 %v5328_v14, %v5315_v38  ;;  %v10678_v12 = vor.u32 %v13724_v29, %v10675_v16  ;;  %v11638_v30 = vor.u32 %v13964_v25, %v11635_v10  ;;  %v9561_v38 = vld [vmem:[#allocation7 + $0x1f0] sm:$0xf]  ;;  %v13450_v14 = vld [vmem:[#allocation7 + $0x214] sm:$0xf0] }
 0x1ed   :  { %v13610_v25 = vld [vmem:[#allocation7 + $0x714] sm:$0xf0]  ;;  %v10521_v10 = vld [vmem:[#allocation7 + $0x970] sm:$0xf] }
 0x1ee   :  { %5593 = vmatpush.bf16.msra.mxu0 %v11478_v34  ;;  %5568 = vmatpush.bf16.msrb.mxu2 %v10798_v5  ;;  %v5342_v50 = vadd.f32 %v5341_v23, %v5329_v22  ;;  %v5343_v54 = vpop.f32.mrf.mxu0  ;;  %v5356_v34 = vpop.f32.mrf.mxu1  ;;  %v11275_v5 = vld [vmem:[#allocation7 + $0xf80] sm:$0xf0]  ;;  %v13530_v22 = vld [vmem:[#allocation7 + $0x494] sm:$0xf0] }
 0x1ef   :  { %5581 = vmatpush.bf16.msrb.mxu3 %v11118_v33  ;;  %v13954_v33 = vld [vmem:[#allocation7 + $0x11dc] sm:$0xf]  ;;  %v11278_v53 = vor.u32 %v13874_v3, %v11275_v5  ;;  %v9562_v54 = vor.u32 %v13450_v14, %v9561_v38  ;;  %v9882_v34 = vor.u32 %v13530_v22, %v9881_v51  ;;  %v10481_v3 = vld [vmem:[#allocation7 + $0x920] sm:$0xf]  ;;  %v13680_v5 = vld [vmem:[#allocation7 + $0x944] sm:$0xf0] }
 0x1f0   :  { %5607 = vmatpush.bf16.msra.mxu1 %v11758_v43  ;;  %v15026_v35 = vadd.f32 %v5354_v8, %v5342_v50  ;;  %v10638_v43 = vor.u32 %v13714_v42, %v10635_v0  ;;  %v11598_v47 = vor.u32 %v13954_v33, %v11595_v32  ;;  %v5317_v23 = vpop.f32.mrf.mxu2  ;;  %v9601_v8 = vld [vmem:[#allocation7 + $0x240] sm:$0xf]  ;;  %v13690_v50 = vld [vmem:[#allocation7 + $0x994] sm:$0xf0]  ;;  %v10202_v42 = vor.u32 %v13610_v25, %v10201_v36  ;;  %v9721_v51 = vld [vmem:[#allocation7 + $0x330] sm:$0xf] }
 0x1f1   :  { %v10522_v0 = vor.u32 %v13690_v50, %v10521_v10  ;;  %v10441_v23 = vld [vmem:[#allocation7 + $0x8d0] sm:$0xf]  ;;  %v13490_v22 = vld [vmem:[#allocation7 + $0x354] sm:$0xf0] }
 0x1f2   :  { %5594 = vmatpush.bf16.msra.mxu0 %v11438_v39  ;;  %5569 = vmatpush.bf16.msrb.mxu2 %v10758_v58  ;;  %v13704_v39 = vld [vmem:[#allocation7 + $0xa0c] sm:$0xf]  ;;  %v10041_v36 = vld [vmem:[#allocation7 + $0x5b0] sm:$0xf]  ;;  %v13570_v10 = vld [vmem:[#allocation7 + $0x5d4] sm:$0xf0] }
 0x1f3   :  { %5582 = vmatpush.bf16.msrb.mxu3 %v11078_v20  ;;  %v5330_v58 = vpop.f32.mrf.mxu3  ;;  %v13864_v20 = vld [vmem:[#allocation7 + $0xf0c] sm:$0xf]  ;;  %v10598_v31 = vor.u32 %v13704_v39, %v10595_v46  ;;  %v9481_v39 = vld [vmem:[#allocation7 + $0x150] sm:$0xf]  ;;  %v10482_v46 = vor.u32 %v13680_v5, %v10481_v3  ;;  %v9681_v3 = vld [vmem:[#allocation7 + $0x2e0] sm:$0xf] }
 0x1f4   :  { %5608 = vmatpush.bf16.msra.mxu1 %v11718_v57  ;;  %v13460_v57 = vld [vmem:[#allocation7 + $0x264] sm:$0xf0]  ;;  %v11238_v29 = vor.u32 %v13864_v20, %v11235_v2  ;;  %v13670_v58 = vld [vmem:[#allocation7 + $0x8f4] sm:$0xf0]  ;;  %v10361_v50 = vld [vmem:[#allocation7 + $0x830] sm:$0xf] }
 0x1f5   :  { %v13480_v5 = vld [vmem:[#allocation7 + $0x304] sm:$0xf0] }
 0x1f6   :  { %5595 = vmatpush.bf16.msra.mxu0 %v11398_v11  ;;  %5570 = vmatpush.bf16.msrb.mxu2 %v10718_v6  ;;  %v11555_v11 = vld [vmem:[#allocation7 + $0x11b0] sm:$0xf0]  ;;  %v10561_v6 = vld [vmem:[#allocation7 + $0x9c0] sm:$0xf] }
 0x1f7   :  { %5583 = vmatpush.bf16.msrb.mxu3 %v11038_v56  ;;  %v13700_v56 = vld [vmem:[#allocation7 + $0x9e4] sm:$0xf0]  ;;  %v11558_v16 = vor.u32 %v13944_v28, %v11555_v11  ;;  %v9802_v11 = vor.u32 %v13510_v44, %v9801_v62  ;;  %v9682_v62 = vor.u32 %v13480_v5, %v9681_v3  ;;  %v13390_v44 = vld [vmem:[#allocation7 + $0x34] sm:$0xf0]  ;;  %v11441_v5 = vld [vmem:[#allocation7 + $0x10a0] sm:$0xf] }
 0x1f8   :  { %5609 = vmatpush.bf16.msra.mxu1 %v11678_v41  ;;  %v9922_v41 = vor.u32 %v13540_v7, %v9921_v18  ;;  %v10562_v37 = vor.u32 %v13700_v56, %v10561_v6  ;;  %v10442_v7 = vor.u32 %v13670_v58, %v10441_v23  ;;  %v10401_v6 = vld [vmem:[#allocation7 + $0x880] sm:$0xf]  ;;  %v13660_v56 = vld [vmem:[#allocation7 + $0x8a4] sm:$0xf0] }
 0x1f9   :  { %v10402_v14 = vor.u32 %v13660_v56, %v10401_v6  ;;  %v11521_v6 = vld [vmem:[#allocation7 + $0x1140] sm:$0xf]  ;;  %v13840_v3 = vld [vmem:[#allocation7 + $0xe44] sm:$0xf0] }
 0x1fa   :  { %5596 = vmatpush.bf16.msra.mxu0 %v11358_v24  ;;  %5571 = vmatpush.bf16.msrb.mxu2 %v10678_v12  ;;  %v9602_v24 = vor.u32 %v13460_v57, %v9601_v8  ;;  %v9521_v12 = vld [vmem:[#allocation7 + $0x1a0] sm:$0xf]  ;;  %v13420_v57 = vld [vmem:[#allocation7 + $0x124] sm:$0xf0] }
 0x1fb   :  { %5584 = vmatpush.bf16.msrb.mxu3 %v10998_v61  ;;  %v13440_v61 = vld [vmem:[#allocation7 + $0x1c4] sm:$0xf0]  ;;  %v9441_v8 = vld [vmem:[#allocation7 + $0x100] sm:$0xf] }
 0x1fc   :  { %5610 = vmatpush.bf16.msra.mxu1 %v11638_v30  ;;  %v13520_v30 = vld [vmem:[#allocation7 + $0x444] sm:$0xf0]  ;;  %v9522_v33 = vor.u32 %v13440_v61, %v9521_v12 }
 0x1fe   :  { %5597 = vmatpush.bf16.msra.mxu0 %v11318_v60  ;;  %5572 = vmatpush.bf16.msrb.mxu2 %v10638_v43  ;;  %v9841_v60 = vld [vmem:[#allocation7 + $0x420] sm:$0xf]  ;;  %v13430_v43 = vld [vmem:[#allocation7 + $0x174] sm:$0xf0] }
 0x1ff   :  { %5585 = vmatpush.bf16.msrb.mxu3 %v10958_v40  ;;  %v9842_v32 = vor.u32 %v13520_v30, %v9841_v60  ;;  %v10162_v40 = vor.u32 %v13600_v26, %v10161_v13  ;;  %v9482_v28 = vor.u32 %v13430_v43, %v9481_v39  ;;  %v9361_v60 = vld [vmem:[#allocation7 + $0x60] sm:$0xf]  ;;  %v13400_v30 = vld [vmem:[#allocation7 + $0x84] sm:$0xf0]  ;;  %v10042_v13 = vor.u32 %v13570_v10, %v10041_v36  ;;  %v13850_v10 = vld [vmem:[#allocation7 + $0xe94] sm:$0xf0] }
 0x200   :  { %5611 = vmatpush.bf16.msra.mxu1 %v11598_v47  ;;  %v13590_v47 = vld [vmem:[#allocation7 + $0x674] sm:$0xf0]  ;;  %v10321_v39 = vld [vmem:[#allocation7 + $0x7e0] sm:$0xf]  ;;  %v13640_v43 = vld [vmem:[#allocation7 + $0x804] sm:$0xf0] }
 0x202   :  { %5598 = vmatpush.bf16.msra.mxu0 %v11278_v53  ;;  %5573 = vmatpush.bf16.msrb.mxu2 %v10598_v31  ;;  %v10121_v53 = vld [vmem:[#allocation7 + $0x650] sm:$0xf]  ;;  %v13500_v31 = vld [vmem:[#allocation7 + $0x3a4] sm:$0xf0] }
 0x203   :  { %5586 = vmatpush.bf16.msrb.mxu3 %v10918_v9  ;;  %v10122_v18 = vor.u32 %v13590_v47, %v10121_v53  ;;  %v10081_v9 = vld [vmem:[#allocation7 + $0x600] sm:$0xf]  ;;  %v9641_v53 = vld [vmem:[#allocation7 + $0x290] sm:$0xf]  ;;  %v13470_v47 = vld [vmem:[#allocation7 + $0x2b4] sm:$0xf0] }
 0x204   :  { %5612 = vmatpush.bf16.msra.mxu1 %v11558_v16  ;;  %v5406_v2 = vpop.f32.mrf.mxu1  ;;  %v9762_v16 = vor.u32 %v13500_v31, %v9761_v1  ;;  %v10082_v38 = vor.u32 %v13580_v4, %v10081_v9  ;;  %v10881_v1 = vld [vmem:[#allocation7 + $0xc40] sm:$0xf]  ;;  %v13780_v31 = vld [vmem:[#allocation7 + $0xc64] sm:$0xf0] }
 0x205   :  { %5574 = vmatmul.bf16.vlgmr.msrb.gmra.mxu2 %v14989_v17  ;;  %v11201_v9 = vld [vmem:[#allocation7 + $0xec0] sm:$0xf]  ;;  %v13860_v4 = vld [vmem:[#allocation7 + $0xee4] sm:$0xf0] }
 0x206   :  { %5599 = vmatpush.bf16.msra.mxu0 %v11238_v29  ;;  %5618 = vmatpush.bf16.msra.mxu2 %v9602_v24  ;;  %v5393_v20 = vpop.f32.mrf.mxu0  ;;  %v9442_v29 = vor.u32 %v13420_v57, %v9441_v8  ;;  %v9401_v24 = vld [vmem:[#allocation7 + $0xb0] sm:$0xf]  ;;  %v13550_v57 = vld [vmem:[#allocation7 + $0x534] sm:$0xf0] }
 0x207   :  { %5631 = vmatpush.bf16.msra.mxu3 %v9922_v41  ;;  %5613 = vmatmul.bf16.vlgmr.msra.gmra.mxu1 %v14995_v45  ;;  %v13410_v41 = vld [vmem:[#allocation7 + $0xd4] sm:$0xf0] }
 0x208   :  { %5657 = vmatpush.bf16.msrb.mxu1 %v10562_v37  ;;  %5587 = vmatmul.bf16.vlgmr.msrb.gmra.mxu3 %v14991_v49 }
 0x209   :  { %5600 = vmatmul.bf16.vlgmr.msra.gmra.mxu0 %v14993_v48 }
 0x20a   :  { %5644 = vmatpush.bf16.msrb.mxu0 %v10242_v52  ;;  %5619 = vmatpush.bf16.msra.mxu2 %v9562_v54  ;;  %v5367_v52 = vpop.f32.mrf.mxu2  ;;  %v13650_v54 = vld [vmem:[#allocation7 + $0x854] sm:$0xf0] }
 0x20b   :  { %5632 = vmatpush.bf16.msra.mxu3 %v9882_v34  ;;  %v5380_v37 = vpop.f32.mrf.mxu3  ;;  %v5368_v25 = vadd.f32 %v5367_v52, %v15026_v35  ;;  %v10362_v26 = vor.u32 %v13650_v54, %v10361_v50  ;;  %v11202_v52 = vor.u32 %v13860_v4, %v11201_v9  ;;  %v11481_v50 = vld [vmem:[#allocation7 + $0x10f0] sm:$0xf]  ;;  %v13930_v54 = vld [vmem:[#allocation7 + $0x1114] sm:$0xf0] }
 0x20c   :  { %5658 = vmatpush.bf16.msrb.mxu1 %v10522_v0  ;;  %v5408_v61 = vpop.f32.mrf.mxu1  ;;  %v9722_v0 = vor.u32 %v13490_v22, %v9721_v51  ;;  %v13770_v51 = vld [vmem:[#allocation7 + $0xc14] sm:$0xf0] }
 0x20d   :  { %v5381_v34 = vadd.f32 %v5380_v37, %v5368_v25  ;;  %v10841_v37 = vld [vmem:[#allocation7 + $0xbf0] sm:$0xf] }
 0x20e   :  { %5645 = vmatpush.bf16.msrb.mxu0 %v10202_v42  ;;  %5620 = vmatpush.bf16.msra.mxu2 %v9522_v33  ;;  %v5395_v12 = vpop.f32.mrf.mxu0  ;;  %v9402_v42 = vor.u32 %v13410_v41, %v9401_v24  ;;  %v10001_v33 = vld [vmem:[#allocation7 + $0x560] sm:$0xf]  ;;  %v14020_v24 = vld [vmem:[#allocation7 + $0x13e4] sm:$0xf0]  ;;  %v11161_v25 = vld [vmem:[#allocation7 + $0xe70] sm:$0xf]  ;;  %v10842_v61 = vor.u32 %v13770_v51, %v10841_v37 }
 0x20f   :  { %5633 = vmatpush.bf16.msra.mxu3 %v9842_v32  ;;  %v5394_v35 = vadd.f32 %v5393_v20, %v5381_v34  ;;  %v13560_v32 = vld [vmem:[#allocation7 + $0x584] sm:$0xf0]  ;;  %v9961_v20 = vld [vmem:[#allocation7 + $0x510] sm:$0xf]  ;;  %v14010_v12 = vld [vmem:[#allocation7 + $0x1394] sm:$0xf0] }
 0x210   :  { %5659 = vmatpush.bf16.msrb.mxu1 %v10482_v46  ;;  %v9362_v46 = vor.u32 %v13400_v30, %v9361_v60  ;;  %v10002_v58 = vor.u32 %v13560_v32, %v10001_v33  ;;  %v9962_v41 = vor.u32 %v13550_v57, %v9961_v20  ;;  %v11801_v34 = vld [vmem:[#allocation7 + $0x1370] sm:$0xf]  ;;  %v13760_v60 = vld [vmem:[#allocation7 + $0xbc4] sm:$0xf0]  ;;  %v11482_v30 = vor.u32 %v13930_v54, %v11481_v50 }
 0x211   :  { %v15033_v23 = vadd.f32 %v5406_v2, %v5394_v35  ;;  %v9642_v2 = vor.u32 %v13470_v47, %v9641_v53  ;;  %v13920_v33 = vld [vmem:[#allocation7 + $0x10c4] sm:$0xf0]  ;;  %v11761_v35 = vld [vmem:[#allocation7 + $0x1320] sm:$0xf]  ;;  %v11081_v53 = vld [vmem:[#allocation7 + $0xdd0] sm:$0xf] }
 0x212   :  { %5646 = vmatpush.bf16.msrb.mxu0 %v10162_v40  ;;  %5621 = vmatpush.bf16.msra.mxu2 %v9482_v28  ;;  %v9321_v40 = vld [vmem:[#allocation7 + $0x10] sm:$0xf]  ;;  %v10322_v28 = vor.u32 %v13640_v43, %v10321_v39  ;;  %v14000_v32 = vld [vmem:[#allocation7 + $0x1344] sm:$0xf0]  ;;  %v13830_v47 = vld [vmem:[#allocation7 + $0xdf4] sm:$0xf0] }
 0x213   :  { %5634 = vmatpush.bf16.msra.mxu3 %v9802_v11  ;;  %v5369_v11 = vpop.f32.mrf.mxu2  ;;  %v5382_v8 = vpop.f32.mrf.mxu3  ;;  %v9322_v56 = vor.u32 %v13390_v44, %v9321_v40  ;;  %v10761_v40 = vld [vmem:[#allocation7 + $0xb50] sm:$0xf]  ;;  %v11762_v44 = vor.u32 %v14000_v32, %v11761_v35  ;;  %v10961_v35 = vld [vmem:[#allocation7 + $0xce0] sm:$0xf]  ;;  %v13800_v32 = vld [vmem:[#allocation7 + $0xd04] sm:$0xf0] }
 0x214   :  { %5660 = vmatpush.bf16.msrb.mxu1 %v10442_v7  ;;  %v13630_v7 = vld [vmem:[#allocation7 + $0x7b4] sm:$0xf0]  ;;  %v11721_v11 = vld [vmem:[#allocation7 + $0x12d0] sm:$0xf] }
 0x215   :  { %v13990_v8 = vld [vmem:[#allocation7 + $0x12f4] sm:$0xf0]  ;;  %v11321_v50 = vld [vmem:[#allocation7 + $0xfb0] sm:$0xf] }
 0x216   :  { %5647 = vmatpush.bf16.msrb.mxu0 %v10122_v18  ;;  %5622 = vmatpush.bf16.msra.mxu2 %v9442_v29  ;;  %v10281_v18 = vld [vmem:[#allocation7 + $0x790] sm:$0xf]  ;;  %v13940_v29 = vld [vmem:[#allocation7 + $0x1164] sm:$0xf0]  ;;  %v11722_v4 = vor.u32 %v13990_v8, %v11721_v11  ;;  %v13790_v11 = vld [vmem:[#allocation7 + $0xcb4] sm:$0xf0] }
 0x217   :  { %5635 = vmatpush.bf16.msra.mxu3 %v9762_v16  ;;  %v11841_v16 = vld [vmem:[#allocation7 + $0x13c0] sm:$0xf]  ;;  %v11522_v22 = vor.u32 %v13940_v29, %v11521_v6  ;;  %v13900_v29 = vld [vmem:[#allocation7 + $0x1024] sm:$0xf0] }
 0x218   :  { %5661 = vmatpush.bf16.msrb.mxu1 %v10402_v14  ;;  %v10882_v14 = vor.u32 %v13780_v31, %v10881_v1  ;;  %v11842_v36 = vor.u32 %v14020_v24, %v11841_v16  ;;  %v10721_v1 = vld [vmem:[#allocation7 + $0xb00] sm:$0xf]  ;;  %v13740_v31 = vld [vmem:[#allocation7 + $0xb24] sm:$0xf0] }
 0x219   :  { %v11041_v6 = vld [vmem:[#allocation7 + $0xd80] sm:$0xf]  ;;  %v13980_v24 = vld [vmem:[#allocation7 + $0x12a4] sm:$0xf0] }
 0x21a   :  { %5648 = vmatpush.bf16.msrb.mxu0 %v10082_v38  ;;  %5623 = vmatpush.bf16.msra.mxu2 %v9402_v42  ;;  %v10282_v38 = vor.u32 %v13630_v7, %v10281_v18  ;;  %v11162_v42 = vor.u32 %v13850_v10, %v11161_v25  ;;  %v11082_v7 = vor.u32 %v13830_v47, %v11081_v53  ;;  %v11681_v16 = vld [vmem:[#allocation7 + $0x1280] sm:$0xf]  ;;  %v11001_v25 = vld [vmem:[#allocation7 + $0xd30] sm:$0xf]  ;;  %v13810_v10 = vld [vmem:[#allocation7 + $0xd54] sm:$0xf0] }
 0x21b   :  { %5636 = vmatpush.bf16.msra.mxu3 %v9722_v0  ;;  %v10801_v0 = vld [vmem:[#allocation7 + $0xba0] sm:$0xf]  ;;  %v11682_v51 = vor.u32 %v13980_v24, %v11681_v16  ;;  %v10962_v47 = vor.u32 %v13800_v32, %v10961_v35  ;;  %v9843_v35 = vld [vmem:[#allocation7 + $0x448] sm:$0xf0]  ;;  %v13595_v32 = vld [vmem:[#allocation7 + $0x6a4] sm:$0xf] }
 0x21c   :  { %5662 = vmatpush.bf16.msrb.mxu1 %v10362_v26  ;;  %v11121_v26 = vld [vmem:[#allocation7 + $0xe20] sm:$0xf]  ;;  %v10802_v39 = vor.u32 %v13760_v60, %v10801_v0 }
 0x21d   :  { %v11122_v43 = vor.u32 %v13840_v3, %v11121_v26  ;;  %v10641_v26 = vld [vmem:[#allocation7 + $0xa60] sm:$0xf]  ;;  %v13720_v3 = vld [vmem:[#allocation7 + $0xa84] sm:$0xf0] }
 0x21e   :  { %5649 = vmatpush.bf16.msrb.mxu0 %v10042_v13  ;;  %5624 = vmatpush.bf16.msra.mxu2 %v9362_v46  ;;  %v11802_v13 = vor.u32 %v14010_v12, %v11801_v34  ;;  %v13750_v46 = vld [vmem:[#allocation7 + $0xb74] sm:$0xf0]  ;;  %v11641_v12 = vld [vmem:[#allocation7 + $0x1230] sm:$0xf]  ;;  %v10642_v53 = vor.u32 %v13720_v3, %v10641_v26  ;;  %v9523_v26 = vld [vmem:[#allocation7 + $0x1c8] sm:$0xf0] }
 0x21f   :  { %5637 = vmatpush.bf16.msra.mxu3 %v9682_v62  ;;  %v11442_v62 = vor.u32 %v13920_v33, %v11441_v5  ;;  %v10762_v18 = vor.u32 %v13750_v46, %v10761_v40  ;;  %v13890_v34 = vld [vmem:[#allocation7 + $0xfd4] sm:$0xf0]  ;;  %v11601_v40 = vld [vmem:[#allocation7 + $0x11e0] sm:$0xf]  ;;  %v13960_v46 = vld [vmem:[#allocation7 + $0x1204] sm:$0xf0] }
 0x220   :  { %5663 = vmatpush.bf16.msrb.mxu1 %v10322_v28  ;;  %v13910_v28 = vld [vmem:[#allocation7 + $0x1074] sm:$0xf0]  ;;  %v11322_v5 = vor.u32 %v13890_v34, %v11321_v50  ;;  %v9883_v34 = vld [vmem:[#allocation7 + $0x498] sm:$0xf0] }
 0x222   :  { %5650 = vmatpush.bf16.msrb.mxu0 %v10002_v58  ;;  %5625 = vmatpush.bf16.msra.mxu2 %v9322_v56  ;;  %v11401_v58 = vld [vmem:[#allocation7 + $0x1050] sm:$0xf]  ;;  %v13820_v56 = vld [vmem:[#allocation7 + $0xda4] sm:$0xf0] }
 0x223   :  { %5638 = vmatpush.bf16.msra.mxu3 %v9642_v2  ;;  %v11402_v9 = vor.u32 %v13910_v28, %v11401_v58  ;;  %v11361_v2 = vld [vmem:[#allocation7 + $0x1000] sm:$0xf]  ;;  %v13710_v58 = vld [vmem:[#allocation7 + $0xa34] sm:$0xf0]  ;;  %v10921_v28 = vld [vmem:[#allocation7 + $0xc90] sm:$0xf] }
 0x224   :  { %5664 = vmatpush.bf16.msrb.mxu1 %v10282_v38  ;;  %v5458_v57 = vpop.f32.mrf.mxu1  ;;  %v11042_v38 = vor.u32 %v13820_v56, %v11041_v6  ;;  %v11362_v37 = vor.u32 %v13900_v29, %v11361_v2  ;;  %v9603_v6 = vld [vmem:[#allocation7 + $0x268] sm:$0xf0]  ;;  %v13535_v56 = vld [vmem:[#allocation7 + $0x4c4] sm:$0xf]  ;;  %v10922_v24 = vor.u32 %v13790_v11, %v10921_v28  ;;  %v13505_v11 = vld [vmem:[#allocation7 + $0x3d4] sm:$0xf] }
 0x225   :  { %5626 = vmatmul.bf16.vlgmr.msra.gmra.mxu2 %v14961_v27  ;;  %v9923_v2 = vld [vmem:[#allocation7 + $0x4e8] sm:$0xf0]  ;;  %v13615_v29 = vld [vmem:[#allocation7 + $0x744] sm:$0xf] }
 0x226   :  { %5651 = vmatpush.bf16.msrb.mxu0 %v9962_v41  ;;  %5670 = vmatpush.bf16.msrb.mxu2 %v10882_v14  ;;  %v5445_v20 = vpop.f32.mrf.mxu0  ;;  %v10722_v41 = vor.u32 %v13740_v31, %v10721_v1  ;;  %v10681_v14 = vld [vmem:[#allocation7 + $0xab0] sm:$0xf]  ;;  %v13870_v31 = vld [vmem:[#allocation7 + $0xf34] sm:$0xf0] }
 0x227   :  { %5683 = vmatpush.bf16.msrb.mxu3 %v11202_v52  ;;  %5665 = vmatmul.bf16.vlgmr.msrb.gmra.mxu1 %v14967_v21  ;;  %v13730_v52 = vld [vmem:[#allocation7 + $0xad4] sm:$0xf0]  ;;  %v11241_v1 = vld [vmem:[#allocation7 + $0xf10] sm:$0xf] }
 0x228   :  { %5709 = vmatpush.bf16.msra.mxu1 %v11842_v36  ;;  %5639 = vmatmul.bf16.vlgmr.msra.gmra.mxu3 %v14963_v55 }
 0x229   :  { %5652 = vmatmul.bf16.vlgmr.msrb.gmra.mxu0 %v14965_v15 }
 0x22a   :  { %5696 = vmatpush.bf16.msra.mxu0 %v11522_v22  ;;  %5671 = vmatpush.bf16.msrb.mxu2 %v10842_v61  ;;  %v5419_v22 = vpop.f32.mrf.mxu2  ;;  %v13970_v61 = vld [vmem:[#allocation7 + $0x1254] sm:$0xf0] }
 0x22b   :  { %5684 = vmatpush.bf16.msrb.mxu3 %v11162_v42  ;;  %v5432_v36 = vpop.f32.mrf.mxu3  ;;  %v11642_v33 = vor.u32 %v13970_v61, %v11641_v12  ;;  %v13605_v12 = vld [vmem:[#allocation7 + $0x6f4] sm:$0xf]  ;;  %v10203_v61 = vld [vmem:[#allocation7 + $0x718] sm:$0xf0] }
 0x22c   :  { %5710 = vmatpush.bf16.msra.mxu1 %v11802_v13  ;;  %v5433_v54 = vadd.f32 %v5432_v36, %v5419_v22  ;;  %v5460_v60 = vpop.f32.mrf.mxu1  ;;  %v11002_v13 = vor.u32 %v13810_v10, %v11001_v25  ;;  %v9926_v22 = vor.u32 %v13535_v56, %v9923_v2  ;;  %v13445_v36 = vld [vmem:[#allocation7 + $0x1f4] sm:$0xf]  ;;  %v9563_v25 = vld [vmem:[#allocation7 + $0x218] sm:$0xf0]  ;;  %v10206_v3 = vor.u32 %v13605_v12, %v10203_v61  ;;  %v9443_v56 = vld [vmem:[#allocation7 + $0x128] sm:$0xf0] }
 0x22d   :  { %v9566_v60 = vor.u32 %v13445_v36, %v9563_v25  ;;  %v9403_v36 = vld [vmem:[#allocation7 + $0xd8] sm:$0xf0]  ;;  %v13565_v61 = vld [vmem:[#allocation7 + $0x5b4] sm:$0xf] }
 0x22e   :  { %5697 = vmatpush.bf16.msra.mxu0 %v11482_v30  ;;  %5672 = vmatpush.bf16.msrb.mxu2 %v10802_v39  ;;  %v5446_v42 = vadd.f32 %v5445_v20, %v5433_v54  ;;  %v5447_v0 = vpop.f32.mrf.mxu0  ;;  %v10682_v30 = vor.u32 %v13730_v52, %v10681_v14  ;;  %v11281_v39 = vld [vmem:[#allocation7 + $0xf60] sm:$0xf]  ;;  %v11602_v20 = vor.u32 %v13960_v46, %v11601_v40  ;;  %v10563_v14 = vld [vmem:[#allocation7 + $0x9e8] sm:$0xf0]  ;;  %v13525_v54 = vld [vmem:[#allocation7 + $0x474] sm:$0xf] }
 0x22f   :  { %5685 = vmatpush.bf16.msrb.mxu3 %v11122_v43  ;;  %v13880_v43 = vld [vmem:[#allocation7 + $0xf84] sm:$0xf0]  ;;  %v11242_v52 = vor.u32 %v13870_v31, %v11241_v1  ;;  %v10523_v0 = vld [vmem:[#allocation7 + $0x998] sm:$0xf0]  ;;  %v10483_v40 = vld [vmem:[#allocation7 + $0x948] sm:$0xf0] }
 0x230   :  { %5711 = vmatpush.bf16.msra.mxu1 %v11762_v44  ;;  %v10601_v44 = vld [vmem:[#allocation7 + $0xa10] sm:$0xf]  ;;  %v11282_v8 = vor.u32 %v13880_v43, %v11281_v39  ;;  %v10163_v39 = vld [vmem:[#allocation7 + $0x6c8] sm:$0xf0]  ;;  %v13675_v43 = vld [vmem:[#allocation7 + $0x924] sm:$0xf] }
 0x231   :  { %v10602_v16 = vor.u32 %v13710_v58, %v10601_v44  ;;  %v10166_v58 = vor.u32 %v13595_v32, %v10163_v39  ;;  %v10486_v28 = vor.u32 %v13675_v43, %v10483_v40  ;;  %v10443_v1 = vld [vmem:[#allocation7 + $0x8f8] sm:$0xf0]  ;;  %v9363_v32 = vld [vmem:[#allocation7 + $0x88] sm:$0xf0]  ;;  %v13475_v40 = vld [vmem:[#allocation7 + $0x2e4] sm:$0xf] }
 0x232   :  { %5698 = vmatpush.bf16.msra.mxu0 %v11442_v62  ;;  %5673 = vmatpush.bf16.msrb.mxu2 %v10762_v18  ;;  %v15039_v62 = vadd.f32 %v5458_v57, %v5446_v42  ;;  %v5421_v18 = vpop.f32.mrf.mxu2  ;;  %v13455_v57 = vld [vmem:[#allocation7 + $0x244] sm:$0xf]  ;;  %v13685_v42 = vld [vmem:[#allocation7 + $0x974] sm:$0xf]  ;;  %v9723_v12 = vld [vmem:[#allocation7 + $0x358] sm:$0xf0] }
 0x233   :  { %5686 = vmatpush.bf16.msrb.mxu3 %v11082_v7  ;;  %v5434_v7 = vpop.f32.mrf.mxu3  ;;  %v10123_v18 = vld [vmem:[#allocation7 + $0x678] sm:$0xf0] }
 0x234   :  { %5712 = vmatpush.bf16.msra.mxu1 %v11722_v4  ;;  %v13950_v4 = vld [vmem:[#allocation7 + $0x11b4] sm:$0xf0]  ;;  %v13665_v7 = vld [vmem:[#allocation7 + $0x8d4] sm:$0xf] }
 0x236   :  { %5699 = vmatpush.bf16.msra.mxu0 %v11402_v9  ;;  %5674 = vmatpush.bf16.msrb.mxu2 %v10722_v41  ;;  %v11561_v9 = vld [vmem:[#allocation7 + $0x1190] sm:$0xf]  ;;  %v10243_v41 = vld [vmem:[#allocation7 + $0x768] sm:$0xf0] }
 0x237   :  { %5687 = vmatpush.bf16.msrb.mxu3 %v11042_v38  ;;  %v13695_v38 = vld [vmem:[#allocation7 + $0x9c4] sm:$0xf]  ;;  %v10246_v10 = vor.u32 %v13615_v29, %v10243_v41  ;;  %v10446_v29 = vor.u32 %v13665_v7, %v10443_v1  ;;  %v9643_v7 = vld [vmem:[#allocation7 + $0x2b8] sm:$0xf0] }
 0x238   :  { %5713 = vmatpush.bf16.msra.mxu1 %v11682_v51  ;;  %v9606_v51 = vor.u32 %v13455_v57, %v9603_v6  ;;  %v10566_v50 = vor.u32 %v13695_v38, %v10563_v14  ;;  %v13415_v6 = vld [vmem:[#allocation7 + $0x104] sm:$0xf]  ;;  %v10083_v38 = vld [vmem:[#allocation7 + $0x628] sm:$0xf0] }
 0x239   :  { %v13575_v41 = vld [vmem:[#allocation7 + $0x604] sm:$0xf] }
 0x23a   :  { %5700 = vmatpush.bf16.msra.mxu0 %v11362_v37  ;;  %5675 = vmatpush.bf16.msrb.mxu2 %v10682_v30  ;;  %v11562_v37 = vor.u32 %v13950_v4, %v11561_v9  ;;  %v9886_v30 = vor.u32 %v13525_v54, %v9883_v34  ;;  %v13655_v14 = vld [vmem:[#allocation7 + $0x884] sm:$0xf]  ;;  %v10086_v25 = vor.u32 %v13575_v41, %v10083_v38  ;;  %v13485_v34 = vld [vmem:[#allocation7 + $0x334] sm:$0xf]  ;;  %v10883_v41 = vld [vmem:[#allocation7 + $0xc68] sm:$0xf0] }
 0x23b   :  { %5688 = vmatpush.bf16.msrb.mxu3 %v11002_v13  ;;  %v13435_v13 = vld [vmem:[#allocation7 + $0x1a4] sm:$0xf] }
 0x23c   :  { %5714 = vmatpush.bf16.msra.mxu1 %v11642_v33  ;;  %v13515_v33 = vld [vmem:[#allocation7 + $0x424] sm:$0xf]  ;;  %v9526_v46 = vor.u32 %v13435_v13, %v9523_v26 }
 0x23d   :  { %v9846_v44 = vor.u32 %v13515_v33, %v9843_v35  ;;  %v9726_v33 = vor.u32 %v13485_v34, %v9723_v12  ;;  %v13395_v35 = vld [vmem:[#allocation7 + $0x64] sm:$0xf]  ;;  %v13765_v34 = vld [vmem:[#allocation7 + $0xbf4] sm:$0xf]  ;;  %v10843_v12 = vld [vmem:[#allocation7 + $0xc18] sm:$0xf0] }
 0x23e   :  { %5701 = vmatpush.bf16.msra.mxu0 %v11322_v5  ;;  %5676 = vmatpush.bf16.msrb.mxu2 %v10642_v53  ;;  %v10526_v5 = vor.u32 %v13685_v42, %v10523_v0  ;;  %v13425_v53 = vld [vmem:[#allocation7 + $0x154] sm:$0xf]  ;;  %v10043_v0 = vld [vmem:[#allocation7 + $0x5d8] sm:$0xf0]  ;;  %v13855_v38 = vld [vmem:[#allocation7 + $0xec4] sm:$0xf] }
 0x23f   :  { %5689 = vmatpush.bf16.msrb.mxu3 %v10962_v47  ;;  %v9483_v47 = vld [vmem:[#allocation7 + $0x178] sm:$0xf0]  ;;  %v10046_v39 = vor.u32 %v13565_v61, %v10043_v0  ;;  %v13845_v0 = vld [vmem:[#allocation7 + $0xe74] sm:$0xf] }
 0x240   :  { %5715 = vmatpush.bf16.msra.mxu1 %v11602_v20  ;;  %v13585_v20 = vld [vmem:[#allocation7 + $0x654] sm:$0xf]  ;;  %v9486_v4 = vor.u32 %v13425_v53, %v9483_v47  ;;  %v10003_v53 = vld [vmem:[#allocation7 + $0x588] sm:$0xf0]  ;;  %v13635_v47 = vld [vmem:[#allocation7 + $0x7e4] sm:$0xf] }
 0x241   :  { %v10126_v2 = vor.u32 %v13585_v20, %v10123_v18  ;;  %v9323_v20 = vld [vmem:[#allocation7 + $0x38] sm:$0xf0]  ;;  %v13465_v18 = vld [vmem:[#allocation7 + $0x294] sm:$0xf] }
 0x242   :  { %5702 = vmatpush.bf16.msra.mxu0 %v11282_v8  ;;  %5677 = vmatpush.bf16.msrb.mxu2 %v10602_v16  ;;  %v9803_v8 = vld [vmem:[#allocation7 + $0x3f8] sm:$0xf0]  ;;  %v13495_v16 = vld [vmem:[#allocation7 + $0x384] sm:$0xf] }
 0x243   :  { %5690 = vmatpush.bf16.msrb.mxu3 %v10922_v24  ;;  %v9806_v57 = vor.u32 %v13505_v11, %v9803_v8  ;;  %v9763_v24 = vld [vmem:[#allocation7 + $0x3a8] sm:$0xf0]  ;;  %v9366_v11 = vor.u32 %v13395_v35, %v9363_v32  ;;  %v13755_v35 = vld [vmem:[#allocation7 + $0xba4] sm:$0xf] }
 0x244   :  { %5716 = vmatpush.bf16.msra.mxu1 %v11562_v37  ;;  %v5510_v9 = vpop.f32.mrf.mxu1  ;;  %v9446_v37 = vor.u32 %v13415_v6, %v9443_v56  ;;  %v10803_v32 = vld [vmem:[#allocation7 + $0xbc8] sm:$0xf0] }
 0x245   :  { %5678 = vmatmul.bf16.vlgmr.msrb.gmra.mxu2 %v14989_v17 }
 0x246   :  { %5703 = vmatpush.bf16.msra.mxu0 %v11242_v52  ;;  %5722 = vmatpush.bf16.msra.mxu2 %v9606_v51  ;;  %v5497_v31 = vpop.f32.mrf.mxu0  ;;  %v10403_v52 = vld [vmem:[#allocation7 + $0x8a8] sm:$0xf0]  ;;  %v9766_v51 = vor.u32 %v13495_v16, %v9763_v24  ;;  %v10283_v16 = vld [vmem:[#allocation7 + $0x7b8] sm:$0xf0]  ;;  %v13775_v24 = vld [vmem:[#allocation7 + $0xc44] sm:$0xf] }
 0x247   :  { %5735 = vmatpush.bf16.msra.mxu3 %v9926_v22  ;;  %5717 = vmatmul.bf16.vlgmr.msra.gmra.mxu1 %v14995_v45  ;;  %v13405_v22 = vld [vmem:[#allocation7 + $0xb4] sm:$0xf] }
 0x248   :  { %5761 = vmatpush.bf16.msrb.mxu1 %v10566_v50  ;;  %5691 = vmatmul.bf16.vlgmr.msrb.gmra.mxu3 %v14991_v49  ;;  %v5471_v50 = vpop.f32.mrf.mxu2 }
 0x249   :  { %5704 = vmatmul.bf16.vlgmr.msra.gmra.mxu0 %v14993_v48  ;;  %v5472_v42 = vadd.f32 %v5471_v50, %v15039_v62  ;;  %v10886_v50 = vor.u32 %v13775_v24, %v10883_v41  ;;  %v13735_v41 = vld [vmem:[#allocation7 + $0xb04] sm:$0xf] }
 0x24a   :  { %5748 = vmatpush.bf16.msrb.mxu0 %v10246_v10  ;;  %5723 = vmatpush.bf16.msra.mxu2 %v9566_v60  ;;  %v10406_v10 = vor.u32 %v13655_v14, %v10403_v52  ;;  %v13645_v60 = vld [vmem:[#allocation7 + $0x834] sm:$0xf]  ;;  %v11203_v14 = vld [vmem:[#allocation7 + $0xee8] sm:$0xf0]  ;;  %v13935_v52 = vld [vmem:[#allocation7 + $0x1144] sm:$0xf] }
 0x24b   :  { %5736 = vmatpush.bf16.msra.mxu3 %v9886_v30  ;;  %v5484_v54 = vpop.f32.mrf.mxu3  ;;  %v10363_v30 = vld [vmem:[#allocation7 + $0x858] sm:$0xf0] }
 0x24c   :  { %5762 = vmatpush.bf16.msrb.mxu1 %v10526_v5  ;;  %v5485_v13 = vadd.f32 %v5484_v54, %v5472_v42  ;;  %v9406_v5 = vor.u32 %v13405_v22, %v9403_v36  ;;  %v10366_v43 = vor.u32 %v13645_v60, %v10363_v30  ;;  %v14015_v22 = vld [vmem:[#allocation7 + $0x13c4] sm:$0xf]  ;;  %v11843_v36 = vld [vmem:[#allocation7 + $0x13e8] sm:$0xf0]  ;;  %v11206_v54 = vor.u32 %v13855_v38, %v11203_v14  ;;  %v11163_v60 = vld [vmem:[#allocation7 + $0xe98] sm:$0xf0] }
 0x24d   :  { %v11846_v42 = vor.u32 %v14015_v22, %v11843_v36  ;;  %v13925_v30 = vld [vmem:[#allocation7 + $0x10f4] sm:$0xf]  ;;  %v10723_v38 = vld [vmem:[#allocation7 + $0xb28] sm:$0xf0]  ;;  %v13975_v36 = vld [vmem:[#allocation7 + $0x1284] sm:$0xf] }
 0x24e   :  { %5749 = vmatpush.bf16.msrb.mxu0 %v10206_v3  ;;  %5724 = vmatpush.bf16.msra.mxu2 %v9526_v46  ;;  %v5499_v26 = vpop.f32.mrf.mxu0  ;;  %v5512_v3 = vpop.f32.mrf.mxu1  ;;  %v9683_v46 = vld [vmem:[#allocation7 + $0x308] sm:$0xf0]  ;;  %v5498_v62 = vadd.f32 %v5497_v31, %v5485_v13  ;;  %v13545_v31 = vld [vmem:[#allocation7 + $0x514] sm:$0xf]  ;;  %v11483_v13 = vld [vmem:[#allocation7 + $0x1118] sm:$0xf0] }
 0x24f   :  { %5737 = vmatpush.bf16.msra.mxu3 %v9846_v44  ;;  %v13555_v44 = vld [vmem:[#allocation7 + $0x564] sm:$0xf]  ;;  %v9686_v8 = vor.u32 %v13475_v40, %v9683_v46  ;;  %v14005_v26 = vld [vmem:[#allocation7 + $0x1374] sm:$0xf]  ;;  %v11803_v3 = vld [vmem:[#allocation7 + $0x1398] sm:$0xf0] }
 0x250   :  { %5763 = vmatpush.bf16.msrb.mxu1 %v10486_v28  ;;  %v13385_v28 = vld [vmem:[#allocation7 + $0x14] sm:$0xf]  ;;  %v15046_v1 = vadd.f32 %v5510_v9, %v5498_v62  ;;  %v5473_v6 = vpop.f32.mrf.mxu2  ;;  %v9646_v9 = vor.u32 %v13465_v18, %v9643_v7  ;;  %v13835_v40 = vld [vmem:[#allocation7 + $0xe24] sm:$0xf]  ;;  %v11123_v46 = vld [vmem:[#allocation7 + $0xe48] sm:$0xf0] }
 0x251   :  { %v11443_v62 = vld [vmem:[#allocation7 + $0x10c8] sm:$0xf0]  ;;  %v13825_v7 = vld [vmem:[#allocation7 + $0xdd4] sm:$0xf]  ;;  %v11403_v6 = vld [vmem:[#allocation7 + $0x1078] sm:$0xf0] }
 0x252   :  { %5750 = vmatpush.bf16.msrb.mxu0 %v10166_v58  ;;  %5725 = vmatpush.bf16.msra.mxu2 %v9486_v4  ;;  %v10323_v58 = vld [vmem:[#allocation7 + $0x808] sm:$0xf0]  ;;  %v10006_v4 = vor.u32 %v13555_v44, %v10003_v53  ;;  %v13915_v44 = vld [vmem:[#allocation7 + $0x10a4] sm:$0xf] }
 0x253   :  { %5738 = vmatpush.bf16.msra.mxu3 %v9806_v57  ;;  %v10326_v57 = vor.u32 %v13635_v47, %v10323_v58  ;;  %v5486_v56 = vpop.f32.mrf.mxu3  ;;  %v13995_v53 = vld [vmem:[#allocation7 + $0x1324] sm:$0xf]  ;;  %v11763_v47 = vld [vmem:[#allocation7 + $0x1348] sm:$0xf0]  ;;  %v10806_v58 = vor.u32 %v13755_v35, %v10803_v32 }
 0x254   :  { %5764 = vmatpush.bf16.msrb.mxu1 %v10446_v29  ;;  %v13625_v29 = vld [vmem:[#allocation7 + $0x794] sm:$0xf]  ;;  %v11766_v18 = vor.u32 %v13995_v53, %v11763_v47  ;;  %v11363_v22 = vld [vmem:[#allocation7 + $0x1028] sm:$0xf0]  ;;  %v13795_v47 = vld [vmem:[#allocation7 + $0xce4] sm:$0xf] }
 0x255   :  { %v13985_v56 = vld [vmem:[#allocation7 + $0x12d4] sm:$0xf] }
 0x256   :  { %5751 = vmatpush.bf16.msrb.mxu0 %v10126_v2  ;;  %5726 = vmatpush.bf16.msra.mxu2 %v9446_v37  ;;  %v9963_v2 = vld [vmem:[#allocation7 + $0x538] sm:$0xf0]  ;;  %v9326_v37 = vor.u32 %v13385_v28, %v9323_v20  ;;  %v11126_v28 = vor.u32 %v13835_v40, %v11123_v46  ;;  %v11446_v20 = vor.u32 %v13915_v44, %v11443_v62  ;;  %v13715_v46 = vld [vmem:[#allocation7 + $0xa64] sm:$0xf]  ;;  %v10643_v44 = vld [vmem:[#allocation7 + $0xa88] sm:$0xf0] }
 0x257   :  { %5739 = vmatpush.bf16.msra.mxu3 %v9766_v51  ;;  %v11523_v51 = vld [vmem:[#allocation7 + $0x1168] sm:$0xf0] }
 0x258   :  { %5765 = vmatpush.bf16.msrb.mxu1 %v10406_v10  ;;  %v10286_v10 = vor.u32 %v13625_v29, %v10283_v16  ;;  %v11526_v61 = vor.u32 %v13935_v52, %v11523_v51  ;;  %v13895_v51 = vld [vmem:[#allocation7 + $0x1004] sm:$0xf] }
 0x25a   :  { %5752 = vmatpush.bf16.msrb.mxu0 %v10086_v25  ;;  %5727 = vmatpush.bf16.msra.mxu2 %v9406_v5  ;;  %v9966_v25 = vor.u32 %v13545_v31, %v9963_v2  ;;  %v10846_v5 = vor.u32 %v13765_v34, %v10843_v12  ;;  %v11723_v31 = vld [vmem:[#allocation7 + $0x12f8] sm:$0xf0]  ;;  %v11366_v12 = vor.u32 %v13895_v51, %v11363_v22  ;;  %v9929_v51 = vld [vmem:[#allocation7 + $0x4c8] sm:$0xf]  ;;  %v13541_v22 = vld [vmem:[#allocation7 + $0x4ec] sm:$0xf0] }
 0x25b   :  { %5740 = vmatpush.bf16.msra.mxu3 %v9726_v33  ;;  %v11166_v33 = vor.u32 %v13845_v0, %v11163_v60  ;;  %v11726_v52 = vor.u32 %v13985_v56, %v11723_v31  ;;  %v10683_v34 = vld [vmem:[#allocation7 + $0xad8] sm:$0xf0]  ;;  %v13805_v60 = vld [vmem:[#allocation7 + $0xd34] sm:$0xf] }
 0x25c   :  { %5766 = vmatpush.bf16.msrb.mxu1 %v10366_v43  ;;  %v11806_v43 = vor.u32 %v14005_v26, %v11803_v3  ;;  %v11323_v3 = vld [vmem:[#allocation7 + $0xfd8] sm:$0xf0]  ;;  %v13785_v56 = vld [vmem:[#allocation7 + $0xc94] sm:$0xf] }
 0x25d   :  { %v10923_v31 = vld [vmem:[#allocation7 + $0xcb8] sm:$0xf0] }
 0x25e   :  { %5753 = vmatpush.bf16.msrb.mxu0 %v10046_v39  ;;  %5728 = vmatpush.bf16.msra.mxu2 %v9366_v11  ;;  %v11486_v39 = vor.u32 %v13925_v30, %v11483_v13  ;;  %v13745_v11 = vld [vmem:[#allocation7 + $0xb54] sm:$0xf]  ;;  %v11003_v30 = vld [vmem:[#allocation7 + $0xd58] sm:$0xf0] }
 0x25f   :  { %5741 = vmatpush.bf16.msra.mxu3 %v9686_v8  ;;  %v10763_v8 = vld [vmem:[#allocation7 + $0xb78] sm:$0xf0]  ;;  %v13885_v13 = vld [vmem:[#allocation7 + $0xfb4] sm:$0xf]  ;;  %v11006_v40 = vor.u32 %v13805_v60, %v11003_v30  ;;  %v9569_v60 = vld [vmem:[#allocation7 + $0x1f8] sm:$0xf] }
 0x260   :  { %5767 = vmatpush.bf16.msrb.mxu1 %v10326_v57  ;;  %v13905_v57 = vld [vmem:[#allocation7 + $0x1054] sm:$0xf]  ;;  %v10766_v16 = vor.u32 %v13745_v11, %v10763_v8  ;;  %v11326_v62 = vor.u32 %v13885_v13, %v11323_v3  ;;  %v11283_v11 = vld [vmem:[#allocation7 + $0xf88] sm:$0xf0]  ;;  %v13955_v8 = vld [vmem:[#allocation7 + $0x11e4] sm:$0xf] }
 0x261   :  { %v11406_v14 = vor.u32 %v13905_v57, %v11403_v6  ;;  %v10603_v6 = vld [vmem:[#allocation7 + $0xa38] sm:$0xf0]  ;;  %v13451_v30 = vld [vmem:[#allocation7 + $0x21c] sm:$0xf0]  ;;  %v9889_v3 = vld [vmem:[#allocation7 + $0x478] sm:$0xf] }
 0x262   :  { %5754 = vmatpush.bf16.msrb.mxu0 %v10006_v4  ;;  %5729 = vmatpush.bf16.msra.mxu2 %v9326_v37  ;;  %v11083_v4 = vld [vmem:[#allocation7 + $0xdf8] sm:$0xf0]  ;;  %v13815_v37 = vld [vmem:[#allocation7 + $0xd84] sm:$0xf] }
 0x263   :  { %5742 = vmatpush.bf16.msra.mxu3 %v9646_v9  ;;  %v11086_v24 = vor.u32 %v13825_v7, %v11083_v4  ;;  %v11043_v9 = vld [vmem:[#allocation7 + $0xda8] sm:$0xf0]  ;;  %v13705_v7 = vld [vmem:[#allocation7 + $0xa14] sm:$0xf]  ;;  %v10646_v4 = vor.u32 %v13715_v46, %v10643_v44  ;;  %v9529_v46 = vld [vmem:[#allocation7 + $0x1a8] sm:$0xf] }
 0x264   :  { %5768 = vmatpush.bf16.msrb.mxu1 %v10286_v10  ;;  %v5562_v29 = vpop.f32.mrf.mxu1  ;;  %v10726_v10 = vor.u32 %v13735_v41, %v10723_v38  ;;  %v13865_v38 = vld [vmem:[#allocation7 + $0xf14] sm:$0xf]  ;;  %v13441_v44 = vld [vmem:[#allocation7 + $0x1cc] sm:$0xf0] }
 0x265   :  { %5730 = vmatmul.bf16.vlgmr.msra.gmra.mxu2 %v14961_v27 }
 0x266   :  { %5755 = vmatpush.bf16.msrb.mxu0 %v9966_v25  ;;  %5774 = vmatpush.bf16.msrb.mxu2 %v10886_v50  ;;  %v5549_v2 = vpop.f32.mrf.mxu0  ;;  %v11683_v25 = vld [vmem:[#allocation7 + $0x12a8] sm:$0xf0]  ;;  %v11046_v50 = vor.u32 %v13815_v37, %v11043_v9  ;;  %v11563_v37 = vld [vmem:[#allocation7 + $0x11b8] sm:$0xf0]  ;;  %v13461_v9 = vld [vmem:[#allocation7 + $0x26c] sm:$0xf0] }
 0x267   :  { %5787 = vmatpush.bf16.msrb.mxu3 %v11206_v54  ;;  %5769 = vmatmul.bf16.vlgmr.msrb.gmra.mxu1 %v14967_v21  ;;  %v13725_v54 = vld [vmem:[#allocation7 + $0xab4] sm:$0xf] }
 0x268   :  { %5813 = vmatpush.bf16.msra.mxu1 %v11846_v42  ;;  %5743 = vmatmul.bf16.vlgmr.msra.gmra.mxu3 %v14963_v55  ;;  %v5523_v42 = vpop.f32.mrf.mxu2 }
 0x269   :  { %5756 = vmatmul.bf16.vlgmr.msrb.gmra.mxu0 %v14965_v15 }
 0x26a   :  { %5800 = vmatpush.bf16.msra.mxu0 %v11526_v61  ;;  %5775 = vmatpush.bf16.msrb.mxu2 %v10846_v5  ;;  %v11686_v61 = vor.u32 %v13975_v36, %v11683_v25  ;;  %v13965_v5 = vld [vmem:[#allocation7 + $0x1234] sm:$0xf]  ;;  %v10249_v36 = vld [vmem:[#allocation7 + $0x748] sm:$0xf]  ;;  %v10606_v25 = vor.u32 %v13705_v7, %v10603_v6  ;;  %v9530_v7 = vor.u32 %v13441_v44, %v9529_v46  ;;  %v13431_v6 = vld [vmem:[#allocation7 + $0x17c] sm:$0xf0] }
 0x26b   :  { %5788 = vmatpush.bf16.msrb.mxu3 %v11166_v33  ;;  %v5536_v0 = vpop.f32.mrf.mxu3  ;;  %v11643_v33 = vld [vmem:[#allocation7 + $0x1258] sm:$0xf0]  ;;  %v13651_v46 = vld [vmem:[#allocation7 + $0x85c] sm:$0xf0] }
 0x26c   :  { %5814 = vmatpush.bf16.msra.mxu1 %v11806_v43  ;;  %v5537_v26 = vadd.f32 %v5536_v0, %v5523_v42  ;;  %v10686_v43 = vor.u32 %v13725_v54, %v10683_v34  ;;  %v11646_v53 = vor.u32 %v13965_v5, %v11643_v33  ;;  %v10569_v54 = vld [vmem:[#allocation7 + $0x9c8] sm:$0xf]  ;;  %v13701_v34 = vld [vmem:[#allocation7 + $0x9ec] sm:$0xf0]  ;;  %v9930_v0 = vor.u32 %v13541_v22, %v9929_v51  ;;  %v13531_v5 = vld [vmem:[#allocation7 + $0x49c] sm:$0xf0] }
 0x26d   :  { %v10209_v33 = vld [vmem:[#allocation7 + $0x6f8] sm:$0xf]  ;;  %v9449_v51 = vld [vmem:[#allocation7 + $0x108] sm:$0xf]  ;;  %v13421_v22 = vld [vmem:[#allocation7 + $0x12c] sm:$0xf0] }
 0x26e   :  { %5801 = vmatpush.bf16.msra.mxu0 %v11486_v39  ;;  %5776 = vmatpush.bf16.msrb.mxu2 %v10806_v58  ;;  %v5550_v35 = vadd.f32 %v5549_v2, %v5537_v26  ;;  %v5551_v32 = vpop.f32.mrf.mxu0  ;;  %v5564_v39 = vpop.f32.mrf.mxu1  ;;  %v10963_v58 = vld [vmem:[#allocation7 + $0xd08] sm:$0xf0]  ;;  %v10570_v26 = vor.u32 %v13701_v34, %v10569_v54  ;;  %v10089_v54 = vld [vmem:[#allocation7 + $0x608] sm:$0xf]  ;;  %v13581_v34 = vld [vmem:[#allocation7 + $0x62c] sm:$0xf0] }
 0x26f   :  { %5789 = vmatpush.bf16.msrb.mxu3 %v11126_v28  ;;  %v13875_v28 = vld [vmem:[#allocation7 + $0xf64] sm:$0xf]  ;;  %v10966_v57 = vor.u32 %v13795_v47, %v10963_v58  ;;  %v10529_v32 = vld [vmem:[#allocation7 + $0x978] sm:$0xf]  ;;  %v13691_v39 = vld [vmem:[#allocation7 + $0x99c] sm:$0xf0] }
 0x270   :  { %5815 = vmatpush.bf16.msra.mxu1 %v11766_v18  ;;  %v15052_v18 = vadd.f32 %v5562_v29, %v5550_v35  ;;  %v11286_v2 = vor.u32 %v13875_v28, %v11283_v11  ;;  %v9609_v29 = vld [vmem:[#allocation7 + $0x248] sm:$0xf]  ;;  %v13611_v35 = vld [vmem:[#allocation7 + $0x71c] sm:$0xf0]  ;;  %v13521_v58 = vld [vmem:[#allocation7 + $0x44c] sm:$0xf0] }
 0x271   :  { %v9610_v42 = vor.u32 %v13461_v9, %v9609_v29  ;;  %v9849_v47 = vld [vmem:[#allocation7 + $0x428] sm:$0xf]  ;;  %v13601_v11 = vld [vmem:[#allocation7 + $0x6cc] sm:$0xf0] }
 0x272   :  { %5802 = vmatpush.bf16.msra.mxu0 %v11446_v20  ;;  %5777 = vmatpush.bf16.msrb.mxu2 %v10766_v16  ;;  %v11603_v20 = vld [vmem:[#allocation7 + $0x1208] sm:$0xf0]  ;;  %v10169_v28 = vld [vmem:[#allocation7 + $0x6a8] sm:$0xf] }
 0x273   :  { %5790 = vmatpush.bf16.msrb.mxu3 %v11086_v24  ;;  %v11606_v16 = vor.u32 %v13955_v8, %v11603_v20  ;;  %v5525_v24 = vpop.f32.mrf.mxu2  ;;  %v5538_v41 = vpop.f32.mrf.mxu3  ;;  %v10489_v8 = vld [vmem:[#allocation7 + $0x928] sm:$0xf]  ;;  %v13681_v20 = vld [vmem:[#allocation7 + $0x94c] sm:$0xf0] }
 0x274   :  { %5816 = vmatpush.bf16.msra.mxu1 %v11726_v52  ;;  %v13945_v52 = vld [vmem:[#allocation7 + $0x1194] sm:$0xf]  ;;  %v10129_v24 = vld [vmem:[#allocation7 + $0x658] sm:$0xf]  ;;  %v13591_v41 = vld [vmem:[#allocation7 + $0x67c] sm:$0xf0] }
 0x276   :  { %5803 = vmatpush.bf16.msra.mxu0 %v11406_v14  ;;  %5778 = vmatpush.bf16.msrb.mxu2 %v10726_v10  ;;  %v11243_v14 = vld [vmem:[#allocation7 + $0xf38] sm:$0xf0]  ;;  %v10926_v10 = vor.u32 %v13785_v56, %v10923_v31  ;;  %v10170_v56 = vor.u32 %v13601_v11, %v10169_v28  ;;  %v10490_v31 = vor.u32 %v13681_v20, %v10489_v8  ;;  %v9369_v28 = vld [vmem:[#allocation7 + $0x68] sm:$0xf]  ;;  %v13401_v11 = vld [vmem:[#allocation7 + $0x8c] sm:$0xf0] }
 0x277   :  { %5791 = vmatpush.bf16.msrb.mxu3 %v11046_v50  ;;  %v13621_v50 = vld [vmem:[#allocation7 + $0x76c] sm:$0xf0] }
 0x278   :  { %5817 = vmatpush.bf16.msra.mxu1 %v11686_v61  ;;  %v11566_v61 = vor.u32 %v13945_v52, %v11563_v37  ;;  %v10250_v13 = vor.u32 %v13621_v50, %v10249_v36  ;;  %v10130_v36 = vor.u32 %v13591_v41, %v10129_v24  ;;  %v13501_v50 = vld [vmem:[#allocation7 + $0x3ac] sm:$0xf0]  ;;  %v13391_v41 = vld [vmem:[#allocation7 + $0x3c] sm:$0xf0] }
 0x27a   :  { %5804 = vmatpush.bf16.msra.mxu0 %v11366_v12  ;;  %5779 = vmatpush.bf16.msrb.mxu2 %v10686_v43  ;;  %v11246_v12 = vor.u32 %v13865_v38, %v11243_v14  ;;  %v9570_v43 = vor.u32 %v13451_v30, %v9569_v60  ;;  %v10449_v38 = vld [vmem:[#allocation7 + $0x8d8] sm:$0xf]  ;;  %v13671_v14 = vld [vmem:[#allocation7 + $0x8fc] sm:$0xf0] }
 0x27b   :  { %5792 = vmatpush.bf16.msrb.mxu3 %v11006_v40  ;;  %v9890_v40 = vor.u32 %v13531_v5, %v9889_v3  ;;  %v9409_v60 = vld [vmem:[#allocation7 + $0xb8] sm:$0xf]  ;;  %v13411_v30 = vld [vmem:[#allocation7 + $0xdc] sm:$0xf0] }
 0x27c   :  { %5818 = vmatpush.bf16.msra.mxu1 %v11646_v53  ;;  %v10530_v53 = vor.u32 %v13691_v39, %v10529_v32  ;;  %v10049_v32 = vld [vmem:[#allocation7 + $0x5b8] sm:$0xf] }
 0x27e   :  { %5805 = vmatpush.bf16.msra.mxu0 %v11326_v62  ;;  %5780 = vmatpush.bf16.msrb.mxu2 %v10646_v4  ;;  %v10210_v62 = vor.u32 %v13611_v35, %v10209_v33  ;;  %v9850_v4 = vor.u32 %v13521_v58, %v9849_v47  ;;  %v9729_v33 = vld [vmem:[#allocation7 + $0x338] sm:$0xf]  ;;  %v13491_v35 = vld [vmem:[#allocation7 + $0x35c] sm:$0xf0]  ;;  %v9410_v47 = vor.u32 %v13411_v30, %v9409_v60  ;;  %v13941_v60 = vld [vmem:[#allocation7 + $0x116c] sm:$0xf0] }
 0x27f   :  { %5793 = vmatpush.bf16.msrb.mxu3 %v10966_v57  ;;  %v9489_v57 = vld [vmem:[#allocation7 + $0x158] sm:$0xf]  ;;  %v9730_v58 = vor.u32 %v13491_v35, %v9729_v33  ;;  %v11849_v30 = vld [vmem:[#allocation7 + $0x13c8] sm:$0xf] }
 0x280   :  { %5819 = vmatpush.bf16.msra.mxu1 %v11606_v16  ;;  %v13511_v16 = vld [vmem:[#allocation7 + $0x3fc] sm:$0xf0]  ;;  %v9490_v29 = vor.u32 %v13431_v6, %v9489_v57  ;;  %v10009_v57 = vld [vmem:[#allocation7 + $0x568] sm:$0xf]  ;;  %v13561_v6 = vld [vmem:[#allocation7 + $0x58c] sm:$0xf0] }
 0x281   :  { %v10849_v35 = vld [vmem:[#allocation7 + $0xbf8] sm:$0xf] }
 0x282   :  { %5806 = vmatpush.bf16.msra.mxu0 %v11286_v2  ;;  %5781 = vmatpush.bf16.msrb.mxu2 %v10606_v25  ;;  %v9809_v2 = vld [vmem:[#allocation7 + $0x3d8] sm:$0xf]  ;;  %v10450_v25 = vor.u32 %v13671_v14, %v10449_v38  ;;  %v13471_v14 = vld [vmem:[#allocation7 + $0x2bc] sm:$0xf0] }
 0x283   :  { %5794 = vmatpush.bf16.msrb.mxu3 %v10926_v10  ;;  %v9810_v9 = vor.u32 %v13511_v16, %v9809_v2  ;;  %v9769_v10 = vld [vmem:[#allocation7 + $0x388] sm:$0xf]  ;;  %v9329_v2 = vld [vmem:[#allocation7 + $0x18] sm:$0xf]  ;;  %v9370_v16 = vor.u32 %v13401_v11, %v9369_v28 }
 0x284   :  { %5820 = vmatpush.bf16.msra.mxu1 %v11566_v61  ;;  %v5614_v37 = vpop.f32.mrf.mxu1  ;;  %v13661_v61 = vld [vmem:[#allocation7 + $0x8ac] sm:$0xf0]  ;;  %v9649_v38 = vld [vmem:[#allocation7 + $0x298] sm:$0xf]  ;;  %v10809_v11 = vld [vmem:[#allocation7 + $0xba8] sm:$0xf] }
 0x285   :  { %5782 = vmatmul.bf16.vlgmr.msrb.gmra.mxu2 %v14989_v17 }
 0x286   :  { %5807 = vmatpush.bf16.msra.mxu0 %v11246_v12  ;;  %5826 = vmatpush.bf16.msra.mxu2 %v9610_v42  ;;  %v5601_v52 = vpop.f32.mrf.mxu0  ;;  %v10409_v12 = vld [vmem:[#allocation7 + $0x888] sm:$0xf]  ;;  %v9450_v42 = vor.u32 %v13421_v22, %v9449_v51 }
 0x287   :  { %5839 = vmatpush.bf16.msra.mxu3 %v9930_v0  ;;  %5821 = vmatmul.bf16.vlgmr.msra.gmra.mxu1 %v14995_v45  ;;  %v9770_v0 = vor.u32 %v13501_v50, %v9769_v10  ;;  %v10289_v10 = vld [vmem:[#allocation7 + $0x798] sm:$0xf]  ;;  %v13631_v50 = vld [vmem:[#allocation7 + $0x7bc] sm:$0xf0] }
 0x288   :  { %5865 = vmatpush.bf16.msrb.mxu1 %v10570_v26  ;;  %5795 = vmatmul.bf16.vlgmr.msrb.gmra.mxu3 %v14991_v49  ;;  %v10410_v26 = vor.u32 %v13661_v61, %v10409_v12  ;;  %v5575_v3 = vpop.f32.mrf.mxu2  ;;  %v11209_v12 = vld [vmem:[#allocation7 + $0xec8] sm:$0xf]  ;;  %v13861_v61 = vld [vmem:[#allocation7 + $0xeec] sm:$0xf0] }
 0x289   :  { %5808 = vmatmul.bf16.vlgmr.msra.gmra.mxu0 %v14993_v48  ;;  %v5576_v39 = vadd.f32 %v5575_v3, %v15052_v18  ;;  %v10290_v3 = vor.u32 %v13631_v50, %v10289_v10  ;;  %v11210_v33 = vor.u32 %v13861_v61, %v11209_v12  ;;  %v10729_v12 = vld [vmem:[#allocation7 + $0xb08] sm:$0xf]  ;;  %v13741_v61 = vld [vmem:[#allocation7 + $0xb2c] sm:$0xf0] }
 0x28a   :  { %5852 = vmatpush.bf16.msrb.mxu0 %v10250_v13  ;;  %5827 = vmatpush.bf16.msra.mxu2 %v9570_v43  ;;  %v10090_v13 = vor.u32 %v13581_v34, %v10089_v54  ;;  %v13571_v43 = vld [vmem:[#allocation7 + $0x5dc] sm:$0xf0]  ;;  %v10889_v54 = vld [vmem:[#allocation7 + $0xc48] sm:$0xf]  ;;  %v13781_v34 = vld [vmem:[#allocation7 + $0xc6c] sm:$0xf0] }
 0x28b   :  { %5840 = vmatpush.bf16.msra.mxu3 %v9890_v40  ;;  %v5588_v5 = vpop.f32.mrf.mxu3  ;;  %v10369_v40 = vld [vmem:[#allocation7 + $0x838] sm:$0xf]  ;;  %v10050_v8 = vor.u32 %v13571_v43, %v10049_v32  ;;  %v13771_v32 = vld [vmem:[#allocation7 + $0xc1c] sm:$0xf0] }
 0x28c   :  { %5866 = vmatpush.bf16.msrb.mxu1 %v10530_v53  ;;  %v5589_v44 = vadd.f32 %v5588_v5, %v5576_v39  ;;  %v5616_v53 = vpop.f32.mrf.mxu1  ;;  %v10370_v20 = vor.u32 %v13651_v46, %v10369_v40  ;;  %v10890_v5 = vor.u32 %v13781_v34, %v10889_v54  ;;  %v11169_v40 = vld [vmem:[#allocation7 + $0xe78] sm:$0xf]  ;;  %v13851_v46 = vld [vmem:[#allocation7 + $0xe9c] sm:$0xf0] }
 0x28d   :  { %v11809_v53 = vld [vmem:[#allocation7 + $0x1378] sm:$0xf]  ;;  %v11170_v28 = vor.u32 %v13851_v46, %v11169_v40 }
 0x28e   :  { %5853 = vmatpush.bf16.msrb.mxu0 %v10210_v62  ;;  %5828 = vmatpush.bf16.msra.mxu2 %v9530_v7  ;;  %v5603_v62 = vpop.f32.mrf.mxu0  ;;  %v9689_v7 = vld [vmem:[#allocation7 + $0x2e8] sm:$0xf]  ;;  %v5602_v18 = vadd.f32 %v5601_v52, %v5589_v44  ;;  %v9969_v52 = vld [vmem:[#allocation7 + $0x518] sm:$0xf] }
 0x28f   :  { %5841 = vmatpush.bf16.msra.mxu3 %v9850_v4  ;;  %v13481_v4 = vld [vmem:[#allocation7 + $0x30c] sm:$0xf0]  ;;  %v11489_v44 = vld [vmem:[#allocation7 + $0x10f8] sm:$0xf]  ;;  %v13931_v62 = vld [vmem:[#allocation7 + $0x111c] sm:$0xf0] }
 0x290   :  { %5867 = vmatpush.bf16.msrb.mxu1 %v10490_v31  ;;  %v13641_v31 = vld [vmem:[#allocation7 + $0x80c] sm:$0xf0]  ;;  %v9690_v24 = vor.u32 %v13481_v4, %v9689_v7  ;;  %v5577_v22 = vpop.f32.mrf.mxu2  ;;  %v11129_v4 = vld [vmem:[#allocation7 + $0xe28] sm:$0xf] }
 0x291   :  { %v11409_v22 = vld [vmem:[#allocation7 + $0x1058] sm:$0xf] }
 0x292   :  { %5854 = vmatpush.bf16.msrb.mxu0 %v10170_v56  ;;  %5829 = vmatpush.bf16.msra.mxu2 %v9490_v29  ;;  %v10329_v56 = vld [vmem:[#allocation7 + $0x7e8] sm:$0xf]  ;;  %v15059_v29 = vadd.f32 %v5614_v37, %v5602_v18  ;;  %v9650_v37 = vor.u32 %v13471_v14, %v9649_v38 }
 0x293   :  { %5842 = vmatpush.bf16.msra.mxu3 %v9810_v9  ;;  %v10010_v9 = vor.u32 %v13561_v6, %v10009_v57  ;;  %v10330_v51 = vor.u32 %v13641_v31, %v10329_v56  ;;  %v13841_v57 = vld [vmem:[#allocation7 + $0xe4c] sm:$0xf0]  ;;  %v11449_v18 = vld [vmem:[#allocation7 + $0x10a8] sm:$0xf] }
 0x294   :  { %5868 = vmatpush.bf16.msrb.mxu1 %v10450_v25  ;;  %v13551_v25 = vld [vmem:[#allocation7 + $0x53c] sm:$0xf0]  ;;  %v13921_v6 = vld [vmem:[#allocation7 + $0x10cc] sm:$0xf0]  ;;  %v11769_v56 = vld [vmem:[#allocation7 + $0x1328] sm:$0xf] }
 0x295   :  { %v14001_v31 = vld [vmem:[#allocation7 + $0x134c] sm:$0xf0]  ;;  %v11450_v38 = vor.u32 %v13921_v6, %v11449_v18  ;;  %v10649_v18 = vld [vmem:[#allocation7 + $0xa68] sm:$0xf] }
 0x296   :  { %5855 = vmatpush.bf16.msrb.mxu0 %v10130_v36  ;;  %5830 = vmatpush.bf16.msra.mxu2 %v9450_v42  ;;  %v5590_v36 = vpop.f32.mrf.mxu3  ;;  %v11529_v42 = vld [vmem:[#allocation7 + $0x1148] sm:$0xf]  ;;  %v11770_v14 = vor.u32 %v14001_v31, %v11769_v56  ;;  %v13721_v6 = vld [vmem:[#allocation7 + $0xa8c] sm:$0xf0] }
 0x297   :  { %5843 = vmatpush.bf16.msra.mxu3 %v9770_v0  ;;  %v9330_v0 = vor.u32 %v13391_v41, %v9329_v2  ;;  %v11530_v39 = vor.u32 %v13941_v60, %v11529_v42  ;;  %v13751_v41 = vld [vmem:[#allocation7 + $0xb7c] sm:$0xf0]  ;;  %v13821_v60 = vld [vmem:[#allocation7 + $0xdac] sm:$0xf0] }
 0x298   :  { %5869 = vmatpush.bf16.msrb.mxu1 %v10410_v26  ;;  %v9970_v26 = vor.u32 %v13551_v25, %v9969_v52  ;;  %v13911_v36 = vld [vmem:[#allocation7 + $0x107c] sm:$0xf0]  ;;  %v11729_v52 = vld [vmem:[#allocation7 + $0x12d8] sm:$0xf] }
 0x299   :  { %v13991_v25 = vld [vmem:[#allocation7 + $0x12fc] sm:$0xf0]  ;;  %v11410_v42 = vor.u32 %v13911_v36, %v11409_v22  ;;  %v10650_v22 = vor.u32 %v13721_v6, %v10649_v18  ;;  %v13436_v6 = vld [vmem:[#allocation7 + $0x1ac] sm:$0xf] }
 0x29a   :  { %5856 = vmatpush.bf16.msrb.mxu0 %v10090_v13  ;;  %5831 = vmatpush.bf16.msra.mxu2 %v9410_v47  ;;  %v14021_v13 = vld [vmem:[#allocation7 + $0x13ec] sm:$0xf0]  ;;  %v14011_v47 = vld [vmem:[#allocation7 + $0x139c] sm:$0xf0] }
 0x29b   :  { %5844 = vmatpush.bf16.msra.mxu3 %v9730_v58  ;;  %v11850_v43 = vor.u32 %v14021_v13, %v11849_v30  ;;  %v10850_v58 = vor.u32 %v13771_v32, %v10849_v35  ;;  %v11810_v7 = vor.u32 %v14011_v47, %v11809_v53  ;;  %v11369_v30 = vld [vmem:[#allocation7 + $0x1008] sm:$0xf]  ;;  %v13901_v13 = vld [vmem:[#allocation7 + $0x102c] sm:$0xf0]  ;;  %v10689_v35 = vld [vmem:[#allocation7 + $0xab8] sm:$0xf] }
 0x29c   :  { %5870 = vmatpush.bf16.msrb.mxu1 %v10370_v20  ;;  %v11490_v20 = vor.u32 %v13931_v62, %v11489_v44  ;;  %v13731_v32 = vld [vmem:[#allocation7 + $0xadc] sm:$0xf0]  ;;  %v11009_v44 = vld [vmem:[#allocation7 + $0xd38] sm:$0xf] }
 0x29d   :  { %v13811_v62 = vld [vmem:[#allocation7 + $0xd5c] sm:$0xf0]  ;;  %v11329_v53 = vld [vmem:[#allocation7 + $0xfb8] sm:$0xf] }
 0x29e   :  { %5857 = vmatpush.bf16.msrb.mxu0 %v10050_v8  ;;  %5832 = vmatpush.bf16.msra.mxu2 %v9370_v16  ;;  %v13761_v8 = vld [vmem:[#allocation7 + $0xbcc] sm:$0xf0]  ;;  %v11130_v16 = vor.u32 %v13841_v57, %v11129_v4  ;;  %v10690_v4 = vor.u32 %v13731_v32, %v10689_v35  ;;  %v11010_v57 = vor.u32 %v13811_v62, %v11009_v44  ;;  %v10251_v35 = vld [vmem:[#allocation7 + $0x770] sm:$0xf0]  ;;  %v13696_v32 = vld [vmem:[#allocation7 + $0x9cc] sm:$0xf] }
 0x29f   :  { %5845 = vmatpush.bf16.msra.mxu3 %v9690_v24  ;;  %v10810_v2 = vor.u32 %v13761_v8, %v10809_v11  ;;  %v10769_v24 = vld [vmem:[#allocation7 + $0xb58] sm:$0xf]  ;;  %v13971_v11 = vld [vmem:[#allocation7 + $0x125c] sm:$0xf0]  ;;  %v13446_v62 = vld [vmem:[#allocation7 + $0x1fc] sm:$0xf] }
 0x2a0   :  { %5871 = vmatpush.bf16.msrb.mxu1 %v10330_v51  ;;  %v13831_v51 = vld [vmem:[#allocation7 + $0xdfc] sm:$0xf0]  ;;  %v10770_v54 = vor.u32 %v13751_v41, %v10769_v24  ;;  %v11289_v24 = vld [vmem:[#allocation7 + $0xf68] sm:$0xf]  ;;  %v13881_v41 = vld [vmem:[#allocation7 + $0xf8c] sm:$0xf0] }
 0x2a2   :  { %5858 = vmatpush.bf16.msrb.mxu0 %v10010_v9  ;;  %5833 = vmatpush.bf16.msra.mxu2 %v9330_v0  ;;  %v11089_v9 = vld [vmem:[#allocation7 + $0xdd8] sm:$0xf]  ;;  %v11730_v0 = vor.u32 %v13991_v25, %v11729_v52  ;;  %v13711_v52 = vld [vmem:[#allocation7 + $0xa3c] sm:$0xf0] }
 0x2a3   :  { %5846 = vmatpush.bf16.msra.mxu3 %v9650_v37  ;;  %v11090_v34 = vor.u32 %v13831_v51, %v11089_v9  ;;  %v11049_v37 = vld [vmem:[#allocation7 + $0xd88] sm:$0xf]  ;;  %v10609_v51 = vld [vmem:[#allocation7 + $0xa18] sm:$0xf] }
 0x2a4   :  { %5872 = vmatpush.bf16.msrb.mxu1 %v10290_v3  ;;  %v5666_v50 = vpop.f32.mrf.mxu1  ;;  %v13981_v3 = vld [vmem:[#allocation7 + $0x12ac] sm:$0xf0]  ;;  %v10929_v25 = vld [vmem:[#allocation7 + $0xc98] sm:$0xf] }
 0x2a5   :  { %5834 = vmatmul.bf16.vlgmr.msra.gmra.mxu2 %v14961_v27 }
 0x2a6   :  { %5859 = vmatpush.bf16.msrb.mxu0 %v9970_v26  ;;  %5878 = vmatpush.bf16.msrb.mxu2 %v10890_v5  ;;  %v5653_v10 = vpop.f32.mrf.mxu0  ;;  %v11689_v26 = vld [vmem:[#allocation7 + $0x1288] sm:$0xf]  ;;  %v10730_v5 = vor.u32 %v13741_v61, %v10729_v12 }
 0x2a7   :  { %5891 = vmatpush.bf16.msrb.mxu3 %v11210_v33  ;;  %5873 = vmatmul.bf16.vlgmr.msrb.gmra.mxu1 %v14967_v21  ;;  %v11050_v33 = vor.u32 %v13821_v60, %v11049_v37  ;;  %v11569_v37 = vld [vmem:[#allocation7 + $0x1198] sm:$0xf]  ;;  %v13951_v60 = vld [vmem:[#allocation7 + $0x11bc] sm:$0xf0] }
 0x2a8   :  { %5917 = vmatpush.bf16.msra.mxu1 %v11850_v43  ;;  %5847 = vmatmul.bf16.vlgmr.msra.gmra.mxu3 %v14963_v55  ;;  %v11690_v43 = vor.u32 %v13981_v3, %v11689_v26  ;;  %v5627_v40 = vpop.f32.mrf.mxu2  ;;  %v9931_v26 = vld [vmem:[#allocation7 + $0x4f0] sm:$0xf0]  ;;  %v13616_v3 = vld [vmem:[#allocation7 + $0x74c] sm:$0xf] }
 0x2a9   :  { %5860 = vmatmul.bf16.vlgmr.msrb.gmra.mxu0 %v14965_v15 }
 0x2aa   :  { %5904 = vmatpush.bf16.msra.mxu0 %v11530_v39  ;;  %5879 = vmatpush.bf16.msrb.mxu2 %v10850_v58  ;;  %v11370_v39 = vor.u32 %v13901_v13, %v11369_v30  ;;  %v13891_v58 = vld [vmem:[#allocation7 + $0xfdc] sm:$0xf0]  ;;  %v9611_v30 = vld [vmem:[#allocation7 + $0x270] sm:$0xf0]  ;;  %v13536_v13 = vld [vmem:[#allocation7 + $0x4cc] sm:$0xf] }
 0x2ab   :  { %5892 = vmatpush.bf16.msrb.mxu3 %v11170_v28  ;;  %v5640_v46 = vpop.f32.mrf.mxu3  ;;  %v11649_v28 = vld [vmem:[#allocation7 + $0x1238] sm:$0xf]  ;;  %v11330_v56 = vor.u32 %v13891_v58, %v11329_v53  ;;  %v9934_v44 = vor.u32 %v13536_v13, %v9931_v26  ;;  %v9571_v53 = vld [vmem:[#allocation7 + $0x220] sm:$0xf0]  ;;  %v13416_v26 = vld [vmem:[#allocation7 + $0x10c] sm:$0xf] }
 0x2ac   :  { %5918 = vmatpush.bf16.msra.mxu1 %v11810_v7  ;;  %v5641_v47 = vadd.f32 %v5640_v46, %v5627_v40  ;;  %v5668_v7 = vpop.f32.mrf.mxu1  ;;  %v11650_v31 = vor.u32 %v13971_v11, %v11649_v28  ;;  %v11570_v40 = vor.u32 %v13951_v60, %v11569_v37  ;;  %v13526_v28 = vld [vmem:[#allocation7 + $0x47c] sm:$0xf]  ;;  %v9891_v11 = vld [vmem:[#allocation7 + $0x4a0] sm:$0xf0] }
 0x2ad   :  { %v13686_v7 = vld [vmem:[#allocation7 + $0x97c] sm:$0xf]  ;;  %v9894_v18 = vor.u32 %v13526_v28, %v9891_v11  ;;  %v10451_v37 = vld [vmem:[#allocation7 + $0x900] sm:$0xf0] }
 0x2ae   :  { %5905 = vmatpush.bf16.msra.mxu0 %v11490_v20  ;;  %5880 = vmatpush.bf16.msrb.mxu2 %v10810_v2  ;;  %v5654_v8 = vadd.f32 %v5653_v10, %v5641_v47  ;;  %v5655_v20 = vpop.f32.mrf.mxu0  ;;  %v10969_v2 = vld [vmem:[#allocation7 + $0xce8] sm:$0xf]  ;;  %v13791_v10 = vld [vmem:[#allocation7 + $0xcbc] sm:$0xf0]  ;;  %v10254_v47 = vor.u32 %v13616_v3, %v10251_v35  ;;  %v9451_v3 = vld [vmem:[#allocation7 + $0x130] sm:$0xf0] }
 0x2af   :  { %5893 = vmatpush.bf16.msrb.mxu3 %v11130_v16  ;;  %v13801_v16 = vld [vmem:[#allocation7 + $0xd0c] sm:$0xf0]  ;;  %v10211_v20 = vld [vmem:[#allocation7 + $0x720] sm:$0xf0]  ;;  %v13496_v35 = vld [vmem:[#allocation7 + $0x38c] sm:$0xf] }
 0x2b0   :  { %5919 = vmatpush.bf16.msra.mxu1 %v11770_v14  ;;  %v13961_v14 = vld [vmem:[#allocation7 + $0x120c] sm:$0xf0]  ;;  %v15065_v9 = vadd.f32 %v5666_v50, %v5654_v8  ;;  %v10970_v36 = vor.u32 %v13801_v16, %v10969_v2  ;;  %v5629_v12 = vpop.f32.mrf.mxu2  ;;  %v13456_v50 = vld [vmem:[#allocation7 + $0x24c] sm:$0xf]  ;;  %v13606_v8 = vld [vmem:[#allocation7 + $0x6fc] sm:$0xf] }
 0x2b1   :  { %v9614_v46 = vor.u32 %v13456_v50, %v9611_v30  ;;  %v13516_v16 = vld [vmem:[#allocation7 + $0x42c] sm:$0xf]  ;;  %v9811_v12 = vld [vmem:[#allocation7 + $0x400] sm:$0xf0] }
 0x2b2   :  { %5906 = vmatpush.bf16.msra.mxu0 %v11450_v38  ;;  %5881 = vmatpush.bf16.msrb.mxu2 %v10770_v54  ;;  %v11609_v38 = vld [vmem:[#allocation7 + $0x11e8] sm:$0xf]  ;;  %v11290_v54 = vor.u32 %v13881_v41, %v11289_v24  ;;  %v9851_v24 = vld [vmem:[#allocation7 + $0x450] sm:$0xf0]  ;;  %v13596_v41 = vld [vmem:[#allocation7 + $0x6ac] sm:$0xf] }
 0x2b3   :  { %5894 = vmatpush.bf16.msrb.mxu3 %v11090_v34  ;;  %v11610_v34 = vor.u32 %v13961_v14, %v11609_v38  ;;  %v5642_v61 = vpop.f32.mrf.mxu3  ;;  %v10171_v38 = vld [vmem:[#allocation7 + $0x6d0] sm:$0xf0]  ;;  %v13676_v14 = vld [vmem:[#allocation7 + $0x92c] sm:$0xf] }
 0x2b4   :  { %5920 = vmatpush.bf16.msra.mxu1 %v11730_v0  ;;  %v13871_v0 = vld [vmem:[#allocation7 + $0xf3c] sm:$0xf0]  ;;  %v13586_v61 = vld [vmem:[#allocation7 + $0x65c] sm:$0xf] }
 0x2b6   :  { %5907 = vmatpush.bf16.msra.mxu0 %v11410_v42  ;;  %5882 = vmatpush.bf16.msrb.mxu2 %v10730_v5  ;;  %v11249_v42 = vld [vmem:[#allocation7 + $0xf18] sm:$0xf]  ;;  %v10610_v5 = vor.u32 %v13711_v52, %v10609_v51  ;;  %v10491_v51 = vld [vmem:[#allocation7 + $0x950] sm:$0xf0]  ;;  %v13426_v52 = vld [vmem:[#allocation7 + $0x15c] sm:$0xf] }
 0x2b7   :  { %5895 = vmatpush.bf16.msrb.mxu3 %v11050_v33  ;;  %v10930_v33 = vor.u32 %v13791_v10, %v10929_v25  ;;  %v9491_v25 = vld [vmem:[#allocation7 + $0x180] sm:$0xf0]  ;;  %v10174_v10 = vor.u32 %v13596_v41, %v10171_v38  ;;  %v13396_v38 = vld [vmem:[#allocation7 + $0x6c] sm:$0xf] }
 0x2b8   :  { %5921 = vmatpush.bf16.msra.mxu1 %v11690_v43  ;;  %v11250_v43 = vor.u32 %v13871_v0, %v11249_v42  ;;  %v10131_v42 = vld [vmem:[#allocation7 + $0x680] sm:$0xf0]  ;;  %v13666_v0 = vld [vmem:[#allocation7 + $0x8dc] sm:$0xf]  ;;  %v9494_v30 = vor.u32 %v13426_v52, %v9491_v25  ;;  %v9691_v52 = vld [vmem:[#allocation7 + $0x310] sm:$0xf0] }
 0x2b9   :  { %v13556_v25 = vld [vmem:[#allocation7 + $0x56c] sm:$0xf] }
 0x2ba   :  { %5908 = vmatpush.bf16.msra.mxu0 %v11370_v39  ;;  %5883 = vmatpush.bf16.msrb.mxu2 %v10690_v4  ;;  %v10571_v39 = vld [vmem:[#allocation7 + $0x9f0] sm:$0xf0]  ;;  %v10531_v4 = vld [vmem:[#allocation7 + $0x9a0] sm:$0xf0] }
 0x2bb   :  { %5896 = vmatpush.bf16.msrb.mxu3 %v11010_v57  ;;  %v10574_v58 = vor.u32 %v13696_v32, %v10571_v39  ;;  %v9574_v57 = vor.u32 %v13446_v62, %v9571_v53  ;;  %v10534_v2 = vor.u32 %v13686_v7, %v10531_v4  ;;  %v9771_v32 = vld [vmem:[#allocation7 + $0x3b0] sm:$0xf0]  ;;  %v13576_v39 = vld [vmem:[#allocation7 + $0x60c] sm:$0xf]  ;;  %v13406_v53 = vld [vmem:[#allocation7 + $0xbc] sm:$0xf] }
 0x2bc   :  { %5922 = vmatpush.bf16.msra.mxu1 %v11650_v31  ;;  %v10214_v31 = vor.u32 %v13606_v8, %v10211_v20  ;;  %v9774_v62 = vor.u32 %v13496_v35, %v9771_v32  ;;  %v13486_v20 = vld [vmem:[#allocation7 + $0x33c] sm:$0xf]  ;;  %v9731_v7 = vld [vmem:[#allocation7 + $0x360] sm:$0xf0] }
 0x2bd   :  { %v13566_v4 = vld [vmem:[#allocation7 + $0x5bc] sm:$0xf]  ;;  %v9734_v41 = vor.u32 %v13486_v20, %v9731_v7  ;;  %v9971_v35 = vld [vmem:[#allocation7 + $0x540] sm:$0xf0] }
 0x2be   :  { %5909 = vmatpush.bf16.msra.mxu0 %v11330_v56  ;;  %5884 = vmatpush.bf16.msrb.mxu2 %v10650_v22  ;;  %v9531_v56 = vld [vmem:[#allocation7 + $0x1d0] sm:$0xf0]  ;;  %v13626_v32 = vld [vmem:[#allocation7 + $0x79c] sm:$0xf] }
 0x2bf   :  { %5897 = vmatpush.bf16.msrb.mxu3 %v10970_v36  ;;  %v9534_v22 = vor.u32 %v13436_v6, %v9531_v56  ;;  %v9854_v36 = vor.u32 %v13516_v16, %v9851_v24  ;;  %v13646_v6 = vld [vmem:[#allocation7 + $0x83c] sm:$0xf]  ;;  %v10371_v56 = vld [vmem:[#allocation7 + $0x860] sm:$0xf0] }
 0x2c0   :  { %5923 = vmatpush.bf16.msra.mxu1 %v11610_v34  ;;  %v13506_v34 = vld [vmem:[#allocation7 + $0x3dc] sm:$0xf] }
 0x2c1   :  { %v9814_v13 = vor.u32 %v13506_v34, %v9811_v12  ;;  %v10331_v34 = vld [vmem:[#allocation7 + $0x810] sm:$0xf0]  ;;  %v13386_v12 = vld [vmem:[#allocation7 + $0x1c] sm:$0xf] }
 0x2c2   :  { %5910 = vmatpush.bf16.msra.mxu0 %v11290_v54  ;;  %5885 = vmatpush.bf16.msrb.mxu2 %v10610_v5  ;;  %v10494_v54 = vor.u32 %v13676_v14, %v10491_v51  ;;  %v10134_v5 = vor.u32 %v13586_v61, %v10131_v42  ;;  %v9371_v14 = vld [vmem:[#allocation7 + $0x90] sm:$0xf0] }
 0x2c3   :  { %5898 = vmatpush.bf16.msrb.mxu3 %v10930_v33  ;;  %v10454_v33 = vor.u32 %v13666_v0, %v10451_v37  ;;  %v9374_v61 = vor.u32 %v13396_v38, %v9371_v14  ;;  %v9331_v0 = vld [vmem:[#allocation7 + $0x40] sm:$0xf0]  ;;  %v13466_v37 = vld [vmem:[#allocation7 + $0x29c] sm:$0xf] }
 0x2c4   :  { %5924 = vmatpush.bf16.msra.mxu1 %v11570_v40  ;;  %v5718_v50 = vpop.f32.mrf.mxu1  ;;  %v13656_v40 = vld [vmem:[#allocation7 + $0x88c] sm:$0xf] }
 0x2c5   :  { %5886 = vmatmul.bf16.vlgmr.msrb.gmra.mxu2 %v14989_v17 }
 0x2c6   :  { %5911 = vmatpush.bf16.msra.mxu0 %v11250_v43  ;;  %5930 = vmatpush.bf16.msra.mxu2 %v9614_v46  ;;  %v5705_v60 = vpop.f32.mrf.mxu0  ;;  %v10091_v43 = vld [vmem:[#allocation7 + $0x630] sm:$0xf0] }
 0x2c7   :  { %5943 = vmatpush.bf16.msra.mxu3 %v9934_v44  ;;  %5925 = vmatmul.bf16.vlgmr.msra.gmra.mxu1 %v14995_v45  ;;  %v10411_v46 = vld [vmem:[#allocation7 + $0x8b0] sm:$0xf0]  ;;  %v9454_v44 = vor.u32 %v13416_v26, %v9451_v3 }
 0x2c8   :  { %5969 = vmatpush.bf16.msrb.mxu1 %v10574_v58  ;;  %5899 = vmatmul.bf16.vlgmr.msrb.gmra.mxu3 %v14991_v49  ;;  %v10094_v58 = vor.u32 %v13576_v39, %v10091_v43  ;;  %v10414_v28 = vor.u32 %v13656_v40, %v10411_v46  ;;  %v5679_v11 = vpop.f32.mrf.mxu2  ;;  %v10291_v39 = vld [vmem:[#allocation7 + $0x7c0] sm:$0xf0]  ;;  %v13776_v43 = vld [vmem:[#allocation7 + $0xc4c] sm:$0xf]  ;;  %v10891_v40 = vld [vmem:[#allocation7 + $0xc70] sm:$0xf0] }
 0x2c9   :  { %5912 = vmatmul.bf16.vlgmr.msra.gmra.mxu0 %v14993_v48  ;;  %v13856_v46 = vld [vmem:[#allocation7 + $0xecc] sm:$0xf]  ;;  %v10894_v20 = vor.u32 %v13776_v43, %v10891_v40 }
 0x2ca   :  { %5956 = vmatpush.bf16.msrb.mxu0 %v10254_v47  ;;  %5931 = vmatpush.bf16.msra.mxu2 %v9574_v57  ;;  %v9411_v47 = vld [vmem:[#allocation7 + $0xe0] sm:$0xf0]  ;;  %v5680_v57 = vadd.f32 %v5679_v11, %v15065_v9 }
 0x2cb   :  { %5944 = vmatpush.bf16.msra.mxu3 %v9894_v18  ;;  %v5692_v8 = vpop.f32.mrf.mxu3  ;;  %v10051_v18 = vld [vmem:[#allocation7 + $0x5e0] sm:$0xf0]  ;;  %v9414_v24 = vor.u32 %v13406_v53, %v9411_v47  ;;  %v9334_v53 = vor.u32 %v13386_v12, %v9331_v0  ;;  %v11531_v47 = vld [vmem:[#allocation7 + $0x1170] sm:$0xf0]  ;;  %v13746_v0 = vld [vmem:[#allocation7 + $0xb5c] sm:$0xf] }
 0x2cc   :  { %5970 = vmatpush.bf16.msrb.mxu1 %v10534_v2  ;;  %v5720_v16 = vpop.f32.mrf.mxu1  ;;  %v10054_v51 = vor.u32 %v13566_v4, %v10051_v18  ;;  %v13766_v4 = vld [vmem:[#allocation7 + $0xbfc] sm:$0xf]  ;;  %v11771_v12 = vld [vmem:[#allocation7 + $0x1350] sm:$0xf0] }
 0x2cd   :  { %v11491_v16 = vld [vmem:[#allocation7 + $0x1120] sm:$0xf0] }
 0x2ce   :  { %5957 = vmatpush.bf16.msrb.mxu0 %v10214_v31  ;;  %5932 = vmatpush.bf16.msra.mxu2 %v9534_v22  ;;  %v5693_v31 = vadd.f32 %v5692_v8, %v5680_v57  ;;  %v5707_v2 = vpop.f32.mrf.mxu0  ;;  %v10374_v22 = vor.u32 %v13646_v6, %v10371_v56  ;;  %v10294_v8 = vor.u32 %v13626_v32, %v10291_v39  ;;  %v10851_v57 = vld [vmem:[#allocation7 + $0xc20] sm:$0xf0]  ;;  %v13846_v56 = vld [vmem:[#allocation7 + $0xe7c] sm:$0xf] }
 0x2cf   :  { %5945 = vmatpush.bf16.msra.mxu3 %v9854_v36  ;;  %v13476_v36 = vld [vmem:[#allocation7 + $0x2ec] sm:$0xf]  ;;  %v13926_v2 = vld [vmem:[#allocation7 + $0x10fc] sm:$0xf]  ;;  %v10854_v38 = vor.u32 %v13766_v4, %v10851_v57  ;;  %v11731_v32 = vld [vmem:[#allocation7 + $0x1300] sm:$0xf0] }
 0x2d0   :  { %5971 = vmatpush.bf16.msrb.mxu1 %v10494_v54  ;;  %v5706_v9 = vadd.f32 %v5705_v60, %v5693_v31  ;;  %v13636_v54 = vld [vmem:[#allocation7 + $0x7ec] sm:$0xf]  ;;  %v9694_v42 = vor.u32 %v13476_v36, %v9691_v52  ;;  %v13546_v60 = vld [vmem:[#allocation7 + $0x51c] sm:$0xf]  ;;  %v11171_v31 = vld [vmem:[#allocation7 + $0xea0] sm:$0xf0]  ;;  %v11494_v36 = vor.u32 %v13926_v2, %v11491_v16 }
 0x2d1   :  { %v10334_v3 = vor.u32 %v13636_v54, %v10331_v34  ;;  %v9974_v11 = vor.u32 %v13546_v60, %v9971_v35  ;;  %v11174_v14 = vor.u32 %v13846_v56, %v11171_v31  ;;  %v11451_v54 = vld [vmem:[#allocation7 + $0x10d0] sm:$0xf0]  ;;  %v13996_v34 = vld [vmem:[#allocation7 + $0x132c] sm:$0xf]  ;;  %v11411_v60 = vld [vmem:[#allocation7 + $0x1080] sm:$0xf0] }
 0x2d2   :  { %5958 = vmatpush.bf16.msrb.mxu0 %v10174_v10  ;;  %5933 = vmatpush.bf16.msra.mxu2 %v9494_v30  ;;  %v10011_v10 = vld [vmem:[#allocation7 + $0x590] sm:$0xf0]  ;;  %v9651_v30 = vld [vmem:[#allocation7 + $0x2c0] sm:$0xf0]  ;;  %v13986_v35 = vld [vmem:[#allocation7 + $0x12dc] sm:$0xf] }
 0x2d3   :  { %5946 = vmatpush.bf16.msra.mxu3 %v9814_v13  ;;  %v15072_v13 = vadd.f32 %v5718_v50, %v5706_v9  ;;  %v10014_v26 = vor.u32 %v13556_v25, %v10011_v10  ;;  %v9654_v50 = vor.u32 %v13466_v37, %v9651_v30  ;;  %v13836_v25 = vld [vmem:[#allocation7 + $0xe2c] sm:$0xf]  ;;  %v11131_v9 = vld [vmem:[#allocation7 + $0xe50] sm:$0xf0]  ;;  %v10771_v37 = vld [vmem:[#allocation7 + $0xb80] sm:$0xf0] }
 0x2d4   :  { %5972 = vmatpush.bf16.msrb.mxu1 %v10454_v33  ;;  %v5694_v33 = vpop.f32.mrf.mxu3  ;;  %v13916_v10 = vld [vmem:[#allocation7 + $0x10ac] sm:$0xf]  ;;  %v10774_v40 = vor.u32 %v13746_v0, %v10771_v37  ;;  %v13726_v57 = vld [vmem:[#allocation7 + $0xabc] sm:$0xf]  ;;  %v10971_v0 = vld [vmem:[#allocation7 + $0xd10] sm:$0xf0] }
 0x2d5   :  { %v11454_v30 = vor.u32 %v13916_v10, %v11451_v54  ;;  %v13906_v33 = vld [vmem:[#allocation7 + $0x105c] sm:$0xf]  ;;  %v13716_v54 = vld [vmem:[#allocation7 + $0xa6c] sm:$0xf] }
 0x2d6   :  { %5959 = vmatpush.bf16.msrb.mxu0 %v10134_v5  ;;  %5934 = vmatpush.bf16.msra.mxu2 %v9454_v44  ;;  %v5681_v5 = vpop.f32.mrf.mxu2  ;;  %v11211_v44 = vld [vmem:[#allocation7 + $0xef0] sm:$0xf0]  ;;  %v13806_v16 = vld [vmem:[#allocation7 + $0xd3c] sm:$0xf]  ;;  %v13876_v37 = vld [vmem:[#allocation7 + $0xf6c] sm:$0xf] }
 0x2d7   :  { %5947 = vmatpush.bf16.msra.mxu3 %v9774_v62  ;;  %v13936_v62 = vld [vmem:[#allocation7 + $0x114c] sm:$0xf]  ;;  %v11214_v7 = vor.u32 %v13856_v46, %v11211_v44  ;;  %v11091_v5 = vld [vmem:[#allocation7 + $0xe00] sm:$0xf0] }
 0x2d8   :  { %5973 = vmatpush.bf16.msrb.mxu1 %v10414_v28  ;;  %v11851_v28 = vld [vmem:[#allocation7 + $0x13f0] sm:$0xf0]  ;;  %v11534_v18 = vor.u32 %v13936_v62, %v11531_v47  ;;  %v13736_v44 = vld [vmem:[#allocation7 + $0xb0c] sm:$0xf] }
 0x2d9   :  { %v10731_v62 = vld [vmem:[#allocation7 + $0xb30] sm:$0xf0]  ;;  %v13816_v47 = vld [vmem:[#allocation7 + $0xd8c] sm:$0xf] }
 0x2da   :  { %5960 = vmatpush.bf16.msrb.mxu0 %v10094_v58  ;;  %5935 = vmatpush.bf16.msra.mxu2 %v9414_v24  ;;  %v14016_v58 = vld [vmem:[#allocation7 + $0x13cc] sm:$0xf]  ;;  %v14006_v24 = vld [vmem:[#allocation7 + $0x137c] sm:$0xf] }
 0x2db   :  { %5948 = vmatpush.bf16.msra.mxu3 %v9734_v41  ;;  %v11854_v6 = vor.u32 %v14016_v58, %v11851_v28  ;;  %v11811_v41 = vld [vmem:[#allocation7 + $0x13a0] sm:$0xf0]  ;;  %v11051_v58 = vld [vmem:[#allocation7 + $0xdb0] sm:$0xf0]  ;;  %v13896_v28 = vld [vmem:[#allocation7 + $0x100c] sm:$0xf] }
 0x2dc   :  { %5974 = vmatpush.bf16.msrb.mxu1 %v10374_v22  ;;  %v10811_v22 = vld [vmem:[#allocation7 + $0xbd0] sm:$0xf0]  ;;  %v11814_v52 = vor.u32 %v14006_v24, %v11811_v41  ;;  %v11054_v4 = vor.u32 %v13816_v47, %v11051_v58  ;;  %v11011_v24 = vld [vmem:[#allocation7 + $0xd60] sm:$0xf0]  ;;  %v13886_v41 = vld [vmem:[#allocation7 + $0xfbc] sm:$0xf] }
 0x2dd   :  { %v11014_v10 = vor.u32 %v13806_v16, %v11011_v24  ;;  %v11251_v47 = vld [vmem:[#allocation7 + $0xf40] sm:$0xf0]  ;;  %v13946_v58 = vld [vmem:[#allocation7 + $0x119c] sm:$0xf] }
 0x2de   :  { %5961 = vmatpush.bf16.msrb.mxu0 %v10054_v51  ;;  %5936 = vmatpush.bf16.msra.mxu2 %v9374_v61  ;;  %v13756_v51 = vld [vmem:[#allocation7 + $0xbac] sm:$0xf] }
 0x2df   :  { %5949 = vmatpush.bf16.msra.mxu3 %v9694_v42  ;;  %v10814_v61 = vor.u32 %v13756_v51, %v10811_v22  ;;  %v11134_v42 = vor.u32 %v13836_v25, %v11131_v9  ;;  %v13966_v51 = vld [vmem:[#allocation7 + $0x123c] sm:$0xf]  ;;  %v11651_v22 = vld [vmem:[#allocation7 + $0x1260] sm:$0xf0] }
 0x2e0   :  { %5975 = vmatpush.bf16.msrb.mxu1 %v10334_v3  ;;  %v13826_v3 = vld [vmem:[#allocation7 + $0xddc] sm:$0xf] }
 0x2e1   :  { %v11094_v46 = vor.u32 %v13826_v3, %v11091_v5  ;;  %v11611_v3 = vld [vmem:[#allocation7 + $0x1210] sm:$0xf0] }
 0x2e2   :  { %5962 = vmatpush.bf16.msrb.mxu0 %v10014_v26  ;;  %5937 = vmatpush.bf16.msra.mxu2 %v9334_v53  ;;  %v11774_v26 = vor.u32 %v13996_v34, %v11771_v12  ;;  %v11414_v53 = vor.u32 %v13906_v33, %v11411_v60  ;;  %v10651_v34 = vld [vmem:[#allocation7 + $0xa90] sm:$0xf0]  ;;  %v13706_v33 = vld [vmem:[#allocation7 + $0xa1c] sm:$0xf] }
 0x2e3   :  { %5950 = vmatpush.bf16.msra.mxu3 %v9654_v50  ;;  %v11734_v50 = vor.u32 %v13986_v35, %v11731_v32  ;;  %v10654_v60 = vor.u32 %v13716_v54, %v10651_v34  ;;  %v10611_v32 = vld [vmem:[#allocation7 + $0xa40] sm:$0xf0] }
 0x2e4   :  { %5976 = vmatpush.bf16.msrb.mxu1 %v10294_v8  ;;  %v5770_v43 = vpop.f32.mrf.mxu1  ;;  %v13976_v8 = vld [vmem:[#allocation7 + $0x128c] sm:$0xf] }
 0x2e5   :  { %5938 = vmatmul.bf16.vlgmr.msra.gmra.mxu2 %v14961_v27 }
 0x2e6   :  { %5963 = vmatpush.bf16.msrb.mxu0 %v9974_v11  ;;  %5982 = vmatpush.bf16.msrb.mxu2 %v10894_v20  ;;  %v5757_v39 = vpop.f32.mrf.mxu0  ;;  %v11371_v11 = vld [vmem:[#allocation7 + $0x1030] sm:$0xf0] }
 0x2e7   :  { %5995 = vmatpush.bf16.msrb.mxu3 %v11214_v7  ;;  %5977 = vmatmul.bf16.vlgmr.msrb.gmra.mxu1 %v14967_v21  ;;  %v11691_v20 = vld [vmem:[#allocation7 + $0x12b0] sm:$0xf0]  ;;  %v10734_v7 = vor.u32 %v13736_v44, %v10731_v62 }
 0x2e8   :  { %6021 = vmatpush.bf16.msra.mxu1 %v11854_v6  ;;  %5951 = vmatmul.bf16.vlgmr.msra.gmra.mxu3 %v14963_v55  ;;  %v11374_v6 = vor.u32 %v13896_v28, %v11371_v11  ;;  %v11694_v56 = vor.u32 %v13976_v8, %v11691_v20  ;;  %v5731_v31 = vpop.f32.mrf.mxu2  ;;  %v11571_v28 = vld [vmem:[#allocation7 + $0x11c0] sm:$0xf0]  ;;  %v13462_v11 = vld [vmem:[#allocation7 + $0x274] sm:$0xf0]  ;;  %v9937_v8 = vld [vmem:[#allocation7 + $0x4d0] sm:$0xf] }
 0x2e9   :  { %5964 = vmatmul.bf16.vlgmr.msrb.gmra.mxu0 %v14965_v15  ;;  %v13542_v20 = vld [vmem:[#allocation7 + $0x4f4] sm:$0xf0] }
 0x2ea   :  { %6008 = vmatpush.bf16.msra.mxu0 %v11534_v18  ;;  %5983 = vmatpush.bf16.msrb.mxu2 %v10854_v38  ;;  %v10691_v18 = vld [vmem:[#allocation7 + $0xae0] sm:$0xf0]  ;;  %v9938_v24 = vor.u32 %v13542_v20, %v9937_v8 }
 0x2eb   :  { %5996 = vmatpush.bf16.msrb.mxu3 %v11174_v14  ;;  %v5744_v2 = vpop.f32.mrf.mxu3  ;;  %v11331_v14 = vld [vmem:[#allocation7 + $0xfe0] sm:$0xf0]  ;;  %v10694_v9 = vor.u32 %v13726_v57, %v10691_v18  ;;  %v13622_v18 = vld [vmem:[#allocation7 + $0x774] sm:$0xf0] }
 0x2ec   :  { %6022 = vmatpush.bf16.msra.mxu1 %v11814_v52  ;;  %v5745_v38 = vadd.f32 %v5744_v2, %v5731_v31  ;;  %v5772_v25 = vpop.f32.mrf.mxu1  ;;  %v11334_v12 = vor.u32 %v13886_v41, %v11331_v14  ;;  %v11574_v2 = vor.u32 %v13946_v58, %v11571_v28  ;;  %v9577_v41 = vld [vmem:[#allocation7 + $0x200] sm:$0xf]  ;;  %v13672_v28 = vld [vmem:[#allocation7 + $0x904] sm:$0xf0] }
 0x2ed   :  { %v13612_v25 = vld [vmem:[#allocation7 + $0x724] sm:$0xf0]  ;;  %v10457_v58 = vld [vmem:[#allocation7 + $0x8e0] sm:$0xf] }
 0x2ee   :  { %6009 = vmatpush.bf16.msra.mxu0 %v11494_v36  ;;  %5984 = vmatpush.bf16.msrb.mxu2 %v10814_v61  ;;  %v5758_v36 = vadd.f32 %v5757_v39, %v5745_v38  ;;  %v5759_v52 = vpop.f32.mrf.mxu0  ;;  %v11654_v61 = vor.u32 %v13966_v51, %v11651_v22  ;;  %v13786_v39 = vld [vmem:[#allocation7 + $0xc9c] sm:$0xf]  ;;  %v13452_v38 = vld [vmem:[#allocation7 + $0x224] sm:$0xf0]  ;;  %v9897_v22 = vld [vmem:[#allocation7 + $0x480] sm:$0xf] }
 0x2ef   :  { %5997 = vmatpush.bf16.msrb.mxu3 %v11134_v42  ;;  %v13796_v42 = vld [vmem:[#allocation7 + $0xcec] sm:$0xf]  ;;  %v10217_v52 = vld [vmem:[#allocation7 + $0x700] sm:$0xf]  ;;  %v9578_v54 = vor.u32 %v13452_v38, %v9577_v41 }
 0x2f0   :  { %6023 = vmatpush.bf16.msra.mxu1 %v11774_v26  ;;  %v13956_v26 = vld [vmem:[#allocation7 + $0x11ec] sm:$0xf]  ;;  %v15078_v5 = vadd.f32 %v5770_v43, %v5758_v36  ;;  %v10974_v35 = vor.u32 %v13796_v42, %v10971_v0  ;;  %v5733_v62 = vpop.f32.mrf.mxu2  ;;  %v9617_v43 = vld [vmem:[#allocation7 + $0x250] sm:$0xf]  ;;  %v13532_v36 = vld [vmem:[#allocation7 + $0x4a4] sm:$0xf0]  ;;  %v10218_v42 = vor.u32 %v13612_v25, %v10217_v52 }
 0x2f1   :  { %v11614_v44 = vor.u32 %v13956_v26, %v11611_v3  ;;  %v9618_v16 = vor.u32 %v13462_v11, %v9617_v43  ;;  %v9898_v34 = vor.u32 %v13532_v36, %v9897_v22  ;;  %v10177_v26 = vld [vmem:[#allocation7 + $0x6b0] sm:$0xf]  ;;  %v13602_v3 = vld [vmem:[#allocation7 + $0x6d4] sm:$0xf0]  ;;  %v9817_v62 = vld [vmem:[#allocation7 + $0x3e0] sm:$0xf] }
 0x2f2   :  { %6010 = vmatpush.bf16.msra.mxu0 %v11454_v30  ;;  %5985 = vmatpush.bf16.msrb.mxu2 %v10774_v40  ;;  %v11291_v30 = vld [vmem:[#allocation7 + $0xf90] sm:$0xf0]  ;;  %v10931_v40 = vld [vmem:[#allocation7 + $0xcc0] sm:$0xf0] }
 0x2f3   :  { %5998 = vmatpush.bf16.msrb.mxu3 %v11094_v46  ;;  %v11294_v46 = vor.u32 %v13876_v37, %v11291_v30  ;;  %v10934_v57 = vor.u32 %v13786_v39, %v10931_v40  ;;  %v9857_v37 = vld [vmem:[#allocation7 + $0x430] sm:$0xf]  ;;  %v13522_v30 = vld [vmem:[#allocation7 + $0x454] sm:$0xf0]  ;;  %v9497_v39 = vld [vmem:[#allocation7 + $0x160] sm:$0xf] }
 0x2f4   :  { %6024 = vmatpush.bf16.msra.mxu1 %v11734_v50  ;;  %v13866_v50 = vld [vmem:[#allocation7 + $0xf1c] sm:$0xf]  ;;  %v13432_v40 = vld [vmem:[#allocation7 + $0x184] sm:$0xf0] }
 0x2f5   :  { %v11254_v31 = vor.u32 %v13866_v50, %v11251_v47  ;;  %v10137_v50 = vld [vmem:[#allocation7 + $0x660] sm:$0xf]  ;;  %v13592_v47 = vld [vmem:[#allocation7 + $0x684] sm:$0xf0]  ;;  %v9498_v8 = vor.u32 %v13432_v40, %v9497_v39  ;;  %v9697_v39 = vld [vmem:[#allocation7 + $0x2f0] sm:$0xf] }
 0x2f6   :  { %6011 = vmatpush.bf16.msra.mxu0 %v11414_v53  ;;  %5986 = vmatpush.bf16.msrb.mxu2 %v10734_v7  ;;  %v5746_v53 = vpop.f32.mrf.mxu3  ;;  %v10257_v7 = vld [vmem:[#allocation7 + $0x750] sm:$0xf]  ;;  %v13482_v40 = vld [vmem:[#allocation7 + $0x314] sm:$0xf0] }
 0x2f7   :  { %5999 = vmatpush.bf16.msrb.mxu3 %v11054_v4  ;;  %v10614_v4 = vor.u32 %v13706_v33, %v10611_v32  ;;  %v10258_v14 = vor.u32 %v13622_v18, %v10257_v7  ;;  %v10497_v33 = vld [vmem:[#allocation7 + $0x930] sm:$0xf]  ;;  %v9858_v32 = vor.u32 %v13522_v30, %v9857_v37  ;;  %v13512_v53 = vld [vmem:[#allocation7 + $0x404] sm:$0xf0]  ;;  %v10458_v18 = vor.u32 %v13672_v28, %v10457_v58 }
 0x2f8   :  { %6025 = vmatpush.bf16.msra.mxu1 %v11694_v56  ;;  %v13702_v56 = vld [vmem:[#allocation7 + $0x9f4] sm:$0xf0]  ;;  %v9818_v20 = vor.u32 %v13512_v53, %v9817_v62  ;;  %v9457_v7 = vld [vmem:[#allocation7 + $0x110] sm:$0xf]  ;;  %v9698_v58 = vor.u32 %v13482_v40, %v9697_v39  ;;  %v13392_v28 = vld [vmem:[#allocation7 + $0x44] sm:$0xf0] }
 0x2f9   :  { %v10337_v62 = vld [vmem:[#allocation7 + $0x7f0] sm:$0xf]  ;;  %v13642_v53 = vld [vmem:[#allocation7 + $0x814] sm:$0xf0] }
 0x2fa   :  { %6012 = vmatpush.bf16.msra.mxu0 %v11374_v6  ;;  %5987 = vmatpush.bf16.msrb.mxu2 %v10694_v9  ;;  %v10577_v6 = vld [vmem:[#allocation7 + $0x9d0] sm:$0xf]  ;;  %v10537_v9 = vld [vmem:[#allocation7 + $0x980] sm:$0xf]  ;;  %v13762_v39 = vld [vmem:[#allocation7 + $0xbd4] sm:$0xf0] }
 0x2fb   :  { %6000 = vmatpush.bf16.msrb.mxu3 %v11014_v10  ;;  %v10578_v51 = vor.u32 %v13702_v56, %v10577_v6  ;;  %v13692_v10 = vld [vmem:[#allocation7 + $0x9a4] sm:$0xf0]  ;;  %v9777_v6 = vld [vmem:[#allocation7 + $0x390] sm:$0xf]  ;;  %v13502_v56 = vld [vmem:[#allocation7 + $0x3b4] sm:$0xf0] }
 0x2fc   :  { %6026 = vmatpush.bf16.msra.mxu1 %v11654_v61  ;;  %v13442_v61 = vld [vmem:[#allocation7 + $0x1d4] sm:$0xf0]  ;;  %v10538_v0 = vor.u32 %v13692_v10, %v10537_v9  ;;  %v9778_v38 = vor.u32 %v13502_v56, %v9777_v6  ;;  %v9737_v9 = vld [vmem:[#allocation7 + $0x340] sm:$0xf]  ;;  %v13492_v10 = vld [vmem:[#allocation7 + $0x364] sm:$0xf0] }
 0x2fd   :  { %v13552_v56 = vld [vmem:[#allocation7 + $0x544] sm:$0xf0] }
 0x2fe   :  { %6013 = vmatpush.bf16.msra.mxu0 %v11334_v12  ;;  %5988 = vmatpush.bf16.msrb.mxu2 %v10654_v60  ;;  %v9537_v12 = vld [vmem:[#allocation7 + $0x1b0] sm:$0xf]  ;;  %v13682_v60 = vld [vmem:[#allocation7 + $0x954] sm:$0xf0] }
 0x2ff   :  { %6001 = vmatpush.bf16.msrb.mxu3 %v10974_v35  ;;  %v9538_v35 = vor.u32 %v13442_v61, %v9537_v12  ;;  %v13572_v12 = vld [vmem:[#allocation7 + $0x5e4] sm:$0xf0]  ;;  %v10377_v61 = vld [vmem:[#allocation7 + $0x840] sm:$0xf] }
 0x300   :  { %6027 = vmatpush.bf16.msra.mxu1 %v11614_v44  ;;  %v10498_v44 = vor.u32 %v13682_v60, %v10497_v33  ;;  %v9377_v33 = vld [vmem:[#allocation7 + $0x70] sm:$0xf]  ;;  %v13402_v60 = vld [vmem:[#allocation7 + $0x94] sm:$0xf0] }
 0x302   :  { %6014 = vmatpush.bf16.msra.mxu0 %v11294_v46  ;;  %5989 = vmatpush.bf16.msrb.mxu2 %v10614_v4  ;;  %v10178_v46 = vor.u32 %v13602_v3, %v10177_v26  ;;  %v13422_v4 = vld [vmem:[#allocation7 + $0x134] sm:$0xf0]  ;;  %v9738_v3 = vor.u32 %v13492_v10, %v9737_v9 }
 0x303   :  { %6002 = vmatpush.bf16.msrb.mxu3 %v10934_v57  ;;  %v10138_v57 = vor.u32 %v13592_v47, %v10137_v50  ;;  %v9458_v41 = vor.u32 %v13422_v4, %v9457_v7  ;;  %v9337_v50 = vld [vmem:[#allocation7 + $0x20] sm:$0xf]  ;;  %v9378_v47 = vor.u32 %v13402_v60, %v9377_v33  ;;  %v14012_v33 = vld [vmem:[#allocation7 + $0x13a4] sm:$0xf0] }
 0x304   :  { %6028 = vmatpush.bf16.msra.mxu1 %v11574_v2  ;;  %v5822_v11 = vpop.f32.mrf.mxu1  ;;  %v13582_v2 = vld [vmem:[#allocation7 + $0x634] sm:$0xf0] }
 0x305   :  { %5990 = vmatmul.bf16.vlgmr.msrb.gmra.mxu2 %v14989_v17 }
 0x306   :  { %6015 = vmatpush.bf16.msra.mxu0 %v11254_v31  ;;  %6034 = vmatpush.bf16.msra.mxu2 %v9618_v16  ;;  %v5809_v43 = vpop.f32.mrf.mxu0  ;;  %v10097_v31 = vld [vmem:[#allocation7 + $0x610] sm:$0xf] }
 0x307   :  { %6047 = vmatpush.bf16.msra.mxu3 %v9938_v24  ;;  %6029 = vmatmul.bf16.vlgmr.msra.gmra.mxu1 %v14995_v45  ;;  %v10417_v16 = vld [vmem:[#allocation7 + $0x890] sm:$0xf]  ;;  %v13662_v24 = vld [vmem:[#allocation7 + $0x8b4] sm:$0xf0]  ;;  %v10098_v22 = vor.u32 %v13582_v2, %v10097_v31  ;;  %v10297_v31 = vld [vmem:[#allocation7 + $0x7a0] sm:$0xf] }
 0x308   :  { %6073 = vmatpush.bf16.msrb.mxu1 %v10578_v51  ;;  %6003 = vmatmul.bf16.vlgmr.msrb.gmra.mxu3 %v14991_v49  ;;  %v13412_v51 = vld [vmem:[#allocation7 + $0xe4] sm:$0xf0]  ;;  %v10418_v36 = vor.u32 %v13662_v24, %v10417_v16  ;;  %v5783_v52 = vpop.f32.mrf.mxu2  ;;  %v10897_v16 = vld [vmem:[#allocation7 + $0xc50] sm:$0xf]  ;;  %v13782_v24 = vld [vmem:[#allocation7 + $0xc74] sm:$0xf0] }
 0x309   :  { %6016 = vmatmul.bf16.vlgmr.msra.gmra.mxu0 %v14993_v48  ;;  %v13632_v2 = vld [vmem:[#allocation7 + $0x7c4] sm:$0xf0]  ;;  %v10898_v10 = vor.u32 %v13782_v24, %v10897_v16 }
 0x30a   :  { %6060 = vmatpush.bf16.msrb.mxu0 %v10258_v14  ;;  %6035 = vmatpush.bf16.msra.mxu2 %v9578_v54  ;;  %v9417_v14 = vld [vmem:[#allocation7 + $0xc0] sm:$0xf]  ;;  %v10298_v9 = vor.u32 %v13632_v2, %v10297_v31  ;;  %v13992_v2 = vld [vmem:[#allocation7 + $0x1304] sm:$0xf0] }
 0x30b   :  { %6048 = vmatpush.bf16.msra.mxu3 %v9898_v34  ;;  %v5796_v25 = vpop.f32.mrf.mxu3  ;;  %v10057_v54 = vld [vmem:[#allocation7 + $0x5c0] sm:$0xf]  ;;  %v5784_v34 = vadd.f32 %v5783_v52, %v15078_v5  ;;  %v9418_v26 = vor.u32 %v13412_v51, %v9417_v14  ;;  %v11537_v14 = vld [vmem:[#allocation7 + $0x1150] sm:$0xf]  ;;  %v9338_v51 = vor.u32 %v13392_v28, %v9337_v50  ;;  %v14022_v52 = vld [vmem:[#allocation7 + $0x13f4] sm:$0xf0] }
 0x30c   :  { %6074 = vmatpush.bf16.msrb.mxu1 %v10538_v0  ;;  %v5824_v30 = vpop.f32.mrf.mxu1  ;;  %v11777_v50 = vld [vmem:[#allocation7 + $0x1330] sm:$0xf]  ;;  %v11737_v31 = vld [vmem:[#allocation7 + $0x12e0] sm:$0xf] }
 0x30d   :  { %v5797_v0 = vadd.f32 %v5796_v25, %v5784_v34  ;;  %v10857_v34 = vld [vmem:[#allocation7 + $0xc00] sm:$0xf] }
 0x30e   :  { %6061 = vmatpush.bf16.msrb.mxu0 %v10218_v42  ;;  %6036 = vmatpush.bf16.msra.mxu2 %v9538_v35  ;;  %v13652_v42 = vld [vmem:[#allocation7 + $0x864] sm:$0xf0]  ;;  %v5811_v37 = vpop.f32.mrf.mxu0  ;;  %v10058_v35 = vor.u32 %v13572_v12, %v10057_v54  ;;  %v11497_v30 = vld [vmem:[#allocation7 + $0x1100] sm:$0xf] }
 0x30f   :  { %6049 = vmatpush.bf16.msra.mxu3 %v9858_v32  ;;  %v10378_v32 = vor.u32 %v13652_v42, %v10377_v61  ;;  %v5810_v5 = vadd.f32 %v5809_v43, %v5797_v0  ;;  %v9977_v43 = vld [vmem:[#allocation7 + $0x520] sm:$0xf]  ;;  %v13772_v12 = vld [vmem:[#allocation7 + $0xc24] sm:$0xf0] }
 0x310   :  { %6075 = vmatpush.bf16.msrb.mxu1 %v10498_v44  ;;  %v13562_v44 = vld [vmem:[#allocation7 + $0x594] sm:$0xf0]  ;;  %v9978_v25 = vor.u32 %v13552_v56, %v9977_v43  ;;  %v11177_v0 = vld [vmem:[#allocation7 + $0xe80] sm:$0xf]  ;;  %v13852_v37 = vld [vmem:[#allocation7 + $0xea4] sm:$0xf0]  ;;  %v10858_v60 = vor.u32 %v13772_v12, %v10857_v34 }
 0x311   :  { %v15085_v7 = vadd.f32 %v5822_v11, %v5810_v5  ;;  %v11137_v5 = vld [vmem:[#allocation7 + $0xe30] sm:$0xf]  ;;  %v11417_v43 = vld [vmem:[#allocation7 + $0x1060] sm:$0xf]  ;;  %v13912_v56 = vld [vmem:[#allocation7 + $0x1084] sm:$0xf0] }
 0x312   :  { %6062 = vmatpush.bf16.msrb.mxu0 %v10178_v46  ;;  %6037 = vmatpush.bf16.msra.mxu2 %v9498_v8  ;;  %v10017_v46 = vld [vmem:[#allocation7 + $0x570] sm:$0xf]  ;;  %v9657_v8 = vld [vmem:[#allocation7 + $0x2a0] sm:$0xf] }
 0x313   :  { %6050 = vmatpush.bf16.msra.mxu3 %v9818_v20  ;;  %v13472_v20 = vld [vmem:[#allocation7 + $0x2c4] sm:$0xf0]  ;;  %v10018_v4 = vor.u32 %v13562_v44, %v10017_v46  ;;  %v5798_v6 = vpop.f32.mrf.mxu3  ;;  %v13842_v44 = vld [vmem:[#allocation7 + $0xe54] sm:$0xf0] }
 0x314   :  { %6076 = vmatpush.bf16.msrb.mxu1 %v10458_v18  ;;  %v5785_v18 = vpop.f32.mrf.mxu2  ;;  %v9658_v11 = vor.u32 %v13472_v20, %v9657_v8  ;;  %v11138_v28 = vor.u32 %v13842_v44, %v11137_v5  ;;  %v10777_v8 = vld [vmem:[#allocation7 + $0xb60] sm:$0xf]  ;;  %v13752_v20 = vld [vmem:[#allocation7 + $0xb84] sm:$0xf0] }
 0x315   :  { %v11097_v18 = vld [vmem:[#allocation7 + $0xde0] sm:$0xf]  ;;  %v13832_v6 = vld [vmem:[#allocation7 + $0xe04] sm:$0xf0] }
 0x316   :  { %6063 = vmatpush.bf16.msrb.mxu0 %v10138_v57  ;;  %6038 = vmatpush.bf16.msra.mxu2 %v9458_v41  ;;  %v10338_v57 = vor.u32 %v13642_v53, %v10337_v62  ;;  %v11217_v41 = vld [vmem:[#allocation7 + $0xed0] sm:$0xf]  ;;  %v13922_v53 = vld [vmem:[#allocation7 + $0x10d4] sm:$0xf0] }
 0x317   :  { %6051 = vmatpush.bf16.msra.mxu3 %v9778_v38  ;;  %v13862_v38 = vld [vmem:[#allocation7 + $0xef4] sm:$0xf0]  ;;  %v11457_v62 = vld [vmem:[#allocation7 + $0x10b0] sm:$0xf] }
 0x318   :  { %6077 = vmatpush.bf16.msrb.mxu1 %v10418_v36  ;;  %v11857_v36 = vld [vmem:[#allocation7 + $0x13d0] sm:$0xf]  ;;  %v11218_v54 = vor.u32 %v13862_v38, %v11217_v41  ;;  %v10778_v41 = vor.u32 %v13752_v20, %v10777_v8  ;;  %v11098_v38 = vor.u32 %v13832_v6, %v11097_v18  ;;  %v13802_v20 = vld [vmem:[#allocation7 + $0xd14] sm:$0xf0] }
 0x319   :  { %v11858_v42 = vor.u32 %v14022_v52, %v11857_v36  ;;  %v11057_v36 = vld [vmem:[#allocation7 + $0xd90] sm:$0xf]  ;;  %v13822_v52 = vld [vmem:[#allocation7 + $0xdb4] sm:$0xf0] }
 0x31a   :  { %6064 = vmatpush.bf16.msrb.mxu0 %v10098_v22  ;;  %6039 = vmatpush.bf16.msra.mxu2 %v9418_v26  ;;  %v13942_v22 = vld [vmem:[#allocation7 + $0x1174] sm:$0xf0]  ;;  %v13932_v26 = vld [vmem:[#allocation7 + $0x1124] sm:$0xf0]  ;;  %v11058_v12 = vor.u32 %v13822_v52, %v11057_v36  ;;  %v10977_v8 = vld [vmem:[#allocation7 + $0xcf0] sm:$0xf] }
 0x31b   :  { %6052 = vmatpush.bf16.msra.mxu3 %v9738_v3  ;;  %v11538_v61 = vor.u32 %v13942_v22, %v11537_v14  ;;  %v11817_v3 = vld [vmem:[#allocation7 + $0x1380] sm:$0xf]  ;;  %v11498_v40 = vor.u32 %v13932_v26, %v11497_v30  ;;  %v10737_v14 = vld [vmem:[#allocation7 + $0xb10] sm:$0xf]  ;;  %v11738_v22 = vor.u32 %v13992_v2, %v11737_v31  ;;  %v13962_v6 = vld [vmem:[#allocation7 + $0x1214] sm:$0xf0]  ;;  %v10978_v2 = vor.u32 %v13802_v20, %v10977_v8 }
 0x31c   :  { %6078 = vmatpush.bf16.msrb.mxu1 %v10378_v32  ;;  %v10817_v32 = vld [vmem:[#allocation7 + $0xbb0] sm:$0xf]  ;;  %v11818_v46 = vor.u32 %v14012_v33, %v11817_v3  ;;  %v11017_v3 = vld [vmem:[#allocation7 + $0xd40] sm:$0xf]  ;;  %v13812_v33 = vld [vmem:[#allocation7 + $0xd64] sm:$0xf0] }
 0x31d   :  { %v11617_v18 = vld [vmem:[#allocation7 + $0x11f0] sm:$0xf]  ;;  %v11257_v36 = vld [vmem:[#allocation7 + $0xf20] sm:$0xf]  ;;  %v13872_v52 = vld [vmem:[#allocation7 + $0xf44] sm:$0xf0] }
 0x31e   :  { %6065 = vmatpush.bf16.msrb.mxu0 %v10058_v35  ;;  %6040 = vmatpush.bf16.msra.mxu2 %v9378_v47  ;;  %v11178_v35 = vor.u32 %v13852_v37, %v11177_v0  ;;  %v14002_v47 = vld [vmem:[#allocation7 + $0x1354] sm:$0xf0]  ;;  %v9539_v8 = vld [vmem:[#allocation7 + $0x1d8] sm:$0xf0] }
 0x31f   :  { %6053 = vmatpush.bf16.msra.mxu3 %v9698_v58  ;;  %v10818_v58 = vor.u32 %v13762_v39, %v10817_v32  ;;  %v13892_v32 = vld [vmem:[#allocation7 + $0xfe4] sm:$0xf0]  ;;  %v11657_v39 = vld [vmem:[#allocation7 + $0x1240] sm:$0xf] }
 0x320   :  { %6079 = vmatpush.bf16.msrb.mxu1 %v10338_v57  ;;  %v11778_v57 = vor.u32 %v14002_v47, %v11777_v50  ;;  %v10657_v50 = vld [vmem:[#allocation7 + $0xa70] sm:$0xf]  ;;  %v13722_v47 = vld [vmem:[#allocation7 + $0xa94] sm:$0xf0] }
 0x321   :  { %v10658_v31 = vor.u32 %v13722_v47, %v10657_v50  ;;  %v10539_v50 = vld [vmem:[#allocation7 + $0x9a8] sm:$0xf0] }
 0x322   :  { %6066 = vmatpush.bf16.msrb.mxu0 %v10018_v4  ;;  %6041 = vmatpush.bf16.msra.mxu2 %v9338_v51  ;;  %v11458_v4 = vor.u32 %v13922_v53, %v11457_v62  ;;  %v13742_v51 = vld [vmem:[#allocation7 + $0xb34] sm:$0xf0]  ;;  %v11018_v53 = vor.u32 %v13812_v33, %v11017_v3 }
 0x323   :  { %6054 = vmatpush.bf16.msra.mxu3 %v9658_v11  ;;  %v11418_v11 = vor.u32 %v13912_v56, %v11417_v43  ;;  %v10738_v34 = vor.u32 %v13742_v51, %v10737_v14  ;;  %v10617_v56 = vld [vmem:[#allocation7 + $0xa20] sm:$0xf]  ;;  %v11618_v51 = vor.u32 %v13962_v6, %v11617_v18  ;;  %v9859_v18 = vld [vmem:[#allocation7 + $0x458] sm:$0xf0]  ;;  %v13597_v6 = vld [vmem:[#allocation7 + $0x6b4] sm:$0xf] }
 0x324   :  { %6080 = vmatpush.bf16.msrb.mxu1 %v10298_v9  ;;  %v5874_v24 = vpop.f32.mrf.mxu1  ;;  %v13902_v9 = vld [vmem:[#allocation7 + $0x1034] sm:$0xf0] }
 0x325   :  { %6042 = vmatmul.bf16.vlgmr.msra.gmra.mxu2 %v14961_v27 }
 0x326   :  { %6067 = vmatpush.bf16.msrb.mxu0 %v9978_v25  ;;  %6086 = vmatpush.bf16.msrb.mxu2 %v10898_v10  ;;  %v5861_v16 = vpop.f32.mrf.mxu0  ;;  %v11377_v25 = vld [vmem:[#allocation7 + $0x1010] sm:$0xf] }
 0x327   :  { %6099 = vmatpush.bf16.msrb.mxu3 %v11218_v54  ;;  %6081 = vmatmul.bf16.vlgmr.msrb.gmra.mxu1 %v14967_v21  ;;  %v11697_v10 = vld [vmem:[#allocation7 + $0x1290] sm:$0xf]  ;;  %v13982_v54 = vld [vmem:[#allocation7 + $0x12b4] sm:$0xf0]  ;;  %v11378_v0 = vor.u32 %v13902_v9, %v11377_v25  ;;  %v11577_v25 = vld [vmem:[#allocation7 + $0x11a0] sm:$0xf] }
 0x328   :  { %6125 = vmatpush.bf16.msra.mxu1 %v11858_v42  ;;  %6055 = vmatmul.bf16.vlgmr.msra.gmra.mxu3 %v14963_v55  ;;  %v13732_v42 = vld [vmem:[#allocation7 + $0xae4] sm:$0xf0]  ;;  %v11698_v37 = vor.u32 %v13982_v54, %v11697_v10  ;;  %v5835_v30 = vpop.f32.mrf.mxu2  ;;  %v9619_v10 = vld [vmem:[#allocation7 + $0x278] sm:$0xf0]  ;;  %v13537_v54 = vld [vmem:[#allocation7 + $0x4d4] sm:$0xf] }
 0x329   :  { %6068 = vmatmul.bf16.vlgmr.msrb.gmra.mxu0 %v14965_v15  ;;  %v13952_v9 = vld [vmem:[#allocation7 + $0x11c4] sm:$0xf0] }
 0x32a   :  { %6112 = vmatpush.bf16.msra.mxu0 %v11538_v61  ;;  %6087 = vmatpush.bf16.msrb.mxu2 %v10858_v60  ;;  %v10697_v61 = vld [vmem:[#allocation7 + $0xac0] sm:$0xf]  ;;  %v11578_v3 = vor.u32 %v13952_v9, %v11577_v25  ;;  %v10139_v25 = vld [vmem:[#allocation7 + $0x688] sm:$0xf0]  ;;  %v13667_v9 = vld [vmem:[#allocation7 + $0x8e4] sm:$0xf] }
 0x32b   :  { %6100 = vmatpush.bf16.msrb.mxu3 %v11178_v35  ;;  %v5848_v26 = vpop.f32.mrf.mxu3  ;;  %v11337_v60 = vld [vmem:[#allocation7 + $0xfc0] sm:$0xf]  ;;  %v10698_v62 = vor.u32 %v13732_v42, %v10697_v61 }
 0x32c   :  { %6126 = vmatpush.bf16.msra.mxu1 %v11818_v46  ;;  %v5849_v35 = vadd.f32 %v5848_v26, %v5835_v30  ;;  %v5876_v44 = vpop.f32.mrf.mxu1  ;;  %v10579_v30 = vld [vmem:[#allocation7 + $0x9f8] sm:$0xf0]  ;;  %v11258_v26 = vor.u32 %v13872_v52, %v11257_v36  ;;  %v9819_v36 = vld [vmem:[#allocation7 + $0x408] sm:$0xf0]  ;;  %v13587_v52 = vld [vmem:[#allocation7 + $0x664] sm:$0xf] }
 0x32d   :  { %v13607_v44 = vld [vmem:[#allocation7 + $0x704] sm:$0xf] }
 0x32e   :  { %6113 = vmatpush.bf16.msra.mxu0 %v11498_v40  ;;  %6088 = vmatpush.bf16.msrb.mxu2 %v10818_v58  ;;  %v13972_v40 = vld [vmem:[#allocation7 + $0x1264] sm:$0xf0]  ;;  %v5862_v46 = vadd.f32 %v5861_v16, %v5849_v35  ;;  %v5863_v5 = vpop.f32.mrf.mxu0  ;;  %v11338_v58 = vor.u32 %v13892_v32, %v11337_v60  ;;  %v13447_v35 = vld [vmem:[#allocation7 + $0x204] sm:$0xf]  ;;  %v9579_v32 = vld [vmem:[#allocation7 + $0x228] sm:$0xf0] }
 0x32f   :  { %6101 = vmatpush.bf16.msrb.mxu3 %v11138_v28  ;;  %v11658_v28 = vor.u32 %v13972_v40, %v11657_v39  ;;  %v13712_v16 = vld [vmem:[#allocation7 + $0xa44] sm:$0xf0]  ;;  %v9899_v5 = vld [vmem:[#allocation7 + $0x4a8] sm:$0xf0]  ;;  %v9582_v47 = vor.u32 %v13447_v35, %v9579_v32  ;;  %v10419_v35 = vld [vmem:[#allocation7 + $0x8b8] sm:$0xf0] }
 0x330   :  { %6127 = vmatpush.bf16.msra.mxu1 %v11778_v57  ;;  %v13882_v57 = vld [vmem:[#allocation7 + $0xf94] sm:$0xf0]  ;;  %v15091_v43 = vadd.f32 %v5874_v24, %v5862_v46  ;;  %v13457_v24 = vld [vmem:[#allocation7 + $0x254] sm:$0xf]  ;;  %v10618_v61 = vor.u32 %v13712_v16, %v10617_v56  ;;  %v13527_v46 = vld [vmem:[#allocation7 + $0x484] sm:$0xf] }
 0x331   :  { %v9622_v33 = vor.u32 %v13457_v24, %v9619_v10  ;;  %v10179_v56 = vld [vmem:[#allocation7 + $0x6d8] sm:$0xf0]  ;;  %v10459_v24 = vld [vmem:[#allocation7 + $0x908] sm:$0xf0] }
 0x332   :  { %6114 = vmatpush.bf16.msra.mxu0 %v11458_v4  ;;  %6089 = vmatpush.bf16.msrb.mxu2 %v10778_v41  ;;  %v11297_v4 = vld [vmem:[#allocation7 + $0xf70] sm:$0xf]  ;;  %v10937_v41 = vld [vmem:[#allocation7 + $0xca0] sm:$0xf] }
 0x333   :  { %6102 = vmatpush.bf16.msrb.mxu3 %v11098_v38  ;;  %v13792_v38 = vld [vmem:[#allocation7 + $0xcc4] sm:$0xf0]  ;;  %v11298_v14 = vor.u32 %v13882_v57, %v11297_v4  ;;  %v13517_v57 = vld [vmem:[#allocation7 + $0x434] sm:$0xf] }
 0x334   :  { %6128 = vmatpush.bf16.msra.mxu1 %v11738_v22  ;;  %v5850_v22 = vpop.f32.mrf.mxu3  ;;  %v10938_v42 = vor.u32 %v13792_v38, %v10937_v41  ;;  %v9862_v41 = vor.u32 %v13517_v57, %v9859_v18  ;;  %v13427_v38 = vld [vmem:[#allocation7 + $0x164] sm:$0xf] }
 0x335   :  { %v13507_v22 = vld [vmem:[#allocation7 + $0x3e4] sm:$0xf] }
 0x336   :  { %6115 = vmatpush.bf16.msra.mxu0 %v11418_v11  ;;  %6090 = vmatpush.bf16.msrb.mxu2 %v10738_v34  ;;  %v5837_v11 = vpop.f32.mrf.mxu2  ;;  %v9939_v34 = vld [vmem:[#allocation7 + $0x4f8] sm:$0xf0] }
 0x337   :  { %6103 = vmatpush.bf16.msrb.mxu3 %v11058_v12  ;;  %v13617_v12 = vld [vmem:[#allocation7 + $0x754] sm:$0xf]  ;;  %v9942_v60 = vor.u32 %v13537_v54, %v9939_v34 }
 0x338   :  { %6129 = vmatpush.bf16.msra.mxu1 %v11698_v37  ;;  %v13697_v37 = vld [vmem:[#allocation7 + $0x9d4] sm:$0xf] }
 0x339   :  { %v10582_v40 = vor.u32 %v13697_v37, %v10579_v30  ;;  %v10462_v37 = vor.u32 %v13667_v9, %v10459_v24  ;;  %v13497_v30 = vld [vmem:[#allocation7 + $0x394] sm:$0xf] }
 0x33a   :  { %6116 = vmatpush.bf16.msra.mxu0 %v11378_v0  ;;  %6091 = vmatpush.bf16.msrb.mxu2 %v10698_v62  ;;  %v10259_v0 = vld [vmem:[#allocation7 + $0x778] sm:$0xf0]  ;;  %v10219_v62 = vld [vmem:[#allocation7 + $0x728] sm:$0xf0] }
 0x33b   :  { %6104 = vmatpush.bf16.msrb.mxu3 %v11018_v53  ;;  %v10262_v39 = vor.u32 %v13617_v12, %v10259_v0  ;;  %v13687_v53 = vld [vmem:[#allocation7 + $0x984] sm:$0xf]  ;;  %v10222_v20 = vor.u32 %v13607_v44, %v10219_v62  ;;  %v9822_v12 = vor.u32 %v13507_v22, %v9819_v36  ;;  %v10142_v0 = vor.u32 %v13587_v52, %v10139_v25  ;;  %v10019_v22 = vld [vmem:[#allocation7 + $0x598] sm:$0xf0]  ;;  %v13637_v36 = vld [vmem:[#allocation7 + $0x7f4] sm:$0xf] }
 0x33c   :  { %6130 = vmatpush.bf16.msra.mxu1 %v11658_v28  ;;  %v13437_v28 = vld [vmem:[#allocation7 + $0x1b4] sm:$0xf]  ;;  %v10542_v4 = vor.u32 %v13687_v53, %v10539_v50  ;;  %v13487_v50 = vld [vmem:[#allocation7 + $0x344] sm:$0xf]  ;;  %v10339_v52 = vld [vmem:[#allocation7 + $0x818] sm:$0xf0] }
 0x33d   :  { %v9542_v16 = vor.u32 %v13437_v28, %v9539_v8  ;;  %v10059_v8 = vld [vmem:[#allocation7 + $0x5e8] sm:$0xf0]  ;;  %v13387_v25 = vld [vmem:[#allocation7 + $0x24] sm:$0xf] }
 0x33e   :  { %6117 = vmatpush.bf16.msra.mxu0 %v11338_v58  ;;  %6092 = vmatpush.bf16.msrb.mxu2 %v10658_v31  ;;  %v9902_v58 = vor.u32 %v13527_v46, %v9899_v5  ;;  %v13677_v31 = vld [vmem:[#allocation7 + $0x934] sm:$0xf]  ;;  %v9419_v46 = vld [vmem:[#allocation7 + $0xe8] sm:$0xf0] }
 0x33f   :  { %6105 = vmatpush.bf16.msrb.mxu3 %v10978_v2  ;;  %v10499_v2 = vld [vmem:[#allocation7 + $0x958] sm:$0xf0] }
 0x340   :  { %6131 = vmatpush.bf16.msra.mxu1 %v11618_v51  ;;  %v10182_v51 = vor.u32 %v13597_v6, %v10179_v56  ;;  %v10502_v11 = vor.u32 %v13677_v31, %v10499_v2  ;;  %v13397_v2 = vld [vmem:[#allocation7 + $0x74] sm:$0xf] }
 0x342   :  { %6118 = vmatpush.bf16.msra.mxu0 %v11298_v14  ;;  %6093 = vmatpush.bf16.msrb.mxu2 %v10618_v61  ;;  %v9499_v14 = vld [vmem:[#allocation7 + $0x188] sm:$0xf0]  ;;  %v13417_v61 = vld [vmem:[#allocation7 + $0x114] sm:$0xf] }
 0x343   :  { %6106 = vmatpush.bf16.msrb.mxu3 %v10938_v42  ;;  %v9502_v34 = vor.u32 %v13427_v38, %v9499_v14  ;;  %v9459_v42 = vld [vmem:[#allocation7 + $0x138] sm:$0xf0]  ;;  %v13477_v14 = vld [vmem:[#allocation7 + $0x2f4] sm:$0xf] }
 0x344   :  { %6132 = vmatpush.bf16.msra.mxu1 %v11578_v3  ;;  %v5926_v54 = vpop.f32.mrf.mxu1  ;;  %v13577_v3 = vld [vmem:[#allocation7 + $0x614] sm:$0xf]  ;;  %v9462_v32 = vor.u32 %v13417_v61, %v9459_v42  ;;  %v9659_v61 = vld [vmem:[#allocation7 + $0x2c8] sm:$0xf0] }
 0x345   :  { %6094 = vmatmul.bf16.vlgmr.msrb.gmra.mxu2 %v14989_v17 }
 0x346   :  { %6119 = vmatpush.bf16.msra.mxu0 %v11258_v26  ;;  %6138 = vmatpush.bf16.msra.mxu2 %v9622_v33  ;;  %v5913_v10 = vpop.f32.mrf.mxu0  ;;  %v9779_v26 = vld [vmem:[#allocation7 + $0x3b8] sm:$0xf0] }
 0x347   :  { %6151 = vmatpush.bf16.msra.mxu3 %v9942_v60  ;;  %6133 = vmatmul.bf16.vlgmr.msra.gmra.mxu1 %v14995_v45  ;;  %v10099_v33 = vld [vmem:[#allocation7 + $0x638] sm:$0xf0]  ;;  %v13657_v60 = vld [vmem:[#allocation7 + $0x894] sm:$0xf] }
 0x348   :  { %6177 = vmatpush.bf16.msrb.mxu1 %v10582_v40  ;;  %6107 = vmatmul.bf16.vlgmr.msrb.gmra.mxu3 %v14991_v49  ;;  %v13407_v40 = vld [vmem:[#allocation7 + $0xc4] sm:$0xf]  ;;  %v10102_v5 = vor.u32 %v13577_v3, %v10099_v33  ;;  %v10422_v44 = vor.u32 %v13657_v60, %v10419_v35  ;;  %v5887_v62 = vpop.f32.mrf.mxu2  ;;  %v9979_v3 = vld [vmem:[#allocation7 + $0x548] sm:$0xf0]  ;;  %v13777_v35 = vld [vmem:[#allocation7 + $0xc54] sm:$0xf] }
 0x349   :  { %6120 = vmatmul.bf16.vlgmr.msra.gmra.mxu0 %v14993_v48  ;;  %v5888_v28 = vadd.f32 %v5887_v62, %v15091_v43  ;;  %v9422_v56 = vor.u32 %v13407_v40, %v9419_v46  ;;  %v13627_v33 = vld [vmem:[#allocation7 + $0x7a4] sm:$0xf]  ;;  %v10299_v60 = vld [vmem:[#allocation7 + $0x7c8] sm:$0xf0]  ;;  %v11219_v40 = vld [vmem:[#allocation7 + $0xef8] sm:$0xf0] }
 0x34a   :  { %6164 = vmatpush.bf16.msrb.mxu0 %v10262_v39  ;;  %6139 = vmatpush.bf16.msra.mxu2 %v9582_v47  ;;  %v9782_v39 = vor.u32 %v13497_v30, %v9779_v26  ;;  %v9739_v47 = vld [vmem:[#allocation7 + $0x368] sm:$0xf0]  ;;  %v13937_v46 = vld [vmem:[#allocation7 + $0x1154] sm:$0xf] }
 0x34b   :  { %6152 = vmatpush.bf16.msra.mxu3 %v9902_v58  ;;  %v5900_v53 = vpop.f32.mrf.mxu3  ;;  %v13567_v58 = vld [vmem:[#allocation7 + $0x5c4] sm:$0xf]  ;;  %v9742_v31 = vor.u32 %v13487_v50, %v9739_v47  ;;  %v14017_v62 = vld [vmem:[#allocation7 + $0x13d4] sm:$0xf]  ;;  %v10302_v47 = vor.u32 %v13627_v33, %v10299_v60  ;;  %v11739_v33 = vld [vmem:[#allocation7 + $0x1308] sm:$0xf0] }
 0x34c   :  { %6178 = vmatpush.bf16.msrb.mxu1 %v10542_v4  ;;  %v10379_v4 = vld [vmem:[#allocation7 + $0x868] sm:$0xf0]  ;;  %v5901_v57 = vadd.f32 %v5900_v53, %v5888_v28  ;;  %v5928_v6 = vpop.f32.mrf.mxu1  ;;  %v11859_v53 = vld [vmem:[#allocation7 + $0x13f8] sm:$0xf0] }
 0x34d   :  { %v11179_v6 = vld [vmem:[#allocation7 + $0xea8] sm:$0xf0] }
 0x34e   :  { %6165 = vmatpush.bf16.msrb.mxu0 %v10222_v20  ;;  %6140 = vmatpush.bf16.msra.mxu2 %v9542_v16  ;;  %v13647_v20 = vld [vmem:[#allocation7 + $0x844] sm:$0xf]  ;;  %v5915_v18 = vpop.f32.mrf.mxu0  ;;  %v9379_v16 = vld [vmem:[#allocation7 + $0x98] sm:$0xf0]  ;;  %v5914_v43 = vadd.f32 %v5913_v10, %v5901_v57  ;;  %v11862_v57 = vor.u32 %v14017_v62, %v11859_v53  ;;  %v13977_v53 = vld [vmem:[#allocation7 + $0x1294] sm:$0xf] }
 0x34f   :  { %6153 = vmatpush.bf16.msra.mxu3 %v9862_v41  ;;  %v10062_v41 = vor.u32 %v13567_v58, %v10059_v8  ;;  %v10382_v38 = vor.u32 %v13647_v20, %v10379_v4  ;;  %v9382_v9 = vor.u32 %v13397_v2, %v9379_v16  ;;  %v13547_v10 = vld [vmem:[#allocation7 + $0x524] sm:$0xf]  ;;  %v10859_v20 = vld [vmem:[#allocation7 + $0xc28] sm:$0xf0]  ;;  %v11379_v62 = vld [vmem:[#allocation7 + $0x1038] sm:$0xf0] }
 0x350   :  { %6179 = vmatpush.bf16.msrb.mxu1 %v10502_v11  ;;  %v13557_v11 = vld [vmem:[#allocation7 + $0x574] sm:$0xf]  ;;  %v15098_v42 = vadd.f32 %v5926_v54, %v5914_v43  ;;  %v5889_v30 = vpop.f32.mrf.mxu2  ;;  %v9982_v50 = vor.u32 %v13547_v10, %v9979_v3  ;;  %v13767_v8 = vld [vmem:[#allocation7 + $0xc04] sm:$0xf]  ;;  %v11819_v16 = vld [vmem:[#allocation7 + $0x13a8] sm:$0xf0] }
 0x351   :  { %v13847_v18 = vld [vmem:[#allocation7 + $0xe84] sm:$0xf]  ;;  %v11419_v10 = vld [vmem:[#allocation7 + $0x1088] sm:$0xf0] }
 0x352   :  { %6166 = vmatpush.bf16.msrb.mxu0 %v10182_v51  ;;  %6141 = vmatpush.bf16.msra.mxu2 %v9502_v34  ;;  %v9699_v51 = vld [vmem:[#allocation7 + $0x318] sm:$0xf0]  ;;  %v9339_v34 = vld [vmem:[#allocation7 + $0x48] sm:$0xf0]  ;;  %v14007_v2 = vld [vmem:[#allocation7 + $0x1384] sm:$0xf] }
 0x353   :  { %6154 = vmatpush.bf16.msra.mxu3 %v9822_v12  ;;  %v9702_v24 = vor.u32 %v13477_v14, %v9699_v51  ;;  %v13467_v12 = vld [vmem:[#allocation7 + $0x2a4] sm:$0xf]  ;;  %v5902_v26 = vpop.f32.mrf.mxu3  ;;  %v13757_v14 = vld [vmem:[#allocation7 + $0xbb4] sm:$0xf]  ;;  %v10819_v51 = vld [vmem:[#allocation7 + $0xbd8] sm:$0xf0]  ;;  %v11822_v43 = vor.u32 %v14007_v2, %v11819_v16 }
 0x354   :  { %6180 = vmatpush.bf16.msrb.mxu1 %v10462_v37  ;;  %v10342_v37 = vor.u32 %v13637_v36, %v10339_v52  ;;  %v9662_v54 = vor.u32 %v13467_v12, %v9659_v61  ;;  %v11139_v36 = vld [vmem:[#allocation7 + $0xe58] sm:$0xf0]  ;;  %v13917_v52 = vld [vmem:[#allocation7 + $0x10b4] sm:$0xf]  ;;  %v13747_v61 = vld [vmem:[#allocation7 + $0xb64] sm:$0xf] }
 0x355   :  { %v11099_v26 = vld [vmem:[#allocation7 + $0xe08] sm:$0xf0]  ;;  %v13987_v3 = vld [vmem:[#allocation7 + $0x12e4] sm:$0xf] }
 0x356   :  { %6167 = vmatpush.bf16.msrb.mxu0 %v10142_v0  ;;  %6142 = vmatpush.bf16.msra.mxu2 %v9462_v32  ;;  %v10022_v0 = vor.u32 %v13557_v11, %v10019_v22  ;;  %v10899_v32 = vld [vmem:[#allocation7 + $0xc78] sm:$0xf0]  ;;  %v13837_v22 = vld [vmem:[#allocation7 + $0xe34] sm:$0xf]  ;;  %v11339_v16 = vld [vmem:[#allocation7 + $0xfe8] sm:$0xf0] }
 0x357   :  { %6155 = vmatpush.bf16.msra.mxu3 %v9782_v39  ;;  %v13857_v39 = vld [vmem:[#allocation7 + $0xed4] sm:$0xf]  ;;  %v10902_v58 = vor.u32 %v13777_v35, %v10899_v32  ;;  %v11142_v12 = vor.u32 %v13837_v22, %v11139_v36 }
 0x358   :  { %6181 = vmatpush.bf16.msrb.mxu1 %v10422_v44  ;;  %v11539_v44 = vld [vmem:[#allocation7 + $0x1178] sm:$0xf0]  ;;  %v11222_v28 = vor.u32 %v13857_v39, %v11219_v40  ;;  %v13737_v32 = vld [vmem:[#allocation7 + $0xb14] sm:$0xf] }
 0x359   :  { %v11542_v4 = vor.u32 %v13937_v46, %v11539_v44  ;;  %v10739_v39 = vld [vmem:[#allocation7 + $0xb38] sm:$0xf0]  ;;  %v11742_v46 = vor.u32 %v13987_v3, %v11739_v33  ;;  %v13897_v44 = vld [vmem:[#allocation7 + $0x1014] sm:$0xf]  ;;  %v13787_v3 = vld [vmem:[#allocation7 + $0xca4] sm:$0xf] }
 0x35a   :  { %6168 = vmatpush.bf16.msrb.mxu0 %v10102_v5  ;;  %6143 = vmatpush.bf16.msra.mxu2 %v9422_v56  ;;  %v9342_v5 = vor.u32 %v13387_v25, %v9339_v34  ;;  %v13927_v56 = vld [vmem:[#allocation7 + $0x1104] sm:$0xf]  ;;  %v11459_v25 = vld [vmem:[#allocation7 + $0x10d8] sm:$0xf0]  ;;  %v10822_v34 = vor.u32 %v13757_v14, %v10819_v51  ;;  %v13717_v36 = vld [vmem:[#allocation7 + $0xa74] sm:$0xf] }
 0x35b   :  { %6156 = vmatpush.bf16.msra.mxu3 %v9742_v31  ;;  %v11499_v31 = vld [vmem:[#allocation7 + $0x1128] sm:$0xf0] }
 0x35c   :  { %6182 = vmatpush.bf16.msrb.mxu1 %v10382_v38  ;;  %v11182_v38 = vor.u32 %v13847_v18, %v11179_v6  ;;  %v11502_v11 = vor.u32 %v13927_v56, %v11499_v31  ;;  %v13807_v6 = vld [vmem:[#allocation7 + $0xd44] sm:$0xf]  ;;  %v11019_v56 = vld [vmem:[#allocation7 + $0xd68] sm:$0xf0] }
 0x35d   :  { %v13887_v31 = vld [vmem:[#allocation7 + $0xfc4] sm:$0xf]  ;;  %v11022_v22 = vor.u32 %v13807_v6, %v11019_v56  ;;  %v10939_v33 = vld [vmem:[#allocation7 + $0xcc8] sm:$0xf0]  ;;  %v12105_v6 = vld [vmem:[#allocation6 + $0x1e0] sm:$0xf] }
 0x35e   :  { %6169 = vmatpush.bf16.msrb.mxu0 %v10062_v41  ;;  %6144 = vmatpush.bf16.msra.mxu2 %v9382_v9  ;;  %v10862_v41 = vor.u32 %v13767_v8, %v10859_v20  ;;  %v13997_v9 = vld [vmem:[#allocation7 + $0x1334] sm:$0xf]  ;;  %v10699_v8 = vld [vmem:[#allocation7 + $0xae8] sm:$0xf0]  ;;  %v11382_v20 = vor.u32 %v13897_v44, %v11379_v62  ;;  %v12465_v44 = vld [vmem:[#allocation6 + $0x4b0] sm:$0xf] }
 0x35f   :  { %6157 = vmatpush.bf16.msra.mxu3 %v9702_v24  ;;  %v11779_v24 = vld [vmem:[#allocation7 + $0x1358] sm:$0xf0]  ;;  %v13378_v62 = vld [vmem:[#allocation6 + $0x4d4] sm:$0xf0]  ;;  %v13288_v56 = vld [vmem:[#allocation6 + $0x204] sm:$0xf0] }
 0x360   :  { %6183 = vmatpush.bf16.msrb.mxu1 %v10342_v37  ;;  %v11462_v37 = vor.u32 %v13917_v52, %v11459_v25  ;;  %v11782_v30 = vor.u32 %v13997_v9, %v11779_v24  ;;  %v10659_v52 = vld [vmem:[#allocation7 + $0xa98] sm:$0xf0]  ;;  %v11342_v25 = vor.u32 %v13887_v31, %v11339_v16  ;;  %v13797_v24 = vld [vmem:[#allocation7 + $0xcf4] sm:$0xf]  ;;  %v12425_v16 = vld [vmem:[#allocation6 + $0x460] sm:$0xf] }
 0x362   :  { %6170 = vmatpush.bf16.msrb.mxu0 %v10022_v0  ;;  %6145 = vmatpush.bf16.msra.mxu2 %v9342_v5  ;;  %v10779_v0 = vld [vmem:[#allocation7 + $0xb88] sm:$0xf0]  ;;  %v13817_v5 = vld [vmem:[#allocation7 + $0xd94] sm:$0xf] }
 0x363   :  { %6158 = vmatpush.bf16.msra.mxu3 %v9662_v54  ;;  %v10782_v60 = vor.u32 %v13747_v61, %v10779_v0  ;;  %v11059_v54 = vld [vmem:[#allocation7 + $0xdb8] sm:$0xf0]  ;;  %v13957_v0 = vld [vmem:[#allocation7 + $0x11f4] sm:$0xf] }
 0x364   :  { %6184 = vmatpush.bf16.msrb.mxu1 %v10302_v47  ;;  %v10742_v47 = vor.u32 %v13737_v32, %v10739_v39  ;;  %v11299_v61 = vld [vmem:[#allocation7 + $0xf98] sm:$0xf0]  ;;  %v13867_v39 = vld [vmem:[#allocation7 + $0xf24] sm:$0xf] }
 0x365   :  { %6146 = vmatmul.bf16.vlgmr.msra.gmra.mxu2 %v14961_v27  ;;  %v13827_v27 = vld [vmem:[#allocation7 + $0xde4] sm:$0xf] }
 0x366   :  { %6171 = vmatpush.bf16.msrb.mxu0 %v9982_v50  ;;  %6190 = vmatpush.bf16.msrb.mxu2 %v10902_v58  ;;  %v11102_v35 = vor.u32 %v13827_v27, %v11099_v26  ;;  %v11699_v50 = vld [vmem:[#allocation7 + $0x12b8] sm:$0xf0]  ;;  %v11062_v58 = vor.u32 %v13817_v5, %v11059_v54  ;;  %v13707_v27 = vld [vmem:[#allocation7 + $0xa24] sm:$0xf]  ;;  %v10662_v26 = vor.u32 %v13717_v36, %v10659_v52  ;;  %v11579_v5 = vld [vmem:[#allocation7 + $0x11c8] sm:$0xf0] }
 0x367   :  { %6203 = vmatpush.bf16.msrb.mxu3 %v11222_v28  ;;  %6185 = vmatmul.bf16.vlgmr.msrb.gmra.mxu1 %v14967_v21  ;;  %v5978_v21 = vpop.f32.mrf.mxu1  ;;  %v13727_v28 = vld [vmem:[#allocation7 + $0xac4] sm:$0xf]  ;;  %v13298_v54 = vld [vmem:[#allocation6 + $0x254] sm:$0xf0]  ;;  %v12065_v36 = vld [vmem:[#allocation6 + $0x190] sm:$0xf] }
 0x368   :  { %6229 = vmatpush.bf16.msra.mxu1 %v11862_v57  ;;  %6159 = vmatmul.bf16.vlgmr.msra.gmra.mxu3 %v14963_v55  ;;  %v13907_v55 = vld [vmem:[#allocation7 + $0x1064] sm:$0xf]  ;;  %v5939_v57 = vpop.f32.mrf.mxu2  ;;  %v13278_v52 = vld [vmem:[#allocation6 + $0x1b4] sm:$0xf0] }
 0x369   :  { %6172 = vmatmul.bf16.vlgmr.msrb.gmra.mxu0 %v14965_v15  ;;  %v5965_v15 = vpop.f32.mrf.mxu0  ;;  %v11422_v40 = vor.u32 %v13907_v55, %v11419_v10  ;;  %v10619_v10 = vld [vmem:[#allocation7 + $0xa48] sm:$0xf0] }
 0x36a   :  { %6216 = vmatpush.bf16.msra.mxu0 %v11542_v4  ;;  %6191 = vmatpush.bf16.msrb.mxu2 %v10862_v41  ;;  %v11702_v4 = vor.u32 %v13977_v53, %v11699_v50  ;;  %v13967_v41 = vld [vmem:[#allocation7 + $0x1244] sm:$0xf]  ;;  %v13293_v53 = vld [vmem:[#allocation6 + $0x234] sm:$0xf]  ;;  %v10622_v50 = vor.u32 %v13707_v27, %v10619_v10  ;;  %v12066_v27 = vor.u32 %v13278_v52, %v12065_v36  ;;  %v13268_v10 = vld [vmem:[#allocation6 + $0x164] sm:$0xf0] }
 0x36b   :  { %6204 = vmatpush.bf16.msrb.mxu3 %v11182_v38  ;;  %v5952_v18 = vpop.f32.mrf.mxu3  ;;  %v11659_v38 = vld [vmem:[#allocation7 + $0x1268] sm:$0xf0] }
 0x36c   :  { %6230 = vmatpush.bf16.msra.mxu1 %v11822_v43  ;;  %v5953_v2 = vadd.f32 %v5952_v18, %v5939_v57  ;;  %v10702_v43 = vor.u32 %v13727_v28, %v10699_v8  ;;  %v11662_v9 = vor.u32 %v13967_v41, %v11659_v38  ;;  %v13373_v28 = vld [vmem:[#allocation6 + $0x4b4] sm:$0xf]  ;;  %v12467_v8 = vld [vmem:[#allocation6 + $0x4d8] sm:$0xf0]  ;;  %v12466_v18 = vor.u32 %v13378_v62, %v12465_v44  ;;  %v13368_v41 = vld [vmem:[#allocation6 + $0x484] sm:$0xf0] }
 0x36d   :  { %v13283_v38 = vld [vmem:[#allocation6 + $0x1e4] sm:$0xf]  ;;  %v12305_v44 = vld [vmem:[#allocation6 + $0x370] sm:$0xf]  ;;  %v13338_v62 = vld [vmem:[#allocation6 + $0x394] sm:$0xf0] }
 0x36e   :  { %6217 = vmatpush.bf16.msra.mxu0 %v11502_v11  ;;  %6192 = vmatpush.bf16.msrb.mxu2 %v10822_v34  ;;  %v5966_v14 = vadd.f32 %v5965_v15, %v5953_v2  ;;  %v10979_v34 = vld [vmem:[#allocation7 + $0xd18] sm:$0xf0]  ;;  %v12470_v2 = vor.u32 %v13373_v28, %v12467_v8  ;;  %v12306_v8 = vor.u32 %v13338_v62, %v12305_v44  ;;  %v12473_v44 = vld [vmem:[#allocation6 + $0x4b8] sm:$0xf]  ;;  %v13379_v62 = vld [vmem:[#allocation6 + $0x4dc] sm:$0xf0] }
 0x36f   :  { %6205 = vmatpush.bf16.msrb.mxu3 %v11142_v12  ;;  %v5980_v11 = vpop.f32.mrf.mxu1  ;;  %v13877_v12 = vld [vmem:[#allocation7 + $0xf74] sm:$0xf]  ;;  %v10982_v55 = vor.u32 %v13797_v24, %v10979_v34  ;;  %v12385_v24 = vld [vmem:[#allocation6 + $0x410] sm:$0xf]  ;;  %v13358_v34 = vld [vmem:[#allocation6 + $0x434] sm:$0xf0] }
 0x370   :  { %6231 = vmatpush.bf16.msra.mxu1 %v11782_v30  ;;  %v15104_v30 = vadd.f32 %v5978_v21, %v5966_v14  ;;  %v11302_v15 = vor.u32 %v13877_v12, %v11299_v61  ;;  %v12145_v21 = vld [vmem:[#allocation6 + $0x230] sm:$0xf]  ;;  %v12107_v14 = vld [vmem:[#allocation6 + $0x208] sm:$0xf0]  ;;  %v13273_v12 = vld [vmem:[#allocation6 + $0x194] sm:$0xf] }
 0x371   :  { %v5967_v51 = vpop.f32.mrf.mxu0  ;;  %v12146_v57 = vor.u32 %v13298_v54, %v12145_v21  ;;  %v12427_v11 = vld [vmem:[#allocation6 + $0x488] sm:$0xf0]  ;;  %v12067_v61 = vld [vmem:[#allocation6 + $0x1b8] sm:$0xf0] }
 0x372   :  { %6218 = vmatpush.bf16.msra.mxu0 %v11462_v37  ;;  %6193 = vmatpush.bf16.msrb.mxu2 %v10782_v60  ;;  %v11619_v37 = vld [vmem:[#allocation7 + $0x1218] sm:$0xf0]  ;;  %v13363_v51 = vld [vmem:[#allocation6 + $0x464] sm:$0xf] }
 0x373   :  { %6206 = vmatpush.bf16.msrb.mxu3 %v11102_v35  ;;  %v11622_v60 = vor.u32 %v13957_v0, %v11619_v37  ;;  %v5941_v35 = vpop.f32.mrf.mxu2  ;;  %v5954_v32 = vpop.f32.mrf.mxu3  ;;  %v13353_v0 = vld [vmem:[#allocation6 + $0x414] sm:$0xf]  ;;  %v12387_v37 = vld [vmem:[#allocation6 + $0x438] sm:$0xf0] }
 0x374   :  { %6232 = vmatpush.bf16.msra.mxu1 %v11742_v46  ;;  %v13947_v46 = vld [vmem:[#allocation7 + $0x11a4] sm:$0xf]  ;;  %v12347_v32 = vld [vmem:[#allocation6 + $0x3e8] sm:$0xf0] }
 0x375   :  { %v13343_v35 = vld [vmem:[#allocation6 + $0x3c4] sm:$0xf] }
 0x376   :  { %6219 = vmatpush.bf16.msra.mxu0 %v11422_v40  ;;  %6194 = vmatpush.bf16.msrb.mxu2 %v10742_v47  ;;  %v11259_v40 = vld [vmem:[#allocation7 + $0xf48] sm:$0xf0]  ;;  %v10942_v47 = vor.u32 %v13787_v3, %v10939_v33  ;;  %v12070_v3 = vor.u32 %v13273_v12, %v12067_v61  ;;  %v12390_v33 = vor.u32 %v13353_v0, %v12387_v37  ;;  %v12225_v12 = vld [vmem:[#allocation6 + $0x2d0] sm:$0xf]  ;;  %v13318_v61 = vld [vmem:[#allocation6 + $0x2f4] sm:$0xf0] }
 0x377   :  { %6207 = vmatpush.bf16.msrb.mxu3 %v11062_v58  ;;  %v12147_v58 = vld [vmem:[#allocation6 + $0x258] sm:$0xf0]  ;;  %v12350_v54 = vor.u32 %v13343_v35, %v12347_v32  ;;  %v13233_v0 = vld [vmem:[#allocation6 + $0x54] sm:$0xf] }
 0x378   :  { %6233 = vmatpush.bf16.msra.mxu1 %v11702_v4  ;;  %v11582_v4 = vor.u32 %v13947_v46, %v11579_v5  ;;  %v12150_v31 = vor.u32 %v13293_v53, %v12147_v58  ;;  %v11985_v46 = vld [vmem:[#allocation6 + $0xf0] sm:$0xf]  ;;  %v13258_v5 = vld [vmem:[#allocation6 + $0x114] sm:$0xf0]  ;;  %v13253_v53 = vld [vmem:[#allocation6 + $0xf4] sm:$0xf] }
 0x379   :  { %v12307_v58 = vld [vmem:[#allocation6 + $0x398] sm:$0xf0]  ;;  %v11986_v28 = vor.u32 %v13258_v5, %v11985_v46  ;;  %v13303_v46 = vld [vmem:[#allocation6 + $0x284] sm:$0xf]  ;;  %v12187_v5 = vld [vmem:[#allocation6 + $0x2a8] sm:$0xf0] }
 0x37a   :  { %6220 = vmatpush.bf16.msra.mxu0 %v11382_v20  ;;  %6195 = vmatpush.bf16.msrb.mxu2 %v10702_v43  ;;  %v11262_v20 = vor.u32 %v13867_v39, %v11259_v40  ;;  %v12106_v43 = vor.u32 %v13288_v56, %v12105_v6  ;;  %v11907_v37 = vld [vmem:[#allocation6 + $0x78] sm:$0xf0] }
 0x37b   :  { %6208 = vmatpush.bf16.msrb.mxu3 %v11022_v22  ;;  %v12426_v22 = vor.u32 %v13368_v41, %v12425_v16  ;;  %v13243_v16 = vld [vmem:[#allocation6 + $0xa4] sm:$0xf] }
 0x37c   :  { %6234 = vmatpush.bf16.msra.mxu1 %v11662_v9  ;;  %v12430_v9 = vor.u32 %v13363_v51, %v12427_v11  ;;  %v12267_v51 = vld [vmem:[#allocation6 + $0x348] sm:$0xf0] }
 0x37e   :  { %6221 = vmatpush.bf16.msra.mxu0 %v11342_v25  ;;  %6196 = vmatpush.bf16.msrb.mxu2 %v10662_v26  ;;  %v12110_v25 = vor.u32 %v13283_v38, %v12107_v14  ;;  %v12386_v26 = vor.u32 %v13358_v34, %v12385_v24  ;;  %v11947_v38 = vld [vmem:[#allocation6 + $0xc8] sm:$0xf0]  ;;  %v13323_v14 = vld [vmem:[#allocation6 + $0x324] sm:$0xf] }
 0x37f   :  { %6209 = vmatpush.bf16.msrb.mxu3 %v10982_v55  ;;  %v12025_v55 = vld [vmem:[#allocation6 + $0x140] sm:$0xf]  ;;  %v11950_v24 = vor.u32 %v13243_v16, %v11947_v38  ;;  %v12270_v34 = vor.u32 %v13323_v14, %v12267_v51  ;;  %v13369_v38 = vld [vmem:[#allocation6 + $0x48c] sm:$0xf0]  ;;  %v13284_v14 = vld [vmem:[#allocation6 + $0x1ec] sm:$0xf] }
 0x380   :  { %6235 = vmatpush.bf16.msra.mxu1 %v11622_v60  ;;  %v12027_v60 = vld [vmem:[#allocation6 + $0x168] sm:$0xf0]  ;;  %v12026_v39 = vor.u32 %v13268_v10, %v12025_v55  ;;  %v11865_v55 = vld [vmem:[#allocation6] sm:$0xf]  ;;  %v12115_v51 = vld [vmem:[#allocation6 + $0x210] sm:$0xf0] }
 0x382   :  { %6222 = vmatpush.bf16.msra.mxu0 %v11302_v15  ;;  %6197 = vmatpush.bf16.msrb.mxu2 %v10622_v50  ;;  %v13348_v15 = vld [vmem:[#allocation6 + $0x3e4] sm:$0xf0]  ;;  %v11987_v50 = vld [vmem:[#allocation6 + $0x118] sm:$0xf0] }
 0x383   :  { %6210 = vmatpush.bf16.msrb.mxu3 %v10942_v47  ;;  %v13333_v47 = vld [vmem:[#allocation6 + $0x374] sm:$0xf] }
 0x384   :  { %6236 = vmatpush.bf16.msra.mxu1 %v11582_v4  ;;  %v13248_v4 = vld [vmem:[#allocation6 + $0xc4] sm:$0xf0] }
 0x385   :  { %6198 = vmatmul.bf16.vlgmr.msrb.gmra.mxu2 %v14989_v17  ;;  %v12345_v17 = vld [vmem:[#allocation6 + $0x3c0] sm:$0xf] }
 0x386   :  { %6223 = vmatpush.bf16.msra.mxu0 %v11262_v20  ;;  %7042 = vmatpush.bf16.msra.mxu2 %v12146_v57  ;;  %v12346_v40 = vor.u32 %v13348_v15, %v12345_v17  ;;  %v11945_v20 = vld [vmem:[#allocation6 + $0xa0] sm:$0xf]  ;;  %v11990_v57 = vor.u32 %v13253_v53, %v11987_v50  ;;  %v13308_v15 = vld [vmem:[#allocation6 + $0x2a4] sm:$0xf0]  ;;  %v13294_v53 = vld [vmem:[#allocation6 + $0x23c] sm:$0xf] }
 0x387   :  { %7055 = vmatpush.bf16.msra.mxu3 %v12466_v18  ;;  %6237 = vmatmul.bf16.vlgmr.msra.gmra.mxu1 %v14995_v45  ;;  %v6030_v45 = vpop.f32.mrf.mxu1  ;;  %v12310_v18 = vor.u32 %v13333_v47, %v12307_v58  ;;  %v11946_v36 = vor.u32 %v13248_v4, %v11945_v20  ;;  %v12185_v17 = vld [vmem:[#allocation6 + $0x280] sm:$0xf]  ;;  %v12155_v47 = vld [vmem:[#allocation6 + $0x260] sm:$0xf0]  ;;  %v13374_v58 = vld [vmem:[#allocation6 + $0x4bc] sm:$0xf]  ;;  %v12190_v4 = vor.u32 %v13303_v46, %v12187_v5 }
 0x388   :  { %7081 = vmatpush.bf16.msrb.mxu1 %v12470_v2  ;;  %6211 = vmatmul.bf16.vlgmr.msrb.gmra.mxu3 %v14991_v49  ;;  %v13263_v49 = vld [vmem:[#allocation6 + $0x144] sm:$0xf]  ;;  %v5991_v6 = vpop.f32.mrf.mxu2  ;;  %v13328_v2 = vld [vmem:[#allocation6 + $0x344] sm:$0xf0] }
 0x389   :  { %6224 = vmatmul.bf16.vlgmr.msra.gmra.mxu0 %v14993_v48  ;;  %v6017_v48 = vpop.f32.mrf.mxu0  ;;  %v12030_v21 = vor.u32 %v13263_v49, %v12027_v60  ;;  %v5992_v41 = vadd.f32 %v5991_v6, %v15104_v30  ;;  %v11910_v60 = vor.u32 %v13233_v0, %v11907_v37  ;;  %v12474_v6 = vor.u32 %v13379_v62, %v12473_v44  ;;  %v12075_v0 = vld [vmem:[#allocation6 + $0x1c0] sm:$0xf0] }
 0x38a   :  { %7068 = vmatpush.bf16.msrb.mxu0 %v12150_v31  ;;  %7043 = vmatpush.bf16.msra.mxu2 %v12106_v43  ;;  %v12265_v31 = vld [vmem:[#allocation6 + $0x320] sm:$0xf]  ;;  %v12395_v37 = vld [vmem:[#allocation6 + $0x440] sm:$0xf0] }
 0x38b   :  { %7056 = vmatpush.bf16.msra.mxu3 %v12426_v22  ;;  %v6004_v56 = vpop.f32.mrf.mxu3  ;;  %v12266_v52 = vor.u32 %v13328_v2, %v12265_v31  ;;  %v13289_v31 = vld [vmem:[#allocation6 + $0x20c] sm:$0xf0]  ;;  %v12158_v2 = vor.u32 %v13294_v53, %v12155_v47  ;;  %v12313_v53 = vld [vmem:[#allocation6 + $0x378] sm:$0xf]  ;;  %v11995_v47 = vld [vmem:[#allocation6 + $0x120] sm:$0xf0] }
 0x38c   :  { %7082 = vmatpush.bf16.msrb.mxu1 %v12430_v9  ;;  %v6005_v11 = vadd.f32 %v6004_v56, %v5992_v41  ;;  %v13238_v9 = vld [vmem:[#allocation6 + $0x74] sm:$0xf0]  ;;  %v12113_v56 = vld [vmem:[#allocation6 + $0x1e8] sm:$0xf] }
 0x38d   :  { %v12433_v41 = vld [vmem:[#allocation6 + $0x468] sm:$0xf] }
 0x38e   :  { %7069 = vmatpush.bf16.msrb.mxu0 %v12110_v25  ;;  %7044 = vmatpush.bf16.msra.mxu2 %v12066_v27  ;;  %v11905_v25 = vld [vmem:[#allocation6 + $0x50] sm:$0xf]  ;;  %v6018_v30 = vadd.f32 %v6017_v48, %v6005_v11  ;;  %v13313_v27 = vld [vmem:[#allocation6 + $0x2d4] sm:$0xf]  ;;  %v13223_v48 = vld [vmem:[#allocation6 + $0x4] sm:$0xf] }
 0x38f   :  { %7057 = vmatpush.bf16.msra.mxu3 %v12386_v26  ;;  %v6032_v22 = vpop.f32.mrf.mxu1  ;;  %v12227_v26 = vld [vmem:[#allocation6 + $0x2f8] sm:$0xf0]  ;;  %v11906_v10 = vor.u32 %v13238_v9, %v11905_v25  ;;  %v13364_v11 = vld [vmem:[#allocation6 + $0x46c] sm:$0xf]  ;;  %v13279_v25 = vld [vmem:[#allocation6 + $0x1bc] sm:$0xf0]  ;;  %v12118_v9 = vor.u32 %v13284_v14, %v12115_v51 }
 0x390   :  { %7083 = vmatpush.bf16.msrb.mxu1 %v12390_v33  ;;  %v13228_v33 = vld [vmem:[#allocation6 + $0x24] sm:$0xf0]  ;;  %v15111_v49 = vadd.f32 %v6030_v45, %v6018_v30  ;;  %v12230_v35 = vor.u32 %v13313_v27, %v12227_v26  ;;  %v5993_v32 = vpop.f32.mrf.mxu2  ;;  %v12186_v45 = vor.u32 %v13308_v15, %v12185_v17  ;;  %v13354_v30 = vld [vmem:[#allocation6 + $0x41c] sm:$0xf]  ;;  %v13349_v15 = vld [vmem:[#allocation6 + $0x3ec] sm:$0xf0] }
 0x391   :  { %v6019_v43 = vpop.f32.mrf.mxu0  ;;  %v11866_v50 = vor.u32 %v13228_v33, %v11865_v55  ;;  %v12033_v55 = vld [vmem:[#allocation6 + $0x148] sm:$0xf]  ;;  %v12398_v33 = vor.u32 %v13354_v30, %v12395_v37  ;;  %v13344_v32 = vld [vmem:[#allocation6 + $0x3cc] sm:$0xf]  ;;  %v11955_v14 = vld [vmem:[#allocation6 + $0xd0] sm:$0xf0] }
 0x392   :  { %7070 = vmatpush.bf16.msrb.mxu0 %v12070_v3  ;;  %7045 = vmatpush.bf16.msra.mxu2 %v12026_v39  ;;  %v12226_v3 = vor.u32 %v13318_v61, %v12225_v12  ;;  %v13359_v12 = vld [vmem:[#allocation6 + $0x43c] sm:$0xf0]  ;;  %v13274_v61 = vld [vmem:[#allocation6 + $0x19c] sm:$0xf]  ;;  %v12353_v17 = vld [vmem:[#allocation6 + $0x3c8] sm:$0xf] }
 0x393   :  { %7058 = vmatpush.bf16.msra.mxu3 %v12346_v40  ;;  %v6006_v39 = vpop.f32.mrf.mxu3  ;;  %v11867_v40 = vld [vmem:[#allocation6 + $0x28] sm:$0xf0]  ;;  %v12354_v5 = vor.u32 %v13349_v15, %v12353_v17  ;;  %v13234_v30 = vld [vmem:[#allocation6 + $0x5c] sm:$0xf]  ;;  %v11915_v37 = vld [vmem:[#allocation6 + $0x80] sm:$0xf0] }
 0x394   :  { %7084 = vmatpush.bf16.msrb.mxu1 %v12350_v54  ;;  %v13299_v54 = vld [vmem:[#allocation6 + $0x25c] sm:$0xf0]  ;;  %v11870_v20 = vor.u32 %v13223_v48, %v11867_v40  ;;  %v12355_v39 = vld [vmem:[#allocation6 + $0x3f0] sm:$0xf0]  ;;  %v13324_v51 = vld [vmem:[#allocation6 + $0x32c] sm:$0xf] }
 0x395   :  { %v12358_v62 = vor.u32 %v13344_v32, %v12355_v39  ;;  %v13229_v17 = vld [vmem:[#allocation6 + $0x2c] sm:$0xf0]  ;;  %v12193_v15 = vld [vmem:[#allocation6 + $0x288] sm:$0xf] }
 0x396   :  { %7071 = vmatpush.bf16.msrb.mxu0 %v12030_v21  ;;  %7046 = vmatpush.bf16.msra.mxu2 %v11986_v28  ;;  %v12153_v21 = vld [vmem:[#allocation6 + $0x238] sm:$0xf]  ;;  %v12475_v28 = vld [vmem:[#allocation6 + $0x4e0] sm:$0xf0] }
 0x397   :  { %7059 = vmatpush.bf16.msra.mxu3 %v12306_v8  ;;  %v348_v8 = vmax.f32 %v14598_v63, 0.0  ;;  %v12478_v16 = vor.u32 %v13374_v58, %v12475_v28  ;;  %v12435_v63 = vld [vmem:[#allocation6 + $0x490] sm:$0xf0]  ;;  %v13334_v58 = vld [vmem:[#allocation6 + $0x37c] sm:$0xf] }
 0x398   :  { %7085 = vmatpush.bf16.msrb.mxu1 %v12310_v18  ;;  %v12154_v18 = vor.u32 %v13299_v54, %v12153_v21  ;;  %v11993_v21 = vld [vmem:[#allocation6 + $0xf8] sm:$0xf]  ;;  %v13259_v54 = vld [vmem:[#allocation6 + $0x11c] sm:$0xf0]  ;;  %v12315_v28 = vld [vmem:[#allocation6 + $0x3a0] sm:$0xf0] }
 0x399   :  { %v15115_v43 = vpack.c.bf16 %v348_v8, %v348_v8  ;;  %v11994_v8 = vor.u32 %v13259_v54, %v11993_v21  ;;  %v13304_v21 = vld [vmem:[#allocation6 + $0x28c] sm:$0xf]  ;;  %v12195_v54 = vld [vmem:[#allocation6 + $0x2b0] sm:$0xf0] }
 0x39a   :  { %7072 = vmatpush.bf16.msrb.mxu0 %v11990_v57  ;;  %7047 = vmatpush.bf16.msra.mxu2 %v11946_v36  ;;  %v349_v57 = vmax.f32 %v14600_v59, 0.0  ;;  %v12114_v59 = vor.u32 %v13289_v31, %v12113_v56  ;;  %v12434_v36 = vor.u32 %v13369_v38, %v12433_v41  ;;  %v13244_v41 = vld [vmem:[#allocation6 + $0xac] sm:$0xf] }
 0x39b   :  { %7060 = vmatpush.bf16.msra.mxu3 %v12266_v52  ;;  %v12073_v52 = vld [vmem:[#allocation6 + $0x198] sm:$0xf] }
 0x39c   :  { %7086 = vmatpush.bf16.msrb.mxu1 %v12270_v34  ;;  %v15117_v22 = vpack.c.bf16 %v349_v57, %v349_v57  ;;  %v12393_v34 = vld [vmem:[#allocation6 + $0x418] sm:$0xf]  ;;  %v12074_v27 = vor.u32 %v13279_v25, %v12073_v52  ;;  %v13249_v57 = vld [vmem:[#allocation6 + $0xcc] sm:$0xf0] }
 0x39d   :  { %v12394_v26 = vor.u32 %v13359_v12, %v12393_v34  ;;  %v11958_v34 = vor.u32 %v13244_v41, %v11955_v14  ;;  %v13370_v41 = vld [vmem:[#allocation6 + $0x494] sm:$0xf0]  ;;  %v12123_v14 = vld [vmem:[#allocation6 + $0x218] sm:$0xf0] }
 0x39e   :  { %7073 = vmatpush.bf16.msrb.mxu0 %v11950_v24  ;;  %7048 = vmatpush.bf16.msra.mxu2 %v11906_v10  ;;  %v12438_v24 = vor.u32 %v13364_v11, %v12435_v63  ;;  %v13269_v10 = vld [vmem:[#allocation6 + $0x16c] sm:$0xf0]  ;;  %v12275_v11 = vld [vmem:[#allocation6 + $0x350] sm:$0xf0] }
 0x39f   :  { %7061 = vmatpush.bf16.msra.mxu3 %v12226_v3  ;;  %v12078_v3 = vor.u32 %v13274_v61, %v12075_v0  ;;  %v12034_v46 = vor.u32 %v13269_v10, %v12033_v55  ;;  %v12278_v12 = vor.u32 %v13324_v51, %v12275_v11  ;;  %v12233_v61 = vld [vmem:[#allocation6 + $0x2d8] sm:$0xf]  ;;  %v13319_v0 = vld [vmem:[#allocation6 + $0x2fc] sm:$0xf0]  ;;  %v11873_v10 = vld [vmem:[#allocation6 + $0x8] sm:$0xf] }
 0x3a0   :  { %7087 = vmatpush.bf16.msrb.mxu1 %v12230_v35  ;;  %v12035_v35 = vld [vmem:[#allocation6 + $0x170] sm:$0xf0]  ;;  %v12443_v11 = vld [vmem:[#allocation6 + $0x498] sm:$0xf0] }
 0x3a1   :  { %v13365_v51 = vld [vmem:[#allocation6 + $0x474] sm:$0xf] }
 0x3a2   :  { %7074 = vmatpush.bf16.msrb.mxu0 %v11910_v60  ;;  %7049 = vmatpush.bf16.msra.mxu2 %v11866_v50  ;;  %v13264_v60 = vld [vmem:[#allocation6 + $0x14c] sm:$0xf]  ;;  %v13339_v50 = vld [vmem:[#allocation6 + $0x39c] sm:$0xf0] }
 0x3a3   :  { %7062 = vmatpush.bf16.msra.mxu3 %v12186_v45  ;;  %v12038_v44 = vor.u32 %v13264_v60, %v12035_v35  ;;  %v13254_v45 = vld [vmem:[#allocation6 + $0xfc] sm:$0xf]  ;;  %v13309_v60 = vld [vmem:[#allocation6 + $0x2ac] sm:$0xf0]  ;;  %v11918_v35 = vor.u32 %v13234_v30, %v11915_v37  ;;  %v12403_v30 = vld [vmem:[#allocation6 + $0x448] sm:$0xf0] }
 0x3a4   :  { %7088 = vmatpush.bf16.msrb.mxu1 %v12190_v4  ;;  %v6082_v40 = vpop.f32.mrf.mxu1  ;;  %v11953_v4 = vld [vmem:[#allocation6 + $0xa8] sm:$0xf] }
 0x3a5   :  { %7050 = vmatmul.bf16.vlgmr.msra.gmra.mxu2 %v15115_v43  ;;  %v11954_v52 = vor.u32 %v13249_v57, %v11953_v4  ;;  %v12198_v4 = vor.u32 %v13304_v21, %v12195_v54  ;;  %v12001_v54 = vld [vmem:[#allocation6 + $0x100] sm:$0xf] }
 0x3a6   :  { %7075 = vmatpush.bf16.msrb.mxu0 %v11870_v20  ;;  %7094 = vmatpush.bf16.msrb.mxu2 %v12154_v18  ;;  %v6069_v48 = vpop.f32.mrf.mxu0  ;;  %v12314_v20 = vor.u32 %v13339_v50, %v12313_v53  ;;  %v11998_v18 = vor.u32 %v13254_v45, %v11995_v47  ;;  %v13380_v53 = vld [vmem:[#allocation6 + $0x4e4] sm:$0xf0]  ;;  %v13295_v50 = vld [vmem:[#allocation6 + $0x244] sm:$0xf]  ;;  %v11874_v45 = vor.u32 %v13229_v17, %v11873_v10  ;;  %v13270_v10 = vld [vmem:[#allocation6 + $0x174] sm:$0xf0] }
 0x3a7   :  { %7107 = vmatpush.bf16.msrb.mxu3 %v12474_v6  ;;  %7089 = vmatmul.bf16.vlgmr.msrb.gmra.mxu1 %v15117_v22  ;;  %v12318_v6 = vor.u32 %v13334_v58, %v12315_v28  ;;  %v12194_v47 = vor.u32 %v13309_v60, %v12193_v15  ;;  %v12163_v58 = vld [vmem:[#allocation6 + $0x268] sm:$0xf0]  ;;  %v13375_v28 = vld [vmem:[#allocation6 + $0x4c4] sm:$0xf]  ;;  %v12361_v17 = vld [vmem:[#allocation6 + $0x3d0] sm:$0xf] }
 0x3a8   :  { %7133 = vmatpush.bf16.msra.mxu1 %v12478_v16  ;;  %7063 = vmatmul.bf16.vlgmr.msra.gmra.mxu3 %v15117_v22  ;;  %v6043_v56 = vpop.f32.mrf.mxu2  ;;  %v13329_v16 = vld [vmem:[#allocation6 + $0x34c] sm:$0xf0]  ;;  %v13350_v15 = vld [vmem:[#allocation6 + $0x3f4] sm:$0xf0]  ;;  %v13265_v60 = vld [vmem:[#allocation6 + $0x154] sm:$0xf] }
 0x3a9   :  { %7076 = vmatmul.bf16.vlgmr.msrb.gmra.mxu0 %v15115_v43  ;;  %v12362_v21 = vor.u32 %v13350_v15, %v12361_v17  ;;  %v13230_v17 = vld [vmem:[#allocation6 + $0x34] sm:$0xf0]  ;;  %v12201_v15 = vld [vmem:[#allocation6 + $0x290] sm:$0xf] }
 0x3aa   :  { %7120 = vmatpush.bf16.msra.mxu0 %v12158_v2  ;;  %7095 = vmatpush.bf16.msrb.mxu2 %v12114_v59  ;;  %v12273_v2 = vld [vmem:[#allocation6 + $0x328] sm:$0xf] }
 0x3ab   :  { %7108 = vmatpush.bf16.msrb.mxu3 %v12434_v36  ;;  %v6056_v31 = vpop.f32.mrf.mxu3  ;;  %v12274_v25 = vor.u32 %v13329_v16, %v12273_v2  ;;  %v12441_v16 = vld [vmem:[#allocation6 + $0x470] sm:$0xf] }
 0x3ac   :  { %7134 = vmatpush.bf16.msra.mxu1 %v12438_v24  ;;  %v6057_v38 = vadd.f32 %v6056_v31, %v6043_v56  ;;  %v6084_v36 = vpop.f32.mrf.mxu1  ;;  %v13239_v24 = vld [vmem:[#allocation6 + $0x7c] sm:$0xf0]  ;;  %v13290_v56 = vld [vmem:[#allocation6 + $0x214] sm:$0xf0]  ;;  %v12166_v31 = vor.u32 %v13295_v50, %v12163_v58  ;;  %v13340_v50 = vld [vmem:[#allocation6 + $0x3a4] sm:$0xf0] }
 0x3ad   :  { %v12081_v36 = vld [vmem:[#allocation6 + $0x1a0] sm:$0xf]  ;;  %v13335_v58 = vld [vmem:[#allocation6 + $0x384] sm:$0xf] }
 0x3ae   :  { %7121 = vmatpush.bf16.msra.mxu0 %v12118_v9  ;;  %7096 = vmatpush.bf16.msrb.mxu2 %v12074_v27  ;;  %v6070_v63 = vadd.f32 %v6069_v48, %v6057_v38  ;;  %v6071_v59 = vpop.f32.mrf.mxu0  ;;  %v11913_v9 = vld [vmem:[#allocation6 + $0x58] sm:$0xf]  ;;  %v13314_v27 = vld [vmem:[#allocation6 + $0x2dc] sm:$0xf]  ;;  %v13285_v38 = vld [vmem:[#allocation6 + $0x1f4] sm:$0xf] }
 0x3af   :  { %7109 = vmatpush.bf16.msrb.mxu3 %v12394_v26  ;;  %v12235_v26 = vld [vmem:[#allocation6 + $0x300] sm:$0xf0]  ;;  %v12442_v59 = vor.u32 %v13370_v41, %v12441_v16  ;;  %v13330_v16 = vld [vmem:[#allocation6 + $0x354] sm:$0xf0]  ;;  %v13245_v41 = vld [vmem:[#allocation6 + $0xb4] sm:$0xf] }
 0x3b0   :  { %7135 = vmatpush.bf16.msra.mxu1 %v12398_v33  ;;  %v15123_v55 = vadd.f32 %v6082_v40, %v6070_v63  ;;  %v12234_v33 = vor.u32 %v13319_v0, %v12233_v61  ;;  %v12238_v32 = vor.u32 %v13314_v27, %v12235_v26  ;;  %v6045_v39 = vpop.f32.mrf.mxu2  ;;  %v12161_v40 = vld [vmem:[#allocation6 + $0x240] sm:$0xf]  ;;  %v12083_v61 = vld [vmem:[#allocation6 + $0x1c8] sm:$0xf0]  ;;  %v13355_v0 = vld [vmem:[#allocation6 + $0x424] sm:$0xf] }
 0x3b1   :  { %v12041_v26 = vld [vmem:[#allocation6 + $0x150] sm:$0xf]  ;;  %v12363_v39 = vld [vmem:[#allocation6 + $0x3f8] sm:$0xf0] }
 0x3b2   :  { %7122 = vmatpush.bf16.msra.mxu0 %v12078_v3  ;;  %7097 = vmatpush.bf16.msrb.mxu2 %v12034_v46  ;;  %v11914_v3 = vor.u32 %v13239_v24, %v11913_v9  ;;  %v13224_v46 = vld [vmem:[#allocation6 + $0xc] sm:$0xf]  ;;  %v12446_v9 = vor.u32 %v13365_v51, %v12443_v11  ;;  %v12401_v24 = vld [vmem:[#allocation6 + $0x420] sm:$0xf]  ;;  %v13325_v51 = vld [vmem:[#allocation6 + $0x334] sm:$0xf] }
 0x3b3   :  { %7110 = vmatpush.bf16.msrb.mxu3 %v12354_v5  ;;  %v6058_v48 = vpop.f32.mrf.mxu3  ;;  %v11875_v5 = vld [vmem:[#allocation6 + $0x30] sm:$0xf0]  ;;  %v12283_v11 = vld [vmem:[#allocation6 + $0x358] sm:$0xf0] }
 0x3b4   :  { %7136 = vmatpush.bf16.msra.mxu1 %v12358_v62  ;;  %v12481_v62 = vld [vmem:[#allocation6 + $0x4c0] sm:$0xf] }
 0x3b6   :  { %7123 = vmatpush.bf16.msra.mxu0 %v12038_v44  ;;  %7098 = vmatpush.bf16.msrb.mxu2 %v11994_v8  ;;  %v13300_v44 = vld [vmem:[#allocation6 + $0x264] sm:$0xf0]  ;;  %v12483_v8 = vld [vmem:[#allocation6 + $0x4e8] sm:$0xf0] }
 0x3b7   :  { %7111 = vmatpush.bf16.msrb.mxu3 %v12314_v20  ;;  %v11878_v20 = vor.u32 %v13224_v46, %v11875_v5  ;;  %v12162_v57 = vor.u32 %v13300_v44, %v12161_v40  ;;  %v12486_v2 = vor.u32 %v13375_v28, %v12483_v8  ;;  %v12042_v5 = vor.u32 %v13270_v10, %v12041_v26  ;;  %v13260_v40 = vld [vmem:[#allocation6 + $0x124] sm:$0xf0]  ;;  %v12323_v28 = vld [vmem:[#allocation6 + $0x3a8] sm:$0xf0]  ;;  %v11881_v10 = vld [vmem:[#allocation6 + $0x10] sm:$0xf] }
 0x3b8   :  { %7137 = vmatpush.bf16.msra.mxu1 %v12318_v6  ;;  %v12121_v6 = vld [vmem:[#allocation6 + $0x1f0] sm:$0xf]  ;;  %v12002_v8 = vor.u32 %v13260_v40, %v12001_v54  ;;  %v12243_v26 = vld [vmem:[#allocation6 + $0x308] sm:$0xf0]  ;;  %v11883_v54 = vld [vmem:[#allocation6 + $0x38] sm:$0xf0] }
 0x3b9   :  { %v12122_v63 = vor.u32 %v13290_v56, %v12121_v6  ;;  %v12326_v6 = vor.u32 %v13335_v58, %v12323_v28  ;;  %v13305_v40 = vld [vmem:[#allocation6 + $0x294] sm:$0xf]  ;;  %v11882_v58 = vor.u32 %v13230_v17, %v11881_v10  ;;  %v13271_v10 = vld [vmem:[#allocation6 + $0x17c] sm:$0xf0]  ;;  %v12369_v17 = vld [vmem:[#allocation6 + $0x3d8] sm:$0xf] }
 0x3ba   :  { %7124 = vmatpush.bf16.msra.mxu0 %v11998_v18  ;;  %7099 = vmatpush.bf16.msrb.mxu2 %v11954_v52  ;;  %v12482_v18 = vor.u32 %v13380_v53, %v12481_v62  ;;  %v13280_v52 = vld [vmem:[#allocation6 + $0x1c4] sm:$0xf0]  ;;  %v12321_v53 = vld [vmem:[#allocation6 + $0x380] sm:$0xf]  ;;  %v12171_v28 = vld [vmem:[#allocation6 + $0x270] sm:$0xf0] }
 0x3bb   :  { %7112 = vmatpush.bf16.msrb.mxu3 %v12274_v25  ;;  %v12126_v25 = vor.u32 %v13285_v38, %v12123_v14  ;;  %v12082_v37 = vor.u32 %v13280_v52, %v12081_v36  ;;  %v11963_v14 = vld [vmem:[#allocation6 + $0xd8] sm:$0xf0] }
 0x3bc   :  { %7138 = vmatpush.bf16.msra.mxu1 %v12278_v12  ;;  %v13275_v12 = vld [vmem:[#allocation6 + $0x1a4] sm:$0xf] }
 0x3be   :  { %7125 = vmatpush.bf16.msra.mxu0 %v11958_v34  ;;  %7100 = vmatpush.bf16.msrb.mxu2 %v11914_v3  ;;  %v13360_v34 = vld [vmem:[#allocation6 + $0x444] sm:$0xf0]  ;;  %v12086_v3 = vor.u32 %v13275_v12, %v12083_v61  ;;  %v12286_v12 = vor.u32 %v13325_v51, %v12283_v11  ;;  %v12241_v61 = vld [vmem:[#allocation6 + $0x2e0] sm:$0xf]  ;;  %v12131_v51 = vld [vmem:[#allocation6 + $0x220] sm:$0xf0] }
 0x3bf   :  { %7113 = vmatpush.bf16.msrb.mxu3 %v12234_v33  ;;  %v12402_v27 = vor.u32 %v13360_v34, %v12401_v24  ;;  %v12406_v33 = vor.u32 %v13355_v0, %v12403_v30  ;;  %v13240_v24 = vld [vmem:[#allocation6 + $0x84] sm:$0xf0]  ;;  %v11966_v34 = vor.u32 %v13245_v41, %v11963_v14  ;;  %v13235_v30 = vld [vmem:[#allocation6 + $0x64] sm:$0xf]  ;;  %v12449_v41 = vld [vmem:[#allocation6 + $0x478] sm:$0xf] }
 0x3c0   :  { %7139 = vmatpush.bf16.msra.mxu1 %v12238_v32  ;;  %v13345_v32 = vld [vmem:[#allocation6 + $0x3d4] sm:$0xf]  ;;  %v13320_v0 = vld [vmem:[#allocation6 + $0x304] sm:$0xf0]  ;;  %v13286_v14 = vld [vmem:[#allocation6 + $0x1fc] sm:$0xf] }
 0x3c1   :  { %v12366_v62 = vor.u32 %v13345_v32, %v12363_v39  ;;  %v13366_v11 = vld [vmem:[#allocation6 + $0x47c] sm:$0xf] }
 0x3c2   :  { %7126 = vmatpush.bf16.msra.mxu0 %v11918_v35  ;;  %7101 = vmatpush.bf16.msrb.mxu2 %v11874_v45  ;;  %v12043_v35 = vld [vmem:[#allocation6 + $0x178] sm:$0xf0]  ;;  %v13255_v45 = vld [vmem:[#allocation6 + $0x104] sm:$0xf] }
 0x3c3   :  { %7114 = vmatpush.bf16.msrb.mxu3 %v12194_v47  ;;  %v12046_v44 = vor.u32 %v13265_v60, %v12043_v35  ;;  %v12003_v47 = vld [vmem:[#allocation6 + $0x128] sm:$0xf0]  ;;  %v13310_v60 = vld [vmem:[#allocation6 + $0x2b4] sm:$0xf0] }
 0x3c4   :  { %7140 = vmatpush.bf16.msra.mxu1 %v12198_v4  ;;  %v6134_v46 = vpop.f32.mrf.mxu1  ;;  %v11961_v4 = vld [vmem:[#allocation6 + $0xb0] sm:$0xf] }
 0x3c5   :  { %7102 = vmatmul.bf16.vlgmr.msrb.gmra.mxu2 %v15115_v43 }
 0x3c6   :  { %7127 = vmatpush.bf16.msra.mxu0 %v11878_v20  ;;  %7146 = vmatpush.bf16.msra.mxu2 %v12162_v57  ;;  %v6121_v48 = vpop.f32.mrf.mxu0  ;;  %v12322_v20 = vor.u32 %v13340_v50, %v12321_v53  ;;  %v13250_v57 = vld [vmem:[#allocation6 + $0xd4] sm:$0xf0]  ;;  %v13301_v53 = vld [vmem:[#allocation6 + $0x26c] sm:$0xf0]  ;;  %v12489_v50 = vld [vmem:[#allocation6 + $0x4c8] sm:$0xf] }
 0x3c7   :  { %7159 = vmatpush.bf16.msra.mxu3 %v12482_v18  ;;  %7141 = vmatmul.bf16.vlgmr.msra.gmra.mxu1 %v15117_v22  ;;  %v12006_v18 = vor.u32 %v13255_v45, %v12003_v47  ;;  %v11962_v52 = vor.u32 %v13250_v57, %v11961_v4  ;;  %v13381_v45 = vld [vmem:[#allocation6 + $0x4ec] sm:$0xf0]  ;;  %v13296_v47 = vld [vmem:[#allocation6 + $0x24c] sm:$0xf] }
 0x3c8   :  { %7185 = vmatpush.bf16.msrb.mxu1 %v12486_v2  ;;  %7115 = vmatmul.bf16.vlgmr.msrb.gmra.mxu3 %v15117_v22  ;;  %v6095_v56 = vpop.f32.mrf.mxu2  ;;  %v12281_v2 = vld [vmem:[#allocation6 + $0x330] sm:$0xf] }
 0x3c9   :  { %7128 = vmatmul.bf16.vlgmr.msra.gmra.mxu0 %v15115_v43  ;;  %v6096_v38 = vadd.f32 %v6095_v56, %v15123_v55  ;;  %v12129_v56 = vld [vmem:[#allocation6 + $0x1f8] sm:$0xf] }
 0x3ca   :  { %7172 = vmatpush.bf16.msrb.mxu0 %v12166_v31  ;;  %7147 = vmatpush.bf16.msra.mxu2 %v12122_v63 }
 0x3cb   :  { %7160 = vmatpush.bf16.msra.mxu3 %v12442_v59  ;;  %v6108_v31 = vpop.f32.mrf.mxu3 }
 0x3cc   :  { %7186 = vmatpush.bf16.msrb.mxu1 %v12446_v9  ;;  %v6109_v63 = vadd.f32 %v6108_v31, %v6096_v38  ;;  %v6136_v36 = vpop.f32.mrf.mxu1  ;;  %v11921_v9 = vld [vmem:[#allocation6 + $0x60] sm:$0xf] }
 0x3cd   :  { %v13291_v31 = vld [vmem:[#allocation6 + $0x21c] sm:$0xf0] }
 0x3ce   :  { %7173 = vmatpush.bf16.msrb.mxu0 %v12126_v25  ;;  %7148 = vmatpush.bf16.msra.mxu2 %v12082_v37  ;;  %v6123_v59 = vpop.f32.mrf.mxu0  ;;  %v12282_v25 = vor.u32 %v13330_v16, %v12281_v2  ;;  %v6122_v55 = vadd.f32 %v6121_v48, %v6109_v63  ;;  %v11923_v37 = vld [vmem:[#allocation6 + $0x88] sm:$0xf0]  ;;  %v13225_v48 = vld [vmem:[#allocation6 + $0x14] sm:$0xf]  ;;  %v12174_v2 = vor.u32 %v13296_v47, %v12171_v28  ;;  %v13371_v38 = vld [vmem:[#allocation6 + $0x49c] sm:$0xf0] }
 0x3cf   :  { %7161 = vmatpush.bf16.msra.mxu3 %v12402_v27  ;;  %v13315_v27 = vld [vmem:[#allocation6 + $0x2e4] sm:$0xf]  ;;  %v11926_v32 = vor.u32 %v13235_v30, %v11923_v37  ;;  %v11886_v4 = vor.u32 %v13225_v48, %v11883_v54  ;;  %v12130_v59 = vor.u32 %v13291_v31, %v12129_v56  ;;  %v12450_v36 = vor.u32 %v13371_v38, %v12449_v41  ;;  %v13356_v30 = vld [vmem:[#allocation6 + $0x42c] sm:$0xf]  ;;  %v13341_v47 = vld [vmem:[#allocation6 + $0x3ac] sm:$0xf0] }
 0x3d0   :  { %7187 = vmatpush.bf16.msrb.mxu1 %v12406_v33  ;;  %v12242_v33 = vor.u32 %v13320_v0, %v12241_v61  ;;  %v15130_v35 = vadd.f32 %v6134_v46, %v6122_v55  ;;  %v12246_v39 = vor.u32 %v13315_v27, %v12243_v26  ;;  %v12202_v46 = vor.u32 %v13310_v60, %v12201_v15  ;;  %v12451_v63 = vld [vmem:[#allocation6 + $0x4a0] sm:$0xf0]  ;;  %v13276_v61 = vld [vmem:[#allocation6 + $0x1ac] sm:$0xf]  ;;  %v12091_v0 = vld [vmem:[#allocation6 + $0x1d0] sm:$0xf0] }
 0x3d1   :  { %v12411_v55 = vld [vmem:[#allocation6 + $0x450] sm:$0xf0]  ;;  %v12049_v26 = vld [vmem:[#allocation6 + $0x158] sm:$0xf]  ;;  %v13351_v15 = vld [vmem:[#allocation6 + $0x3fc] sm:$0xf0] }
 0x3d2   :  { %7174 = vmatpush.bf16.msrb.mxu0 %v12086_v3  ;;  %7149 = vmatpush.bf16.msra.mxu2 %v12042_v5  ;;  %v11922_v3 = vor.u32 %v13240_v24, %v11921_v9  ;;  %v6097_v5 = vpop.f32.mrf.mxu2  ;;  %v12134_v9 = vor.u32 %v13286_v14, %v12131_v51  ;;  %v12454_v24 = vor.u32 %v13366_v11, %v12451_v63  ;;  %v13266_v60 = vld [vmem:[#allocation6 + $0x15c] sm:$0xf]  ;;  %v13336_v28 = vld [vmem:[#allocation6 + $0x38c] sm:$0xf]  ;;  %v13331_v41 = vld [vmem:[#allocation6 + $0x35c] sm:$0xf0] }
 0x3d3   :  { %7162 = vmatpush.bf16.msra.mxu3 %v12362_v21  ;;  %v6110_v21 = vpop.f32.mrf.mxu3  ;;  %v12371_v5 = vld [vmem:[#allocation6 + $0x400] sm:$0xf0]  ;;  %v12050_v54 = vor.u32 %v13271_v10, %v12049_v26  ;;  %v13246_v38 = vld [vmem:[#allocation6 + $0xbc] sm:$0xf]  ;;  %v12251_v26 = vld [vmem:[#allocation6 + $0x310] sm:$0xf0] }
 0x3d4   :  { %7188 = vmatpush.bf16.msrb.mxu1 %v12366_v62  ;;  %v12169_v62 = vld [vmem:[#allocation6 + $0x248] sm:$0xf]  ;;  %v11971_v51 = vld [vmem:[#allocation6 + $0xe0] sm:$0xf0]  ;;  %v13326_v11 = vld [vmem:[#allocation6 + $0x33c] sm:$0xf] }
 0x3d5   :  { %v12291_v63 = vld [vmem:[#allocation6 + $0x360] sm:$0xf0] }
 0x3d6   :  { %7175 = vmatpush.bf16.msrb.mxu0 %v12046_v44  ;;  %7150 = vmatpush.bf16.msra.mxu2 %v12002_v8  ;;  %v12203_v44 = vld [vmem:[#allocation6 + $0x2b8] sm:$0xf0]  ;;  %v13376_v8 = vld [vmem:[#allocation6 + $0x4cc] sm:$0xf] }
 0x3d7   :  { %7163 = vmatpush.bf16.msra.mxu3 %v12322_v20  ;;  %v12491_v20 = vld [vmem:[#allocation6 + $0x4f0] sm:$0xf0]  ;;  %v12206_v57 = vor.u32 %v13305_v40, %v12203_v44  ;;  %v12370_v40 = vor.u32 %v13351_v15, %v12369_v17  ;;  %v12009_v44 = vld [vmem:[#allocation6 + $0x108] sm:$0xf]  ;;  %v13231_v15 = vld [vmem:[#allocation6 + $0x3c] sm:$0xf0] }
 0x3d8   :  { %7189 = vmatpush.bf16.msrb.mxu1 %v12326_v6  ;;  %v12490_v6 = vor.u32 %v13381_v45, %v12489_v50  ;;  %v12494_v16 = vor.u32 %v13376_v8, %v12491_v20  ;;  %v12329_v45 = vld [vmem:[#allocation6 + $0x388] sm:$0xf]  ;;  %v12331_v8 = vld [vmem:[#allocation6 + $0x3b0] sm:$0xf0] }
 0x3d9   :  { %v12334_v56 = vor.u32 %v13336_v28, %v12331_v8  ;;  %v12179_v8 = vld [vmem:[#allocation6 + $0x278] sm:$0xf0] }
 0x3da   :  { %7176 = vmatpush.bf16.msrb.mxu0 %v12006_v18  ;;  %7151 = vmatpush.bf16.msra.mxu2 %v11962_v52  ;;  %v12170_v18 = vor.u32 %v13301_v53, %v12169_v62  ;;  %v12089_v52 = vld [vmem:[#allocation6 + $0x1a8] sm:$0xf]  ;;  %v13261_v62 = vld [vmem:[#allocation6 + $0x12c] sm:$0xf0] }
 0x3db   :  { %7164 = vmatpush.bf16.msra.mxu3 %v12282_v25  ;;  %v13281_v25 = vld [vmem:[#allocation6 + $0x1cc] sm:$0xf0]  ;;  %v12010_v20 = vor.u32 %v13261_v62, %v12009_v44  ;;  %v11891_v44 = vld [vmem:[#allocation6 + $0x40] sm:$0xf0]  ;;  %v13306_v62 = vld [vmem:[#allocation6 + $0x29c] sm:$0xf] }
 0x3dc   :  { %7190 = vmatpush.bf16.msrb.mxu1 %v12286_v12  ;;  %v13361_v12 = vld [vmem:[#allocation6 + $0x44c] sm:$0xf0]  ;;  %v12090_v37 = vor.u32 %v13281_v25, %v12089_v52 }
 0x3de   :  { %7177 = vmatpush.bf16.msrb.mxu0 %v11966_v34  ;;  %7152 = vmatpush.bf16.msra.mxu2 %v11922_v3  ;;  %v12409_v34 = vld [vmem:[#allocation6 + $0x428] sm:$0xf]  ;;  %v12094_v3 = vor.u32 %v13276_v61, %v12091_v0  ;;  %v12294_v61 = vor.u32 %v13326_v11, %v12291_v63  ;;  %v12139_v11 = vld [vmem:[#allocation6 + $0x228] sm:$0xf0]  ;;  %v13367_v63 = vld [vmem:[#allocation6 + $0x484] sm:$0xf] }
 0x3df   :  { %7165 = vmatpush.bf16.msra.mxu3 %v12242_v33  ;;  %v12410_v27 = vor.u32 %v13361_v12, %v12409_v34  ;;  %v12414_v33 = vor.u32 %v13356_v30, %v12411_v55  ;;  %v13241_v34 = vld [vmem:[#allocation6 + $0x8c] sm:$0xf0]  ;;  %v11974_v12 = vor.u32 %v13246_v38, %v11971_v51  ;;  %v12249_v0 = vld [vmem:[#allocation6 + $0x2e8] sm:$0xf]  ;;  %v13236_v55 = vld [vmem:[#allocation6 + $0x6c] sm:$0xf] }
 0x3e0   :  { %7191 = vmatpush.bf16.msrb.mxu1 %v12246_v39  ;;  %v13346_v39 = vld [vmem:[#allocation6 + $0x3dc] sm:$0xf]  ;;  %v13321_v30 = vld [vmem:[#allocation6 + $0x30c] sm:$0xf0]  ;;  %v12457_v38 = vld [vmem:[#allocation6 + $0x480] sm:$0xf] }
 0x3e1   :  { %v12374_v50 = vor.u32 %v13346_v39, %v12371_v5  ;;  %v12250_v17 = vor.u32 %v13321_v30, %v12249_v0  ;;  %v13287_v51 = vld [vmem:[#allocation6 + $0x204] sm:$0xf]  ;;  %v13277_v0 = vld [vmem:[#allocation6 + $0x1b4] sm:$0xf]  ;;  %v12099_v30 = vld [vmem:[#allocation6 + $0x1d8] sm:$0xf0] }
 0x3e2   :  { %7178 = vmatpush.bf16.msrb.mxu0 %v11926_v32  ;;  %7153 = vmatpush.bf16.msra.mxu2 %v11882_v58  ;;  %v12051_v32 = vld [vmem:[#allocation6 + $0x180] sm:$0xf0]  ;;  %v13256_v58 = vld [vmem:[#allocation6 + $0x10c] sm:$0xf] }
 0x3e3   :  { %7166 = vmatpush.bf16.msra.mxu3 %v12202_v46  ;;  %v12054_v53 = vor.u32 %v13266_v60, %v12051_v32  ;;  %v12011_v46 = vld [vmem:[#allocation6 + $0x130] sm:$0xf0]  ;;  %v12209_v60 = vld [vmem:[#allocation6 + $0x298] sm:$0xf]  ;;  %v13311_v32 = vld [vmem:[#allocation6 + $0x2bc] sm:$0xf0] }
 0x3e4   :  { %7192 = vmatpush.bf16.msrb.mxu1 %v12206_v57  ;;  %v6186_v48 = vpop.f32.mrf.mxu1  ;;  %v11969_v57 = vld [vmem:[#allocation6 + $0xb8] sm:$0xf]  ;;  %v12210_v28 = vor.u32 %v13311_v32, %v12209_v60  ;;  %v12377_v60 = vld [vmem:[#allocation6 + $0x3e0] sm:$0xf]  ;;  %v13352_v32 = vld [vmem:[#allocation6 + $0x404] sm:$0xf0] }
 0x3e5   :  { %7154 = vmatmul.bf16.vlgmr.msra.gmra.mxu2 %v15115_v43 }
 0x3e6   :  { %7179 = vmatpush.bf16.msrb.mxu0 %v11886_v4  ;;  %7198 = vmatpush.bf16.msrb.mxu2 %v12170_v18  ;;  %v6173_v21 = vpop.f32.mrf.mxu0  ;;  %v12330_v4 = vor.u32 %v13341_v47, %v12329_v45  ;;  %v13251_v18 = vld [vmem:[#allocation6 + $0xdc] sm:$0xf0]  ;;  %v12497_v45 = vld [vmem:[#allocation6 + $0x4d0] sm:$0xf]  ;;  %v13382_v47 = vld [vmem:[#allocation6 + $0x4f4] sm:$0xf0] }
 0x3e7   :  { %7211 = vmatpush.bf16.msrb.mxu3 %v12490_v6  ;;  %7193 = vmatmul.bf16.vlgmr.msrb.gmra.mxu1 %v15117_v22  ;;  %v12014_v6 = vor.u32 %v13256_v58, %v12011_v46  ;;  %v11970_v25 = vor.u32 %v13251_v18, %v11969_v57  ;;  %v13297_v58 = vld [vmem:[#allocation6 + $0x254] sm:$0xf] }
 0x3e8   :  { %7237 = vmatpush.bf16.msra.mxu1 %v12494_v16  ;;  %7167 = vmatmul.bf16.vlgmr.msra.gmra.mxu3 %v15117_v22  ;;  %v6147_v31 = vpop.f32.mrf.mxu2  ;;  %v12289_v16 = vld [vmem:[#allocation6 + $0x338] sm:$0xf] }
 0x3e9   :  { %7180 = vmatmul.bf16.vlgmr.msrb.gmra.mxu0 %v15115_v43 }
 0x3ea   :  { %7224 = vmatpush.bf16.msra.mxu0 %v12174_v2  ;;  %7199 = vmatpush.bf16.msrb.mxu2 %v12130_v59 }
 0x3eb   :  { %7212 = vmatpush.bf16.msrb.mxu3 %v12450_v36  ;;  %v6160_v2 = vpop.f32.mrf.mxu3 }
 0x3ec   :  { %7238 = vmatpush.bf16.msra.mxu1 %v12454_v24  ;;  %v6161_v14 = vadd.f32 %v6160_v2, %v6147_v31  ;;  %v6188_v52 = vpop.f32.mrf.mxu1  ;;  %v11929_v24 = vld [vmem:[#allocation6 + $0x68] sm:$0xf]  ;;  %v12137_v31 = vld [vmem:[#allocation6 + $0x200] sm:$0xf] }
 0x3ed   :  { %v13292_v2 = vld [vmem:[#allocation6 + $0x224] sm:$0xf0] }
 0x3ee   :  { %7225 = vmatpush.bf16.msra.mxu0 %v12134_v9  ;;  %7200 = vmatpush.bf16.msrb.mxu2 %v12090_v37  ;;  %v6174_v59 = vadd.f32 %v6173_v21, %v6161_v14  ;;  %v6175_v36 = vpop.f32.mrf.mxu0  ;;  %v12290_v9 = vor.u32 %v13331_v41, %v12289_v16  ;;  %v11931_v37 = vld [vmem:[#allocation6 + $0x90] sm:$0xf0]  ;;  %v12182_v16 = vor.u32 %v13297_v58, %v12179_v8  ;;  %v13372_v14 = vld [vmem:[#allocation6 + $0x4a4] sm:$0xf0]  ;;  %v12337_v58 = vld [vmem:[#allocation6 + $0x390] sm:$0xf] }
 0x3ef   :  { %7213 = vmatpush.bf16.msrb.mxu3 %v12410_v27  ;;  %v13316_v27 = vld [vmem:[#allocation6 + $0x2ec] sm:$0xf]  ;;  %v11934_v39 = vor.u32 %v13236_v55, %v11931_v37  ;;  %v12138_v36 = vor.u32 %v13292_v2, %v12137_v31  ;;  %v12458_v52 = vor.u32 %v13372_v14, %v12457_v38  ;;  %v13357_v55 = vld [vmem:[#allocation6 + $0x434] sm:$0xf]  ;;  %v12419_v37 = vld [vmem:[#allocation6 + $0x458] sm:$0xf0] }
 0x3f0   :  { %7239 = vmatpush.bf16.msra.mxu1 %v12414_v33  ;;  %v15136_v10 = vadd.f32 %v6186_v48, %v6174_v59  ;;  %v11930_v33 = vor.u32 %v13241_v34, %v11929_v24  ;;  %v12254_v5 = vor.u32 %v13316_v27, %v12251_v26  ;;  %v6149_v21 = vpop.f32.mrf.mxu2  ;;  %v12177_v48 = vld [vmem:[#allocation6 + $0x250] sm:$0xf]  ;;  %v12459_v59 = vld [vmem:[#allocation6 + $0x4a8] sm:$0xf0]  ;;  %v12142_v24 = vor.u32 %v13287_v51, %v12139_v11  ;;  %v12019_v8 = vld [vmem:[#allocation6 + $0x138] sm:$0xf0] }
 0x3f1   :  { %v12462_v34 = vor.u32 %v13367_v63, %v12459_v59  ;;  %v13347_v21 = vld [vmem:[#allocation6 + $0x3e4] sm:$0xf]  ;;  %v12297_v38 = vld [vmem:[#allocation6 + $0x340] sm:$0xf]  ;;  %v13332_v14 = vld [vmem:[#allocation6 + $0x364] sm:$0xf0] }
 0x3f2   :  { %7226 = vmatpush.bf16.msra.mxu0 %v12094_v3  ;;  %7201 = vmatpush.bf16.msrb.mxu2 %v12050_v54  ;;  %v11889_v3 = vld [vmem:[#allocation6 + $0x18] sm:$0xf]  ;;  %v13247_v51 = vld [vmem:[#allocation6 + $0xc4] sm:$0xf]  ;;  %v11979_v63 = vld [vmem:[#allocation6 + $0xe8] sm:$0xf0] }
 0x3f3   :  { %7214 = vmatpush.bf16.msrb.mxu3 %v12370_v40  ;;  %v6162_v54 = vpop.f32.mrf.mxu3  ;;  %v13226_v40 = vld [vmem:[#allocation6 + $0x1c] sm:$0xf]  ;;  %v11890_v46 = vor.u32 %v13231_v15, %v11889_v3  ;;  %v12057_v3 = vld [vmem:[#allocation6 + $0x160] sm:$0xf]  ;;  %v12422_v15 = vor.u32 %v13357_v55, %v12419_v37  ;;  %v13327_v59 = vld [vmem:[#allocation6 + $0x344] sm:$0xf] }
 0x3f4   :  { %7240 = vmatpush.bf16.msra.mxu1 %v12374_v50  ;;  %v13302_v50 = vld [vmem:[#allocation6 + $0x274] sm:$0xf0]  ;;  %v11894_v57 = vor.u32 %v13226_v40, %v11891_v44  ;;  %v12379_v54 = vld [vmem:[#allocation6 + $0x408] sm:$0xf0]  ;;  %v12257_v55 = vld [vmem:[#allocation6 + $0x2f0] sm:$0xf] }
 0x3f5   :  { %v13322_v37 = vld [vmem:[#allocation6 + $0x314] sm:$0xf0] }
 0x3f6   :  { %7227 = vmatpush.bf16.msra.mxu0 %v12054_v53  ;;  %7202 = vmatpush.bf16.msrb.mxu2 %v12010_v20  ;;  %v12211_v53 = vld [vmem:[#allocation6 + $0x2c0] sm:$0xf0]  ;;  %v13377_v20 = vld [vmem:[#allocation6 + $0x4d4] sm:$0xf] }
 0x3f7   :  { %7215 = vmatpush.bf16.msrb.mxu3 %v12330_v4  ;;  %v12499_v4 = vld [vmem:[#allocation6 + $0x4f8] sm:$0xf0]  ;;  %v12214_v18 = vor.u32 %v13306_v62, %v12211_v53  ;;  %v12378_v53 = vor.u32 %v13352_v32, %v12377_v60  ;;  %v11897_v60 = vld [vmem:[#allocation6 + $0x20] sm:$0xf]  ;;  %v13232_v32 = vld [vmem:[#allocation6 + $0x44] sm:$0xf0] }
 0x3f8   :  { %7241 = vmatpush.bf16.msra.mxu1 %v12334_v56  ;;  %v12498_v56 = vor.u32 %v13382_v47, %v12497_v45  ;;  %v12502_v41 = vor.u32 %v13377_v20, %v12499_v4  ;;  %v12382_v47 = vor.u32 %v13347_v21, %v12379_v54  ;;  %v13337_v20 = vld [vmem:[#allocation6 + $0x394] sm:$0xf]  ;;  %v12339_v4 = vld [vmem:[#allocation6 + $0x3b8] sm:$0xf0] }
 0x3f9   :  { %v12342_v2 = vor.u32 %v13337_v20, %v12339_v4 }
 0x3fa   :  { %7228 = vmatpush.bf16.msra.mxu0 %v12014_v6  ;;  %7203 = vmatpush.bf16.msrb.mxu2 %v11970_v25  ;;  %v12178_v6 = vor.u32 %v13302_v50, %v12177_v48  ;;  %v12097_v25 = vld [vmem:[#allocation6 + $0x1b0] sm:$0xf]  ;;  %v13262_v50 = vld [vmem:[#allocation6 + $0x134] sm:$0xf0] }
 0x3fb   :  { %7216 = vmatpush.bf16.msrb.mxu3 %v12290_v9  ;;  %v13282_v9 = vld [vmem:[#allocation6 + $0x1d4] sm:$0xf0]  ;;  %v12017_v48 = vld [vmem:[#allocation6 + $0x110] sm:$0xf] }
 0x3fc   :  { %7242 = vmatpush.bf16.msra.mxu1 %v12294_v61  ;;  %v13362_v61 = vld [vmem:[#allocation6 + $0x454] sm:$0xf0]  ;;  %v12098_v27 = vor.u32 %v13282_v9, %v12097_v25 }
 0x3fe   :  { %7229 = vmatpush.bf16.msra.mxu0 %v11974_v12  ;;  %7204 = vmatpush.bf16.msrb.mxu2 %v11930_v33  ;;  %v12417_v12 = vld [vmem:[#allocation6 + $0x430] sm:$0xf]  ;;  %v13272_v33 = vld [vmem:[#allocation6 + $0x184] sm:$0xf0] }
 0x3ff   :  { %7217 = vmatpush.bf16.msrb.mxu3 %v12250_v17  ;;  %v12418_v26 = vor.u32 %v13362_v61, %v12417_v12  ;;  %v12102_v17 = vor.u32 %v13277_v0, %v12099_v30  ;;  %v12058_v62 = vor.u32 %v13272_v33, %v12057_v3  ;;  %v11937_v12 = vld [vmem:[#allocation6 + $0x70] sm:$0xf]  ;;  %v13242_v61 = vld [vmem:[#allocation6 + $0x94] sm:$0xf0]  ;;  %v11982_v0 = vor.u32 %v13247_v51, %v11979_v63  ;;  %v13317_v3 = vld [vmem:[#allocation6 + $0x2f4] sm:$0xf] }
 0x400   :  { %7243 = vmatpush.bf16.msra.mxu1 %v12254_v5  ;;  %v12059_v5 = vld [vmem:[#allocation6 + $0x188] sm:$0xf0]  ;;  %v12259_v33 = vld [vmem:[#allocation6 + $0x318] sm:$0xf0] }
 0x401   :  { %v12262_v21 = vor.u32 %v13317_v3, %v12259_v33 }
 0x402   :  { %7230 = vmatpush.bf16.msra.mxu0 %v11934_v39  ;;  %7205 = vmatpush.bf16.msrb.mxu2 %v11890_v46  ;;  %v13267_v39 = vld [vmem:[#allocation6 + $0x164] sm:$0xf]  ;;  %v13342_v46 = vld [vmem:[#allocation6 + $0x3b4] sm:$0xf0] }
 0x403   :  { %7218 = vmatpush.bf16.msrb.mxu3 %v12210_v28  ;;  %v12062_v45 = vor.u32 %v13267_v39, %v12059_v5  ;;  %v13257_v28 = vld [vmem:[#allocation6 + $0x114] sm:$0xf] }
 0x404   :  { %7244 = vmatpush.bf16.msra.mxu1 %v12214_v18  ;;  %v6238_v44 = vpop.f32.mrf.mxu1  ;;  %v12338_v18 = vor.u32 %v13342_v46, %v12337_v58  ;;  %v12022_v31 = vor.u32 %v13257_v28, %v12019_v8  ;;  %v11898_v58 = vor.u32 %v13232_v32, %v11897_v60 }
 0x405   :  { %7206 = vmatmul.bf16.vlgmr.msrb.gmra.mxu2 %v15115_v43 }
 0x406   :  { %7231 = vmatpush.bf16.msra.mxu0 %v11894_v57  ;;  %7250 = vmatpush.bf16.msra.mxu2 %v12178_v6  ;;  %v6225_v40 = vpop.f32.mrf.mxu0  ;;  %v12018_v57 = vor.u32 %v13262_v50, %v12017_v48  ;;  %v11977_v6 = vld [vmem:[#allocation6 + $0xc0] sm:$0xf]  ;;  %v13312_v48 = vld [vmem:[#allocation6 + $0x2c4] sm:$0xf0]  ;;  %v11899_v50 = vld [vmem:[#allocation6 + $0x48] sm:$0xf0] }
 0x407   :  { %7263 = vmatpush.bf16.msra.mxu3 %v12498_v56  ;;  %7245 = vmatmul.bf16.vlgmr.msra.gmra.mxu1 %v15117_v22  ;;  %v13252_v56 = vld [vmem:[#allocation6 + $0xe4] sm:$0xf0] }
 0x408   :  { %7289 = vmatpush.bf16.msrb.mxu1 %v12502_v41  ;;  %7219 = vmatmul.bf16.vlgmr.msrb.gmra.mxu3 %v15117_v22 }
 0x409   :  { %7232 = vmatmul.bf16.vlgmr.msra.gmra.mxu0 %v15115_v43 }
 0x40a   :  { %7276 = vmatpush.bf16.msrb.mxu0 %v12182_v16  ;;  %7251 = vmatpush.bf16.msra.mxu2 %v12138_v36  ;;  %v6199_v16 = vpop.f32.mrf.mxu2  ;;  %v12299_v36 = vld [vmem:[#allocation6 + $0x368] sm:$0xf0] }
 0x40b   :  { %7264 = vmatpush.bf16.msra.mxu3 %v12458_v52  ;;  %v6212_v41 = vpop.f32.mrf.mxu3  ;;  %v6200_v11 = vadd.f32 %v6199_v16, %v15136_v10  ;;  %v12302_v30 = vor.u32 %v13327_v59, %v12299_v36 }
 0x40c   :  { %7290 = vmatpush.bf16.msrb.mxu1 %v12462_v34  ;;  %v6240_v9 = vpop.f32.mrf.mxu1  ;;  %v12298_v34 = vor.u32 %v13332_v14, %v12297_v38 }
 0x40d   :  { %v6213_v52 = vadd.f32 %v6212_v41, %v6200_v11 }
 0x40e   :  { %7277 = vmatpush.bf16.msrb.mxu0 %v12142_v24  ;;  %7252 = vmatpush.bf16.msra.mxu2 %v12098_v27  ;;  %v6227_v25 = vpop.f32.mrf.mxu0  ;;  %v11978_v24 = vor.u32 %v13252_v56, %v11977_v6  ;;  %v13237_v27 = vld [vmem:[#allocation6 + $0x74] sm:$0xf] }
 0x40f   :  { %7265 = vmatpush.bf16.msra.mxu3 %v12418_v26  ;;  %v6226_v10 = vadd.f32 %v6225_v40, %v6213_v52  ;;  %v11939_v26 = vld [vmem:[#allocation6 + $0x98] sm:$0xf0]  ;;  %v13227_v40 = vld [vmem:[#allocation6 + $0x24] sm:$0xf] }
 0x410   :  { %7291 = vmatpush.bf16.msrb.mxu1 %v12422_v15  ;;  %v12258_v15 = vor.u32 %v13322_v37, %v12257_v55  ;;  %v11942_v5 = vor.u32 %v13237_v27, %v11939_v26  ;;  %v15585_v37 = vld [vmem:[#allocation16_spill] sm:$0xff] }
 0x411   :  { %v15143_v39 = vadd.f32 %v6238_v44, %v6226_v10  ;;  %v11902_v44 = vor.u32 %v13227_v40, %v11899_v50 }
 0x412   :  { %7278 = vmatpush.bf16.msrb.mxu0 %v12102_v17  ;;  %7253 = vmatpush.bf16.msra.mxu2 %v12058_v62  ;;  %v11938_v17 = vor.u32 %v13242_v61, %v11937_v12  ;;  %v6201_v54 = vpop.f32.mrf.mxu2 }
 0x413   :  { %7266 = vmatpush.bf16.msra.mxu3 %v12378_v53  ;;  %v6214_v62 = vpop.f32.mrf.mxu3  ;;  %v12217_v53 = vld [vmem:[#allocation6 + $0x2a0] sm:$0xf] }
 0x414   :  { %7292 = vmatpush.bf16.msrb.mxu1 %v12382_v47  ;;  %v12219_v47 = vld [vmem:[#allocation6 + $0x2c8] sm:$0xf0]  ;;  %v12218_v46 = vor.u32 %v13312_v48, %v12217_v53 }
 0x416   :  { %7279 = vmatpush.bf16.msrb.mxu0 %v12062_v45  ;;  %7254 = vmatpush.bf16.msra.mxu2 %v12018_v57  ;;  %v13307_v45 = vld [vmem:[#allocation6 + $0x2a4] sm:$0xf] }
 0x417   :  { %7267 = vmatpush.bf16.msra.mxu3 %v12338_v18  ;;  %v12222_v28 = vor.u32 %v13307_v45, %v12219_v47 }
 0x418   :  { %7293 = vmatpush.bf16.msrb.mxu1 %v12342_v2 }
 0x41a   :  { %7280 = vmatpush.bf16.msrb.mxu0 %v12022_v31  ;;  %7255 = vmatpush.bf16.msra.mxu2 %v11978_v24 }
 0x41b   :  { %7268 = vmatpush.bf16.msra.mxu3 %v12298_v34 }
 0x41c   :  { %7294 = vmatpush.bf16.msrb.mxu1 %v12302_v30 }
 0x41e   :  { %7281 = vmatpush.bf16.msrb.mxu0 %v11982_v0  ;;  %7256 = vmatpush.bf16.msra.mxu2 %v11938_v17 }
 0x41f   :  { %7269 = vmatpush.bf16.msra.mxu3 %v12258_v15 }
 0x420   :  { %7295 = vmatpush.bf16.msrb.mxu1 %v12262_v21 }
 0x422   :  { %7282 = vmatpush.bf16.msrb.mxu0 %v11942_v5  ;;  %7257 = vmatpush.bf16.msra.mxu2 %v11898_v58 }
 0x423   :  { %7270 = vmatpush.bf16.msra.mxu3 %v12218_v46 }
 0x424   :  { %7296 = vmatpush.bf16.msrb.mxu1 %v12222_v28  ;;  %v7090_v20 = vpop.f32.mrf.mxu1 }
 0x425   :  { %7258 = vmatmul.bf16.vlgmr.msra.gmra.mxu2 %v15115_v43 }
 0x426   :  { %7283 = vmatpush.bf16.msrb.mxu0 %v11902_v44  ;;  %7271 = vmatmul.bf16.vlgmr.msra.gmra.mxu3 %v15117_v22  ;;  %v7077_v8 = vpop.f32.mrf.mxu0 }
 0x427   :  { %7297 = vmatmul.bf16.vlgmr.msrb.gmra.mxu1 %v15117_v22  ;;  %v7078_v4 = vadd.f32 %v7077_v8, %v15033_v23 }
 0x428   :  { %v7051_v56 = vpop.f32.mrf.mxu2 }
 0x429   :  { %7284 = vmatmul.bf16.vlgmr.msrb.gmra.mxu0 %v15115_v43  ;;  %v15150_v57 = vadd.f32 %v7090_v20, %v7078_v4  ;;  %v7052_v2 = vadd.f32 %v7051_v56, %v15022_v19 }
 0x42b   :  { %v7308_v18 = vrot.slane %v15150_v57, 4  ;;  %v7373_v6 = vmul.f32 %v15150_v57, %v15150_v57  ;;  %v7064_v31 = vpop.f32.mrf.mxu3 }
 0x42c   :  { %v15157_v41 = vadd.f32 %v7064_v31, %v7052_v2  ;;  %v7092_v38 = vpop.f32.mrf.mxu1 }
 0x42d   :  { %v7309_v16 = vadd.f32 %v7308_v18, %v15150_v57  ;;  %v7388_v43 = vrot.slane %v7373_v6, 4 }
 0x42e   :  { %v7079_v22 = vpop.f32.mrf.mxu0  ;;  %v7302_v51 = vrot.slane %v15157_v41, 4  ;;  %v7372_v11 = vmul.f32 %v15157_v41, %v15157_v41 }
 0x42f   :  { %v7310_v14 = vrot.slane %v7309_v16, 2  ;;  %v7389_v23 = vadd.f32 %v7388_v43, %v7373_v6 }
 0x430   :  { %v7303_v36 = vadd.f32 %v7302_v51, %v15157_v41  ;;  %v7382_v52 = vrot.slane %v7372_v11, 4  ;;  %v7053_v9 = vpop.f32.mrf.mxu2 }
 0x431   :  { %v7311_v63 = vadd.f32 %v7310_v14, %v7309_v16  ;;  %v7390_v59 = vrot.slane %v7389_v23, 2 }
 0x432   :  { %v7304_v34 = vrot.slane %v7303_v36, 2  ;;  %v7383_v12 = vadd.f32 %v7382_v52, %v7372_v11 }
 0x433   :  { %v7312_v19 = vrot.slane %v7311_v63, 1  ;;  %v7391_v25 = vadd.f32 %v7390_v59, %v7389_v23  ;;  %v7066_v24 = vpop.f32.mrf.mxu3 }
 0x434   :  { %v7305_v30 = vadd.f32 %v7304_v34, %v7303_v36  ;;  %v7384_v55 = vrot.slane %v7383_v12, 2 }
 0x435   :  { %v7313_v61 = vadd.f32 %v7312_v19, %v7311_v63  ;;  %v7392_v0 = vrot.slane %v7391_v25, 1 }
 0x436   :  { %v7306_v26 = vrot.slane %v7305_v30, 1  ;;  %v7385_v3 = vadd.f32 %v7384_v55, %v7383_v12 }
 0x437   :  { %v15164_v27 = vmul.f32 %v7313_v61, %v15585_v37  ;;  %v7393_v10 = vadd.f32 %v7392_v0, %v7391_v25 }
 0x438   :  { %v7307_v15 = vadd.f32 %v7306_v26, %v7305_v30  ;;  %v7386_v60 = vrot.slane %v7385_v3, 1 }
 0x439   :  { %v7443_v33 = vmul.f32 %v7393_v10, %v15585_v37  ;;  %v7453_v17 = vmul.f32 %v15164_v27, %v15164_v27 }
 0x43a   :  { %v15170_v5 = vmul.f32 %v7307_v15, %v15585_v37  ;;  %v7387_v21 = vadd.f32 %v7386_v60, %v7385_v3 }
 0x43b   :  { %v7463_v32 = vsub.f32 %v7443_v33, %v7453_v17 }
 0x43c   :  { %v7442_v62 = vmul.f32 %v7387_v21, %v15585_v37  ;;  %v7452_v53 = vmul.f32 %v15170_v5, %v15170_v5 }
 0x43d   :  { %v7473_v54 = vmax.f32 %v7463_v32, 0.0 }
 0x43e   :  { %v7462_v40 = vsub.f32 %v7442_v62, %v7452_v53 }
 0x43f   :  { %v7483_v48 = vadd.f32 1e-05, %v7473_v54 }
 0x440   :  { %v7472_v50 = vmax.f32 %v7462_v40, 0.0 }
 0x441   :  { %14218 = vrsqrt.f32 %v7483_v48  ;;  %vm7508_vm10 = vweird.f32 %v7483_v48 }
 0x442   :  { %v7482_v45 = vadd.f32 1e-05, %v7472_v50 }
 0x444   :  { %v7142_v58 = vpop.f32.mrf.mxu1  ;;  %14220 = vrsqrt.f32 %v7482_v45  ;;  %vm7498_vm15 = vweird.f32 %v7482_v45 }
 0x446   :  { %v7129_v47 = vpop.f32.mrf.mxu0 }
 0x447   :  { %v7130_v46 = vadd.f32 %v7129_v47, %v15059_v29  ;;  %v14219_v44 = vpop.eup %14218 }
 0x448   :  { %v7503_v8 = vmul.f32 %v14219_v44, %v7483_v48  ;;  %v7103_v18 = vpop.f32.mrf.mxu2  ;;  %vm7509_vm8 = vweird.f32 %v14219_v44 }
 0x449   :  { %v15176_v28 = vadd.f32 %v7142_v58, %v7130_v46  ;;  %v7104_v31 = vadd.f32 %v7103_v18, %v15046_v1  ;;  %vm7510_vm11 = vmor %vm7508_vm10, %vm7509_vm8 }
 0x44a   :  { %v7504_v56 = vmul.f32 %v14219_v44, %v7503_v8  ;;  %v14221_v43 = vpop.eup %14220 }
 0x44b   :  { %v7320_v20 = vrot.slane %v15176_v28, 4  ;;  %v7375_v4 = vmul.f32 %v15176_v28, %v15176_v28  ;;  %v7116_v6 = vpop.f32.mrf.mxu3  ;;  %v7493_v23 = vmul.f32 %v14221_v43, %v7482_v45  ;;  %vm7499_vm13 = vweird.f32 %v14221_v43 }
 0x44c   :  { %v7505_v29 = vmul.f32 0.5, %v7504_v56  ;;  %v15183_v22 = vadd.f32 %v7116_v6, %v7104_v31  ;;  %v7144_v14 = vpop.f32.mrf.mxu1  ;;  %vm7500_vm1 = vmor %vm7498_vm15, %vm7499_vm13 }
 0x44d   :  { %v7321_v2 = vadd.f32 %v7320_v20, %v15176_v28  ;;  %v7400_v16 = vrot.slane %v7375_v4, 4  ;;  %v7494_v1 = vmul.f32 %v14221_v43, %v7493_v23 }
 0x44e   :  { %v7131_v38 = vpop.f32.mrf.mxu0  ;;  %v7506_v63 = vsub.f32 1.5, %v7505_v29  ;;  %v7314_v59 = vrot.slane %v15183_v22, 4  ;;  %v7374_v36 = vmul.f32 %v15183_v22, %v15183_v22 }
 0x44f   :  { %v7322_v51 = vrot.slane %v7321_v2, 2  ;;  %v7401_v11 = vadd.f32 %v7400_v16, %v7375_v4  ;;  %v7495_v34 = vmul.f32 0.5, %v7494_v1 }
 0x450   :  { %v7507_v25 = vmul.f32 %v14219_v44, %v7506_v63  ;;  %v7315_v9 = vadd.f32 %v7314_v59, %v15183_v22  ;;  %v7394_v24 = vrot.slane %v7374_v36, 4  ;;  %v7105_v0 = vpop.f32.mrf.mxu2 }
 0x451   :  { %v7323_v52 = vadd.f32 %v7322_v51, %v7321_v2  ;;  %v7402_v19 = vrot.slane %v7401_v11, 2  ;;  %v7496_v3 = vsub.f32 1.5, %v7495_v34 }
 0x452   :  { %v7316_v55 = vrot.slane %v7315_v9, 2  ;;  %v7395_v10 = vadd.f32 %v7394_v24, %v7374_v36  ;;  %v7511_v26 = vsel %vm7510_vm11, %v14219_v44, %v7507_v25 }
 0x453   :  { %v7324_v12 = vrot.slane %v7323_v52, 1  ;;  %v7403_v61 = vadd.f32 %v7402_v19, %v7401_v11  ;;  %v7118_v30 = vpop.f32.mrf.mxu3  ;;  %v7497_v32 = vmul.f32 %v14221_v43, %v7496_v3  ;;  %v7602_v62 = vrot.slane %v7511_v26, 7 }
 0x454   :  { %v7317_v15 = vadd.f32 %v7316_v55, %v7315_v9  ;;  %v7396_v60 = vrot.slane %v7395_v10, 2 }
 0x455   :  { %v7325_v33 = vadd.f32 %v7324_v12, %v7323_v52  ;;  %v7404_v17 = vrot.slane %v7403_v61, 1  ;;  %v7501_v40 = vsel %vm7500_vm1, %v14221_v43, %v7497_v32 }
 0x456   :  { %v7318_v53 = vrot.slane %v7317_v15, 1  ;;  %v7397_v48 = vadd.f32 %v7396_v60, %v7395_v10  ;;  %v15196_v58 = vsel %vm322_vm7, %v7501_v40, %v7602_v62 }
 0x457   :  { %v15190_v21 = vmul.f32 %v7325_v33, %v15585_v37  ;;  %v7405_v54 = vadd.f32 %v7404_v17, %v7403_v61 }
 0x458   :  { %v7319_v46 = vadd.f32 %v7318_v53, %v7317_v15  ;;  %v7398_v44 = vrot.slane %v7397_v48, 1 }
 0x459   :  { %v7445_v50 = vmul.f32 %v7405_v54, %v15585_v37  ;;  %v7455_v47 = vmul.f32 %v15190_v21, %v15190_v21 }
 0x45a   :  { %v15199_v8 = vmul.f32 %v7319_v46, %v15585_v37  ;;  %v7399_v20 = vadd.f32 %v7398_v44, %v7397_v48 }
 0x45b   :  { %v7465_v45 = vsub.f32 %v7445_v50, %v7455_v47 }
 0x45c   :  { %v7444_v18 = vmul.f32 %v7399_v20, %v15585_v37  ;;  %v7454_v6 = vmul.f32 %v15199_v8, %v15199_v8  ;;  %v12561_v20 = vld [vmem:[#allocation9 + $0x70] sm:$0xf] }
 0x45d   :  { %v7475_v4 = vmax.f32 %v7465_v45, 0.0 }
 0x45e   :  { %v7464_v31 = vsub.f32 %v7444_v18, %v7454_v6 }
 0x45f   :  { %v7485_v56 = vadd.f32 1e-05, %v7475_v4 }
 0x460   :  { %v7474_v2 = vmax.f32 %v7464_v31, 0.0  ;;  %v12625_v31 = vld [vmem:[#allocation9 + $0xf0] sm:$0xf] }
 0x461   :  { %14222 = vrsqrt.f32 %v7485_v56  ;;  %vm7528_vm3 = vweird.f32 %v7485_v56 }
 0x462   :  { %v7484_v16 = vadd.f32 1e-05, %v7474_v2 }
 0x464   :  { %v7194_v29 = vpop.f32.mrf.mxu1  ;;  %14224 = vrsqrt.f32 %v7484_v16  ;;  %vm7518_vm10 = vweird.f32 %v7484_v16 }
 0x466   :  { %v7181_v43 = vpop.f32.mrf.mxu0 }
 0x467   :  { %v7182_v38 = vadd.f32 %v7181_v43, %v15085_v7  ;;  %v14223_v14 = vpop.eup %14222 }
 0x468   :  { %v7523_v51 = vmul.f32 %v14223_v14, %v7485_v56  ;;  %v7155_v59 = vpop.f32.mrf.mxu2  ;;  %vm7529_vm2 = vweird.f32 %v14223_v14  ;;  %v14038_v56 = vld [vmem:[#allocation9 + $0x74] sm:$0xf0] }
 0x469   :  { %v15205_v23 = vadd.f32 %v7194_v29, %v7182_v38  ;;  %v7156_v52 = vadd.f32 %v7155_v59, %v15072_v13  ;;  %vm7530_vm5 = vmor %vm7528_vm3, %vm7529_vm2  ;;  %v12562_v38 = vor.u32 %v14038_v56, %v12561_v20 }
 0x46a   :  { %v7524_v1 = vmul.f32 %v14223_v14, %v7523_v51  ;;  %v14225_v9 = vpop.eup %14224  ;;  %v12689_v51 = vld [vmem:[#allocation9 + $0x170] sm:$0xf] }
 0x46b   :  { %v7332_v11 = vrot.slane %v15205_v23, 4  ;;  %v7377_v63 = vmul.f32 %v15205_v23, %v15205_v23  ;;  %v7168_v36 = vpop.f32.mrf.mxu3  ;;  %v7513_v61 = vmul.f32 %v14225_v9, %v7484_v16  ;;  %vm7519_vm8 = vweird.f32 %v14225_v9  ;;  %v12753_v16 = vld [vmem:[#allocation9 + $0x1f0] sm:$0xf]  ;;  %8711 = vmatpush.bf16.msrb.mxu2 %v12562_v38 }
 0x46c   :  { %v7525_v7 = vmul.f32 0.5, %v7524_v1  ;;  %v15212_v24 = vadd.f32 %v7168_v36, %v7156_v52  ;;  %v7196_v12 = vpop.f32.mrf.mxu1  ;;  %vm7520_vm11 = vmor %vm7518_vm10, %vm7519_vm8  ;;  %v14086_v52 = vld [vmem:[#allocation9 + $0x1f4] sm:$0xf0] }
 0x46d   :  { %v7333_v19 = vadd.f32 %v7332_v11, %v15205_v23  ;;  %v7412_v25 = vrot.slane %v7377_v63, 4  ;;  %v7514_v13 = vmul.f32 %v14225_v9, %v7513_v61  ;;  %v14070_v11 = vld [vmem:[#allocation9 + $0x174] sm:$0xf0]  ;;  %v12553_v12 = vld [vmem:[#allocation9 + $0x60] sm:$0xf] }
 0x46e   :  { %v7183_v34 = vpop.f32.mrf.mxu0  ;;  %v7526_v55 = vsub.f32 1.5, %v7525_v7  ;;  %v7326_v10 = vrot.slane %v15212_v24, 4  ;;  %v7376_v26 = vmul.f32 %v15212_v24, %v15212_v24  ;;  %v12690_v1 = vor.u32 %v14070_v11, %v12689_v51  ;;  %v14036_v61 = vld [vmem:[#allocation9 + $0x64] sm:$0xf0]  ;;  %v12537_v11 = vld [vmem:[#allocation9 + $0x40] sm:$0xf] }
 0x46f   :  { %v7334_v0 = vrot.slane %v7333_v19, 2  ;;  %v7413_v30 = vadd.f32 %v7412_v25, %v7377_v63  ;;  %v7515_v32 = vmul.f32 0.5, %v7514_v13  ;;  %v12754_v34 = vor.u32 %v14086_v52, %v12753_v16  ;;  %v14052_v13 = vld [vmem:[#allocation9 + $0xe4] sm:$0xf0]  ;;  %v12665_v52 = vld [vmem:[#allocation9 + $0x140] sm:$0xf] }
 0x470   :  { %v7527_v17 = vmul.f32 %v14223_v14, %v7526_v55  ;;  %v7327_v15 = vadd.f32 %v7326_v10, %v15212_v24  ;;  %v7406_v60 = vrot.slane %v7376_v26, 4  ;;  %v7157_v53 = vpop.f32.mrf.mxu2  ;;  %8737 = vmatpush.bf16.msra.mxu0 %v12690_v1  ;;  %v14048_v16 = vld [vmem:[#allocation9 + $0xc4] sm:$0xf0] }
 0x471   :  { %v7335_v3 = vadd.f32 %v7334_v0, %v7333_v19  ;;  %v7414_v33 = vrot.slane %v7413_v30, 2  ;;  %v7516_v46 = vsub.f32 1.5, %v7515_v32  ;;  %v12617_v0 = vld [vmem:[#allocation9 + $0xe0] sm:$0xf]  ;;  %8750 = vmatpush.bf16.msra.mxu1 %v12754_v34  ;;  %v14080_v34 = vld [vmem:[#allocation9 + $0x1c4] sm:$0xf0] }
 0x472   :  { %v7531_v40 = vsel %vm7530_vm5, %v14223_v14, %v7527_v17  ;;  %v7328_v50 = vrot.slane %v7327_v15, 2  ;;  %v7407_v47 = vadd.f32 %v7406_v60, %v7376_v26  ;;  %v14054_v14 = vld [vmem:[#allocation9 + $0xf4] sm:$0xf0]  ;;  %v12554_v26 = vor.u32 %v14036_v61, %v12553_v12  ;;  %v14068_v17 = vld [vmem:[#allocation9 + $0x164] sm:$0xf0] }
 0x473   :  { %v7336_v54 = vrot.slane %v7335_v3, 1  ;;  %v7415_v62 = vadd.f32 %v7414_v33, %v7413_v30  ;;  %v7170_v48 = vpop.f32.mrf.mxu3  ;;  %v7604_v4 = vrot.slane %v7531_v40, 5  ;;  %v7517_v2 = vmul.f32 %v14225_v9, %v7516_v46  ;;  %v14084_v60 = vld [vmem:[#allocation9 + $0x1e4] sm:$0xf0]  ;;  %v14034_v46 = vld [vmem:[#allocation9 + $0x54] sm:$0xf0] }
 0x474   :  { %v7329_v18 = vadd.f32 %v7328_v50, %v7327_v15  ;;  %v7408_v6 = vrot.slane %v7407_v47, 2  ;;  %v12626_v36 = vor.u32 %v14054_v14, %v12625_v31  ;;  %v12745_v15 = vld [vmem:[#allocation9 + $0x1e0] sm:$0xf]  ;;  %8712 = vmatpush.bf16.msrb.mxu2 %v12554_v26  ;;  %v14066_v31 = vld [vmem:[#allocation9 + $0x154] sm:$0xf0] }
 0x475   :  { %v7337_v44 = vadd.f32 %v7336_v54, %v7335_v3  ;;  %v7416_v45 = vrot.slane %v7415_v62, 1  ;;  %v7521_v19 = vsel %vm7520_vm11, %v14225_v9, %v7517_v2  ;;  %v12681_v3 = vld [vmem:[#allocation9 + $0x160] sm:$0xf]  ;;  %v12618_v9 = vor.u32 %v14052_v13, %v12617_v0  ;;  %v12737_v2 = vld [vmem:[#allocation9 + $0x1d0] sm:$0xf] }
 0x476   :  { %v7330_v63 = vrot.slane %v7329_v18, 1  ;;  %v7409_v59 = vadd.f32 %v7408_v6, %v7407_v47  ;;  %v7603_v30 = vrot.slane %v7521_v19, 6  ;;  %8724 = vmatpush.bf16.msrb.mxu3 %v12626_v36  ;;  %v12682_v53 = vor.u32 %v14068_v17, %v12681_v3  ;;  %v12545_v47 = vld [vmem:[#allocation9 + $0x50] sm:$0xf]  ;;  %v14082_v14 = vld [vmem:[#allocation9 + $0x1d4] sm:$0xf0] }
 0x477   :  { %v15219_v43 = vmul.f32 %v7337_v44, %v15585_v37  ;;  %v7417_v29 = vadd.f32 %v7416_v45, %v7415_v62  ;;  %v12746_v50 = vor.u32 %v14084_v60, %v12745_v15  ;;  %v12546_v20 = vor.u32 %v14034_v46, %v12545_v47  ;;  %v12673_v6 = vld [vmem:[#allocation9 + $0x150] sm:$0xf]  ;;  %v14062_v46 = vld [vmem:[#allocation9 + $0x134] sm:$0xf0] }
 0x478   :  { %v7331_v55 = vadd.f32 %v7330_v63, %v7329_v18  ;;  %v7410_v10 = vrot.slane %v7409_v59, 1  ;;  %v7611_v32 = vsel %vm1088_vm9, %v7603_v30, %v7604_v4  ;;  %8738 = vmatpush.bf16.msra.mxu0 %v12682_v53  ;;  %v12609_v4 = vld [vmem:[#allocation9 + $0xd0] sm:$0xf]  ;;  %v14050_v18 = vld [vmem:[#allocation9 + $0xd4] sm:$0xf0]  ;;  %v12674_v38 = vor.u32 %v14066_v31, %v12673_v6 }
 0x479   :  { %v7447_v25 = vmul.f32 %v7417_v29, %v15585_v37  ;;  %v7457_v7 = vmul.f32 %v15219_v43, %v15219_v43  ;;  %v15231_v48 = vsel %vm1090_vm0, %v15196_v58, %v7611_v32  ;;  %8751 = vmatpush.bf16.msra.mxu1 %v12746_v50  ;;  %v12610_v58 = vor.u32 %v14050_v18, %v12609_v4  ;;  %v14032_v63 = vld [vmem:[#allocation9 + $0x44] sm:$0xf0]  ;;  %v12529_v3 = vld [vmem:[#allocation9 + $0x30] sm:$0xf] }
 0x47a   :  { %v15227_v54 = vmul.f32 %v7331_v55, %v15585_v37  ;;  %v7411_v62 = vadd.f32 %v7410_v10, %v7409_v59  ;;  %8725 = vmatpush.bf16.msrb.mxu3 %v12618_v9  ;;  %8713 = vmatpush.bf16.msrb.mxu2 %v12546_v20  ;;  %v12738_v51 = vor.u32 %v14082_v14, %v12737_v2  ;;  %v12601_v59 = vld [vmem:[#allocation9 + $0xc0] sm:$0xf]  ;;  %v12593_v9 = vld [vmem:[#allocation9 + $0xb0] sm:$0xf]  ;;  %v14028_v14 = vld [vmem:[#allocation9 + $0x24] sm:$0xf0] }
 0x47b   :  { %v7467_v33 = vsub.f32 %v7447_v25, %v7457_v7  ;;  %v12538_v1 = vor.u32 %v14032_v63, %v12537_v11  ;;  %v12602_v19 = vor.u32 %v14048_v16, %v12601_v59  ;;  %v14064_v25 = vld [vmem:[#allocation9 + $0x144] sm:$0xf0]  ;;  %v12729_v7 = vld [vmem:[#allocation9 + $0x1c0] sm:$0xf]  ;;  %v12657_v53 = vld [vmem:[#allocation9 + $0x130] sm:$0xf] }
 0x47c   :  { %v7446_v44 = vmul.f32 %v7411_v62, %v15585_v37  ;;  %v7456_v45 = vmul.f32 %v15227_v54, %v15227_v54  ;;  %8739 = vmatpush.bf16.msra.mxu0 %v12674_v38  ;;  %v12666_v30 = vor.u32 %v14064_v25, %v12665_v52  ;;  %v12730_v55 = vor.u32 %v14080_v34, %v12729_v7  ;;  %v14046_v62 = vld [vmem:[#allocation9 + $0xb4] sm:$0xf0]  ;;  %v12521_v38 = vld [vmem:[#allocation9 + $0x20] sm:$0xf]  ;;  %v14044_v59 = vld [vmem:[#allocation9 + $0xa4] sm:$0xf0] }
 0x47d   :  { %v7477_v40 = vmax.f32 %v7467_v33, 0.0  ;;  %8752 = vmatpush.bf16.msra.mxu1 %v12738_v51  ;;  %v14030_v33 = vld [vmem:[#allocation9 + $0x34] sm:$0xf0]  ;;  %v12594_v47 = vor.u32 %v14046_v62, %v12593_v9  ;;  %v12658_v18 = vor.u32 %v14062_v46, %v12657_v53  ;;  %v12585_v63 = vld [vmem:[#allocation9 + $0xa0] sm:$0xf]  ;;  %v12522_v52 = vor.u32 %v14028_v14, %v12521_v38 }
 0x47e   :  { %v7466_v29 = vsub.f32 %v7446_v44, %v7456_v45  ;;  %8726 = vmatpush.bf16.msrb.mxu3 %v12610_v58  ;;  %8714 = vmatpush.bf16.msrb.mxu2 %v12538_v1  ;;  %v12530_v32 = vor.u32 %v14030_v33, %v12529_v3  ;;  %v12721_v44 = vld [vmem:[#allocation9 + $0x1b0] sm:$0xf]  ;;  %v14078_v45 = vld [vmem:[#allocation9 + $0x1b4] sm:$0xf0]  ;;  %v14060_v25 = vld [vmem:[#allocation9 + $0x124] sm:$0xf0] }
 0x47f   :  { %v15236_v56 = vadd.f32 1e-05, %v7477_v40  ;;  %v12722_v6 = vor.u32 %v14078_v45, %v12721_v44  ;;  %v12513_v9 = vld [vmem:[#allocation9 + $0x10] sm:$0xf]  ;;  %v14042_v44 = vld [vmem:[#allocation9 + $0x94] sm:$0xf0] }
 0x480   :  { %v7476_v36 = vmax.f32 %v7466_v29, 0.0  ;;  %8740 = vmatpush.bf16.msra.mxu0 %v12666_v30  ;;  %v12713_v30 = vld [vmem:[#allocation9 + $0x1a0] sm:$0xf]  ;;  %v12577_v53 = vld [vmem:[#allocation9 + $0x90] sm:$0xf] }
 0x481   :  { %14226 = vrsqrt.f32 %v15236_v56  ;;  %8753 = vmatpush.bf16.msra.mxu1 %v12730_v55  ;;  %v14076_v55 = vld [vmem:[#allocation9 + $0x1a4] sm:$0xf0]  ;;  %v12641_v45 = vld [vmem:[#allocation9 + $0x110] sm:$0xf]  ;;  %v12578_v38 = vor.u32 %v14042_v44, %v12577_v53  ;;  %vm7548_vm15 = vweird.f32 %v15236_v56 }
 0x482   :  { %v15239_v12 = vadd.f32 1e-05, %v7476_v36  ;;  %8727 = vmatpush.bf16.msrb.mxu3 %v12602_v19  ;;  %8715 = vmatpush.bf16.msrb.mxu2 %v12530_v32  ;;  %v12649_v19 = vld [vmem:[#allocation9 + $0x120] sm:$0xf]  ;;  %v12714_v62 = vor.u32 %v14076_v55, %v12713_v30  ;;  %v12945_v44 = vld [vmem:[#allocation9 + $0x370] sm:$0xf] }
 0x483   :  { %v12650_v33 = vor.u32 %v14060_v25, %v12649_v19 }
 0x484   :  { %v7246_v0 = vpop.f32.mrf.mxu1  ;;  %14228 = vrsqrt.f32 %v15239_v12  ;;  %8741 = vmatpush.bf16.msra.mxu0 %v12658_v18  ;;  %vm7538_vm3 = vweird.f32 %v15239_v12 }
 0x485   :  { %8754 = vmatpush.bf16.msra.mxu1 %v12722_v6  ;;  %v14058_v6 = vld [vmem:[#allocation9 + $0x114] sm:$0xf0] }
 0x486   :  { %v7233_v61 = vpop.f32.mrf.mxu0  ;;  %8728 = vmatpush.bf16.msrb.mxu3 %v12594_v47  ;;  %8716 = vmatpush.bf16.msrb.mxu2 %v12522_v52  ;;  %v12642_v14 = vor.u32 %v14058_v6, %v12641_v45  ;;  %v14150_v6 = vld [vmem:[#allocation9 + $0x3f4] sm:$0xf0] }
 0x487   :  { %v7234_v10 = vadd.f32 %v7233_v61, %v15111_v49  ;;  %v15243_v26 = vpop.eup %14226 }
 0x488   :  { %v7207_v60 = vpop.f32.mrf.mxu2  ;;  %v7543_v40 = vmul.f32 %v15243_v26, %v15236_v56  ;;  %8742 = vmatpush.bf16.msra.mxu0 %v12650_v33  ;;  %v14072_v33 = vld [vmem:[#allocation9 + $0x184] sm:$0xf0]  ;;  %vm7549_vm13 = vweird.f32 %v15243_v26 }
 0x489   :  { %v15245_v13 = vadd.f32 %v7246_v0, %v7234_v10  ;;  %v7208_v50 = vadd.f32 %v7207_v60, %v15098_v42  ;;  %v12586_v0 = vor.u32 %v14044_v59, %v12585_v63  ;;  %8755 = vmatpush.bf16.msra.mxu1 %v12714_v62  ;;  %vm15297_vm2 = vmor %vm7548_vm15, %vm7549_vm13  ;;  %v14096_v56 = vld [vmem:[#allocation9 + $0x244] sm:$0xf0] }
 0x48a   :  { %v15254_v58 = vpop.eup %14228  ;;  %v7544_v36 = vmul.f32 %v15243_v26, %v7543_v40 }
 0x48b   :  { %v7344_v17 = vrot.slane %v15245_v13, 4  ;;  %v7379_v15 = vmul.f32 %v15245_v13, %v15245_v13  ;;  %v7220_v49 = vpop.f32.mrf.mxu3  ;;  %v7533_v42 = vmul.f32 %v15254_v58, %v15239_v12  ;;  %8729 = vmatpush.bf16.msrb.mxu3 %v12586_v0  ;;  %vm7539_vm1 = vweird.f32 %v15254_v58 }
 0x48c   :  { %v15256_v31 = vadd.f32 %v7220_v49, %v7208_v50  ;;  %v7248_v29 = vpop.f32.mrf.mxu1  ;;  %v15266_v40 = vmul.f32 0.5, %v7544_v36  ;;  %v12505_v36 = vld [vmem:[#allocation9] sm:$0xf]  ;;  %8743 = vmatpush.bf16.msra.mxu0 %v12642_v14  ;;  %vm15305_vm5 = vmor %vm7538_vm3, %vm7539_vm1 }
 0x48d   :  { %v7345_v20 = vadd.f32 %v7344_v17, %v15245_v13  ;;  %v7424_v4 = vrot.slane %v7379_v15, 4  ;;  %v7534_v7 = vmul.f32 %v15254_v58, %v7533_v42  ;;  %v14026_v17 = vld [vmem:[#allocation9 + $0x14] sm:$0xf0]  ;;  %v12705_v42 = vld [vmem:[#allocation9 + $0x190] sm:$0xf] }
 0x48e   :  { %v7235_v2 = vpop.f32.mrf.mxu0  ;;  %v7338_v1 = vrot.slane %v15256_v31, 4  ;;  %v7378_v16 = vmul.f32 %v15256_v31, %v15256_v31  ;;  %v12514_v46 = vor.u32 %v14026_v17, %v12513_v9  ;;  %v7546_v52 = vsub.f32 1.5, %v15266_v40 }
 0x48f   :  { %v7346_v51 = vrot.slane %v7345_v20, 2  ;;  %v7425_v11 = vadd.f32 %v7424_v4, %v7379_v15  ;;  %8730 = vmatpush.bf16.msrb.mxu3 %v12578_v38 }
 0x490   :  { %v7339_v10 = vadd.f32 %v7338_v1, %v15256_v31  ;;  %v7418_v3 = vrot.slane %v7378_v16, 4  ;;  %v7209_v49 = vpop.f32.mrf.mxu2  ;;  %8717 = vmatpush.bf16.msrb.mxu2 %v12514_v46  ;;  %v14024_v1 = vld [vmem:[#allocation9 + $0x4] sm:$0xf0]  ;;  %v14118_v46 = vld [vmem:[#allocation9 + $0x2f4] sm:$0xf0] }
 0x491   :  { %v7347_v34 = vadd.f32 %v7346_v51, %v7345_v20  ;;  %v7426_v61 = vrot.slane %v7425_v11, 2  ;;  %v15268_v20 = vmul.f32 0.5, %v7534_v7  ;;  %v14074_v51 = vld [vmem:[#allocation9 + $0x194] sm:$0xf0]  ;;  %v12506_v7 = vor.u32 %v14024_v1, %v12505_v36  ;;  %v12817_v49 = vld [vmem:[#allocation9 + $0x270] sm:$0xf] }
 0x492   :  { %v7340_v50 = vrot.slane %v7339_v10, 2  ;;  %v7419_v47 = vadd.f32 %v7418_v3, %v7378_v16  ;;  %v12706_v59 = vor.u32 %v14074_v51, %v12705_v42  ;;  %v12569_v16 = vld [vmem:[#allocation9 + $0x80] sm:$0xf]  ;;  %v14100_v51 = vld [vmem:[#allocation9 + $0x264] sm:$0xf0] }
 0x493   :  { %v7348_v15 = vrot.slane %v7347_v34, 1  ;;  %v7427_v60 = vadd.f32 %v7426_v61, %v7425_v11  ;;  %v7222_v32 = vpop.f32.mrf.mxu3  ;;  %v12633_v61 = vld [vmem:[#allocation9 + $0x100] sm:$0xf]  ;;  %v7536_v9 = vsub.f32 1.5, %v15268_v20  ;;  %v13009_v20 = vld [vmem:[#allocation9 + $0x3f0] sm:$0xf] }
 0x494   :  { %v7341_v2 = vadd.f32 %v7340_v50, %v7339_v10  ;;  %v7420_v29 = vrot.slane %v7419_v47, 2  ;;  %8756 = vmatpush.bf16.msra.mxu1 %v12706_v59  ;;  %v14056_v10 = vld [vmem:[#allocation9 + $0x104] sm:$0xf0]  ;;  %v12697_v3 = vld [vmem:[#allocation9 + $0x180] sm:$0xf]  ;;  %8718 = vmatpush.bf16.msrb.mxu2 %v12506_v7  ;;  %v13010_v14 = vor.u32 %v14150_v6, %v13009_v20 }
 0x495   :  { %v7349_v4 = vadd.f32 %v7348_v15, %v7347_v34  ;;  %v7428_v18 = vrot.slane %v7427_v60, 1  ;;  %v14040_v34 = vld [vmem:[#allocation9 + $0x84] sm:$0xf0]  ;;  %v14102_v32 = vld [vmem:[#allocation9 + $0x274] sm:$0xf0]  ;;  %v12698_v53 = vor.u32 %v14072_v33, %v12697_v3 }
 0x496   :  { %v7342_v19 = vrot.slane %v7341_v2, 1  ;;  %v7421_v25 = vadd.f32 %v7420_v29, %v7419_v47  ;;  %v12570_v55 = vor.u32 %v14040_v34, %v12569_v16  ;;  %v12818_v50 = vor.u32 %v14102_v32, %v12817_v49  ;;  %v12881_v47 = vld [vmem:[#allocation9 + $0x2f0] sm:$0xf]  ;;  %v12809_v42 = vld [vmem:[#allocation9 + $0x260] sm:$0xf] }
 0x497   :  { %v15271_v11 = vmul.f32 %v7349_v4, %v15585_v37  ;;  %v7429_v63 = vadd.f32 %v7428_v18, %v7427_v60  ;;  %v12634_v60 = vor.u32 %v14056_v10, %v12633_v61  ;;  %v14134_v18 = vld [vmem:[#allocation9 + $0x374] sm:$0xf0]  ;;  %v12882_v29 = vor.u32 %v14118_v46, %v12881_v47  ;;  %v12873_v1 = vld [vmem:[#allocation9 + $0x2e0] sm:$0xf]  ;;  %v14116_v16 = vld [vmem:[#allocation9 + $0x2e4] sm:$0xf0] }
 0x498   :  { %v7343_v17 = vadd.f32 %v7342_v19, %v7341_v2  ;;  %v7422_v15 = vrot.slane %v7421_v25, 1  ;;  %8731 = vmatpush.bf16.msrb.mxu3 %v12570_v55  ;;  %8757 = vmatpush.bf16.msra.mxu1 %v12698_v53  ;;  %v12946_v38 = vor.u32 %v14134_v18, %v12945_v44  ;;  %v12810_v36 = vor.u32 %v14100_v51, %v12809_v42  ;;  %v12937_v19 = vld [vmem:[#allocation9 + $0x360] sm:$0xf]  ;;  %v14132_v34 = vld [vmem:[#allocation9 + $0x364] sm:$0xf0] }
 0x499   :  { %v7449_v0 = vmul.f32 %v7429_v63, %v15585_v37  ;;  %v7459_v30 = vmul.f32 %v15271_v11, %v15271_v11  ;;  %8744 = vmatpush.bf16.msra.mxu0 %v12634_v60  ;;  %8763 = vmatpush.bf16.msra.mxu2 %v12818_v50  ;;  %v12874_v7 = vor.u32 %v14116_v16, %v12873_v1  ;;  %v13001_v61 = vld [vmem:[#allocation9 + $0x3e0] sm:$0xf]  ;;  %v14148_v55 = vld [vmem:[#allocation9 + $0x3e4] sm:$0xf0]  ;;  %v12801_v10 = vld [vmem:[#allocation9 + $0x250] sm:$0xf] }
 0x49a   :  { %v15279_v45 = vmul.f32 %v7343_v17, %v15585_v37  ;;  %v7423_v4 = vadd.f32 %v7422_v15, %v7421_v25  ;;  %v14098_v3 = vld [vmem:[#allocation9 + $0x254] sm:$0xf0]  ;;  %v13002_v33 = vor.u32 %v14148_v55, %v13001_v61  ;;  %v12865_v15 = vld [vmem:[#allocation9 + $0x2d0] sm:$0xf]  ;;  %v7547_v32 = vmul.f32 %v15243_v26, %v7546_v52  ;;  %v12793_v20 = vld [vmem:[#allocation9 + $0x240] sm:$0xf] }
 0x49b   :  { %v7469_v62 = vsub.f32 %v7449_v0, %v7459_v30  ;;  %v12938_v30 = vor.u32 %v14132_v34, %v12937_v19  ;;  %v12802_v17 = vor.u32 %v14098_v3, %v12801_v10  ;;  %v14114_v60 = vld [vmem:[#allocation9 + $0x2d4] sm:$0xf0]  ;;  %v12929_v49 = vld [vmem:[#allocation9 + $0x350] sm:$0xf]  ;;  %v7537_v53 = vmul.f32 %v15254_v58, %v7536_v9  ;;  %v12921_v42 = vld [vmem:[#allocation9 + $0x340] sm:$0xf] }
 0x49c   :  { %v7448_v63 = vmul.f32 %v7423_v4, %v15585_v37  ;;  %v7458_v59 = vmul.f32 %v15279_v45, %v15279_v45  ;;  %8776 = vmatpush.bf16.msra.mxu3 %v12882_v29  ;;  %8802 = vmatpush.bf16.msrb.mxu1 %v13010_v14  ;;  %v14130_v47 = vld [vmem:[#allocation9 + $0x354] sm:$0xf0]  ;;  %v12993_v46 = vld [vmem:[#allocation9 + $0x3d0] sm:$0xf]  ;;  %v12866_v40 = vor.u32 %v14114_v60, %v12865_v15  ;;  %v12857_v29 = vld [vmem:[#allocation9 + $0x2c0] sm:$0xf] }
 0x49d   :  { %v7479_v2 = vmax.f32 %v7469_v62, 0.0  ;;  %8789 = vmatpush.bf16.msrb.mxu0 %v12946_v38  ;;  %8764 = vmatpush.bf16.msra.mxu2 %v12810_v36  ;;  %v12930_v52 = vor.u32 %v14130_v47, %v12929_v49  ;;  %v14146_v18 = vld [vmem:[#allocation9 + $0x3d4] sm:$0xf0]  ;;  %v14112_v38 = vld [vmem:[#allocation9 + $0x2c4] sm:$0xf0]  ;;  %v12794_v14 = vor.u32 %v14096_v56, %v12793_v20  ;;  %v7541_v36 = vsel %vm15305_vm5, %v15254_v58, %v7537_v53 }
 0x49e   :  { %v7468_v0 = vsub.f32 %v7448_v63, %v7458_v59  ;;  %v12994_v12 = vor.u32 %v14146_v18, %v12993_v46  ;;  %v14128_v51 = vld [vmem:[#allocation9 + $0x344] sm:$0xf0]  ;;  %v12985_v63 = vld [vmem:[#allocation9 + $0x3c0] sm:$0xf]  ;;  %v7551_v59 = vsel %vm15297_vm2, %v15243_v26, %v7547_v32  ;;  %v12858_v19 = vor.u32 %v14112_v38, %v12857_v29  ;;  %v12785_v34 = vld [vmem:[#allocation9 + $0x230] sm:$0xf] }
 0x49f   :  { %v15285_v25 = vadd.f32 1e-05, %v7479_v2  ;;  %v14144_v1 = vld [vmem:[#allocation9 + $0x3c4] sm:$0xf0]  ;;  %v14094_v61 = vld [vmem:[#allocation9 + $0x234] sm:$0xf0] }
 0x4a0   :  { %v7478_v50 = vmax.f32 %v7468_v0, 0.0  ;;  %8777 = vmatpush.bf16.msra.mxu3 %v12874_v7  ;;  %8803 = vmatpush.bf16.msrb.mxu1 %v13002_v33  ;;  %v12922_v7 = vor.u32 %v14128_v51, %v12921_v42  ;;  %v12849_v0 = vld [vmem:[#allocation9 + $0x2b0] sm:$0xf]  ;;  %v12986_v3 = vor.u32 %v14144_v1, %v12985_v63  ;;  %v14110_v33 = vld [vmem:[#allocation9 + $0x2b4] sm:$0xf0]  ;;  %v15328_v15 = vrot.slane %v7551_v59, 3 }
 0x4a1   :  { %14230 = vrsqrt.f32 %v15285_v25  ;;  %8790 = vmatpush.bf16.msrb.mxu0 %v12938_v30  ;;  %8765 = vmatpush.bf16.msra.mxu2 %v12802_v17  ;;  %v12913_v17 = vld [vmem:[#allocation9 + $0x330] sm:$0xf]  ;;  %v15330_v60 = vrot.slane %v7541_v36, 4  ;;  %v12786_v32 = vor.u32 %v14094_v61, %v12785_v34  ;;  %v14126_v62 = vld [vmem:[#allocation9 + $0x334] sm:$0xf0]  ;;  %vm7568_vm8 = vweird.f32 %v15285_v25 }
 0x4a2   :  { %v15309_v9 = vadd.f32 1e-05, %v7478_v50  ;;  %v12977_v53 = vld [vmem:[#allocation9 + $0x3b0] sm:$0xf]  ;;  %v12914_v18 = vor.u32 %v14126_v62, %v12913_v17  ;;  %v12777_v20 = vld [vmem:[#allocation9 + $0x220] sm:$0xf] }
 0x4a3   :  { %v14092_v56 = vld [vmem:[#allocation9 + $0x224] sm:$0xf0]  ;;  %v12841_v6 = vld [vmem:[#allocation9 + $0x2a0] sm:$0xf]  ;;  %v14090_v17 = vld [vmem:[#allocation9 + $0x214] sm:$0xf0] }
 0x4a4   :  { %v7298_v4 = vpop.f32.mrf.mxu1  ;;  %14232 = vrsqrt.f32 %v15309_v9  ;;  %8778 = vmatpush.bf16.msra.mxu3 %v12866_v40  ;;  %8804 = vmatpush.bf16.msrb.mxu1 %v12994_v12  ;;  %v14108_v42 = vld [vmem:[#allocation9 + $0x2a4] sm:$0xf0]  ;;  %v12905_v51 = vld [vmem:[#allocation9 + $0x320] sm:$0xf]  ;;  %v12778_v1 = vor.u32 %v14092_v56, %v12777_v20  ;;  %vm7558_vm11 = vweird.f32 %v15309_v9 }
 0x4a5   :  { %8791 = vmatpush.bf16.msrb.mxu0 %v12930_v52  ;;  %8766 = vmatpush.bf16.msra.mxu2 %v12794_v14 }
 0x4a6   :  { %v7285_v44 = vpop.f32.mrf.mxu0 }
 0x4a7   :  { %v7286_v2 = vadd.f32 %v7285_v44, %v15143_v39  ;;  %v15321_v16 = vpop.eup %14230  ;;  %v14142_v44 = vld [vmem:[#allocation9 + $0x3b4] sm:$0xf0] }
 0x4a8   :  { %v7563_v26 = vmul.f32 %v15321_v16, %v15285_v25  ;;  %v7259_v55 = vpop.f32.mrf.mxu2  ;;  %vm7569_vm10 = vweird.f32 %v15321_v16  ;;  %8779 = vmatpush.bf16.msra.mxu3 %v12858_v19  ;;  %8805 = vmatpush.bf16.msrb.mxu1 %v12986_v3  ;;  %v12978_v14 = vor.u32 %v14142_v44, %v12977_v53  ;;  %v14124_v19 = vld [vmem:[#allocation9 + $0x324] sm:$0xf0]  ;;  %v14106_v44 = vld [vmem:[#allocation9 + $0x294] sm:$0xf0] }
 0x4a9   :  { %v15319_v39 = vadd.f32 %v7298_v4, %v7286_v2  ;;  %v7272_v10 = vpop.f32.mrf.mxu3  ;;  %v7260_v49 = vadd.f32 %v7259_v55, %v15130_v35  ;;  %8792 = vmatpush.bf16.msrb.mxu0 %v12922_v7  ;;  %v12850_v35 = vor.u32 %v14110_v33, %v12849_v0  ;;  %8767 = vmatpush.bf16.msra.mxu2 %v12786_v32  ;;  %v12969_v7 = vld [vmem:[#allocation9 + $0x3a0] sm:$0xf]  ;;  %v12769_v33 = vld [vmem:[#allocation9 + $0x210] sm:$0xf]  ;;  %vm15355_vm15 = vmor %vm7568_vm8, %vm7569_vm10 }
 0x4aa   :  { %v7564_v50 = vmul.f32 %v15321_v16, %v7563_v26  ;;  %v15339_v2 = vpop.eup %14232  ;;  %v12842_v26 = vor.u32 %v14108_v42, %v12841_v6  ;;  %v12906_v3 = vor.u32 %v14124_v19, %v12905_v51  ;;  %v12770_v56 = vor.u32 %v14090_v17, %v12769_v33  ;;  %v14138_v19 = vld [vmem:[#allocation9 + $0x394] sm:$0xf0] }
 0x4ab   :  { %v7356_v30 = vrot.slane %v15319_v39, 4  ;;  %v7381_v58 = vmul.f32 %v15319_v39, %v15319_v39  ;;  %v15337_v4 = vadd.f32 %v7272_v10, %v7260_v49  ;;  %v7553_v63 = vmul.f32 %v15339_v2, %v15309_v9  ;;  %v12953_v9 = vld [vmem:[#allocation9 + $0x380] sm:$0xf] }
 0x4ac   :  { %v7300_v52 = vpop.f32.mrf.mxu1  ;;  %v7565_v12 = vmul.f32 0.5, %v7564_v50  ;;  %8780 = vmatpush.bf16.msra.mxu3 %v12850_v35  ;;  %8806 = vmatpush.bf16.msrb.mxu1 %v12978_v14  ;;  %v12897_v35 = vld [vmem:[#allocation9 + $0x310] sm:$0xf]  ;;  %vm7559_vm13 = vweird.f32 %v15339_v2 }
 0x4ad   :  { %v7357_v47 = vadd.f32 %v7356_v30, %v15319_v39  ;;  %v7436_v46 = vrot.slane %v7381_v58, 4  ;;  %v7350_v59 = vrot.slane %v15337_v4, 4  ;;  %v7380_v36 = vmul.f32 %v15337_v4, %v15337_v4  ;;  %v14140_v30 = vld [vmem:[#allocation9 + $0x3a4] sm:$0xf0]  ;;  %8793 = vmatpush.bf16.msrb.mxu0 %v12914_v18  ;;  %8768 = vmatpush.bf16.msra.mxu2 %v12778_v1  ;;  %v14122_v18 = vld [vmem:[#allocation9 + $0x314] sm:$0xf0]  ;;  %vm15370_vm1 = vmor %vm7558_vm11, %vm7559_vm13 }
 0x4ae   :  { %v7287_v40 = vpop.f32.mrf.mxu0  ;;  %v7566_v34 = vsub.f32 1.5, %v7565_v12  ;;  %v12898_v25 = vor.u32 %v14122_v18, %v12897_v35  ;;  %v125_v18 = vld [vmem:[#allocation10 + $0x14] sm:$0xff] }
 0x4af   :  { %v7358_v29 = vrot.slane %v7357_v47, 2  ;;  %v7437_v38 = vadd.f32 %v7436_v46, %v7381_v58  ;;  %v7554_v58 = vmul.f32 %v15339_v2, %v7553_v63  ;;  %v7351_v55 = vadd.f32 %v7350_v59, %v15337_v4  ;;  %v12833_v46 = vld [vmem:[#allocation9 + $0x290] sm:$0xf] }
 0x4b0   :  { %v7430_v10 = vrot.slane %v7380_v36, 4  ;;  %v7567_v49 = vmul.f32 %v15321_v16, %v7566_v34  ;;  %v7261_v53 = vpop.f32.mrf.mxu2  ;;  %8781 = vmatpush.bf16.msra.mxu3 %v12842_v26  ;;  %v12834_v51 = vor.u32 %v14106_v44, %v12833_v46  ;;  %v12961_v63 = vld [vmem:[#allocation9 + $0x390] sm:$0xf]  ;;  %v14088_v34 = vld [vmem:[#allocation9 + $0x204] sm:$0xf0] }
 0x4b1   :  { %v7359_v61 = vadd.f32 %v7358_v29, %v7357_v47  ;;  %v7438_v0 = vrot.slane %v7437_v38, 2  ;;  %v7274_v50 = vpop.f32.mrf.mxu3  ;;  %v12970_v47 = vor.u32 %v14140_v30, %v12969_v7  ;;  %v7555_v40 = vmul.f32 0.5, %v7554_v58  ;;  %8794 = vmatpush.bf16.msrb.mxu0 %v12906_v3  ;;  %v12761_v7 = vld [vmem:[#allocation9 + $0x200] sm:$0xf]  ;;  %8769 = vmatpush.bf16.msra.mxu2 %v12770_v56  ;;  %v14136_v46 = vld [vmem:[#allocation9 + $0x384] sm:$0xf0] }
 0x4b2   :  { %v7352_v52 = vrot.slane %v7351_v55, 2  ;;  %v7431_v20 = vadd.f32 %v7430_v10, %v7380_v36  ;;  %v7571_v59 = vsel %vm15355_vm15, %v15321_v16, %v7567_v49  ;;  %v12962_v30 = vor.u32 %v14138_v19, %v12961_v63  ;;  %v12825_v58 = vld [vmem:[#allocation9 + $0x280] sm:$0xf] }
 0x4b3   :  { %v7360_v32 = vrot.slane %v7359_v61, 1  ;;  %v7439_v62 = vadd.f32 %v7438_v0, %v7437_v38  ;;  %v7556_v38 = vsub.f32 1.5, %v7555_v40  ;;  %8807 = vmatpush.bf16.msrb.mxu1 %v12970_v47  ;;  %v12762_v33 = vor.u32 %v14088_v34, %v12761_v7  ;;  %v12889_v49 = vld [vmem:[#allocation9 + $0x300] sm:$0xf] }
 0x4b4   :  { %v7353_v14 = vadd.f32 %v7352_v52, %v7351_v55  ;;  %v7432_v42 = vrot.slane %v7431_v20, 2  ;;  %v14104_v55 = vld [vmem:[#allocation9 + $0x284] sm:$0xf0]  ;;  %8782 = vmatpush.bf16.msra.mxu3 %v12834_v51  ;;  %v7608_v44 = vrot.slane %v7571_v59, 1 }
 0x4b5   :  { %v7361_v6 = vadd.f32 %v7360_v32, %v7359_v61  ;;  %v7440_v12 = vrot.slane %v7439_v62, 1  ;;  %v7557_v61 = vmul.f32 %v15339_v2, %v7556_v38  ;;  %v12826_v17 = vor.u32 %v14104_v55, %v12825_v58  ;;  %v14120_v32 = vld [vmem:[#allocation9 + $0x304] sm:$0xf0]  ;;  %8795 = vmatpush.bf16.msrb.mxu0 %v12898_v25  ;;  %8770 = vmatpush.bf16.msra.mxu2 %v12762_v33 }
 0x4b6   :  { %v7354_v16 = vrot.slane %v7353_v14, 1  ;;  %v7433_v26 = vadd.f32 %v7432_v42, %v7431_v20  ;;  %v12890_v47 = vor.u32 %v14120_v32, %v12889_v49  ;;  %v12954_v20 = vor.u32 %v14136_v46, %v12953_v9 }
 0x4b7   :  { %v15363_v36 = vmul.f32 %v7361_v6, %v15585_v37  ;;  %v7441_v1 = vadd.f32 %v7440_v12, %v7439_v62  ;;  %v7561_v62 = vsel %vm15370_vm1, %v15339_v2, %v7557_v61  ;;  %8808 = vmatpush.bf16.msrb.mxu1 %v12962_v30  ;;  %v7613_v2 = vsel %vm1092_vm12, %v15330_v60, %v15328_v15 }
 0x4b8   :  { %v7355_v53 = vadd.f32 %v7354_v16, %v7353_v14  ;;  %v7434_v50 = vrot.slane %v7433_v26, 1  ;;  %v7607_v40 = vrot.slane %v7561_v62, 2  ;;  %8783 = vmatpush.bf16.msra.mxu3 %v12826_v17  ;;  %v127_v62 = vld [vmem:[#allocation10 + $0x1e] sm:$0xff] }
 0x4b9   :  { %v7451_v10 = vmul.f32 %v7441_v1, %v15585_v37  ;;  %v7461_v3 = vmul.f32 %v15363_v36, %v15363_v36  ;;  %8796 = vmatpush.bf16.msrb.mxu0 %v12890_v47 }
 0x4ba   :  { %v15381_v56 = vmul.f32 %v7355_v53, %v15585_v37  ;;  %v7435_v35 = vadd.f32 %v7434_v50, %v7433_v26  ;;  %v7614_v6 = vsel %vm1094_vm14, %v7607_v40, %v7608_v44 }
 0x4bb   :  { %v7471_v52 = vsub.f32 %v7451_v10, %v7461_v3  ;;  %v7615_v29 = vsel %vm1096_vm4, %v7613_v2, %v7614_v6  ;;  %8809 = vmatpush.bf16.msrb.mxu1 %v12954_v20  ;;  %v15440_v2 = vld [vmem:[#allocation9 + $0x470] sm:$0xf]  ;;  %v14166_v6 = vld [vmem:[#allocation9 + $0x474] sm:$0xf0] }
 0x4bc   :  { %v7450_v38 = vmul.f32 %v7435_v35, %v15585_v37  ;;  %v7460_v14 = vmul.f32 %v15381_v56, %v15381_v56  ;;  %v7616_v42 = vsel %vm1098_vm6, %v15231_v48, %v7615_v29 }
 0x4bd   :  { %v7481_v12 = vmax.f32 %v7471_v52, 0.0  ;;  %v15395_v15 = vmul.f32 %v7616_v42, %v125_v18 }
 0x4be   :  { %v7470_v60 = vsub.f32 %v7450_v38, %v7460_v14 }
 0x4bf   :  { %v15393_v51 = vadd.f32 1e-05, %v7481_v12  ;;  %v7624_v63 = vperm.slane %v15395_v15, 0  ;;  %v7625_v37 = vperm.slane %v15395_v15, 1  ;;  %v7626_v59 = vperm.slane %v15395_v15, 2 }
 0x4c0   :  { %v7627_v1 = vperm.slane %v15395_v15, 3  ;;  %v7628_v25 = vperm.slane %v15395_v15, 4  ;;  %v7629_v48 = vperm.slane %v15395_v15, 5  ;;  %v7630_v19 = vperm.slane %v15395_v15, 6  ;;  %v13137_v12 = vld [vmem:[#allocation9 + $0x4f0] sm:$0xf] }
 0x4c1   :  { %14234 = vrsqrt.f32 %v15393_v51  ;;  %v7631_v7 = vperm.slane %v15395_v15, 7  ;;  %v7654_v34 = vmul.f32 %v7624_v63, %v15170_v5  ;;  %v7655_v61 = vmul.f32 %v7625_v37, %v15164_v27  ;;  %v13057_v15 = vld [vmem:[#allocation9 + $0x450] sm:$0xf] }
 0x4c2   :  { %v7656_v0 = vmul.f32 %v7626_v59, %v15199_v8  ;;  %v7657_v16 = vmul.f32 %v7627_v1, %v15190_v21  ;;  %v7650_v26 = vmul.f32 %v7630_v19, %v15256_v31  ;;  %v7658_v30 = vmul.f32 %v7628_v25, %v15227_v54 }
 0x4c3   :  { %v7659_v58 = vmul.f32 %v7629_v48, %v15219_v43  ;;  %v7660_v55 = vmul.f32 %v7630_v19, %v15279_v45  ;;  %v7661_v27 = vmul.f32 %v7631_v7, %v15271_v11  ;;  %v7674_v5 = vrot.slane %v7655_v61, 7 }
 0x4c4   :  { %v7675_v8 = vrot.slane %v7656_v0, 6  ;;  %v7676_v10 = vrot.slane %v7657_v16, 5  ;;  %v7677_v31 = vrot.slane %v7658_v30, 4  ;;  %v7480_v17 = vmax.f32 %v7470_v60, 0.0  ;;  %v15450_v60 = vld [vmem:[#allocation9 + $0x78] sm:$0xf0] }
 0x4c5   :  { %v7678_v3 = vrot.slane %v7659_v58, 3  ;;  %v7679_v33 = vrot.slane %v7660_v55, 2  ;;  %v7680_v54 = vrot.slane %v7661_v27, 1  ;;  %v7682_v49 = vsel %vm322_vm7, %v7654_v34, %v7674_v5  ;;  %v14053_v58 = vld [vmem:[#allocation9 + $0xf4] sm:$0xf] }
 0x4c6   :  { %v7683_v43 = vsel %vm1088_vm9, %v7675_v8, %v7676_v10  ;;  %v15429_v9 = vadd.f32 1e-05, %v7480_v17  ;;  %v7644_v47 = vmul.f32 %v7624_v63, %v15157_v41  ;;  %v7645_v46 = vmul.f32 %v7625_v37, %v15150_v57  ;;  %v14182_v41 = vld [vmem:[#allocation9 + $0x4f4] sm:$0xf0]  ;;  %v15444_v57 = vld [vmem:[#allocation9 + $0x74] sm:$0xf] }
 0x4c7   :  { %v15421_v21 = vpop.eup %14234  ;;  %v7684_v32 = vsel %vm1090_vm0, %v7682_v49, %v7683_v43  ;;  %v7685_v11 = vsel %vm1092_vm12, %v7677_v31, %v7678_v3  ;;  %v7686_v53 = vsel %vm1094_vm14, %v7679_v33, %v7680_v54  ;;  %v7646_v40 = vmul.f32 %v7626_v59, %v15183_v22  ;;  %v12627_v55 = vld [vmem:[#allocation9 + $0xf8] sm:$0xf0]  ;;  %v13065_v33 = vld [vmem:[#allocation9 + $0x460] sm:$0xf] }
 0x4c8   :  { %v7583_v45 = vmul.f32 %v15421_v21, %v15393_v51  ;;  %v7687_v44 = vsel %vm1096_vm4, %v7685_v11, %v7686_v53  ;;  %14236 = vrsqrt.f32 %v15429_v9  ;;  %v7647_v35 = vmul.f32 %v7627_v1, %v15176_v28  ;;  %v14180_v11 = vld [vmem:[#allocation9 + $0x4e4] sm:$0xf0] }
 0x4c9   :  { %v7688_v52 = vsel %vm1098_vm6, %v7684_v32, %v7687_v44  ;;  %v13074_v63 = vor.u32 %v14166_v6, %v15440_v2  ;;  %v13138_v37 = vor.u32 %v14182_v41, %v13137_v12  ;;  %vm7589_vm9 = vweird.f32 %v15421_v21  ;;  %v13129_v32 = vld [vmem:[#allocation9 + $0x4e0] sm:$0xf]  ;;  %v12619_v44 = vld [vmem:[#allocation9 + $0xe8] sm:$0xf0] }
 0x4ca   :  { %v7584_v50 = vmul.f32 %v15421_v21, %v7583_v45  ;;  %v15442_v18 = vsub.f32 %v127_v62, %v7688_v52  ;;  %v12566_v30 = vor.u32 %v15444_v57, %v15450_v60  ;;  %vm7588_vm12 = vweird.f32 %v15393_v51  ;;  %v14164_v45 = vld [vmem:[#allocation9 + $0x464] sm:$0xf0]  ;;  %v14049_v60 = vld [vmem:[#allocation9 + $0xd4] sm:$0xf] }
 0x4cb   :  { %v12630_v43 = vor.u32 %v14053_v58, %v12627_v55  ;;  %vm15482_vm14 = vmor %vm7588_vm12, %vm7589_vm9  ;;  %v13130_v12 = vor.u32 %v14180_v11, %v13129_v32  ;;  %vm7578_vm4 = vweird.f32 %v15429_v9 }
 0x4cc   :  { %v7585_v20 = vmul.f32 0.5, %v7584_v50  ;;  %v7702_v38 = vperm.slane %v15442_v18, 6  ;;  %v7696_v14 = vperm.slane %v15442_v18, 0  ;;  %v7697_v22 = vperm.slane %v15442_v18, 1  ;;  %v12555_v50 = vld [vmem:[#allocation9 + $0x68] sm:$0xf0] }
 0x4cd   :  { %v7698_v42 = vperm.slane %v15442_v18, 2  ;;  %v7699_v28 = vperm.slane %v15442_v18, 3  ;;  %v7700_v17 = vperm.slane %v15442_v18, 4  ;;  %v7701_v52 = vperm.slane %v15442_v18, 5 }
 0x4ce   :  { %v7586_v29 = vsub.f32 1.5, %v7585_v20  ;;  %v15454_v59 = vpop.eup %14236  ;;  %v15456_v1 = vadd.f32 %v7702_v38, %v7650_v26  ;;  %v7716_v19 = vadd.f32 %v7696_v14, %v7644_v47  ;;  %v7717_v34 = vadd.f32 %v7697_v22, %v7645_v46  ;;  %v14051_v46 = vld [vmem:[#allocation9 + $0xe4] sm:$0xf]  ;;  %v14178_v38 = vld [vmem:[#allocation9 + $0x4d4] sm:$0xf0] }
 0x4cf   :  { %v7718_v61 = vadd.f32 %v7698_v42, %v7646_v40  ;;  %v7573_v0 = vmul.f32 %v15454_v59, %v15429_v9  ;;  %v7719_v16 = vadd.f32 %v7699_v28, %v7647_v35  ;;  %v7648_v26 = vmul.f32 %v7628_v25, %v15212_v24  ;;  %v14035_v25 = vld [vmem:[#allocation9 + $0x64] sm:$0xf]  ;;  %v14033_v14 = vld [vmem:[#allocation9 + $0x54] sm:$0xf]  ;;  %v12547_v22 = vld [vmem:[#allocation9 + $0x58] sm:$0xf0] }
 0x4d0   :  { %v7587_v27 = vmul.f32 %v15421_v21, %v7586_v29  ;;  %v7726_v5 = vmax.f32 %v7716_v19, 0.0  ;;  %v7727_v8 = vmax.f32 %v7717_v34, 0.0  ;;  %v7649_v40 = vmul.f32 %v7629_v48, %v15205_v23  ;;  %v126_v48 = vld [vmem:[#allocation10 + $0x1c] sm:$0x3]  ;;  %v14160_v19 = vld [vmem:[#allocation9 + $0x444] sm:$0xf0] }
 0x4d1   :  { %v7574_v10 = vmul.f32 %v15454_v59, %v7573_v0  ;;  %v7728_v31 = vmax.f32 %v7718_v61, 0.0  ;;  %v7729_v3 = vmax.f32 %v7719_v16, 0.0  ;;  %v15478_v47 = vadd.f32 %v7700_v17, %v7648_v26  ;;  %v12611_v28 = vld [vmem:[#allocation9 + $0xd8] sm:$0xf0]  ;;  %v13113_v0 = vld [vmem:[#allocation9 + $0x4c0] sm:$0xf] }
 0x4d2   :  { %v15470_v54 = vpack.c.bf16 %v7726_v5, %v7726_v5  ;;  %v15472_v49 = vpack.c.bf16 %v7727_v8, %v7727_v8  ;;  %v7651_v20 = vmul.f32 %v7631_v7, %v15245_v13  ;;  %v7703_v35 = vperm.slane %v15442_v18, 7  ;;  %v14162_v13 = vld [vmem:[#allocation9 + $0x454] sm:$0xf0]  ;;  %v13121_v7 = vld [vmem:[#allocation9 + $0x4d0] sm:$0xf] }
 0x4d3   :  { %v7575_v62 = vmul.f32 0.5, %v7574_v10  ;;  %v15474_v53 = vpack.c.bf16 %v7728_v31, %v7728_v31  ;;  %v15476_v24 = vpack.c.bf16 %v7729_v3, %v7729_v3  ;;  %vm7579_vm0 = vweird.f32 %v15454_v59  ;;  %v14176_v16 = vld [vmem:[#allocation9 + $0x4c4] sm:$0xf0]  ;;  %v12539_v5 = vld [vmem:[#allocation9 + $0x48] sm:$0xf0] }
 0x4d4   :  { %8719 = vmatmul.bf16.vlgmr.msrb.gmra.mxu2 %v15470_v54  ;;  %8732 = vmatmul.bf16.vlgmr.msrb.gmra.mxu3 %v15472_v49  ;;  %v7591_v6 = vsel %vm15482_vm14, %v15421_v21, %v7587_v27  ;;  %v13066_v23 = vor.u32 %v14164_v45, %v13065_v33  ;;  %v15502_v18 = vadd.f32 %v7701_v52, %v7649_v40  ;;  %vm7580_vm6 = vmor %vm7578_vm4, %vm7579_vm0  ;;  %v14047_v8 = vld [vmem:[#allocation9 + $0xc4] sm:$0xf]  ;;  %v12603_v26 = vld [vmem:[#allocation9 + $0xc8] sm:$0xf0]  ;;  %v7732_v31 = vmax.f32 %v15456_v1, 0.0 }
 0x4d5   :  { %v7576_v2 = vsub.f32 1.5, %v7575_v62  ;;  %8745 = vmatmul.bf16.vlgmr.msra.gmra.mxu0 %v15474_v53  ;;  %8758 = vmatmul.bf16.vlgmr.msra.gmra.mxu1 %v15476_v24  ;;  %v15504_v41 = vadd.f32 %v7703_v35, %v7651_v20  ;;  %v12558_v21 = vor.u32 %v14035_v25, %v12555_v50  ;;  %v12622_v57 = vor.u32 %v14051_v46, %v12619_v44  ;;  %v13041_v10 = vld [vmem:[#allocation9 + $0x430] sm:$0xf]  ;;  %v14174_v50 = vld [vmem:[#allocation9 + $0x4b4] sm:$0xf0] }
 0x4d6   :  { %8815 = vmatpush.bf16.msrb.mxu2 %v13074_v63  ;;  %8828 = vmatpush.bf16.msrb.mxu3 %v13138_v37  ;;  %v7609_v42 = vrot.slane %v7591_v6, 7  ;;  %v13049_v37 = vld [vmem:[#allocation9 + $0x440] sm:$0xf]  ;;  %v13058_v9 = vor.u32 %v14162_v13, %v13057_v15  ;;  %v13122_v61 = vor.u32 %v14178_v38, %v13121_v7  ;;  %v12550_v55 = vor.u32 %v14033_v14, %v12547_v22  ;;  %v13105_v25 = vld [vmem:[#allocation9 + $0x4b0] sm:$0xf] }
 0x4d7   :  { %v7577_v29 = vmul.f32 %v15454_v59, %v7576_v2  ;;  %8841 = vmatpush.bf16.msra.mxu0 %v12566_v30  ;;  %8854 = vmatpush.bf16.msra.mxu1 %v12630_v43  ;;  %v14031_v30 = vld [vmem:[#allocation9 + $0x44] sm:$0xf]  ;;  %v12614_v27 = vor.u32 %v14049_v60, %v12611_v28  ;;  %v13114_v17 = vor.u32 %v14176_v16, %v13113_v0  ;;  %v14158_v43 = vld [vmem:[#allocation9 + $0x434] sm:$0xf0]  ;;  %v7730_v11 = vmax.f32 %v15478_v47, 0.0 }
 0x4d8   :  { %v12542_v45 = vor.u32 %v14031_v30, %v12539_v5  ;;  %v12606_v32 = vor.u32 %v14047_v8, %v12603_v26  ;;  %v7731_v62 = vmax.f32 %v15502_v18, 0.0  ;;  %v7733_v44 = vmax.f32 %v15504_v41, 0.0  ;;  %v14029_v40 = vld [vmem:[#allocation9 + $0x34] sm:$0xf]  ;;  %v12531_v52 = vld [vmem:[#allocation9 + $0x38] sm:$0xf0] }
 0x4d9   :  { %v7581_v63 = vsel %vm7580_vm6, %v15454_v59, %v7577_v29  ;;  %v13050_v59 = vor.u32 %v14160_v19, %v13049_v37  ;;  %v14045_v20 = vld [vmem:[#allocation9 + $0xb4] sm:$0xf]  ;;  %v12595_v35 = vld [vmem:[#allocation9 + $0xb8] sm:$0xf0]  ;;  %v15520_v2 = vpack.c.bf16 %v7732_v31, %v7732_v31  ;;  %v128_v6 = vld [vmem:[#allocation10 + $0x26] sm:$0x3] }
 0x4da   :  { %v7617_v34 = vsel %vm322_vm7, %v7581_v63, %v7609_v42  ;;  %8816 = vmatpush.bf16.msrb.mxu2 %v13066_v23  ;;  %8829 = vmatpush.bf16.msrb.mxu3 %v13130_v12  ;;  %v12534_v12 = vor.u32 %v14029_v40, %v12531_v52  ;;  %v13033_v15 = vld [vmem:[#allocation9 + $0x420] sm:$0xf]  ;;  %v14156_v13 = vld [vmem:[#allocation9 + $0x424] sm:$0xf0]  ;;  %v12598_v18 = vor.u32 %v14045_v20, %v12595_v35  ;;  %v12523_v38 = vld [vmem:[#allocation9 + $0x28] sm:$0xf0] }
 0x4db   :  { %v7621_v58 = vmul.f32 %v7617_v34, %v126_v48  ;;  %8842 = vmatpush.bf16.msra.mxu0 %v12558_v21  ;;  %8855 = vmatpush.bf16.msra.mxu1 %v12622_v57  ;;  %v13042_v48 = vor.u32 %v14158_v43, %v13041_v10  ;;  %v13097_v41 = vld [vmem:[#allocation9 + $0x4a0] sm:$0xf]  ;;  %v14172_v29 = vld [vmem:[#allocation9 + $0x4a4] sm:$0xf0]  ;;  %v14027_v21 = vld [vmem:[#allocation9 + $0x24] sm:$0xf]  ;;  %v13034_v60 = vor.u32 %v14156_v13, %v13033_v15 }
 0x4dc   :  { %v14043_v14 = vld [vmem:[#allocation9 + $0xa4] sm:$0xf]  ;;  %v12587_v22 = vld [vmem:[#allocation9 + $0xa8] sm:$0xf0]  ;;  %v13098_v28 = vor.u32 %v14172_v29, %v13097_v41  ;;  %v13025_v63 = vld [vmem:[#allocation9 + $0x410] sm:$0xf]  ;;  %v12526_v34 = vor.u32 %v14027_v21, %v12523_v38 }
 0x4dd   :  { %v7632_v3 = vperm.slane %v7621_v58, 0  ;;  %v7633_v33 = vperm.slane %v7621_v58, 1  ;;  %v14154_v37 = vld [vmem:[#allocation9 + $0x414] sm:$0xf0]  ;;  %v14025_v16 = vld [vmem:[#allocation9 + $0x14] sm:$0xf] }
 0x4de   :  { %8817 = vmatpush.bf16.msrb.mxu2 %v13058_v9  ;;  %8830 = vmatpush.bf16.msrb.mxu3 %v13122_v61  ;;  %v12590_v9 = vor.u32 %v14043_v14, %v12587_v22  ;;  %v13089_v61 = vld [vmem:[#allocation9 + $0x490] sm:$0xf]  ;;  %v14170_v0 = vld [vmem:[#allocation9 + $0x494] sm:$0xf0]  ;;  %v12515_v58 = vld [vmem:[#allocation9 + $0x18] sm:$0xf0]  ;;  %v13026_v26 = vor.u32 %v14154_v37, %v13025_v63 }
 0x4df   :  { %v7652_v51 = vmul.f32 %v7632_v3, %v15337_v4  ;;  %v7662_v46 = vmul.f32 %v7632_v3, %v15381_v56  ;;  %v7663_v1 = vmul.f32 %v7633_v33, %v15363_v36  ;;  %8843 = vmatpush.bf16.msra.mxu0 %v12550_v55  ;;  %8856 = vmatpush.bf16.msra.mxu1 %v12614_v27  ;;  %v14041_v55 = vld [vmem:[#allocation9 + $0x94] sm:$0xf]  ;;  %v12579_v27 = vld [vmem:[#allocation9 + $0x98] sm:$0xf0]  ;;  %v13017_v8 = vld [vmem:[#allocation9 + $0x400] sm:$0xf] }
 0x4e0   :  { %v7653_v47 = vmul.f32 %v7633_v33, %v15319_v39  ;;  %v13106_v4 = vor.u32 %v14174_v50, %v13105_v25  ;;  %v15522_v56 = vpack.c.bf16 %v7730_v11, %v7730_v11  ;;  %v15524_v36 = vpack.c.bf16 %v7731_v62, %v7731_v62  ;;  %v14152_v10 = vld [vmem:[#allocation9 + $0x404] sm:$0xf0]  ;;  %v13081_v31 = vld [vmem:[#allocation9 + $0x480] sm:$0xf]  ;;  %v14023_v43 = vld [vmem:[#allocation9 + $0x4] sm:$0xf] }
 0x4e1   :  { %v7681_v23 = vrot.slane %v7663_v1, 7  ;;  %v15527_v39 = vpack.c.bf16 %v7733_v44, %v7733_v44  ;;  %v14168_v3 = vld [vmem:[#allocation9 + $0x484] sm:$0xf0]  ;;  %v12518_v33 = vor.u32 %v14025_v16, %v12515_v58  ;;  %v12571_v11 = vld [vmem:[#allocation9 + $0x88] sm:$0xf0]  ;;  %v13018_v1 = vor.u32 %v14152_v10, %v13017_v8 }
 0x4e2   :  { %8818 = vmatpush.bf16.msrb.mxu2 %v13050_v59  ;;  %8831 = vmatpush.bf16.msrb.mxu3 %v13114_v17  ;;  %v13090_v59 = vor.u32 %v14170_v0, %v13089_v61  ;;  %v12582_v17 = vor.u32 %v14041_v55, %v12579_v27  ;;  %v14069_v62 = vld [vmem:[#allocation9 + $0x174] sm:$0xf]  ;;  %v12691_v25 = vld [vmem:[#allocation9 + $0x178] sm:$0xf0]  ;;  %v13082_v44 = vor.u32 %v14168_v3, %v13081_v31  ;;  %v12683_v15 = vld [vmem:[#allocation9 + $0x168] sm:$0xf0] }
 0x4e3   :  { %v7689_v7 = vsel %vm322_vm7, %v7662_v46, %v7681_v23  ;;  %8844 = vmatpush.bf16.msra.mxu0 %v12542_v45  ;;  %8857 = vmatpush.bf16.msra.mxu1 %v12606_v32  ;;  %v12507_v45 = vld [vmem:[#allocation9 + $0x8] sm:$0xf0]  ;;  %v14039_v32 = vld [vmem:[#allocation9 + $0x84] sm:$0xf]  ;;  %v14085_v50 = vld [vmem:[#allocation9 + $0x1f4] sm:$0xf]  ;;  %v12694_v23 = vor.u32 %v14069_v62, %v12691_v25 }
 0x4e4   :  { %v7693_v57 = vsub.f32 %v128_v6, %v7689_v7  ;;  %8771 = vmatmul.bf16.vlgmr.msra.gmra.mxu2 %v15522_v56  ;;  %8784 = vmatmul.bf16.vlgmr.msra.gmra.mxu3 %v15524_v36  ;;  %v14101_v46 = vld [vmem:[#allocation9 + $0x274] sm:$0xf]  ;;  %v12819_v40 = vld [vmem:[#allocation9 + $0x278] sm:$0xf0]  ;;  %v12510_v35 = vor.u32 %v14023_v43, %v12507_v45  ;;  %v12747_v41 = vld [vmem:[#allocation9 + $0x1e8] sm:$0xf0] }
 0x4e5   :  { %8797 = vmatmul.bf16.vlgmr.msrb.gmra.mxu0 %v15520_v2  ;;  %8810 = vmatmul.bf16.vlgmr.msrb.gmra.mxu1 %v15527_v39  ;;  %v14117_v52 = vld [vmem:[#allocation9 + $0x2f4] sm:$0xf]  ;;  %v12883_v20 = vld [vmem:[#allocation9 + $0x2f8] sm:$0xf0]  ;;  %v12822_v13 = vor.u32 %v14101_v46, %v12819_v40  ;;  %v14099_v29 = vld [vmem:[#allocation9 + $0x264] sm:$0xf] }
 0x4e6   :  { %v7704_v42 = vperm.slane %v7693_v57, 0  ;;  %8819 = vmatpush.bf16.msrb.mxu2 %v13042_v48  ;;  %8832 = vmatpush.bf16.msrb.mxu3 %v13106_v4  ;;  %v7705_v19 = vperm.slane %v7693_v57, 1  ;;  %v12886_v7 = vor.u32 %v14117_v52, %v12883_v20  ;;  %v12811_v21 = vld [vmem:[#allocation9 + $0x268] sm:$0xf0]  ;;  %v14115_v57 = vld [vmem:[#allocation9 + $0x2e4] sm:$0xf] }
 0x4e7   :  { %8845 = vmatpush.bf16.msra.mxu0 %v12534_v12  ;;  %8858 = vmatpush.bf16.msra.mxu1 %v12598_v18  ;;  %v14067_v12 = vld [vmem:[#allocation9 + $0x164] sm:$0xf]  ;;  %v12875_v38 = vld [vmem:[#allocation9 + $0x2e8] sm:$0xf0]  ;;  %v12675_v63 = vld [vmem:[#allocation9 + $0x158] sm:$0xf0]  ;;  %v12814_v37 = vor.u32 %v14099_v29, %v12811_v21 }
 0x4e8   :  { %v7724_v30 = vadd.f32 %v7704_v42, %v7652_v51  ;;  %v7725_v5 = vadd.f32 %v7705_v19, %v7653_v47  ;;  %v12755_v51 = vld [vmem:[#allocation9 + $0x1f8] sm:$0xf0]  ;;  %v12574_v47 = vor.u32 %v14039_v32, %v12571_v11  ;;  %v14083_v18 = vld [vmem:[#allocation9 + $0x1e4] sm:$0xf]  ;;  %v12686_v14 = vor.u32 %v14067_v12, %v12683_v15  ;;  %v14097_v61 = vld [vmem:[#allocation9 + $0x254] sm:$0xf] }
 0x4e9   :  { %v12758_v48 = vor.u32 %v14085_v50, %v12755_v51  ;;  %v12878_v19 = vor.u32 %v14115_v57, %v12875_v38  ;;  %v12803_v0 = vld [vmem:[#allocation9 + $0x258] sm:$0xf0]  ;;  %v14113_v16 = vld [vmem:[#allocation9 + $0x2d4] sm:$0xf]  ;;  %v14063_v27 = vld [vmem:[#allocation9 + $0x144] sm:$0xf] }
 0x4ea   :  { %8820 = vmatpush.bf16.msrb.mxu2 %v13034_v60  ;;  %8833 = vmatpush.bf16.msrb.mxu3 %v13098_v28  ;;  %v7734_v6 = vmax.f32 %v7724_v30, 0.0  ;;  %v7735_v4 = vmax.f32 %v7725_v5, 0.0  ;;  %v12750_v60 = vor.u32 %v14083_v18, %v12747_v41  ;;  %v14065_v28 = vld [vmem:[#allocation9 + $0x154] sm:$0xf]  ;;  %v12867_v30 = vld [vmem:[#allocation9 + $0x2d8] sm:$0xf0]  ;;  %v12806_v8 = vor.u32 %v14097_v61, %v12803_v0 }
 0x4eb   :  { %8846 = vmatpush.bf16.msra.mxu0 %v12526_v34  ;;  %8859 = vmatpush.bf16.msra.mxu1 %v12590_v9  ;;  %v14081_v34 = vld [vmem:[#allocation9 + $0x1d4] sm:$0xf]  ;;  %v12739_v9 = vld [vmem:[#allocation9 + $0x1d8] sm:$0xf0]  ;;  %v12678_v58 = vor.u32 %v14065_v28, %v12675_v63  ;;  %v12667_v5 = vld [vmem:[#allocation9 + $0x148] sm:$0xf0] }
 0x4ec   :  { %v15533_v22 = vpack.c.bf16 %v7734_v6, %v7734_v6  ;;  %v15535_v42 = vpack.c.bf16 %v7735_v4, %v7735_v4  ;;  %v12742_v55 = vor.u32 %v14081_v34, %v12739_v9  ;;  %v12731_v10 = vld [vmem:[#allocation9 + $0x1c8] sm:$0xf0]  ;;  %v14095_v31 = vld [vmem:[#allocation9 + $0x244] sm:$0xf]  ;;  %v14061_v43 = vld [vmem:[#allocation9 + $0x134] sm:$0xf] }
 0x4ed   :  { %v12795_v3 = vld [vmem:[#allocation9 + $0x248] sm:$0xf0]  ;;  %v12659_v45 = vld [vmem:[#allocation9 + $0x138] sm:$0xf0]  ;;  %v14077_v62 = vld [vmem:[#allocation9 + $0x1b4] sm:$0xf] }
 0x4ee   :  { %8821 = vmatpush.bf16.msrb.mxu2 %v13026_v26  ;;  %8834 = vmatpush.bf16.msrb.mxu3 %v13090_v59  ;;  %v12870_v26 = vor.u32 %v14113_v16, %v12867_v30  ;;  %v14079_v59 = vld [vmem:[#allocation9 + $0x1c4] sm:$0xf]  ;;  %v12798_v32 = vor.u32 %v14095_v31, %v12795_v3  ;;  %v12723_v25 = vld [vmem:[#allocation9 + $0x1b8] sm:$0xf0]  ;;  %v14093_v50 = vld [vmem:[#allocation9 + $0x234] sm:$0xf] }
 0x4ef   :  { %8847 = vmatpush.bf16.msra.mxu0 %v12518_v33  ;;  %8860 = vmatpush.bf16.msra.mxu1 %v12582_v17  ;;  %v14111_v33 = vld [vmem:[#allocation9 + $0x2c4] sm:$0xf]  ;;  %v12859_v17 = vld [vmem:[#allocation9 + $0x2c8] sm:$0xf0]  ;;  %v12787_v51 = vld [vmem:[#allocation9 + $0x238] sm:$0xf0]  ;;  %v12726_v40 = vor.u32 %v14077_v62, %v12723_v25 }
 0x4f0   :  { %v12862_v11 = vor.u32 %v14111_v33, %v12859_v17  ;;  %v14109_v46 = vld [vmem:[#allocation9 + $0x2b4] sm:$0xf]  ;;  %v14059_v52 = vld [vmem:[#allocation9 + $0x124] sm:$0xf]  ;;  %v12651_v20 = vld [vmem:[#allocation9 + $0x128] sm:$0xf0] }
 0x4f1   :  { %v14075_v6 = vld [vmem:[#allocation9 + $0x1a4] sm:$0xf]  ;;  %v12779_v4 = vld [vmem:[#allocation9 + $0x228] sm:$0xf0]  ;;  %v14057_v18 = vld [vmem:[#allocation9 + $0x114] sm:$0xf] }
 0x4f2   :  { %8822 = vmatpush.bf16.msrb.mxu2 %v13018_v1  ;;  %8835 = vmatpush.bf16.msrb.mxu3 %v13082_v44  ;;  %v12851_v1 = vld [vmem:[#allocation9 + $0x2b8] sm:$0xf0]  ;;  %v12662_v44 = vor.u32 %v14061_v43, %v12659_v45  ;;  %v14107_v12 = vld [vmem:[#allocation9 + $0x2a4] sm:$0xf]  ;;  %v12843_v15 = vld [vmem:[#allocation9 + $0x2a8] sm:$0xf0] }
 0x4f3   :  { %8848 = vmatpush.bf16.msra.mxu0 %v12510_v35  ;;  %8861 = vmatpush.bf16.msra.mxu1 %v12574_v47  ;;  %v12790_v35 = vor.u32 %v14093_v50, %v12787_v51  ;;  %v12854_v47 = vor.u32 %v14109_v46, %v12851_v1  ;;  %v12643_v41 = vld [vmem:[#allocation9 + $0x118] sm:$0xf0]  ;;  %v12846_v21 = vor.u32 %v14107_v12, %v12843_v15  ;;  %v14073_v57 = vld [vmem:[#allocation9 + $0x194] sm:$0xf]  ;;  %v12635_v9 = vld [vmem:[#allocation9 + $0x108] sm:$0xf0] }
 0x4f4   :  { %v12707_v38 = vld [vmem:[#allocation9 + $0x198] sm:$0xf0]  ;;  %v14105_v28 = vld [vmem:[#allocation9 + $0x294] sm:$0xf]  ;;  %v14071_v61 = vld [vmem:[#allocation9 + $0x184] sm:$0xf] }
 0x4f5   :  { %8823 = vmatmul.bf16.vlgmr.msrb.gmra.mxu2 %v15533_v22  ;;  %8836 = vmatmul.bf16.vlgmr.msrb.gmra.mxu3 %v15535_v42  ;;  %v12835_v63 = vld [vmem:[#allocation9 + $0x298] sm:$0xf0]  ;;  %v12710_v34 = vor.u32 %v14073_v57, %v12707_v38  ;;  %v12699_v0 = vld [vmem:[#allocation9 + $0x188] sm:$0xf0]  ;;  %v14165_v31 = vld [vmem:[#allocation9 + $0x474] sm:$0xf] }
 0x4f6   :  { %8867 = vmatpush.bf16.msra.mxu2 %v12694_v23  ;;  %8880 = vmatpush.bf16.msra.mxu3 %v12758_v48  ;;  %v12715_v23 = vld [vmem:[#allocation9 + $0x1a8] sm:$0xf0]  ;;  %v14091_v48 = vld [vmem:[#allocation9 + $0x224] sm:$0xf]  ;;  %v12838_v30 = vor.u32 %v14105_v28, %v12835_v63  ;;  %v12702_v33 = vor.u32 %v14071_v61, %v12699_v0  ;;  %v13075_v17 = vld [vmem:[#allocation9 + $0x478] sm:$0xf0] }
 0x4f7   :  { %8893 = vmatpush.bf16.msrb.mxu0 %v12822_v13  ;;  %8906 = vmatpush.bf16.msrb.mxu1 %v12886_v7  ;;  %v12654_v13 = vor.u32 %v14059_v52, %v12651_v20  ;;  %v12718_v7 = vor.u32 %v14075_v6, %v12715_v23  ;;  %v12782_v29 = vor.u32 %v14091_v48, %v12779_v4  ;;  %v14131_v62 = vld [vmem:[#allocation9 + $0x364] sm:$0xf]  ;;  %v12939_v25 = vld [vmem:[#allocation9 + $0x368] sm:$0xf0]  ;;  %v14129_v6 = vld [vmem:[#allocation9 + $0x354] sm:$0xf] }
 0x4f8   :  { %8849 = vmatmul.bf16.vlgmr.msra.gmra.mxu0 %v15470_v54  ;;  %8862 = vmatmul.bf16.vlgmr.msra.gmra.mxu1 %v15472_v49  ;;  %v12670_v54 = vor.u32 %v14063_v27, %v12667_v5  ;;  %v12734_v49 = vor.u32 %v14079_v59, %v12731_v10  ;;  %v14103_v27 = vld [vmem:[#allocation9 + $0x284] sm:$0xf]  ;;  %v12827_v5 = vld [vmem:[#allocation9 + $0x288] sm:$0xf0]  ;;  %v14149_v59 = vld [vmem:[#allocation9 + $0x3f4] sm:$0xf]  ;;  %v13078_v50 = vor.u32 %v14165_v31, %v13075_v17 }
 0x4f9   :  { %v13011_v10 = vld [vmem:[#allocation9 + $0x3f8] sm:$0xf0]  ;;  %v12830_v45 = vor.u32 %v14103_v27, %v12827_v5  ;;  %v14147_v46 = vld [vmem:[#allocation9 + $0x3e4] sm:$0xf]  ;;  %v13003_v1 = vld [vmem:[#allocation9 + $0x3e8] sm:$0xf0] }
 0x4fa   :  { %8868 = vmatpush.bf16.msra.mxu2 %v12686_v14  ;;  %8881 = vmatpush.bf16.msra.mxu3 %v12750_v60  ;;  %v14089_v14 = vld [vmem:[#allocation9 + $0x214] sm:$0xf]  ;;  %v12771_v60 = vld [vmem:[#allocation9 + $0x218] sm:$0xf0]  ;;  %v14179_v52 = vld [vmem:[#allocation9 + $0x4e4] sm:$0xf] }
 0x4fb   :  { %8894 = vmatpush.bf16.msrb.mxu0 %v12814_v37  ;;  %8907 = vmatpush.bf16.msrb.mxu1 %v12878_v19  ;;  %v14055_v37 = vld [vmem:[#allocation9 + $0x104] sm:$0xf]  ;;  %v12646_v19 = vor.u32 %v14057_v18, %v12643_v41  ;;  %v12774_v16 = vor.u32 %v14089_v14, %v12771_v60  ;;  %v13131_v20 = vld [vmem:[#allocation9 + $0x4e8] sm:$0xf0]  ;;  %v12931_v23 = vld [vmem:[#allocation9 + $0x358] sm:$0xf0] }
 0x4fc   :  { %v12638_v3 = vor.u32 %v14055_v37, %v12635_v9  ;;  %v13134_v4 = vor.u32 %v14179_v52, %v13131_v20  ;;  %v14145_v12 = vld [vmem:[#allocation9 + $0x3d4] sm:$0xf]  ;;  %v12995_v15 = vld [vmem:[#allocation9 + $0x3d8] sm:$0xf0]  ;;  %v14127_v57 = vld [vmem:[#allocation9 + $0x344] sm:$0xf] }
 0x4fd   :  { %v14177_v18 = vld [vmem:[#allocation9 + $0x4d4] sm:$0xf]  ;;  %v13123_v41 = vld [vmem:[#allocation9 + $0x4d8] sm:$0xf0]  ;;  %v12923_v38 = vld [vmem:[#allocation9 + $0x348] sm:$0xf0] }
 0x4fe   :  { %8869 = vmatpush.bf16.msra.mxu2 %v12678_v58  ;;  %8882 = vmatpush.bf16.msra.mxu3 %v12742_v55  ;;  %v14087_v58 = vld [vmem:[#allocation9 + $0x204] sm:$0xf]  ;;  %v12763_v55 = vld [vmem:[#allocation9 + $0x208] sm:$0xf0]  ;;  %v13126_v60 = vor.u32 %v14177_v18, %v13123_v41  ;;  %v12915_v9 = vld [vmem:[#allocation9 + $0x338] sm:$0xf0] }
 0x4ff   :  { %8895 = vmatpush.bf16.msrb.mxu0 %v12806_v8  ;;  %8908 = vmatpush.bf16.msrb.mxu1 %v12870_v26  ;;  %v14133_v8 = vld [vmem:[#allocation9 + $0x374] sm:$0xf]  ;;  %v12947_v26 = vld [vmem:[#allocation9 + $0x378] sm:$0xf0]  ;;  %v12766_v43 = vor.u32 %v14087_v58, %v12763_v55  ;;  %v12987_v28 = vld [vmem:[#allocation9 + $0x3c8] sm:$0xf0] }
 0x500   :  { %v13051_v63 = vld [vmem:[#allocation9 + $0x448] sm:$0xf0]  ;;  %v14175_v37 = vld [vmem:[#allocation9 + $0x4c4] sm:$0xf]  ;;  %v14157_v58 = vld [vmem:[#allocation9 + $0x434] sm:$0xf] }
 0x501   :  { %v13043_v55 = vld [vmem:[#allocation9 + $0x438] sm:$0xf0]  ;;  %v14173_v27 = vld [vmem:[#allocation9 + $0x4b4] sm:$0xf]  ;;  %v12971_v17 = vld [vmem:[#allocation9 + $0x3a8] sm:$0xf0] }
 0x502   :  { %8870 = vmatpush.bf16.msra.mxu2 %v12670_v54  ;;  %8883 = vmatpush.bf16.msra.mxu3 %v12734_v49  ;;  %v14181_v54 = vld [vmem:[#allocation9 + $0x4f4] sm:$0xf]  ;;  %v13139_v49 = vld [vmem:[#allocation9 + $0x4f8] sm:$0xf0]  ;;  %v13046_v31 = vor.u32 %v14157_v58, %v13043_v55  ;;  %v14167_v18 = vld [vmem:[#allocation9 + $0x484] sm:$0xf] }
 0x503   :  { %8896 = vmatpush.bf16.msrb.mxu0 %v12798_v32  ;;  %8909 = vmatpush.bf16.msrb.mxu1 %v12862_v11  ;;  %v12950_v32 = vor.u32 %v14133_v8, %v12947_v26  ;;  %v13014_v11 = vor.u32 %v14149_v59, %v13011_v10  ;;  %v13142_v51 = vor.u32 %v14181_v54, %v13139_v49  ;;  %v13107_v5 = vld [vmem:[#allocation9 + $0x4b8] sm:$0xf0]  ;;  %v14123_v59 = vld [vmem:[#allocation9 + $0x324] sm:$0xf]  ;;  %v12907_v10 = vld [vmem:[#allocation9 + $0x328] sm:$0xf0] }
 0x504   :  { %v14155_v54 = vld [vmem:[#allocation9 + $0x424] sm:$0xf]  ;;  %v13035_v49 = vld [vmem:[#allocation9 + $0x428] sm:$0xf0]  ;;  %v14169_v52 = vld [vmem:[#allocation9 + $0x494] sm:$0xf] }
 0x505   :  { %v13091_v20 = vld [vmem:[#allocation9 + $0x498] sm:$0xf0]  ;;  %v13083_v41 = vld [vmem:[#allocation9 + $0x488] sm:$0xf0] }
 0x506   :  { %8871 = vmatpush.bf16.msra.mxu2 %v12662_v44  ;;  %8884 = vmatpush.bf16.msra.mxu3 %v12726_v40  ;;  %v14163_v44 = vld [vmem:[#allocation9 + $0x464] sm:$0xf]  ;;  %v13067_v40 = vld [vmem:[#allocation9 + $0x468] sm:$0xf0] }
 0x507   :  { %8897 = vmatpush.bf16.msrb.mxu0 %v12790_v35  ;;  %8910 = vmatpush.bf16.msrb.mxu1 %v12854_v47  ;;  %v12942_v35 = vor.u32 %v14131_v62, %v12939_v25  ;;  %v13006_v47 = vor.u32 %v14147_v46, %v13003_v1  ;;  %v13070_v48 = vor.u32 %v14163_v44, %v13067_v40  ;;  %v14121_v62 = vld [vmem:[#allocation9 + $0x314] sm:$0xf]  ;;  %v12899_v25 = vld [vmem:[#allocation9 + $0x318] sm:$0xf0] }
 0x508   :  { %v14137_v46 = vld [vmem:[#allocation9 + $0x394] sm:$0xf]  ;;  %v12963_v1 = vld [vmem:[#allocation9 + $0x398] sm:$0xf0] }
 0x509   :  { %v14153_v44 = vld [vmem:[#allocation9 + $0x414] sm:$0xf]  ;;  %v13027_v40 = vld [vmem:[#allocation9 + $0x418] sm:$0xf0] }
 0x50a   :  { %8872 = vmatpush.bf16.msra.mxu2 %v12654_v13  ;;  %8885 = vmatpush.bf16.msra.mxu3 %v12718_v7  ;;  %v14161_v13 = vld [vmem:[#allocation9 + $0x454] sm:$0xf]  ;;  %v13059_v7 = vld [vmem:[#allocation9 + $0x458] sm:$0xf0] }
 0x50b   :  { %8898 = vmatpush.bf16.msrb.mxu0 %v12782_v29  ;;  %8911 = vmatpush.bf16.msrb.mxu1 %v12846_v21  ;;  %v12934_v29 = vor.u32 %v14129_v6, %v12931_v23  ;;  %v12998_v21 = vor.u32 %v14145_v12, %v12995_v15  ;;  %v13062_v14 = vor.u32 %v14161_v13, %v13059_v7  ;;  %v14119_v6 = vld [vmem:[#allocation9 + $0x304] sm:$0xf]  ;;  %v12891_v23 = vld [vmem:[#allocation9 + $0x308] sm:$0xf0] }
 0x50c   :  { %v14135_v12 = vld [vmem:[#allocation9 + $0x384] sm:$0xf]  ;;  %v12955_v15 = vld [vmem:[#allocation9 + $0x388] sm:$0xf0] }
 0x50d   :  { %v14151_v13 = vld [vmem:[#allocation9 + $0x404] sm:$0xf]  ;;  %v13019_v7 = vld [vmem:[#allocation9 + $0x408] sm:$0xf0] }
 0x50e   :  { %8873 = vmatpush.bf16.msra.mxu2 %v12646_v19  ;;  %8886 = vmatpush.bf16.msra.mxu3 %v12710_v34  ;;  %v13115_v19 = vld [vmem:[#allocation9 + $0x4c8] sm:$0xf0]  ;;  %v14125_v34 = vld [vmem:[#allocation9 + $0x334] sm:$0xf] }
 0x50f   :  { %8899 = vmatpush.bf16.msrb.mxu0 %v12774_v16  ;;  %8912 = vmatpush.bf16.msrb.mxu1 %v12838_v30  ;;  %v13118_v0 = vor.u32 %v14175_v37, %v13115_v19  ;;  %v14141_v16 = vld [vmem:[#allocation9 + $0x3b4] sm:$0xf]  ;;  %v12979_v30 = vld [vmem:[#allocation9 + $0x3b8] sm:$0xf0]  ;;  %v12918_v8 = vor.u32 %v14125_v34, %v12915_v9 }
 0x510   :  { %v12982_v26 = vor.u32 %v14141_v16, %v12979_v30 }
 0x512   :  { %8874 = vmatpush.bf16.msra.mxu2 %v12638_v3  ;;  %8887 = vmatpush.bf16.msra.mxu3 %v12702_v33  ;;  %v13110_v3 = vor.u32 %v14173_v27, %v13107_v5  ;;  %v14139_v33 = vld [vmem:[#allocation9 + $0x3a4] sm:$0xf] }
 0x513   :  { %8900 = vmatpush.bf16.msrb.mxu0 %v12766_v43  ;;  %8913 = vmatpush.bf16.msrb.mxu1 %v12830_v45  ;;  %v14171_v43 = vld [vmem:[#allocation9 + $0x4a4] sm:$0xf]  ;;  %v13099_v45 = vld [vmem:[#allocation9 + $0x4a8] sm:$0xf0] }
 0x515   :  { %8875 = vmatmul.bf16.vlgmr.msra.gmra.mxu2 %v15474_v53  ;;  %8888 = vmatmul.bf16.vlgmr.msra.gmra.mxu3 %v15476_v24  ;;  %v14143_v53 = vld [vmem:[#allocation9 + $0x3c4] sm:$0xf] }
 0x516   :  { %8919 = vmatpush.bf16.msrb.mxu2 %v12950_v32  ;;  %8932 = vmatpush.bf16.msrb.mxu3 %v13014_v11  ;;  %v14159_v24 = vld [vmem:[#allocation9 + $0x444] sm:$0xf]  ;;  %v12910_v32 = vor.u32 %v14123_v59, %v12907_v10  ;;  %v12974_v11 = vor.u32 %v14139_v33, %v12971_v17 }
 0x517   :  { %8945 = vmatpush.bf16.msra.mxu0 %v13078_v50  ;;  %8958 = vmatpush.bf16.msra.mxu1 %v13142_v51  ;;  %v13054_v61 = vor.u32 %v14159_v24, %v13051_v63  ;;  %v13038_v50 = vor.u32 %v14155_v54, %v13035_v49  ;;  %v13102_v51 = vor.u32 %v14171_v43, %v13099_v45 }
 0x518   :  { %8901 = vmatmul.bf16.vlgmr.msrb.gmra.mxu0 %v15522_v56  ;;  %8914 = vmatmul.bf16.vlgmr.msrb.gmra.mxu1 %v15524_v36  ;;  %v12926_v56 = vor.u32 %v14127_v57, %v12923_v38  ;;  %v12990_v36 = vor.u32 %v14143_v53, %v12987_v28  ;;  %v13022_v57 = vor.u32 %v14151_v13, %v13019_v7  ;;  %v129_v53 = vld [vmem:[#allocation10 + $0x28] sm:$0x3] }
 0x519   :  { %v13086_v38 = vor.u32 %v14167_v18, %v13083_v41  ;;  %v7907_v63 = vperm.slane %v129_v53, 0 }
 0x51a   :  { %8920 = vmatpush.bf16.msrb.mxu2 %v12942_v35  ;;  %8933 = vmatpush.bf16.msrb.mxu3 %v13006_v47  ;;  %v12902_v35 = vor.u32 %v14121_v62, %v12899_v25  ;;  %v12966_v47 = vor.u32 %v14137_v46, %v12963_v1  ;;  %v7908_v1 = vperm.slane %v129_v53, 1 }
 0x51b   :  { %8946 = vmatpush.bf16.msra.mxu0 %v13070_v48  ;;  %8959 = vmatpush.bf16.msra.mxu1 %v13134_v4  ;;  %v13030_v48 = vor.u32 %v14153_v44, %v13027_v40  ;;  %v13094_v4 = vor.u32 %v14169_v52, %v13091_v20 }
 0x51e   :  { %8921 = vmatpush.bf16.msrb.mxu2 %v12934_v29  ;;  %8934 = vmatpush.bf16.msrb.mxu3 %v12998_v21  ;;  %v12894_v29 = vor.u32 %v14119_v6, %v12891_v23  ;;  %v12958_v21 = vor.u32 %v14135_v12, %v12955_v15 }
 0x51f   :  { %8947 = vmatpush.bf16.msra.mxu0 %v13062_v14  ;;  %8960 = vmatpush.bf16.msra.mxu1 %v13126_v60 }
 0x522   :  { %8922 = vmatpush.bf16.msrb.mxu2 %v12926_v56  ;;  %8935 = vmatpush.bf16.msrb.mxu3 %v12990_v36 }
 0x523   :  { %8948 = vmatpush.bf16.msra.mxu0 %v13054_v61  ;;  %8961 = vmatpush.bf16.msra.mxu1 %v13118_v0 }
 0x526   :  { %8923 = vmatpush.bf16.msrb.mxu2 %v12918_v8  ;;  %8936 = vmatpush.bf16.msrb.mxu3 %v12982_v26 }
 0x527   :  { %8949 = vmatpush.bf16.msra.mxu0 %v13046_v31  ;;  %8962 = vmatpush.bf16.msra.mxu1 %v13110_v3 }
 0x52a   :  { %8924 = vmatpush.bf16.msrb.mxu2 %v12910_v32  ;;  %8937 = vmatpush.bf16.msrb.mxu3 %v12974_v11 }
 0x52b   :  { %8950 = vmatpush.bf16.msra.mxu0 %v13038_v50  ;;  %8963 = vmatpush.bf16.msra.mxu1 %v13102_v51 }
 0x52e   :  { %8925 = vmatpush.bf16.msrb.mxu2 %v12902_v35  ;;  %8938 = vmatpush.bf16.msrb.mxu3 %v12966_v47 }
 0x52f   :  { %8951 = vmatpush.bf16.msra.mxu0 %v13030_v48  ;;  %8964 = vmatpush.bf16.msra.mxu1 %v13094_v4 }
 0x532   :  { %8926 = vmatpush.bf16.msrb.mxu2 %v12894_v29  ;;  %8939 = vmatpush.bf16.msrb.mxu3 %v12958_v21 }
 0x533   :  { %8952 = vmatpush.bf16.msra.mxu0 %v13022_v57  ;;  %8965 = vmatpush.bf16.msra.mxu1 %v13086_v38 }
 0x535   :  { %8927 = vmatmul.bf16.vlgmr.msrb.gmra.mxu2 %v15520_v2  ;;  %8940 = vmatmul.bf16.vlgmr.msrb.gmra.mxu3 %v15527_v39 }
 0x536   :  { %8953 = vmatmul.bf16.vlgmr.msra.gmra.mxu0 %v15533_v22  ;;  %8966 = vmatmul.bf16.vlgmr.msra.gmra.mxu1 %v15535_v42 }
 0x552   :  { %v8746_v14 = vpop.f32.mrf.mxu0  ;;  %v8759_v60 = vpop.f32.mrf.mxu1 }
 0x557   :  { %v8720_v28 = vpop.f32.mrf.mxu2  ;;  %v8733_v24 = vpop.f32.mrf.mxu3 }
 0x558   :  { %v8721_v56 = vadd.f32 %v8720_v28, %v7907_v63 }
 0x55a   :  { %v8748_v37 = vpop.f32.mrf.mxu0  ;;  %v8761_v19 = vpop.f32.mrf.mxu1  ;;  %v8734_v9 = vadd.f32 %v8733_v24, %v8721_v56 }
 0x55c   :  { %v8747_v0 = vadd.f32 %v8746_v14, %v8734_v9 }
 0x55e   :  { %v8760_v22 = vadd.f32 %v8759_v60, %v8747_v0 }
 0x55f   :  { %v8722_v36 = vpop.f32.mrf.mxu2  ;;  %v8735_v34 = vpop.f32.mrf.mxu3 }
 0x562   :  { %v8798_v61 = vpop.f32.mrf.mxu0  ;;  %v8811_v2 = vpop.f32.mrf.mxu1 }
 0x567   :  { %v8772_v39 = vpop.f32.mrf.mxu2  ;;  %v8785_v16 = vpop.f32.mrf.mxu3 }
 0x568   :  { %v8773_v58 = vadd.f32 %v8772_v39, %v8760_v22 }
 0x56a   :  { %v8800_v30 = vpop.f32.mrf.mxu0  ;;  %v8813_v42 = vpop.f32.mrf.mxu1  ;;  %v8786_v5 = vadd.f32 %v8785_v16, %v8773_v58 }
 0x56c   :  { %v8799_v8 = vadd.f32 %v8798_v61, %v8786_v5 }
 0x56e   :  { %v8812_v10 = vadd.f32 %v8811_v2, %v8799_v8 }
 0x56f   :  { %v8774_v55 = vpop.f32.mrf.mxu2  ;;  %v8787_v27 = vpop.f32.mrf.mxu3 }
 0x575   :  { %v8850_v26 = vpop.f32.mrf.mxu0  ;;  %v8863_v59 = vpop.f32.mrf.mxu1 }
 0x576   :  { %v8851_v52 = vadd.f32 %v8850_v26, %v7908_v1 }
 0x578   :  { %v8824_v31 = vpop.f32.mrf.mxu2  ;;  %v8837_v3 = vpop.f32.mrf.mxu3  ;;  %v8864_v20 = vadd.f32 %v8863_v59, %v8851_v52 }
 0x579   :  { %v8825_v33 = vadd.f32 %v8824_v31, %v8812_v10 }
 0x57b   :  { %v8838_v17 = vadd.f32 %v8837_v3, %v8825_v33 }
 0x57d   :  { %v8852_v54 = vpop.f32.mrf.mxu0  ;;  %v8865_v49 = vpop.f32.mrf.mxu1  ;;  %14238 = vtanh.f32 %v8838_v17 }
 0x580   :  { %v8826_v43 = vpop.f32.mrf.mxu2  ;;  %v8839_v45 = vpop.f32.mrf.mxu3 }
 0x583   :  { %v14239_v32 = vpop.eup %14238 }
 0x584   :  { %8973 = vst [vmem:[%s15563_s8] sm:$0xff] %v14239_v32 }
 0x595   :  { %v8902_v11 = vpop.f32.mrf.mxu0  ;;  %v8915_v62 = vpop.f32.mrf.mxu1 }
 0x598   :  { %v8876_v25 = vpop.f32.mrf.mxu2  ;;  %v8889_v50 = vpop.f32.mrf.mxu3 }
 0x599   :  { %v8877_v35 = vadd.f32 %v8876_v25, %v8864_v20 }
 0x59b   :  { %v8890_v47 = vadd.f32 %v8889_v50, %v8877_v35 }
 0x59d   :  { %v8904_v51 = vpop.f32.mrf.mxu0  ;;  %v8917_v46 = vpop.f32.mrf.mxu1  ;;  %v8903_v6 = vadd.f32 %v8902_v11, %v8890_v47 }
 0x59f   :  { %v8916_v4 = vadd.f32 %v8915_v62, %v8903_v6 }
 0x5a0   :  { %v8878_v44 = vpop.f32.mrf.mxu2  ;;  %v8891_v40 = vpop.f32.mrf.mxu3 }
 0x5b3   :  { %v8954_v23 = vpop.f32.mrf.mxu0  ;;  %v8967_v48 = vpop.f32.mrf.mxu1 }
 0x5b8   :  { %v8928_v12 = vpop.f32.mrf.mxu2  ;;  %v8941_v15 = vpop.f32.mrf.mxu3 }
 0x5b9   :  { %v8929_v13 = vadd.f32 %v8928_v12, %v8916_v4 }
 0x5bb   :  { %v8942_v7 = vadd.f32 %v8941_v15, %v8929_v13  ;;  %v8956_v18 = vpop.f32.mrf.mxu0  ;;  %v8969_v41 = vpop.f32.mrf.mxu1 }
 0x5bd   :  { %v8955_v29 = vadd.f32 %v8954_v23, %v8942_v7 }
 0x5bf   :  { %v8968_v21 = vadd.f32 %v8967_v48, %v8955_v29 }
 0x5c0   :  { %v8930_v57 = vpop.f32.mrf.mxu2  ;;  %v8943_v38 = vpop.f32.mrf.mxu3 }
 0x5c1   :  { %14240 = vtanh.f32 %v8968_v21 }
 0x5c7   :  { %v14241_v14 = vpop.eup %14240 }
 0x5c8   :  { %8974 = vst [vmem:[%s15563_s8 + $0x8] sm:$0xff] %v14241_v14 }
 0x5c9   :  { %8979 = vsyncpa [#allocation3], 1 }
 0x5ca   :  { %8980 = vsyncpa [#allocation5], 1 }
 0x5cb   :  { %8981 = vsyncpa [#allocation8], 1 }
 0x5cc   :  { %8982 = vsyncpa [#allocation11], 1 }

</bundles_post_ra>
